<compile_context>
chip_gen: v5e
topology: v5e:2x2
jax: 0.10.0
libtpu: 0.0.40
codegen_flags: <defaults>
</compile_context>

<pallas_src>
import functools

import jax
import jax.numpy as jnp
from jax import lax
from jax.experimental import pallas as pl
from jax.experimental.pallas import tpu as pltpu

_EPS = 1e-5  # PyTorch InstanceNorm3d default (affine=False, no running stats)

# Set to jnp.bfloat16 for ~2-3x MXU throughput once the MXU is fed (perf-review
# item); left at float32 so the 2e-3 validation tolerance below is met --
# bf16 operand rounding over the 1000-term 5x5x5 taps needs a ~5e-2 tolerance.
_COMPUTE_DTYPE = jnp.float32


def _instance_norm_relu(y):
    # y: (C, S) f32 -- normalize each channel over the flat spatial (lane) axis.
    mean = jnp.mean(y, axis=1, keepdims=True)
    cen = y - mean
    var = jnp.mean(cen * cen, axis=1, keepdims=True)
    return jnp.maximum(cen * lax.rsqrt(var + _EPS), 0.0)


def _make_axis_masks(spatial):
    """Builds 15 (1, S) f32 masks (5 per axis) for the zero-padded 5x5x5 conv.

    mask_*[k][p] == 1 iff the source voxel at offset (k-2) along that axis is
    inside the volume for the flat target position p.  Built in-kernel from a
    lane iota with compares / mul / sub only (no vector integer div or mod).
    """
    Do, Ho, Wo = spatial
    S = Do * Ho * Wo
    HW = Ho * Wo
    flat = lax.broadcasted_iota(jnp.int32, (1, S), 1)

    # depth index via sum-of-compares (avoids vector integer division)
    d_idx = jnp.zeros_like(flat)
    for a in range(1, Do):
        d_idx = d_idx + (flat >= a * HW).astype(jnp.int32)
    plane = flat - d_idx * HW                       # index within the (Ho, Wo) plane
    h_idx = jnp.zeros_like(flat)
    for b in range(1, Ho):
        h_idx = h_idx + (plane >= b * Wo).astype(jnp.int32)
    w_idx = plane - h_idx * Wo

    def rng_mask(idx, lo, hi):
        return ((idx >= lo) & (idx < hi)).astype(jnp.float32)

    mask_d = [rng_mask(flat, max(0, 2 - k) * HW, (Do - max(0, k - 2)) * HW)
              for k in range(5)]
    mask_h = [rng_mask(plane, max(0, 2 - k) * Wo, (Ho - max(0, k - 2)) * Wo)
              for k in range(5)]
    mask_w = [rng_mask(w_idx, max(0, 2 - k), Wo - max(0, k - 2))
              for k in range(5)]
    return mask_d, mask_h, mask_w


def _down_transition_kernel(x_ref, wd_ref, bd_ref, lw_ref, lb_ref, o_ref,
                            stack_ref, *, spatial, n_conv, c_out):
    Do, Ho, Wo = spatial
    S = Do * Ho * Wo
    HW = Ho * Wo

    mask_d, mask_h, mask_w = _make_axis_masks(spatial)

    # ---- down_conv (2x2x2, stride 2) == one channel matmul on the
    # space-to-channel gathered input (gather done once in the wrapper).
    x = x_ref[0, :, :].astype(_COMPUTE_DTYPE)                        # (8*C_in, S)
    y = jnp.dot(wd_ref[...], x, preferred_element_type=jnp.float32) + bd_ref[...]
    down = _instance_norm_relu(y)                                    # (C_out, S) f32

    # TODO(synk): nn.Dropout3d (self.do1) not implemented -- constructor default
    # dropout=False, so forward() skips it.

    def maybe_roll(v, shift):
        return v if shift == 0 else pltpu.roll(v, shift, axis=1)

    cur = down
    for layer in range(n_conv):
        # Build the (25*C_out, S) stacked operand once per layer: 25 (kd, kh)
        # hierarchically-rolled, d/h-masked copies of `cur` stored into VMEM
        # scratch (bounds live ranges; rows are sublane-aligned since C_out%8==0
        # for typical VNet widths).
        for kd in range(5):
            xd = maybe_roll(cur, ((2 - kd) * HW) % S) * mask_d[kd]
            for kh in range(5):
                xdh = maybe_roll(xd, ((2 - kh) * Wo) % S) * mask_h[kh]
                row = (kd * 5 + kh) * c_out
                stack_ref[pl.ds(row, c_out), :] = xdh.astype(stack_ref.dtype)
        stack = stack_ref[...]                                       # (25*C_out, S)

        # 5 deep matmuls (K = 25*C_out), one per kw tap; the +-1/+-2 kw shift
        # and the w-boundary mask are applied to the small (C_out, S) result.
        acc = None
        for kw in range(5):
            z = jnp.dot(lw_ref[layer, kw, :, :], stack,
                        preferred_element_type=jnp.float32)          # (C_out, S)
            z = maybe_roll(z, (2 - kw) % S) * mask_w[kw]
            acc = z if acc is None else acc + z
        cur = _instance_norm_relu(acc + lb_ref[layer, :, :])

    # ---- residual add + ReLU; lane-dense store in NCDHW-flat layout.
    o_ref[0, :, :] = jnp.maximum(cur + down, 0.0).astype(o_ref.dtype)


def down_transition_forward(x, down_w, down_b, lu_ws, lu_bs):
    """Forward of VNet DownTransition (dropout disabled, as in the default ctor).

    x       : (N, C_in, D, H, W)
    down_w  : (C_out, C_in, 2, 2, 2) with C_out = 2*C_in ; down_b: (C_out,)
    lu_ws   : list of n_conv arrays (C_out, C_out, 5, 5, 5) ; lu_bs: list of (C_out,)
    returns : (N, C_out, D//2, H//2, W//2)
    """
    N, C_in, D, H, W = x.shape
    C_out = down_w.shape[0]
    Do, Ho, Wo = D // 2, H // 2, W // 2
    S = Do * Ho * Wo
    n_conv = len(lu_ws)
    assert n_conv >= 1

    x = x[:, :, :2 * Do, :2 * Ho, :2 * Wo].astype(jnp.float32)

    # One-time space-to-channel gather for the stride-2/kernel-2 conv; after
    # this everything stays in lane-dense (channels, flat-spatial) layout.
    # TODO(synk): fold this gather into the kernel (8 strided sub-slab matmuls)
    # to avoid the extra HBM round trip of the input (perf-review item).
    xr = x.reshape(N, C_in, Do, 2, Ho, 2, Wo, 2)
    x_patches = (jnp.transpose(xr, (0, 1, 3, 5, 7, 2, 4, 6))
                 .reshape(N, C_in * 8, S).astype(_COMPUTE_DTYPE))

    wd = down_w.reshape(C_out, C_in * 8).astype(_COMPUTE_DTYPE)
    bd = down_b.reshape(C_out, 1).astype(jnp.float32)

    # LUConv weights -> (n_conv, 5_kw, C_out, 25*C_out); weight column
    # (kd*5+kh)*C_out + ci matches the stacked-operand row built in-kernel.
    lw = jnp.stack(
        [jnp.transpose(w, (4, 0, 2, 3, 1)).reshape(5, C_out, 25 * C_out)
         for w in lu_ws], axis=0).astype(_COMPUTE_DTYPE)
    lb = jnp.stack([b.reshape(C_out, 1) for b in lu_bs], axis=0).astype(jnp.float32)

    kernel = functools.partial(_down_transition_kernel, spatial=(Do, Ho, Wo),
                               n_conv=n_conv, c_out=C_out)

    # NOTE: S is a multiple of 128 for the usual power-of-two VNet volumes ->
    # lane-dense unmasked stores. TODO(synk): pad S to a multiple of 128
    # (excluding the pad from InstanceNorm statistics) for odd volumes, and add
    # D-slab tiling + two-pass InstanceNorm for volumes exceeding VMEM.
    # NOTE: the weight/bias specs below have constant index maps; on VMEM-tight
    # chips (v7x) they could additionally use pipeline_mode=pl.Buffered(1).
    out_flat = pl.pallas_call(
        kernel,
        out_shape=jax.ShapeDtypeStruct((N, C_out, S), jnp.float32),
        grid_spec=pltpu.PrefetchScalarGridSpec(
            num_scalar_prefetch=0,
            grid=(N,),
            in_specs=[
                pl.BlockSpec((1, C_in * 8, S), lambda n: (n, 0, 0)),
                pl.BlockSpec((C_out, C_in * 8), lambda n: (0, 0)),
                pl.BlockSpec((C_out, 1), lambda n: (0, 0)),
                pl.BlockSpec((n_conv, 5, C_out, 25 * C_out), lambda n: (0, 0, 0, 0)),
                pl.BlockSpec((n_conv, C_out, 1), lambda n: (0, 0, 0)),
            ],
            out_specs=pl.BlockSpec((1, C_out, S), lambda n: (n, 0, 0)),
            scratch_shapes=[pltpu.VMEM((25 * C_out, S), _COMPUTE_DTYPE)],
        ),
        compiler_params=pltpu.CompilerParams(
            # Batch axis -> both v7x TensorCores busy when N > 1.
            # TODO(synk): for N == 1 add a parallel spatial (D-slab) axis with a
            # +-2 halo + two-pass InstanceNorm so the second core is used.
            dimension_semantics=("parallel",),
            vmem_limit_bytes=48 * 1024 * 1024,
        ),
    )(x_patches, wd, bd, lw, lb)

    return out_flat.reshape(N, C_out, Do, Ho, Wo)   # free reshape, already NCDHW


def _reference_forward(x, down_w, down_b, lu_ws, lu_bs):
    dn = ("NCDHW", "OIDHW", "NCDHW")

    def in_relu(y):
        mean = jnp.mean(y, axis=(2, 3, 4), keepdims=True)
        var = jnp.mean((y - mean) ** 2, axis=(2, 3, 4), keepdims=True)
        return jnp.maximum((y - mean) * lax.rsqrt(var + _EPS), 0.0)

    y = lax.conv_general_dilated(x, down_w, (2, 2, 2), "VALID",
                                 dimension_numbers=dn,
                                 precision=lax.Precision.HIGHEST)
    down = in_relu(y + down_b.reshape(1, -1, 1, 1, 1))
    cur = down
    for w, b in zip(lu_ws, lu_bs):
        z = lax.conv_general_dilated(cur, w, (1, 1, 1), [(2, 2)] * 3,
                                     dimension_numbers=dn,
                                     precision=lax.Precision.HIGHEST)
        cur = in_relu(z + b.reshape(1, -1, 1, 1, 1))
    return jnp.maximum(cur + down, 0.0)


if __name__ == "__main__":
    # Small deterministic example: batch=2, in_channels=4 -> out_channels=8,
    # spatial 16^3 -> 8^3 after the down conv (S = 512), n_conv=2 LUConv blocks.
    N, C_in = 2, 4
    D = H = W = 16
    n_conv = 2
    C_out = 2 * C_in

    key = jax.random.PRNGKey(0)
    kx, kwd, kbd, *kl = jax.random.split(key, 3 + 2 * n_conv)

    x = jax.random.normal(kx, (N, C_in, D, H, W), dtype=jnp.float32)
    down_w = jax.random.normal(kwd, (C_out, C_in, 2, 2, 2), dtype=jnp.float32) * 0.2
    down_b = jax.random.normal(kbd, (C_out,), dtype=jnp.float32) * 0.1
    lu_ws = [jax.random.normal(kl[2 * i], (C_out, C_out, 5, 5, 5),
                               dtype=jnp.float32) * 0.05 for i in range(n_conv)]
    lu_bs = [jax.random.normal(kl[2 * i + 1], (C_out,),
                               dtype=jnp.float32) * 0.1 for i in range(n_conv)]

    out = down_transition_forward(x, down_w, down_b, lu_ws, lu_bs)
    out = jax.block_until_ready(out)

    ref = _reference_forward(x, down_w, down_b, lu_ws, lu_bs)
    assert out.shape == (N, C_out, D // 2, H // 2, W // 2)
    max_err = float(jnp.max(jnp.abs(out - ref)))
    assert jnp.allclose(out, ref, atol=2e-3, rtol=2e-3), f"max abs err {max_err}"

    print("KERNEL_OK")
</pallas_src>

<mosaic_0001>
module attributes {stable_mosaic.version = 11 : i64} {
  func.func @_down_transition_kernel(%arg0: i32, %arg1: memref<1x32x512xf32, #tpu.memory_space<vmem>>, %arg2: memref<8x32xf32, #tpu.memory_space<vmem>>, %arg3: memref<8x1xf32, #tpu.memory_space<vmem>>, %arg4: memref<2x5x8x200xf32, #tpu.memory_space<vmem>>, %arg5: memref<2x8x1xf32, #tpu.memory_space<vmem>>, %arg6: memref<1x8x512xf32, #tpu.memory_space<vmem>>, %arg7: memref<200x512xf32, #tpu.memory_space<vmem>>) attributes {dimension_semantics = [#tpu.dimension_semantics<parallel>], iteration_bounds = array<i64: 2>, scalar_prefetch = 0 : i64, scratch_operands = 1 : i64, tpu.core_type = #tpu.core_type<tc>, window_params = [{transform_indices = @transform_0, window_bounds = array<i64: 1, 32, 512>}, {pipeline_mode = #tpu.pipeline_mode<synchronous>, transform_indices = @transform_1, window_bounds = array<i64: 8, 32>}, {pipeline_mode = #tpu.pipeline_mode<synchronous>, transform_indices = @transform_2, window_bounds = array<i64: 8, 1>}, {pipeline_mode = #tpu.pipeline_mode<synchronous>, transform_indices = @transform_3, window_bounds = array<i64: 2, 5, 8, 200>}, {pipeline_mode = #tpu.pipeline_mode<synchronous>, transform_indices = @transform_4, window_bounds = array<i64: 2, 8, 1>}, {transform_indices = @transform_5, window_bounds = array<i64: 1, 8, 512>}]} {
    %0 = tpu.iota {dimensions = array<i32: 1>} : vector<1x512xi32>
    %c0_i32 = arith.constant 0 : i32
    %1 = vector.broadcast %c0_i32 : i32 to vector<1x512xi32>
    %c64_i32 = arith.constant 64 : i32
    %2 = vector.broadcast %c64_i32 : i32 to vector<1x512xi32>
    %3 = arith.cmpi sge, %0, %2 : vector<1x512xi32>
    %4 = arith.extui %3 : vector<1x512xi1> to vector<1x512xi32>
    %5 = arith.addi %1, %4 : vector<1x512xi32>
    %c128_i32 = arith.constant 128 : i32
    %6 = vector.broadcast %c128_i32 : i32 to vector<1x512xi32>
    %7 = arith.cmpi sge, %0, %6 : vector<1x512xi32>
    %8 = arith.extui %7 : vector<1x512xi1> to vector<1x512xi32>
    %9 = arith.addi %5, %8 : vector<1x512xi32>
    %c192_i32 = arith.constant 192 : i32
    %10 = vector.broadcast %c192_i32 : i32 to vector<1x512xi32>
    %11 = arith.cmpi sge, %0, %10 : vector<1x512xi32>
    %12 = arith.extui %11 : vector<1x512xi1> to vector<1x512xi32>
    %13 = arith.addi %9, %12 : vector<1x512xi32>
    %c256_i32 = arith.constant 256 : i32
    %14 = vector.broadcast %c256_i32 : i32 to vector<1x512xi32>
    %15 = arith.cmpi sge, %0, %14 : vector<1x512xi32>
    %16 = arith.extui %15 : vector<1x512xi1> to vector<1x512xi32>
    %17 = arith.addi %13, %16 : vector<1x512xi32>
    %c320_i32 = arith.constant 320 : i32
    %18 = vector.broadcast %c320_i32 : i32 to vector<1x512xi32>
    %19 = arith.cmpi sge, %0, %18 : vector<1x512xi32>
    %20 = arith.extui %19 : vector<1x512xi1> to vector<1x512xi32>
    %21 = arith.addi %17, %20 : vector<1x512xi32>
    %c384_i32 = arith.constant 384 : i32
    %22 = vector.broadcast %c384_i32 : i32 to vector<1x512xi32>
    %23 = arith.cmpi sge, %0, %22 : vector<1x512xi32>
    %24 = arith.extui %23 : vector<1x512xi1> to vector<1x512xi32>
    %25 = arith.addi %21, %24 : vector<1x512xi32>
    %c448_i32 = arith.constant 448 : i32
    %26 = vector.broadcast %c448_i32 : i32 to vector<1x512xi32>
    %27 = arith.cmpi sge, %0, %26 : vector<1x512xi32>
    %28 = arith.extui %27 : vector<1x512xi1> to vector<1x512xi32>
    %29 = arith.addi %25, %28 : vector<1x512xi32>
    %c64_i32_0 = arith.constant 64 : i32
    %30 = vector.broadcast %c64_i32_0 : i32 to vector<1x512xi32>
    %31 = arith.muli %29, %30 : vector<1x512xi32>
    %32 = arith.subi %0, %31 : vector<1x512xi32>
    %c0_i32_1 = arith.constant 0 : i32
    %33 = vector.broadcast %c0_i32_1 : i32 to vector<1x512xi32>
    %c8_i32 = arith.constant 8 : i32
    %34 = vector.broadcast %c8_i32 : i32 to vector<1x512xi32>
    %35 = arith.cmpi sge, %32, %34 : vector<1x512xi32>
    %36 = arith.extui %35 : vector<1x512xi1> to vector<1x512xi32>
    %37 = arith.addi %33, %36 : vector<1x512xi32>
    %c16_i32 = arith.constant 16 : i32
    %38 = vector.broadcast %c16_i32 : i32 to vector<1x512xi32>
    %39 = arith.cmpi sge, %32, %38 : vector<1x512xi32>
    %40 = arith.extui %39 : vector<1x512xi1> to vector<1x512xi32>
    %41 = arith.addi %37, %40 : vector<1x512xi32>
    %c24_i32 = arith.constant 24 : i32
    %42 = vector.broadcast %c24_i32 : i32 to vector<1x512xi32>
    %43 = arith.cmpi sge, %32, %42 : vector<1x512xi32>
    %44 = arith.extui %43 : vector<1x512xi1> to vector<1x512xi32>
    %45 = arith.addi %41, %44 : vector<1x512xi32>
    %c32_i32 = arith.constant 32 : i32
    %46 = vector.broadcast %c32_i32 : i32 to vector<1x512xi32>
    %47 = arith.cmpi sge, %32, %46 : vector<1x512xi32>
    %48 = arith.extui %47 : vector<1x512xi1> to vector<1x512xi32>
    %49 = arith.addi %45, %48 : vector<1x512xi32>
    %c40_i32 = arith.constant 40 : i32
    %50 = vector.broadcast %c40_i32 : i32 to vector<1x512xi32>
    %51 = arith.cmpi sge, %32, %50 : vector<1x512xi32>
    %52 = arith.extui %51 : vector<1x512xi1> to vector<1x512xi32>
    %53 = arith.addi %49, %52 : vector<1x512xi32>
    %c48_i32 = arith.constant 48 : i32
    %54 = vector.broadcast %c48_i32 : i32 to vector<1x512xi32>
    %55 = arith.cmpi sge, %32, %54 : vector<1x512xi32>
    %56 = arith.extui %55 : vector<1x512xi1> to vector<1x512xi32>
    %57 = arith.addi %53, %56 : vector<1x512xi32>
    %c56_i32 = arith.constant 56 : i32
    %58 = vector.broadcast %c56_i32 : i32 to vector<1x512xi32>
    %59 = arith.cmpi sge, %32, %58 : vector<1x512xi32>
    %60 = arith.extui %59 : vector<1x512xi1> to vector<1x512xi32>
    %61 = arith.addi %57, %60 : vector<1x512xi32>
    %c8_i32_2 = arith.constant 8 : i32
    %62 = vector.broadcast %c8_i32_2 : i32 to vector<1x512xi32>
    %63 = arith.muli %61, %62 : vector<1x512xi32>
    %64 = arith.subi %32, %63 : vector<1x512xi32>
    %c128_i32_3 = arith.constant 128 : i32
    %65 = vector.broadcast %c128_i32_3 : i32 to vector<1x512xi32>
    %66 = arith.cmpi sge, %0, %65 : vector<1x512xi32>
    %c512_i32 = arith.constant 512 : i32
    %67 = vector.broadcast %c512_i32 : i32 to vector<1x512xi32>
    %68 = arith.cmpi slt, %0, %67 : vector<1x512xi32>
    %69 = arith.andi %66, %68 : vector<1x512xi1>
    %70 = arith.extui %69 : vector<1x512xi1> to vector<1x512xi32>
    %71 = arith.sitofp %70 : vector<1x512xi32> to vector<1x512xf32>
    %c64_i32_4 = arith.constant 64 : i32
    %72 = vector.broadcast %c64_i32_4 : i32 to vector<1x512xi32>
    %73 = arith.cmpi sge, %0, %72 : vector<1x512xi32>
    %c512_i32_5 = arith.constant 512 : i32
    %74 = vector.broadcast %c512_i32_5 : i32 to vector<1x512xi32>
    %75 = arith.cmpi slt, %0, %74 : vector<1x512xi32>
    %76 = arith.andi %73, %75 : vector<1x512xi1>
    %77 = arith.extui %76 : vector<1x512xi1> to vector<1x512xi32>
    %78 = arith.sitofp %77 : vector<1x512xi32> to vector<1x512xf32>
    %c0_i32_6 = arith.constant 0 : i32
    %79 = vector.broadcast %c0_i32_6 : i32 to vector<1x512xi32>
    %80 = arith.cmpi sge, %0, %79 : vector<1x512xi32>
    %c512_i32_7 = arith.constant 512 : i32
    %81 = vector.broadcast %c512_i32_7 : i32 to vector<1x512xi32>
    %82 = arith.cmpi slt, %0, %81 : vector<1x512xi32>
    %83 = arith.andi %80, %82 : vector<1x512xi1>
    %84 = arith.extui %83 : vector<1x512xi1> to vector<1x512xi32>
    %85 = arith.sitofp %84 : vector<1x512xi32> to vector<1x512xf32>
    %c0_i32_8 = arith.constant 0 : i32
    %86 = vector.broadcast %c0_i32_8 : i32 to vector<1x512xi32>
    %87 = arith.cmpi sge, %0, %86 : vector<1x512xi32>
    %c448_i32_9 = arith.constant 448 : i32
    %88 = vector.broadcast %c448_i32_9 : i32 to vector<1x512xi32>
    %89 = arith.cmpi slt, %0, %88 : vector<1x512xi32>
    %90 = arith.andi %87, %89 : vector<1x512xi1>
    %91 = arith.extui %90 : vector<1x512xi1> to vector<1x512xi32>
    %92 = arith.sitofp %91 : vector<1x512xi32> to vector<1x512xf32>
    %c0_i32_10 = arith.constant 0 : i32
    %93 = vector.broadcast %c0_i32_10 : i32 to vector<1x512xi32>
    %94 = arith.cmpi sge, %0, %93 : vector<1x512xi32>
    %c384_i32_11 = arith.constant 384 : i32
    %95 = vector.broadcast %c384_i32_11 : i32 to vector<1x512xi32>
    %96 = arith.cmpi slt, %0, %95 : vector<1x512xi32>
    %97 = arith.andi %94, %96 : vector<1x512xi1>
    %98 = arith.extui %97 : vector<1x512xi1> to vector<1x512xi32>
    %99 = arith.sitofp %98 : vector<1x512xi32> to vector<1x512xf32>
    %c16_i32_12 = arith.constant 16 : i32
    %100 = vector.broadcast %c16_i32_12 : i32 to vector<1x512xi32>
    %101 = arith.cmpi sge, %32, %100 : vector<1x512xi32>
    %c64_i32_13 = arith.constant 64 : i32
    %102 = vector.broadcast %c64_i32_13 : i32 to vector<1x512xi32>
    %103 = arith.cmpi slt, %32, %102 : vector<1x512xi32>
    %104 = arith.andi %101, %103 : vector<1x512xi1>
    %105 = arith.extui %104 : vector<1x512xi1> to vector<1x512xi32>
    %106 = arith.sitofp %105 : vector<1x512xi32> to vector<1x512xf32>
    %c8_i32_14 = arith.constant 8 : i32
    %107 = vector.broadcast %c8_i32_14 : i32 to vector<1x512xi32>
    %108 = arith.cmpi sge, %32, %107 : vector<1x512xi32>
    %c64_i32_15 = arith.constant 64 : i32
    %109 = vector.broadcast %c64_i32_15 : i32 to vector<1x512xi32>
    %110 = arith.cmpi slt, %32, %109 : vector<1x512xi32>
    %111 = arith.andi %108, %110 : vector<1x512xi1>
    %112 = arith.extui %111 : vector<1x512xi1> to vector<1x512xi32>
    %113 = arith.sitofp %112 : vector<1x512xi32> to vector<1x512xf32>
    %c0_i32_16 = arith.constant 0 : i32
    %114 = vector.broadcast %c0_i32_16 : i32 to vector<1x512xi32>
    %115 = arith.cmpi sge, %32, %114 : vector<1x512xi32>
    %c64_i32_17 = arith.constant 64 : i32
    %116 = vector.broadcast %c64_i32_17 : i32 to vector<1x512xi32>
    %117 = arith.cmpi slt, %32, %116 : vector<1x512xi32>
    %118 = arith.andi %115, %117 : vector<1x512xi1>
    %119 = arith.extui %118 : vector<1x512xi1> to vector<1x512xi32>
    %120 = arith.sitofp %119 : vector<1x512xi32> to vector<1x512xf32>
    %c0_i32_18 = arith.constant 0 : i32
    %121 = vector.broadcast %c0_i32_18 : i32 to vector<1x512xi32>
    %122 = arith.cmpi sge, %32, %121 : vector<1x512xi32>
    %c56_i32_19 = arith.constant 56 : i32
    %123 = vector.broadcast %c56_i32_19 : i32 to vector<1x512xi32>
    %124 = arith.cmpi slt, %32, %123 : vector<1x512xi32>
    %125 = arith.andi %122, %124 : vector<1x512xi1>
    %126 = arith.extui %125 : vector<1x512xi1> to vector<1x512xi32>
    %127 = arith.sitofp %126 : vector<1x512xi32> to vector<1x512xf32>
    %c0_i32_20 = arith.constant 0 : i32
    %128 = vector.broadcast %c0_i32_20 : i32 to vector<1x512xi32>
    %129 = arith.cmpi sge, %32, %128 : vector<1x512xi32>
    %c48_i32_21 = arith.constant 48 : i32
    %130 = vector.broadcast %c48_i32_21 : i32 to vector<1x512xi32>
    %131 = arith.cmpi slt, %32, %130 : vector<1x512xi32>
    %132 = arith.andi %129, %131 : vector<1x512xi1>
    %133 = arith.extui %132 : vector<1x512xi1> to vector<1x512xi32>
    %134 = arith.sitofp %133 : vector<1x512xi32> to vector<1x512xf32>
    %c2_i32 = arith.constant 2 : i32
    %135 = vector.broadcast %c2_i32 : i32 to vector<1x512xi32>
    %136 = arith.cmpi sge, %64, %135 : vector<1x512xi32>
    %c8_i32_22 = arith.constant 8 : i32
    %137 = vector.broadcast %c8_i32_22 : i32 to vector<1x512xi32>
    %138 = arith.cmpi slt, %64, %137 : vector<1x512xi32>
    %139 = arith.andi %136, %138 : vector<1x512xi1>
    %140 = arith.extui %139 : vector<1x512xi1> to vector<1x512xi32>
    %141 = arith.sitofp %140 : vector<1x512xi32> to vector<1x512xf32>
    %c1_i32 = arith.constant 1 : i32
    %142 = vector.broadcast %c1_i32 : i32 to vector<1x512xi32>
    %143 = arith.cmpi sge, %64, %142 : vector<1x512xi32>
    %c8_i32_23 = arith.constant 8 : i32
    %144 = vector.broadcast %c8_i32_23 : i32 to vector<1x512xi32>
    %145 = arith.cmpi slt, %64, %144 : vector<1x512xi32>
    %146 = arith.andi %143, %145 : vector<1x512xi1>
    %147 = arith.extui %146 : vector<1x512xi1> to vector<1x512xi32>
    %148 = arith.sitofp %147 : vector<1x512xi32> to vector<1x512xf32>
    %c0_i32_24 = arith.constant 0 : i32
    %149 = vector.broadcast %c0_i32_24 : i32 to vector<1x512xi32>
    %150 = arith.cmpi sge, %64, %149 : vector<1x512xi32>
    %c8_i32_25 = arith.constant 8 : i32
    %151 = vector.broadcast %c8_i32_25 : i32 to vector<1x512xi32>
    %152 = arith.cmpi slt, %64, %151 : vector<1x512xi32>
    %153 = arith.andi %150, %152 : vector<1x512xi1>
    %154 = arith.extui %153 : vector<1x512xi1> to vector<1x512xi32>
    %155 = arith.sitofp %154 : vector<1x512xi32> to vector<1x512xf32>
    %c0_i32_26 = arith.constant 0 : i32
    %156 = vector.broadcast %c0_i32_26 : i32 to vector<1x512xi32>
    %157 = arith.cmpi sge, %64, %156 : vector<1x512xi32>
    %c7_i32 = arith.constant 7 : i32
    %158 = vector.broadcast %c7_i32 : i32 to vector<1x512xi32>
    %159 = arith.cmpi slt, %64, %158 : vector<1x512xi32>
    %160 = arith.andi %157, %159 : vector<1x512xi1>
    %161 = arith.extui %160 : vector<1x512xi1> to vector<1x512xi32>
    %162 = arith.sitofp %161 : vector<1x512xi32> to vector<1x512xf32>
    %c0_i32_27 = arith.constant 0 : i32
    %163 = vector.broadcast %c0_i32_27 : i32 to vector<1x512xi32>
    %164 = arith.cmpi sge, %64, %163 : vector<1x512xi32>
    %c6_i32 = arith.constant 6 : i32
    %165 = vector.broadcast %c6_i32 : i32 to vector<1x512xi32>
    %166 = arith.cmpi slt, %64, %165 : vector<1x512xi32>
    %167 = arith.andi %164, %166 : vector<1x512xi1>
    %168 = arith.extui %167 : vector<1x512xi1> to vector<1x512xi32>
    %169 = arith.sitofp %168 : vector<1x512xi32> to vector<1x512xf32>
    %c0 = arith.constant 0 : index
    %c0_28 = arith.constant 0 : index
    %c0_29 = arith.constant 0 : index
    %170 = vector.load %arg1[%c0, %c0_28, %c0_29] : memref<1x32x512xf32, #tpu.memory_space<vmem>>, vector<1x32x512xf32>
    %171 = vector.shape_cast %170 : vector<1x32x512xf32> to vector<32x512xf32>
    %c0_30 = arith.constant 0 : index
    %c0_31 = arith.constant 0 : index
    %172 = vector.load %arg2[%c0_30, %c0_31] : memref<8x32xf32, #tpu.memory_space<vmem>>, vector<8x32xf32>
    %cst = arith.constant dense<0.000000e+00> : vector<8x512xf32>
    %173 = tpu.matmul %172, %171, %cst {dimension_numbers = #tpu.dot_dimension_numbers<[1], [0], [0], [1], [0, 0, 1, 1], [], []>} : vector<8x32xf32>, vector<32x512xf32>, vector<8x512xf32> -> vector<8x512xf32>
    %c0_32 = arith.constant 0 : index
    %c0_33 = arith.constant 0 : index
    %174 = vector.load %arg3[%c0_32, %c0_33] : memref<8x1xf32, #tpu.memory_space<vmem>>, vector<8x1xf32>
    %175 = vector.broadcast %174 : vector<8x1xf32> to vector<8x512xf32>
    %176 = arith.addf %173, %175 : vector<8x512xf32>
    %cst_34 = arith.constant dense<0.000000e+00> : vector<8xf32>
    %177 = vector.multi_reduction <add>, %176, %cst_34 [1] : vector<8x512xf32> to vector<8xf32>
    %178 = vector.shape_cast %177 : vector<8xf32> to vector<8x1xf32>
    %cst_35 = arith.constant 5.120000e+02 : f32
    %179 = vector.broadcast %cst_35 : f32 to vector<8x1xf32>
    %180 = arith.divf %178, %179 : vector<8x1xf32>
    %181 = vector.broadcast %180 : vector<8x1xf32> to vector<8x512xf32>
    %182 = arith.subf %176, %181 : vector<8x512xf32>
    %183 = arith.mulf %182, %182 : vector<8x512xf32>
    %cst_36 = arith.constant dense<0.000000e+00> : vector<8xf32>
    %184 = vector.multi_reduction <add>, %183, %cst_36 [1] : vector<8x512xf32> to vector<8xf32>
    %185 = vector.shape_cast %184 : vector<8xf32> to vector<8x1xf32>
    %cst_37 = arith.constant 5.120000e+02 : f32
    %186 = vector.broadcast %cst_37 : f32 to vector<8x1xf32>
    %187 = arith.divf %185, %186 : vector<8x1xf32>
    %cst_38 = arith.constant 9.99999974E-6 : f32
    %188 = vector.broadcast %cst_38 : f32 to vector<8x1xf32>
    %189 = arith.addf %187, %188 : vector<8x1xf32>
    %190 = math.rsqrt %189 : vector<8x1xf32>
    %191 = vector.broadcast %190 : vector<8x1xf32> to vector<8x512xf32>
    %192 = arith.mulf %182, %191 : vector<8x512xf32>
    %cst_39 = arith.constant 0.000000e+00 : f32
    %193 = vector.broadcast %cst_39 : f32 to vector<8x512xf32>
    %194 = arith.maximumf %192, %193 : vector<8x512xf32>
    %c128_i32_40 = arith.constant 128 : i32
    %195 = tpu.dynamic_rotate %194 by %c128_i32_40 dim 1 : vector<8x512xf32>, i32 -> vector<8x512xf32>
    %196 = vector.broadcast %71 : vector<1x512xf32> to vector<8x512xf32>
    %197 = arith.mulf %195, %196 : vector<8x512xf32>
    %c16_i32_41 = arith.constant 16 : i32
    %198 = tpu.dynamic_rotate %197 by %c16_i32_41 dim 1 : vector<8x512xf32>, i32 -> vector<8x512xf32>
    %199 = vector.broadcast %106 : vector<1x512xf32> to vector<8x512xf32>
    %200 = arith.mulf %198, %199 : vector<8x512xf32>
    %c0_42 = arith.constant 0 : index
    %c0_43 = arith.constant 0 : index
    %201 = vector.load %arg7[%c0_42, %c0_43] : memref<200x512xf32, #tpu.memory_space<vmem>>, vector<8x512xf32>
    tpu.vector_store %arg7[%c0_42, %c0_43], %200 {strides = array<i32>} : memref<200x512xf32, #tpu.memory_space<vmem>>, vector<8x512xf32>,
    %c8_i32_44 = arith.constant 8 : i32
    %202 = tpu.dynamic_rotate %197 by %c8_i32_44 dim 1 : vector<8x512xf32>, i32 -> vector<8x512xf32>
    %203 = vector.broadcast %113 : vector<1x512xf32> to vector<8x512xf32>
    %204 = arith.mulf %202, %203 : vector<8x512xf32>
    %c8 = arith.constant 8 : index
    %c0_45 = arith.constant 0 : index
    %205 = vector.load %arg7[%c8, %c0_45] : memref<200x512xf32, #tpu.memory_space<vmem>>, vector<8x512xf32>
    tpu.vector_store %arg7[%c8, %c0_45], %204 {strides = array<i32>} : memref<200x512xf32, #tpu.memory_space<vmem>>, vector<8x512xf32>,
    %206 = vector.broadcast %120 : vector<1x512xf32> to vector<8x512xf32>
    %207 = arith.mulf %197, %206 : vector<8x512xf32>
    %c16 = arith.constant 16 : index
    %c0_46 = arith.constant 0 : index
    %208 = vector.load %arg7[%c16, %c0_46] : memref<200x512xf32, #tpu.memory_space<vmem>>, vector<8x512xf32>
    tpu.vector_store %arg7[%c16, %c0_46], %207 {strides = array<i32>} : memref<200x512xf32, #tpu.memory_space<vmem>>, vector<8x512xf32>,
    %c504_i32 = arith.constant 504 : i32
    %209 = tpu.dynamic_rotate %197 by %c504_i32 dim 1 : vector<8x512xf32>, i32 -> vector<8x512xf32>
    %210 = vector.broadcast %127 : vector<1x512xf32> to vector<8x512xf32>
    %211 = arith.mulf %209, %210 : vector<8x512xf32>
    %c24 = arith.constant 24 : index
    %c0_47 = arith.constant 0 : index
    %212 = vector.load %arg7[%c24, %c0_47] : memref<200x512xf32, #tpu.memory_space<vmem>>, vector<8x512xf32>
    tpu.vector_store %arg7[%c24, %c0_47], %211 {strides = array<i32>} : memref<200x512xf32, #tpu.memory_space<vmem>>, vector<8x512xf32>,
    %c496_i32 = arith.constant 496 : i32
    %213 = tpu.dynamic_rotate %197 by %c496_i32 dim 1 : vector<8x512xf32>, i32 -> vector<8x512xf32>
    %214 = vector.broadcast %134 : vector<1x512xf32> to vector<8x512xf32>
    %215 = arith.mulf %213, %214 : vector<8x512xf32>
    %c32 = arith.constant 32 : index
    %c0_48 = arith.constant 0 : index
    %216 = vector.load %arg7[%c32, %c0_48] : memref<200x512xf32, #tpu.memory_space<vmem>>, vector<8x512xf32>
    tpu.vector_store %arg7[%c32, %c0_48], %215 {strides = array<i32>} : memref<200x512xf32, #tpu.memory_space<vmem>>, vector<8x512xf32>,
    %c64_i32_49 = arith.constant 64 : i32
    %217 = tpu.dynamic_rotate %194 by %c64_i32_49 dim 1 : vector<8x512xf32>, i32 -> vector<8x512xf32>
    %218 = vector.broadcast %78 : vector<1x512xf32> to vector<8x512xf32>
    %219 = arith.mulf %217, %218 : vector<8x512xf32>
    %c16_i32_50 = arith.constant 16 : i32
    %220 = tpu.dynamic_rotate %219 by %c16_i32_50 dim 1 : vector<8x512xf32>, i32 -> vector<8x512xf32>
    %221 = vector.broadcast %106 : vector<1x512xf32> to vector<8x512xf32>
    %222 = arith.mulf %220, %221 : vector<8x512xf32>
    %c40 = arith.constant 40 : index
    %c0_51 = arith.constant 0 : index
    %223 = vector.load %arg7[%c40, %c0_51] : memref<200x512xf32, #tpu.memory_space<vmem>>, vector<8x512xf32>
    tpu.vector_store %arg7[%c40, %c0_51], %222 {strides = array<i32>} : memref<200x512xf32, #tpu.memory_space<vmem>>, vector<8x512xf32>,
    %c8_i32_52 = arith.constant 8 : i32
    %224 = tpu.dynamic_rotate %219 by %c8_i32_52 dim 1 : vector<8x512xf32>, i32 -> vector<8x512xf32>
    %225 = vector.broadcast %113 : vector<1x512xf32> to vector<8x512xf32>
    %226 = arith.mulf %224, %225 : vector<8x512xf32>
    %c48 = arith.constant 48 : index
    %c0_53 = arith.constant 0 : index
    %227 = vector.load %arg7[%c48, %c0_53] : memref<200x512xf32, #tpu.memory_space<vmem>>, vector<8x512xf32>
    tpu.vector_store %arg7[%c48, %c0_53], %226 {strides = array<i32>} : memref<200x512xf32, #tpu.memory_space<vmem>>, vector<8x512xf32>,
    %228 = vector.broadcast %120 : vector<1x512xf32> to vector<8x512xf32>
    %229 = arith.mulf %219, %228 : vector<8x512xf32>
    %c56 = arith.constant 56 : index
    %c0_54 = arith.constant 0 : index
    %230 = vector.load %arg7[%c56, %c0_54] : memref<200x512xf32, #tpu.memory_space<vmem>>, vector<8x512xf32>
    tpu.vector_store %arg7[%c56, %c0_54], %229 {strides = array<i32>} : memref<200x512xf32, #tpu.memory_space<vmem>>, vector<8x512xf32>,
    %c504_i32_55 = arith.constant 504 : i32
    %231 = tpu.dynamic_rotate %219 by %c504_i32_55 dim 1 : vector<8x512xf32>, i32 -> vector<8x512xf32>
    %232 = vector.broadcast %127 : vector<1x512xf32> to vector<8x512xf32>
    %233 = arith.mulf %231, %232 : vector<8x512xf32>
    %c64 = arith.constant 64 : index
    %c0_56 = arith.constant 0 : index
    %234 = vector.load %arg7[%c64, %c0_56] : memref<200x512xf32, #tpu.memory_space<vmem>>, vector<8x512xf32>
    tpu.vector_store %arg7[%c64, %c0_56], %233 {strides = array<i32>} : memref<200x512xf32, #tpu.memory_space<vmem>>, vector<8x512xf32>,
    %c496_i32_57 = arith.constant 496 : i32
    %235 = tpu.dynamic_rotate %219 by %c496_i32_57 dim 1 : vector<8x512xf32>, i32 -> vector<8x512xf32>
    %236 = vector.broadcast %134 : vector<1x512xf32> to vector<8x512xf32>
    %237 = arith.mulf %235, %236 : vector<8x512xf32>
    %c72 = arith.constant 72 : index
    %c0_58 = arith.constant 0 : index
    %238 = vector.load %arg7[%c72, %c0_58] : memref<200x512xf32, #tpu.memory_space<vmem>>, vector<8x512xf32>
    tpu.vector_store %arg7[%c72, %c0_58], %237 {strides = array<i32>} : memref<200x512xf32, #tpu.memory_space<vmem>>, vector<8x512xf32>,
    %239 = vector.broadcast %85 : vector<1x512xf32> to vector<8x512xf32>
    %240 = arith.mulf %194, %239 : vector<8x512xf32>
    %c16_i32_59 = arith.constant 16 : i32
    %241 = tpu.dynamic_rotate %240 by %c16_i32_59 dim 1 : vector<8x512xf32>, i32 -> vector<8x512xf32>
    %242 = vector.broadcast %106 : vector<1x512xf32> to vector<8x512xf32>
    %243 = arith.mulf %241, %242 : vector<8x512xf32>
    %c80 = arith.constant 80 : index
    %c0_60 = arith.constant 0 : index
    %244 = vector.load %arg7[%c80, %c0_60] : memref<200x512xf32, #tpu.memory_space<vmem>>, vector<8x512xf32>
    tpu.vector_store %arg7[%c80, %c0_60], %243 {strides = array<i32>} : memref<200x512xf32, #tpu.memory_space<vmem>>, vector<8x512xf32>,
    %c8_i32_61 = arith.constant 8 : i32
    %245 = tpu.dynamic_rotate %240 by %c8_i32_61 dim 1 : vector<8x512xf32>, i32 -> vector<8x512xf32>
    %246 = vector.broadcast %113 : vector<1x512xf32> to vector<8x512xf32>
    %247 = arith.mulf %245, %246 : vector<8x512xf32>
    %c88 = arith.constant 88 : index
    %c0_62 = arith.constant 0 : index
    %248 = vector.load %arg7[%c88, %c0_62] : memref<200x512xf32, #tpu.memory_space<vmem>>, vector<8x512xf32>
    tpu.vector_store %arg7[%c88, %c0_62], %247 {strides = array<i32>} : memref<200x512xf32, #tpu.memory_space<vmem>>, vector<8x512xf32>,
    %249 = vector.broadcast %120 : vector<1x512xf32> to vector<8x512xf32>
    %250 = arith.mulf %240, %249 : vector<8x512xf32>
    %c96 = arith.constant 96 : index
    %c0_63 = arith.constant 0 : index
    %251 = vector.load %arg7[%c96, %c0_63] : memref<200x512xf32, #tpu.memory_space<vmem>>, vector<8x512xf32>
    tpu.vector_store %arg7[%c96, %c0_63], %250 {strides = array<i32>} : memref<200x512xf32, #tpu.memory_space<vmem>>, vector<8x512xf32>,
    %c504_i32_64 = arith.constant 504 : i32
    %252 = tpu.dynamic_rotate %240 by %c504_i32_64 dim 1 : vector<8x512xf32>, i32 -> vector<8x512xf32>
    %253 = vector.broadcast %127 : vector<1x512xf32> to vector<8x512xf32>
    %254 = arith.mulf %252, %253 : vector<8x512xf32>
    %c104 = arith.constant 104 : index
    %c0_65 = arith.constant 0 : index
    %255 = vector.load %arg7[%c104, %c0_65] : memref<200x512xf32, #tpu.memory_space<vmem>>, vector<8x512xf32>
    tpu.vector_store %arg7[%c104, %c0_65], %254 {strides = array<i32>} : memref<200x512xf32, #tpu.memory_space<vmem>>, vector<8x512xf32>,
    %c496_i32_66 = arith.constant 496 : i32
    %256 = tpu.dynamic_rotate %240 by %c496_i32_66 dim 1 : vector<8x512xf32>, i32 -> vector<8x512xf32>
    %257 = vector.broadcast %134 : vector<1x512xf32> to vector<8x512xf32>
    %258 = arith.mulf %256, %257 : vector<8x512xf32>
    %c112 = arith.constant 112 : index
    %c0_67 = arith.constant 0 : index
    %259 = vector.load %arg7[%c112, %c0_67] : memref<200x512xf32, #tpu.memory_space<vmem>>, vector<8x512xf32>
    tpu.vector_store %arg7[%c112, %c0_67], %258 {strides = array<i32>} : memref<200x512xf32, #tpu.memory_space<vmem>>, vector<8x512xf32>,
    %c448_i32_68 = arith.constant 448 : i32
    %260 = tpu.dynamic_rotate %194 by %c448_i32_68 dim 1 : vector<8x512xf32>, i32 -> vector<8x512xf32>
    %261 = vector.broadcast %92 : vector<1x512xf32> to vector<8x512xf32>
    %262 = arith.mulf %260, %261 : vector<8x512xf32>
    %c16_i32_69 = arith.constant 16 : i32
    %263 = tpu.dynamic_rotate %262 by %c16_i32_69 dim 1 : vector<8x512xf32>, i32 -> vector<8x512xf32>
    %264 = vector.broadcast %106 : vector<1x512xf32> to vector<8x512xf32>
    %265 = arith.mulf %263, %264 : vector<8x512xf32>
    %c120 = arith.constant 120 : index
    %c0_70 = arith.constant 0 : index
    %266 = vector.load %arg7[%c120, %c0_70] : memref<200x512xf32, #tpu.memory_space<vmem>>, vector<8x512xf32>
    tpu.vector_store %arg7[%c120, %c0_70], %265 {strides = array<i32>} : memref<200x512xf32, #tpu.memory_space<vmem>>, vector<8x512xf32>,
    %c8_i32_71 = arith.constant 8 : i32
    %267 = tpu.dynamic_rotate %262 by %c8_i32_71 dim 1 : vector<8x512xf32>, i32 -> vector<8x512xf32>
    %268 = vector.broadcast %113 : vector<1x512xf32> to vector<8x512xf32>
    %269 = arith.mulf %267, %268 : vector<8x512xf32>
    %c128 = arith.constant 128 : index
    %c0_72 = arith.constant 0 : index
    %270 = vector.load %arg7[%c128, %c0_72] : memref<200x512xf32, #tpu.memory_space<vmem>>, vector<8x512xf32>
    tpu.vector_store %arg7[%c128, %c0_72], %269 {strides = array<i32>} : memref<200x512xf32, #tpu.memory_space<vmem>>, vector<8x512xf32>,
    %271 = vector.broadcast %120 : vector<1x512xf32> to vector<8x512xf32>
    %272 = arith.mulf %262, %271 : vector<8x512xf32>
    %c136 = arith.constant 136 : index
    %c0_73 = arith.constant 0 : index
    %273 = vector.load %arg7[%c136, %c0_73] : memref<200x512xf32, #tpu.memory_space<vmem>>, vector<8x512xf32>
    tpu.vector_store %arg7[%c136, %c0_73], %272 {strides = array<i32>} : memref<200x512xf32, #tpu.memory_space<vmem>>, vector<8x512xf32>,
    %c504_i32_74 = arith.constant 504 : i32
    %274 = tpu.dynamic_rotate %262 by %c504_i32_74 dim 1 : vector<8x512xf32>, i32 -> vector<8x512xf32>
    %275 = vector.broadcast %127 : vector<1x512xf32> to vector<8x512xf32>
    %276 = arith.mulf %274, %275 : vector<8x512xf32>
    %c144 = arith.constant 144 : index
    %c0_75 = arith.constant 0 : index
    %277 = vector.load %arg7[%c144, %c0_75] : memref<200x512xf32, #tpu.memory_space<vmem>>, vector<8x512xf32>
    tpu.vector_store %arg7[%c144, %c0_75], %276 {strides = array<i32>} : memref<200x512xf32, #tpu.memory_space<vmem>>, vector<8x512xf32>,
    %c496_i32_76 = arith.constant 496 : i32
    %278 = tpu.dynamic_rotate %262 by %c496_i32_76 dim 1 : vector<8x512xf32>, i32 -> vector<8x512xf32>
    %279 = vector.broadcast %134 : vector<1x512xf32> to vector<8x512xf32>
    %280 = arith.mulf %278, %279 : vector<8x512xf32>
    %c152 = arith.constant 152 : index
    %c0_77 = arith.constant 0 : index
    %281 = vector.load %arg7[%c152, %c0_77] : memref<200x512xf32, #tpu.memory_space<vmem>>, vector<8x512xf32>
    tpu.vector_store %arg7[%c152, %c0_77], %280 {strides = array<i32>} : memref<200x512xf32, #tpu.memory_space<vmem>>, vector<8x512xf32>,
    %c384_i32_78 = arith.constant 384 : i32
    %282 = tpu.dynamic_rotate %194 by %c384_i32_78 dim 1 : vector<8x512xf32>, i32 -> vector<8x512xf32>
    %283 = vector.broadcast %99 : vector<1x512xf32> to vector<8x512xf32>
    %284 = arith.mulf %282, %283 : vector<8x512xf32>
    %c16_i32_79 = arith.constant 16 : i32
    %285 = tpu.dynamic_rotate %284 by %c16_i32_79 dim 1 : vector<8x512xf32>, i32 -> vector<8x512xf32>
    %286 = vector.broadcast %106 : vector<1x512xf32> to vector<8x512xf32>
    %287 = arith.mulf %285, %286 : vector<8x512xf32>
    %c160 = arith.constant 160 : index
    %c0_80 = arith.constant 0 : index
    %288 = vector.load %arg7[%c160, %c0_80] : memref<200x512xf32, #tpu.memory_space<vmem>>, vector<8x512xf32>
    tpu.vector_store %arg7[%c160, %c0_80], %287 {strides = array<i32>} : memref<200x512xf32, #tpu.memory_space<vmem>>, vector<8x512xf32>,
    %c8_i32_81 = arith.constant 8 : i32
    %289 = tpu.dynamic_rotate %284 by %c8_i32_81 dim 1 : vector<8x512xf32>, i32 -> vector<8x512xf32>
    %290 = vector.broadcast %113 : vector<1x512xf32> to vector<8x512xf32>
    %291 = arith.mulf %289, %290 : vector<8x512xf32>
    %c168 = arith.constant 168 : index
    %c0_82 = arith.constant 0 : index
    %292 = vector.load %arg7[%c168, %c0_82] : memref<200x512xf32, #tpu.memory_space<vmem>>, vector<8x512xf32>
    tpu.vector_store %arg7[%c168, %c0_82], %291 {strides = array<i32>} : memref<200x512xf32, #tpu.memory_space<vmem>>, vector<8x512xf32>,
    %293 = vector.broadcast %120 : vector<1x512xf32> to vector<8x512xf32>
    %294 = arith.mulf %284, %293 : vector<8x512xf32>
    %c176 = arith.constant 176 : index
    %c0_83 = arith.constant 0 : index
    %295 = vector.load %arg7[%c176, %c0_83] : memref<200x512xf32, #tpu.memory_space<vmem>>, vector<8x512xf32>
    tpu.vector_store %arg7[%c176, %c0_83], %294 {strides = array<i32>} : memref<200x512xf32, #tpu.memory_space<vmem>>, vector<8x512xf32>,
    %c504_i32_84 = arith.constant 504 : i32
    %296 = tpu.dynamic_rotate %284 by %c504_i32_84 dim 1 : vector<8x512xf32>, i32 -> vector<8x512xf32>
    %297 = vector.broadcast %127 : vector<1x512xf32> to vector<8x512xf32>
    %298 = arith.mulf %296, %297 : vector<8x512xf32>
    %c184 = arith.constant 184 : index
    %c0_85 = arith.constant 0 : index
    %299 = vector.load %arg7[%c184, %c0_85] : memref<200x512xf32, #tpu.memory_space<vmem>>, vector<8x512xf32>
    tpu.vector_store %arg7[%c184, %c0_85], %298 {strides = array<i32>} : memref<200x512xf32, #tpu.memory_space<vmem>>, vector<8x512xf32>,
    %c496_i32_86 = arith.constant 496 : i32
    %300 = tpu.dynamic_rotate %284 by %c496_i32_86 dim 1 : vector<8x512xf32>, i32 -> vector<8x512xf32>
    %301 = vector.broadcast %134 : vector<1x512xf32> to vector<8x512xf32>
    %302 = arith.mulf %300, %301 : vector<8x512xf32>
    %c192 = arith.constant 192 : index
    %c0_87 = arith.constant 0 : index
    %303 = vector.load %arg7[%c192, %c0_87] : memref<200x512xf32, #tpu.memory_space<vmem>>, vector<8x512xf32>
    tpu.vector_store %arg7[%c192, %c0_87], %302 {strides = array<i32>} : memref<200x512xf32, #tpu.memory_space<vmem>>, vector<8x512xf32>,
    %c0_88 = arith.constant 0 : index
    %c0_89 = arith.constant 0 : index
    %304 = vector.load %arg7[%c0_88, %c0_89] : memref<200x512xf32, #tpu.memory_space<vmem>>, vector<200x512xf32>
    %c0_90 = arith.constant 0 : index
    %c0_91 = arith.constant 0 : index
    %c0_92 = arith.constant 0 : index
    %c0_93 = arith.constant 0 : index
    %305 = vector.load %arg4[%c0_90, %c0_91, %c0_92, %c0_93] : memref<2x5x8x200xf32, #tpu.memory_space<vmem>>, vector<1x1x8x200xf32>
    %306 = vector.shape_cast %305 : vector<1x1x8x200xf32> to vector<8x200xf32>
    %cst_94 = arith.constant dense<0.000000e+00> : vector<8x512xf32>
    %307 = tpu.matmul %306, %304, %cst_94 {dimension_numbers = #tpu.dot_dimension_numbers<[1], [0], [0], [1], [0, 0, 1, 1], [], []>} : vector<8x200xf32>, vector<200x512xf32>, vector<8x512xf32> -> vector<8x512xf32>
    %c2_i32_95 = arith.constant 2 : i32
    %308 = tpu.dynamic_rotate %307 by %c2_i32_95 dim 1 : vector<8x512xf32>, i32 -> vector<8x512xf32>
    %309 = vector.broadcast %141 : vector<1x512xf32> to vector<8x512xf32>
    %310 = arith.mulf %308, %309 : vector<8x512xf32>
    %c0_96 = arith.constant 0 : index
    %c1 = arith.constant 1 : index
    %c0_97 = arith.constant 0 : index
    %c0_98 = arith.constant 0 : index
    %311 = vector.load %arg4[%c0_96, %c1, %c0_97, %c0_98] : memref<2x5x8x200xf32, #tpu.memory_space<vmem>>, vector<1x1x8x200xf32>
    %312 = vector.shape_cast %311 : vector<1x1x8x200xf32> to vector<8x200xf32>
    %cst_99 = arith.constant dense<0.000000e+00> : vector<8x512xf32>
    %313 = tpu.matmul %312, %304, %cst_99 {dimension_numbers = #tpu.dot_dimension_numbers<[1], [0], [0], [1], [0, 0, 1, 1], [], []>} : vector<8x200xf32>, vector<200x512xf32>, vector<8x512xf32> -> vector<8x512xf32>
    %c1_i32_100 = arith.constant 1 : i32
    %314 = tpu.dynamic_rotate %313 by %c1_i32_100 dim 1 : vector<8x512xf32>, i32 -> vector<8x512xf32>
    %315 = vector.broadcast %148 : vector<1x512xf32> to vector<8x512xf32>
    %316 = arith.mulf %314, %315 : vector<8x512xf32>
    %317 = arith.addf %310, %316 : vector<8x512xf32>
    %c0_101 = arith.constant 0 : index
    %c2 = arith.constant 2 : index
    %c0_102 = arith.constant 0 : index
    %c0_103 = arith.constant 0 : index
    %318 = vector.load %arg4[%c0_101, %c2, %c0_102, %c0_103] : memref<2x5x8x200xf32, #tpu.memory_space<vmem>>, vector<1x1x8x200xf32>
    %319 = vector.shape_cast %318 : vector<1x1x8x200xf32> to vector<8x200xf32>
    %cst_104 = arith.constant dense<0.000000e+00> : vector<8x512xf32>
    %320 = tpu.matmul %319, %304, %cst_104 {dimension_numbers = #tpu.dot_dimension_numbers<[1], [0], [0], [1], [0, 0, 1, 1], [], []>} : vector<8x200xf32>, vector<200x512xf32>, vector<8x512xf32> -> vector<8x512xf32>
    %321 = vector.broadcast %155 : vector<1x512xf32> to vector<8x512xf32>
    %322 = arith.mulf %320, %321 : vector<8x512xf32>
    %323 = arith.addf %317, %322 : vector<8x512xf32>
    %c0_105 = arith.constant 0 : index
    %c3 = arith.constant 3 : index
    %c0_106 = arith.constant 0 : index
    %c0_107 = arith.constant 0 : index
    %324 = vector.load %arg4[%c0_105, %c3, %c0_106, %c0_107] : memref<2x5x8x200xf32, #tpu.memory_space<vmem>>, vector<1x1x8x200xf32>
    %325 = vector.shape_cast %324 : vector<1x1x8x200xf32> to vector<8x200xf32>
    %cst_108 = arith.constant dense<0.000000e+00> : vector<8x512xf32>
    %326 = tpu.matmul %325, %304, %cst_108 {dimension_numbers = #tpu.dot_dimension_numbers<[1], [0], [0], [1], [0, 0, 1, 1], [], []>} : vector<8x200xf32>, vector<200x512xf32>, vector<8x512xf32> -> vector<8x512xf32>
    %c511_i32 = arith.constant 511 : i32
    %327 = tpu.dynamic_rotate %326 by %c511_i32 dim 1 : vector<8x512xf32>, i32 -> vector<8x512xf32>
    %328 = vector.broadcast %162 : vector<1x512xf32> to vector<8x512xf32>
    %329 = arith.mulf %327, %328 : vector<8x512xf32>
    %330 = arith.addf %323, %329 : vector<8x512xf32>
    %c0_109 = arith.constant 0 : index
    %c4 = arith.constant 4 : index
    %c0_110 = arith.constant 0 : index
    %c0_111 = arith.constant 0 : index
    %331 = vector.load %arg4[%c0_109, %c4, %c0_110, %c0_111] : memref<2x5x8x200xf32, #tpu.memory_space<vmem>>, vector<1x1x8x200xf32>
    %332 = vector.shape_cast %331 : vector<1x1x8x200xf32> to vector<8x200xf32>
    %cst_112 = arith.constant dense<0.000000e+00> : vector<8x512xf32>
    %333 = tpu.matmul %332, %304, %cst_112 {dimension_numbers = #tpu.dot_dimension_numbers<[1], [0], [0], [1], [0, 0, 1, 1], [], []>} : vector<8x200xf32>, vector<200x512xf32>, vector<8x512xf32> -> vector<8x512xf32>
    %c510_i32 = arith.constant 510 : i32
    %334 = tpu.dynamic_rotate %333 by %c510_i32 dim 1 : vector<8x512xf32>, i32 -> vector<8x512xf32>
    %335 = vector.broadcast %169 : vector<1x512xf32> to vector<8x512xf32>
    %336 = arith.mulf %334, %335 : vector<8x512xf32>
    %337 = arith.addf %330, %336 : vector<8x512xf32>
    %c0_113 = arith.constant 0 : index
    %c0_114 = arith.constant 0 : index
    %c0_115 = arith.constant 0 : index
    %338 = vector.load %arg5[%c0_113, %c0_114, %c0_115] : memref<2x8x1xf32, #tpu.memory_space<vmem>>, vector<1x8x1xf32>
    %339 = vector.shape_cast %338 : vector<1x8x1xf32> to vector<8x1xf32>
    %340 = vector.broadcast %339 : vector<8x1xf32> to vector<8x512xf32>
    %341 = arith.addf %337, %340 : vector<8x512xf32>
    %cst_116 = arith.constant dense<0.000000e+00> : vector<8xf32>
    %342 = vector.multi_reduction <add>, %341, %cst_116 [1] : vector<8x512xf32> to vector<8xf32>
    %343 = vector.shape_cast %342 : vector<8xf32> to vector<8x1xf32>
    %cst_117 = arith.constant 5.120000e+02 : f32
    %344 = vector.broadcast %cst_117 : f32 to vector<8x1xf32>
    %345 = arith.divf %343, %344 : vector<8x1xf32>
    %346 = vector.broadcast %345 : vector<8x1xf32> to vector<8x512xf32>
    %347 = arith.subf %341, %346 : vector<8x512xf32>
    %348 = arith.mulf %347, %347 : vector<8x512xf32>
    %cst_118 = arith.constant dense<0.000000e+00> : vector<8xf32>
    %349 = vector.multi_reduction <add>, %348, %cst_118 [1] : vector<8x512xf32> to vector<8xf32>
    %350 = vector.shape_cast %349 : vector<8xf32> to vector<8x1xf32>
    %cst_119 = arith.constant 5.120000e+02 : f32
    %351 = vector.broadcast %cst_119 : f32 to vector<8x1xf32>
    %352 = arith.divf %350, %351 : vector<8x1xf32>
    %cst_120 = arith.constant 9.99999974E-6 : f32
    %353 = vector.broadcast %cst_120 : f32 to vector<8x1xf32>
    %354 = arith.addf %352, %353 : vector<8x1xf32>
    %355 = math.rsqrt %354 : vector<8x1xf32>
    %356 = vector.broadcast %355 : vector<8x1xf32> to vector<8x512xf32>
    %357 = arith.mulf %347, %356 : vector<8x512xf32>
    %cst_121 = arith.constant 0.000000e+00 : f32
    %358 = vector.broadcast %cst_121 : f32 to vector<8x512xf32>
    %359 = arith.maximumf %357, %358 : vector<8x512xf32>
    %c128_i32_122 = arith.constant 128 : i32
    %360 = tpu.dynamic_rotate %359 by %c128_i32_122 dim 1 : vector<8x512xf32>, i32 -> vector<8x512xf32>
    %361 = vector.broadcast %71 : vector<1x512xf32> to vector<8x512xf32>
    %362 = arith.mulf %360, %361 : vector<8x512xf32>
    %c16_i32_123 = arith.constant 16 : i32
    %363 = tpu.dynamic_rotate %362 by %c16_i32_123 dim 1 : vector<8x512xf32>, i32 -> vector<8x512xf32>
    %364 = vector.broadcast %106 : vector<1x512xf32> to vector<8x512xf32>
    %365 = arith.mulf %363, %364 : vector<8x512xf32>
    %c0_124 = arith.constant 0 : index
    %c0_125 = arith.constant 0 : index
    %366 = vector.load %arg7[%c0_124, %c0_125] : memref<200x512xf32, #tpu.memory_space<vmem>>, vector<8x512xf32>
    tpu.vector_store %arg7[%c0_124, %c0_125], %365 {strides = array<i32>} : memref<200x512xf32, #tpu.memory_space<vmem>>, vector<8x512xf32>,
    %c8_i32_126 = arith.constant 8 : i32
    %367 = tpu.dynamic_rotate %362 by %c8_i32_126 dim 1 : vector<8x512xf32>, i32 -> vector<8x512xf32>
    %368 = vector.broadcast %113 : vector<1x512xf32> to vector<8x512xf32>
    %369 = arith.mulf %367, %368 : vector<8x512xf32>
    %c8_127 = arith.constant 8 : index
    %c0_128 = arith.constant 0 : index
    %370 = vector.load %arg7[%c8_127, %c0_128] : memref<200x512xf32, #tpu.memory_space<vmem>>, vector<8x512xf32>
    tpu.vector_store %arg7[%c8_127, %c0_128], %369 {strides = array<i32>} : memref<200x512xf32, #tpu.memory_space<vmem>>, vector<8x512xf32>,
    %371 = vector.broadcast %120 : vector<1x512xf32> to vector<8x512xf32>
    %372 = arith.mulf %362, %371 : vector<8x512xf32>
    %c16_129 = arith.constant 16 : index
    %c0_130 = arith.constant 0 : index
    %373 = vector.load %arg7[%c16_129, %c0_130] : memref<200x512xf32, #tpu.memory_space<vmem>>, vector<8x512xf32>
    tpu.vector_store %arg7[%c16_129, %c0_130], %372 {strides = array<i32>} : memref<200x512xf32, #tpu.memory_space<vmem>>, vector<8x512xf32>,
    %c504_i32_131 = arith.constant 504 : i32
    %374 = tpu.dynamic_rotate %362 by %c504_i32_131 dim 1 : vector<8x512xf32>, i32 -> vector<8x512xf32>
    %375 = vector.broadcast %127 : vector<1x512xf32> to vector<8x512xf32>
    %376 = arith.mulf %374, %375 : vector<8x512xf32>
    %c24_132 = arith.constant 24 : index
    %c0_133 = arith.constant 0 : index
    %377 = vector.load %arg7[%c24_132, %c0_133] : memref<200x512xf32, #tpu.memory_space<vmem>>, vector<8x512xf32>
    tpu.vector_store %arg7[%c24_132, %c0_133], %376 {strides = array<i32>} : memref<200x512xf32, #tpu.memory_space<vmem>>, vector<8x512xf32>,
    %c496_i32_134 = arith.constant 496 : i32
    %378 = tpu.dynamic_rotate %362 by %c496_i32_134 dim 1 : vector<8x512xf32>, i32 -> vector<8x512xf32>
    %379 = vector.broadcast %134 : vector<1x512xf32> to vector<8x512xf32>
    %380 = arith.mulf %378, %379 : vector<8x512xf32>
    %c32_135 = arith.constant 32 : index
    %c0_136 = arith.constant 0 : index
    %381 = vector.load %arg7[%c32_135, %c0_136] : memref<200x512xf32, #tpu.memory_space<vmem>>, vector<8x512xf32>
    tpu.vector_store %arg7[%c32_135, %c0_136], %380 {strides = array<i32>} : memref<200x512xf32, #tpu.memory_space<vmem>>, vector<8x512xf32>,
    %c64_i32_137 = arith.constant 64 : i32
    %382 = tpu.dynamic_rotate %359 by %c64_i32_137 dim 1 : vector<8x512xf32>, i32 -> vector<8x512xf32>
    %383 = vector.broadcast %78 : vector<1x512xf32> to vector<8x512xf32>
    %384 = arith.mulf %382, %383 : vector<8x512xf32>
    %c16_i32_138 = arith.constant 16 : i32
    %385 = tpu.dynamic_rotate %384 by %c16_i32_138 dim 1 : vector<8x512xf32>, i32 -> vector<8x512xf32>
    %386 = vector.broadcast %106 : vector<1x512xf32> to vector<8x512xf32>
    %387 = arith.mulf %385, %386 : vector<8x512xf32>
    %c40_139 = arith.constant 40 : index
    %c0_140 = arith.constant 0 : index
    %388 = vector.load %arg7[%c40_139, %c0_140] : memref<200x512xf32, #tpu.memory_space<vmem>>, vector<8x512xf32>
    tpu.vector_store %arg7[%c40_139, %c0_140], %387 {strides = array<i32>} : memref<200x512xf32, #tpu.memory_space<vmem>>, vector<8x512xf32>,
    %c8_i32_141 = arith.constant 8 : i32
    %389 = tpu.dynamic_rotate %384 by %c8_i32_141 dim 1 : vector<8x512xf32>, i32 -> vector<8x512xf32>
    %390 = vector.broadcast %113 : vector<1x512xf32> to vector<8x512xf32>
    %391 = arith.mulf %389, %390 : vector<8x512xf32>
    %c48_142 = arith.constant 48 : index
    %c0_143 = arith.constant 0 : index
    %392 = vector.load %arg7[%c48_142, %c0_143] : memref<200x512xf32, #tpu.memory_space<vmem>>, vector<8x512xf32>
    tpu.vector_store %arg7[%c48_142, %c0_143], %391 {strides = array<i32>} : memref<200x512xf32, #tpu.memory_space<vmem>>, vector<8x512xf32>,
    %393 = vector.broadcast %120 : vector<1x512xf32> to vector<8x512xf32>
    %394 = arith.mulf %384, %393 : vector<8x512xf32>
    %c56_144 = arith.constant 56 : index
    %c0_145 = arith.constant 0 : index
    %395 = vector.load %arg7[%c56_144, %c0_145] : memref<200x512xf32, #tpu.memory_space<vmem>>, vector<8x512xf32>
    tpu.vector_store %arg7[%c56_144, %c0_145], %394 {strides = array<i32>} : memref<200x512xf32, #tpu.memory_space<vmem>>, vector<8x512xf32>,
    %c504_i32_146 = arith.constant 504 : i32
    %396 = tpu.dynamic_rotate %384 by %c504_i32_146 dim 1 : vector<8x512xf32>, i32 -> vector<8x512xf32>
    %397 = vector.broadcast %127 : vector<1x512xf32> to vector<8x512xf32>
    %398 = arith.mulf %396, %397 : vector<8x512xf32>
    %c64_147 = arith.constant 64 : index
    %c0_148 = arith.constant 0 : index
    %399 = vector.load %arg7[%c64_147, %c0_148] : memref<200x512xf32, #tpu.memory_space<vmem>>, vector<8x512xf32>
    tpu.vector_store %arg7[%c64_147, %c0_148], %398 {strides = array<i32>} : memref<200x512xf32, #tpu.memory_space<vmem>>, vector<8x512xf32>,
    %c496_i32_149 = arith.constant 496 : i32
    %400 = tpu.dynamic_rotate %384 by %c496_i32_149 dim 1 : vector<8x512xf32>, i32 -> vector<8x512xf32>
    %401 = vector.broadcast %134 : vector<1x512xf32> to vector<8x512xf32>
    %402 = arith.mulf %400, %401 : vector<8x512xf32>
    %c72_150 = arith.constant 72 : index
    %c0_151 = arith.constant 0 : index
    %403 = vector.load %arg7[%c72_150, %c0_151] : memref<200x512xf32, #tpu.memory_space<vmem>>, vector<8x512xf32>
    tpu.vector_store %arg7[%c72_150, %c0_151], %402 {strides = array<i32>} : memref<200x512xf32, #tpu.memory_space<vmem>>, vector<8x512xf32>,
    %404 = vector.broadcast %85 : vector<1x512xf32> to vector<8x512xf32>
    %405 = arith.mulf %359, %404 : vector<8x512xf32>
    %c16_i32_152 = arith.constant 16 : i32
    %406 = tpu.dynamic_rotate %405 by %c16_i32_152 dim 1 : vector<8x512xf32>, i32 -> vector<8x512xf32>
    %407 = vector.broadcast %106 : vector<1x512xf32> to vector<8x512xf32>
    %408 = arith.mulf %406, %407 : vector<8x512xf32>
    %c80_153 = arith.constant 80 : index
    %c0_154 = arith.constant 0 : index
    %409 = vector.load %arg7[%c80_153, %c0_154] : memref<200x512xf32, #tpu.memory_space<vmem>>, vector<8x512xf32>
    tpu.vector_store %arg7[%c80_153, %c0_154], %408 {strides = array<i32>} : memref<200x512xf32, #tpu.memory_space<vmem>>, vector<8x512xf32>,
    %c8_i32_155 = arith.constant 8 : i32
    %410 = tpu.dynamic_rotate %405 by %c8_i32_155 dim 1 : vector<8x512xf32>, i32 -> vector<8x512xf32>
    %411 = vector.broadcast %113 : vector<1x512xf32> to vector<8x512xf32>
    %412 = arith.mulf %410, %411 : vector<8x512xf32>
    %c88_156 = arith.constant 88 : index
    %c0_157 = arith.constant 0 : index
    %413 = vector.load %arg7[%c88_156, %c0_157] : memref<200x512xf32, #tpu.memory_space<vmem>>, vector<8x512xf32>
    tpu.vector_store %arg7[%c88_156, %c0_157], %412 {strides = array<i32>} : memref<200x512xf32, #tpu.memory_space<vmem>>, vector<8x512xf32>,
    %414 = vector.broadcast %120 : vector<1x512xf32> to vector<8x512xf32>
    %415 = arith.mulf %405, %414 : vector<8x512xf32>
    %c96_158 = arith.constant 96 : index
    %c0_159 = arith.constant 0 : index
    %416 = vector.load %arg7[%c96_158, %c0_159] : memref<200x512xf32, #tpu.memory_space<vmem>>, vector<8x512xf32>
    tpu.vector_store %arg7[%c96_158, %c0_159], %415 {strides = array<i32>} : memref<200x512xf32, #tpu.memory_space<vmem>>, vector<8x512xf32>,
    %c504_i32_160 = arith.constant 504 : i32
    %417 = tpu.dynamic_rotate %405 by %c504_i32_160 dim 1 : vector<8x512xf32>, i32 -> vector<8x512xf32>
    %418 = vector.broadcast %127 : vector<1x512xf32> to vector<8x512xf32>
    %419 = arith.mulf %417, %418 : vector<8x512xf32>
    %c104_161 = arith.constant 104 : index
    %c0_162 = arith.constant 0 : index
    %420 = vector.load %arg7[%c104_161, %c0_162] : memref<200x512xf32, #tpu.memory_space<vmem>>, vector<8x512xf32>
    tpu.vector_store %arg7[%c104_161, %c0_162], %419 {strides = array<i32>} : memref<200x512xf32, #tpu.memory_space<vmem>>, vector<8x512xf32>,
    %c496_i32_163 = arith.constant 496 : i32
    %421 = tpu.dynamic_rotate %405 by %c496_i32_163 dim 1 : vector<8x512xf32>, i32 -> vector<8x512xf32>
    %422 = vector.broadcast %134 : vector<1x512xf32> to vector<8x512xf32>
    %423 = arith.mulf %421, %422 : vector<8x512xf32>
    %c112_164 = arith.constant 112 : index
    %c0_165 = arith.constant 0 : index
    %424 = vector.load %arg7[%c112_164, %c0_165] : memref<200x512xf32, #tpu.memory_space<vmem>>, vector<8x512xf32>
    tpu.vector_store %arg7[%c112_164, %c0_165], %423 {strides = array<i32>} : memref<200x512xf32, #tpu.memory_space<vmem>>, vector<8x512xf32>,
    %c448_i32_166 = arith.constant 448 : i32
    %425 = tpu.dynamic_rotate %359 by %c448_i32_166 dim 1 : vector<8x512xf32>, i32 -> vector<8x512xf32>
    %426 = vector.broadcast %92 : vector<1x512xf32> to vector<8x512xf32>
    %427 = arith.mulf %425, %426 : vector<8x512xf32>
    %c16_i32_167 = arith.constant 16 : i32
    %428 = tpu.dynamic_rotate %427 by %c16_i32_167 dim 1 : vector<8x512xf32>, i32 -> vector<8x512xf32>
    %429 = vector.broadcast %106 : vector<1x512xf32> to vector<8x512xf32>
    %430 = arith.mulf %428, %429 : vector<8x512xf32>
    %c120_168 = arith.constant 120 : index
    %c0_169 = arith.constant 0 : index
    %431 = vector.load %arg7[%c120_168, %c0_169] : memref<200x512xf32, #tpu.memory_space<vmem>>, vector<8x512xf32>
    tpu.vector_store %arg7[%c120_168, %c0_169], %430 {strides = array<i32>} : memref<200x512xf32, #tpu.memory_space<vmem>>, vector<8x512xf32>,
    %c8_i32_170 = arith.constant 8 : i32
    %432 = tpu.dynamic_rotate %427 by %c8_i32_170 dim 1 : vector<8x512xf32>, i32 -> vector<8x512xf32>
    %433 = vector.broadcast %113 : vector<1x512xf32> to vector<8x512xf32>
    %434 = arith.mulf %432, %433 : vector<8x512xf32>
    %c128_171 = arith.constant 128 : index
    %c0_172 = arith.constant 0 : index
    %435 = vector.load %arg7[%c128_171, %c0_172] : memref<200x512xf32, #tpu.memory_space<vmem>>, vector<8x512xf32>
    tpu.vector_store %arg7[%c128_171, %c0_172], %434 {strides = array<i32>} : memref<200x512xf32, #tpu.memory_space<vmem>>, vector<8x512xf32>,
    %436 = vector.broadcast %120 : vector<1x512xf32> to vector<8x512xf32>
    %437 = arith.mulf %427, %436 : vector<8x512xf32>
    %c136_173 = arith.constant 136 : index
    %c0_174 = arith.constant 0 : index
    %438 = vector.load %arg7[%c136_173, %c0_174] : memref<200x512xf32, #tpu.memory_space<vmem>>, vector<8x512xf32>
    tpu.vector_store %arg7[%c136_173, %c0_174], %437 {strides = array<i32>} : memref<200x512xf32, #tpu.memory_space<vmem>>, vector<8x512xf32>,
    %c504_i32_175 = arith.constant 504 : i32
    %439 = tpu.dynamic_rotate %427 by %c504_i32_175 dim 1 : vector<8x512xf32>, i32 -> vector<8x512xf32>
    %440 = vector.broadcast %127 : vector<1x512xf32> to vector<8x512xf32>
    %441 = arith.mulf %439, %440 : vector<8x512xf32>
    %c144_176 = arith.constant 144 : index
    %c0_177 = arith.constant 0 : index
    %442 = vector.load %arg7[%c144_176, %c0_177] : memref<200x512xf32, #tpu.memory_space<vmem>>, vector<8x512xf32>
    tpu.vector_store %arg7[%c144_176, %c0_177], %441 {strides = array<i32>} : memref<200x512xf32, #tpu.memory_space<vmem>>, vector<8x512xf32>,
    %c496_i32_178 = arith.constant 496 : i32
    %443 = tpu.dynamic_rotate %427 by %c496_i32_178 dim 1 : vector<8x512xf32>, i32 -> vector<8x512xf32>
    %444 = vector.broadcast %134 : vector<1x512xf32> to vector<8x512xf32>
    %445 = arith.mulf %443, %444 : vector<8x512xf32>
    %c152_179 = arith.constant 152 : index
    %c0_180 = arith.constant 0 : index
    %446 = vector.load %arg7[%c152_179, %c0_180] : memref<200x512xf32, #tpu.memory_space<vmem>>, vector<8x512xf32>
    tpu.vector_store %arg7[%c152_179, %c0_180], %445 {strides = array<i32>} : memref<200x512xf32, #tpu.memory_space<vmem>>, vector<8x512xf32>,
    %c384_i32_181 = arith.constant 384 : i32
    %447 = tpu.dynamic_rotate %359 by %c384_i32_181 dim 1 : vector<8x512xf32>, i32 -> vector<8x512xf32>
    %448 = vector.broadcast %99 : vector<1x512xf32> to vector<8x512xf32>
    %449 = arith.mulf %447, %448 : vector<8x512xf32>
    %c16_i32_182 = arith.constant 16 : i32
    %450 = tpu.dynamic_rotate %449 by %c16_i32_182 dim 1 : vector<8x512xf32>, i32 -> vector<8x512xf32>
    %451 = vector.broadcast %106 : vector<1x512xf32> to vector<8x512xf32>
    %452 = arith.mulf %450, %451 : vector<8x512xf32>
    %c160_183 = arith.constant 160 : index
    %c0_184 = arith.constant 0 : index
    %453 = vector.load %arg7[%c160_183, %c0_184] : memref<200x512xf32, #tpu.memory_space<vmem>>, vector<8x512xf32>
    tpu.vector_store %arg7[%c160_183, %c0_184], %452 {strides = array<i32>} : memref<200x512xf32, #tpu.memory_space<vmem>>, vector<8x512xf32>,
    %c8_i32_185 = arith.constant 8 : i32
    %454 = tpu.dynamic_rotate %449 by %c8_i32_185 dim 1 : vector<8x512xf32>, i32 -> vector<8x512xf32>
    %455 = vector.broadcast %113 : vector<1x512xf32> to vector<8x512xf32>
    %456 = arith.mulf %454, %455 : vector<8x512xf32>
    %c168_186 = arith.constant 168 : index
    %c0_187 = arith.constant 0 : index
    %457 = vector.load %arg7[%c168_186, %c0_187] : memref<200x512xf32, #tpu.memory_space<vmem>>, vector<8x512xf32>
    tpu.vector_store %arg7[%c168_186, %c0_187], %456 {strides = array<i32>} : memref<200x512xf32, #tpu.memory_space<vmem>>, vector<8x512xf32>,
    %458 = vector.broadcast %120 : vector<1x512xf32> to vector<8x512xf32>
    %459 = arith.mulf %449, %458 : vector<8x512xf32>
    %c176_188 = arith.constant 176 : index
    %c0_189 = arith.constant 0 : index
    %460 = vector.load %arg7[%c176_188, %c0_189] : memref<200x512xf32, #tpu.memory_space<vmem>>, vector<8x512xf32>
    tpu.vector_store %arg7[%c176_188, %c0_189], %459 {strides = array<i32>} : memref<200x512xf32, #tpu.memory_space<vmem>>, vector<8x512xf32>,
    %c504_i32_190 = arith.constant 504 : i32
    %461 = tpu.dynamic_rotate %449 by %c504_i32_190 dim 1 : vector<8x512xf32>, i32 -> vector<8x512xf32>
    %462 = vector.broadcast %127 : vector<1x512xf32> to vector<8x512xf32>
    %463 = arith.mulf %461, %462 : vector<8x512xf32>
    %c184_191 = arith.constant 184 : index
    %c0_192 = arith.constant 0 : index
    %464 = vector.load %arg7[%c184_191, %c0_192] : memref<200x512xf32, #tpu.memory_space<vmem>>, vector<8x512xf32>
    tpu.vector_store %arg7[%c184_191, %c0_192], %463 {strides = array<i32>} : memref<200x512xf32, #tpu.memory_space<vmem>>, vector<8x512xf32>,
    %c496_i32_193 = arith.constant 496 : i32
    %465 = tpu.dynamic_rotate %449 by %c496_i32_193 dim 1 : vector<8x512xf32>, i32 -> vector<8x512xf32>
    %466 = vector.broadcast %134 : vector<1x512xf32> to vector<8x512xf32>
    %467 = arith.mulf %465, %466 : vector<8x512xf32>
    %c192_194 = arith.constant 192 : index
    %c0_195 = arith.constant 0 : index
    %468 = vector.load %arg7[%c192_194, %c0_195] : memref<200x512xf32, #tpu.memory_space<vmem>>, vector<8x512xf32>
    tpu.vector_store %arg7[%c192_194, %c0_195], %467 {strides = array<i32>} : memref<200x512xf32, #tpu.memory_space<vmem>>, vector<8x512xf32>,
    %c0_196 = arith.constant 0 : index
    %c0_197 = arith.constant 0 : index
    %469 = vector.load %arg7[%c0_196, %c0_197] : memref<200x512xf32, #tpu.memory_space<vmem>>, vector<200x512xf32>
    %c1_198 = arith.constant 1 : index
    %c0_199 = arith.constant 0 : index
    %c0_200 = arith.constant 0 : index
    %c0_201 = arith.constant 0 : index
    %470 = vector.load %arg4[%c1_198, %c0_199, %c0_200, %c0_201] : memref<2x5x8x200xf32, #tpu.memory_space<vmem>>, vector<1x1x8x200xf32>
    %471 = vector.shape_cast %470 : vector<1x1x8x200xf32> to vector<8x200xf32>
    %cst_202 = arith.constant dense<0.000000e+00> : vector<8x512xf32>
    %472 = tpu.matmul %471, %469, %cst_202 {dimension_numbers = #tpu.dot_dimension_numbers<[1], [0], [0], [1], [0, 0, 1, 1], [], []>} : vector<8x200xf32>, vector<200x512xf32>, vector<8x512xf32> -> vector<8x512xf32>
    %c2_i32_203 = arith.constant 2 : i32
    %473 = tpu.dynamic_rotate %472 by %c2_i32_203 dim 1 : vector<8x512xf32>, i32 -> vector<8x512xf32>
    %474 = vector.broadcast %141 : vector<1x512xf32> to vector<8x512xf32>
    %475 = arith.mulf %473, %474 : vector<8x512xf32>
    %c1_204 = arith.constant 1 : index
    %c1_205 = arith.constant 1 : index
    %c0_206 = arith.constant 0 : index
    %c0_207 = arith.constant 0 : index
    %476 = vector.load %arg4[%c1_204, %c1_205, %c0_206, %c0_207] : memref<2x5x8x200xf32, #tpu.memory_space<vmem>>, vector<1x1x8x200xf32>
    %477 = vector.shape_cast %476 : vector<1x1x8x200xf32> to vector<8x200xf32>
    %cst_208 = arith.constant dense<0.000000e+00> : vector<8x512xf32>
    %478 = tpu.matmul %477, %469, %cst_208 {dimension_numbers = #tpu.dot_dimension_numbers<[1], [0], [0], [1], [0, 0, 1, 1], [], []>} : vector<8x200xf32>, vector<200x512xf32>, vector<8x512xf32> -> vector<8x512xf32>
    %c1_i32_209 = arith.constant 1 : i32
    %479 = tpu.dynamic_rotate %478 by %c1_i32_209 dim 1 : vector<8x512xf32>, i32 -> vector<8x512xf32>
    %480 = vector.broadcast %148 : vector<1x512xf32> to vector<8x512xf32>
    %481 = arith.mulf %479, %480 : vector<8x512xf32>
    %482 = arith.addf %475, %481 : vector<8x512xf32>
    %c1_210 = arith.constant 1 : index
    %c2_211 = arith.constant 2 : index
    %c0_212 = arith.constant 0 : index
    %c0_213 = arith.constant 0 : index
    %483 = vector.load %arg4[%c1_210, %c2_211, %c0_212, %c0_213] : memref<2x5x8x200xf32, #tpu.memory_space<vmem>>, vector<1x1x8x200xf32>
    %484 = vector.shape_cast %483 : vector<1x1x8x200xf32> to vector<8x200xf32>
    %cst_214 = arith.constant dense<0.000000e+00> : vector<8x512xf32>
    %485 = tpu.matmul %484, %469, %cst_214 {dimension_numbers = #tpu.dot_dimension_numbers<[1], [0], [0], [1], [0, 0, 1, 1], [], []>} : vector<8x200xf32>, vector<200x512xf32>, vector<8x512xf32> -> vector<8x512xf32>
    %486 = vector.broadcast %155 : vector<1x512xf32> to vector<8x512xf32>
    %487 = arith.mulf %485, %486 : vector<8x512xf32>
    %488 = arith.addf %482, %487 : vector<8x512xf32>
    %c1_215 = arith.constant 1 : index
    %c3_216 = arith.constant 3 : index
    %c0_217 = arith.constant 0 : index
    %c0_218 = arith.constant 0 : index
    %489 = vector.load %arg4[%c1_215, %c3_216, %c0_217, %c0_218] : memref<2x5x8x200xf32, #tpu.memory_space<vmem>>, vector<1x1x8x200xf32>
    %490 = vector.shape_cast %489 : vector<1x1x8x200xf32> to vector<8x200xf32>
    %cst_219 = arith.constant dense<0.000000e+00> : vector<8x512xf32>
    %491 = tpu.matmul %490, %469, %cst_219 {dimension_numbers = #tpu.dot_dimension_numbers<[1], [0], [0], [1], [0, 0, 1, 1], [], []>} : vector<8x200xf32>, vector<200x512xf32>, vector<8x512xf32> -> vector<8x512xf32>
    %c511_i32_220 = arith.constant 511 : i32
    %492 = tpu.dynamic_rotate %491 by %c511_i32_220 dim 1 : vector<8x512xf32>, i32 -> vector<8x512xf32>
    %493 = vector.broadcast %162 : vector<1x512xf32> to vector<8x512xf32>
    %494 = arith.mulf %492, %493 : vector<8x512xf32>
    %495 = arith.addf %488, %494 : vector<8x512xf32>
    %c1_221 = arith.constant 1 : index
    %c4_222 = arith.constant 4 : index
    %c0_223 = arith.constant 0 : index
    %c0_224 = arith.constant 0 : index
    %496 = vector.load %arg4[%c1_221, %c4_222, %c0_223, %c0_224] : memref<2x5x8x200xf32, #tpu.memory_space<vmem>>, vector<1x1x8x200xf32>
    %497 = vector.shape_cast %496 : vector<1x1x8x200xf32> to vector<8x200xf32>
    %cst_225 = arith.constant dense<0.000000e+00> : vector<8x512xf32>
    %498 = tpu.matmul %497, %469, %cst_225 {dimension_numbers = #tpu.dot_dimension_numbers<[1], [0], [0], [1], [0, 0, 1, 1], [], []>} : vector<8x200xf32>, vector<200x512xf32>, vector<8x512xf32> -> vector<8x512xf32>
    %c510_i32_226 = arith.constant 510 : i32
    %499 = tpu.dynamic_rotate %498 by %c510_i32_226 dim 1 : vector<8x512xf32>, i32 -> vector<8x512xf32>
    %500 = vector.broadcast %169 : vector<1x512xf32> to vector<8x512xf32>
    %501 = arith.mulf %499, %500 : vector<8x512xf32>
    %502 = arith.addf %495, %501 : vector<8x512xf32>
    %c1_227 = arith.constant 1 : index
    %c0_228 = arith.constant 0 : index
    %c0_229 = arith.constant 0 : index
    %503 = vector.load %arg5[%c1_227, %c0_228, %c0_229] : memref<2x8x1xf32, #tpu.memory_space<vmem>>, vector<1x8x1xf32>
    %504 = vector.shape_cast %503 : vector<1x8x1xf32> to vector<8x1xf32>
    %505 = vector.broadcast %504 : vector<8x1xf32> to vector<8x512xf32>
    %506 = arith.addf %502, %505 : vector<8x512xf32>
    %cst_230 = arith.constant dense<0.000000e+00> : vector<8xf32>
    %507 = vector.multi_reduction <add>, %506, %cst_230 [1] : vector<8x512xf32> to vector<8xf32>
    %508 = vector.shape_cast %507 : vector<8xf32> to vector<8x1xf32>
    %cst_231 = arith.constant 5.120000e+02 : f32
    %509 = vector.broadcast %cst_231 : f32 to vector<8x1xf32>
    %510 = arith.divf %508, %509 : vector<8x1xf32>
    %511 = vector.broadcast %510 : vector<8x1xf32> to vector<8x512xf32>
    %512 = arith.subf %506, %511 : vector<8x512xf32>
    %513 = arith.mulf %512, %512 : vector<8x512xf32>
    %cst_232 = arith.constant dense<0.000000e+00> : vector<8xf32>
    %514 = vector.multi_reduction <add>, %513, %cst_232 [1] : vector<8x512xf32> to vector<8xf32>
    %515 = vector.shape_cast %514 : vector<8xf32> to vector<8x1xf32>
    %cst_233 = arith.constant 5.120000e+02 : f32
    %516 = vector.broadcast %cst_233 : f32 to vector<8x1xf32>
    %517 = arith.divf %515, %516 : vector<8x1xf32>
    %cst_234 = arith.constant 9.99999974E-6 : f32
    %518 = vector.broadcast %cst_234 : f32 to vector<8x1xf32>
    %519 = arith.addf %517, %518 : vector<8x1xf32>
    %520 = math.rsqrt %519 : vector<8x1xf32>
    %521 = vector.broadcast %520 : vector<8x1xf32> to vector<8x512xf32>
    %522 = arith.mulf %512, %521 : vector<8x512xf32>
    %cst_235 = arith.constant 0.000000e+00 : f32
    %523 = vector.broadcast %cst_235 : f32 to vector<8x512xf32>
    %524 = arith.maximumf %522, %523 : vector<8x512xf32>
    %525 = arith.addf %524, %194 : vector<8x512xf32>
    %cst_236 = arith.constant 0.000000e+00 : f32
    %526 = vector.broadcast %cst_236 : f32 to vector<8x512xf32>
    %527 = arith.maximumf %525, %526 : vector<8x512xf32>
    %c0_237 = arith.constant 0 : index
    %c0_238 = arith.constant 0 : index
    %c0_239 = arith.constant 0 : index
    %528 = vector.load %arg6[%c0_237, %c0_238, %c0_239] : memref<1x8x512xf32, #tpu.memory_space<vmem>>, vector<1x8x512xf32>
    %529 = vector.shape_cast %528 : vector<1x8x512xf32> to vector<8x512xf32>
    %530 = vector.shape_cast %527 : vector<8x512xf32> to vector<1x8x512xf32>
    tpu.vector_store %arg6[%c0_237, %c0_238, %c0_239], %530 {strides = array<i32>} : memref<1x8x512xf32, #tpu.memory_space<vmem>>, vector<1x8x512xf32>,
    return
  }
  func.func @transform_0(%arg0: i32) -> (i32, i32, i32) {
    %c0_i32 = arith.constant 0 : i32
    %c0_i32_0 = arith.constant 0 : i32
    %c0_i32_1 = arith.constant 0 : i32
    return %arg0, %c0_i32, %c0_i32_0 : i32, i32, i32
  }
  func.func @transform_1(%arg0: i32) -> (i32, i32) {
    %c0_i32 = arith.constant 0 : i32
    %c0_i32_0 = arith.constant 0 : i32
    %c0_i32_1 = arith.constant 0 : i32
    return %c0_i32, %c0_i32_0 : i32, i32
  }
  func.func @transform_2(%arg0: i32) -> (i32, i32) {
    %c0_i32 = arith.constant 0 : i32
    %c0_i32_0 = arith.constant 0 : i32
    %c0_i32_1 = arith.constant 0 : i32
    return %c0_i32, %c0_i32_0 : i32, i32
  }
  func.func @transform_3(%arg0: i32) -> (i32, i32, i32, i32) {
    %c0_i32 = arith.constant 0 : i32
    %c0_i32_0 = arith.constant 0 : i32
    %c0_i32_1 = arith.constant 0 : i32
    %c0_i32_2 = arith.constant 0 : i32
    %c0_i32_3 = arith.constant 0 : i32
    return %c0_i32, %c0_i32_0, %c0_i32_1, %c0_i32_2 : i32, i32, i32, i32
  }
  func.func @transform_4(%arg0: i32) -> (i32, i32, i32) {
    %c0_i32 = arith.constant 0 : i32
    %c0_i32_0 = arith.constant 0 : i32
    %c0_i32_1 = arith.constant 0 : i32
    %c0_i32_2 = arith.constant 0 : i32
    return %c0_i32, %c0_i32_0, %c0_i32_1 : i32, i32, i32
  }
  func.func @transform_5(%arg0: i32) -> (i32, i32, i32) {
    %c0_i32 = arith.constant 0 : i32
    %c0_i32_0 = arith.constant 0 : i32
    %c0_i32_1 = arith.constant 0 : i32
    return %arg0, %c0_i32, %c0_i32_0 : i32, i32, i32
  }
}

</mosaic_0001>

<bundles_post_ra>
// kernel: tpu_custom_call.1
= control target key start
LH: loop header
LB: loop body
LE: loop exit
PB: predicated region body
PF: predicated region fallthrough
CT: control target
= control target key end

     0   :  { %10 = vsyncpa [#allocation4], 0  ;;  %s8300_s0 = inlined_call_operand.hbm [shape: f32[2,32,512], index: 0, kind: input, shape index: {}]   ;;  %s8301_s1 = inlined_call_operand.vmem [shape: f32[8,32], index: 1, kind: input, shape index: {}]   ;;  %s8302_s2 = inlined_call_operand.vmem [shape: f32[8,1], index: 2, kind: input, shape index: {}]   ;;  %s8303_s3 = inlined_call_operand.hbm [shape: f32[2,5,8,200], index: 3, kind: input, shape index: {}]   ;;  %s8304_s4 = inlined_call_operand.vmem [shape: f32[2,8,1], index: 4, kind: input, shape index: {}]   ;;  %s8305_s5 = inlined_call_operand.hbm [shape: f32[2,8,512], index: 5, kind: output, shape index: {}]  }
   0x1   :  { %12 = vsyncpa [#allocation4 + $0x1], 0 }
   0x2   :  { %13 = vsyncpa [#allocation7], 0 }
   0x3   :  { %14 = vsyncpa [#allocation5], 0 }
   0x4   :  { %16 = vsyncpa [#allocation5 + $0x1], 0  ;;  %s4388_s18 = smov 0   ;;  %s4390_s19 = smov 0  }
   0x5   :  { %s4392_s20 = smov 0   ;;  %s4394_s21 = smov 0  }
   0x6 LB: > { %s4409_s22 = sadd.s32 4294967295, %s4339_s21   ;;  %s4021_s23 = sadd.s32 4294967294, %s4339_s21   ;;  %s4339_s21 = sphi %s4394_s21, %s9740_s21   ;;  %s4335_s20 = sphi %s4392_s20, %s9739_s20   ;;  %s4331_s19 = sphi %s4390_s19, %s9738_s19   ;;  %s4327_s18 = sphi %s4388_s18, %s9737_s18  }
   0x7   : > { %p42_p0 = scmp.ne.s32.totalorder %s4331_s19, %s4327_s18  ;;  %p43_p1 = scmp.eq.s32.totalorder %s4409_s22, 0 }
   0x8   : > { %p150_p2 = scmp.eq.s32.totalorder %s4409_s22, 1  ;;  %p156_p3 = scmp.eq.s32.totalorder %s4021_s23, 1 }
   0x9   : > { %p4418_p4 = por %p43_p1, %p42_p0  ;;  %p4022_p5 = scmp.ge.s32.totalorder %s4339_s21, 1 }
   0xa   : > { %p4423_p6 = por %p156_p3, %p42_p0  ;;  %p163_p7 = scmp.lt.s32.totalorder %s4339_s21, 3 }
   0xb   : > { %s180_s28 = sshll.u32 %s8303_s3, 4  ;;  %s4341_s30 = smov [#allocation6]   ;;  %s181_s28 = int_to_ptr.hbm [resolvable:$true] %s180_s28 }
   0xc   : > { %p4431_p8 = pnand %p4022_p5, %p163_p7  ;;  %s182_s6 = sshll.u32 %s4341_s30, 4  ;;  %s183_s6 = int_to_ptr.vmem [resolvable:$true] %s182_s6 }
   0xd   : > { %s4441_s7 = sadd.s32 1, %s4339_s21   ;;  %s4342_s8 = smov 256  }
   0xe   : > { %p4134_p9 = pneg %p4431_p8  ;;  %s4343_s9 = smov 16  }
   0xf   : > { %s26_s10 = ssub.s32 %s4339_s21, %s4441_s7  ;;  %s29_s11 = sadd.s32 1, %s4335_s20 }
  0x10   : > { %p4135_p10 = pnand %p4134_p9, %p43_p1  ;;  %p27_p12 = scmp.eq.s32.totalorder %s26_s10, 0 }
  0x11   : > { %p36_p13 = scmp.ne.s32.totalorder %s4335_s20, %s4331_s19  ;;  %p37_p0 = scmp.eq.s32.totalorder %s4339_s21, 0 }
  0x12   : > { %4137 = dma.hbm_to_vmem [thread:$0]  (!%p4135_p10), %s181_s28, 2560, %s183_s6, [#allocation7], %s4342_s8, %s4342_s8, %s4343_s9  }
  0x13   : > { %p4147_p3 = scmp.lt.s32.totalorder %s4339_s21, 2  ;;  %p38_p5 = por %p37_p0, %p36_p13 }
  0x14   : > { %s4451_s12 = scalar_select %p27_p12, %s4335_s20, %s29_s11  }
  0x15   : > { %p4455_p7 = por %p150_p2, %p36_p13  ;;  %s199_s14 = sand.u32 1, %s4335_s20  }
  0x16   : > { %s4124_s15 = sshll.u32 %s4339_s21, 7  ;;  %s4025_s16 = sshll.u32 %s199_s14, 7 }
  0x17   : > { %s208_s26 = scalar_lea.hbm %s8300_s0, %s4124_s15  ;;  %s203_s28 = scalar_lea.vmem [#allocation3], %s4025_s16 }
  0x18   : > { %s209_s27 = sshll.u32 %s208_s26, 4  ;;  %s211_s30 = sshll.u32 %s203_s28, 4  ;;  %s210_s27 = int_to_ptr.hbm [resolvable:$true] %s209_s27  ;;  %s212_s30 = int_to_ptr.vmem [resolvable:$true] %s211_s30 }
  0x19   : > { %p4466_p9 = pnand %p4147_p3, %p38_p5  ;;  %s200_s8 = scalar_lea.sflag [#allocation4], %s199_s14 }
  0x1a   : > { %s4239_s9 = sshra.s32 %s210_s27, 4  ;;  %s4246_s16 = scalar_lea.hbm %s8300_s0, 256  ;;  %s4240_s9 = int_to_ptr.hbm [resolvable:$true] %s4239_s9 }
  0x1b   : > { %s4241_s10 = scalar_lea.hbm %s4240_s9, 128  ;;  %p4243_p10 = pneg %p4466_p9 }
  0x1c   : > { %p4242_p2 = scmp.ne.s32.totalorder %s4240_s9, %s4241_s10  ;;  %p4247_p0 = scmp.lt.s32.totalorder %s4240_s9, %s8300_s0 }
  0x1d   : > { %p4248_p3 = scmp.lt.s32.totalorder %s4246_s16, %s4241_s10 }
  0x1e   : > { %p4244_p12 = pnand %p4243_p10, %p4242_p2 }
  0x1f   : > { %p4249_p5 = por %p4248_p3, %p4247_p0 }
  0x20   : > { %p4245_p13 = pneg %p4244_p12 }
  0x22   : > { %p4250_p11 = pnand %p4249_p5, %p4245_p13 }
  0x24   : > { %4253 = shalt.err (!%p4250_p11)
}
  0x25   : > { %s4344_s14 = smov 512   ;;  %s4345_s26 = smov 32  }
  0x26   : > { %4141 = dma.hbm_to_vmem [thread:$0]  (!%p4466_p9), %s210_s27, 2048, %s212_s30, %s200_s8, %s4344_s14, %s4344_s14, %s4345_s26  }
  0x27   : > { %223 = sbr.rel (%p4431_p8) target bundleno = 2705 (0xa91), region = 40 }
  0x2c   : > { %s4483_s28 = sand.u32 1, %s4331_s19  }
  0x2d   : > { %s4029_s11 = sshll.u32 %s4483_s28, 7  ;;  %s226_s9 = scalar_lea.sflag [#allocation4], %s4483_s28 }
  0x2e   : > { %s4487_s10 = scalar_lea.vmem [#allocation3], %s4029_s11 }
  0x2f   : > { %4314 = dma.done.wait (%p4418_p4), %s226_s9, 2048  }
  0x30   : > { %4316 = vsyncadd (%p4418_p4), %s226_s9, 4294965248 }
  0x31   : > { %4318 = dma.done.wait (%p43_p1), [#allocation7], 2560  }
  0x32   : > { %4320 = vsyncadd (%p43_p1), [#allocation7], 4294964736  ;;  %v8307_v0 = vmov 0   ;;  %v693_v1 = vld [vmem:[%s4487_s10 + $0x70] sm:$0xff]  ;;  %v694_v2 = vld [vmem:[%s4487_s10 + $0x78] sm:$0xff]  ;;  %vm702_vm0 = vcmask 261120  }
  0x33   : > { %4199 = vset.pattern.permute.xlu0 %v8307_v0  ;;  %4200 = vset.pattern.permute.xlu2 %v8307_v0  ;;  %v689_v3 = vld [vmem:[%s4487_s10 + $0x50] sm:$0xff]  ;;  %v690_v4 = vld [vmem:[%s4487_s10 + $0x58] sm:$0xff]  ;;  %v691_v5 = vld [vmem:[%s4487_s10 + $0x60] sm:$0xff]  ;;  %v4347_v31 = vmov 512.0   ;;  %s4348_s6 = smov 112   ;;  %s4349_s8 = smov 64  }
  0x34   : > { %758 = vmatpush.msra.mxu2 %v693_v1  ;;  %778 = vmatpush.msra.mxu3 %v694_v2  ;;  %v692_v6 = vld [vmem:[%s4487_s10 + $0x68] sm:$0xff]  ;;  %v685_v7 = vld [vmem:[%s4487_s10 + $0x30] sm:$0xff]  ;;  %v686_v8 = vld [vmem:[%s4487_s10 + $0x38] sm:$0xff]  ;;  %4201 = vrcp.f32 %v4347_v31  ;;  %s4350_s15 = smov 16   ;;  %s4351_s16 = smov 8  }
  0x35   : > { %718 = vmatpush.msra.mxu0 %v691_v5  ;;  %738 = vmatpush.msra.mxu1 %v692_v6  ;;  %v687_v9 = vld [vmem:[%s4487_s10 + $0x40] sm:$0xff]  ;;  %v688_v10 = vld [vmem:[%s4487_s10 + $0x48] sm:$0xff]  ;;  %v681_v11 = vld [vmem:[%s4487_s10 + $0x10] sm:$0xff]  ;;  %s4352_s17 = smov 120   ;;  %s4354_s23 = smov 2  }
  0x36   : > { %759 = vmatpush.msra.mxu2 %v689_v3  ;;  %779 = vmatpush.msra.mxu3 %v690_v4  ;;  %v682_v12 = vld [vmem:[%s4487_s10 + $0x18] sm:$0xff]  ;;  %v683_v13 = vld [vmem:[%s4487_s10 + $0x20] sm:$0xff]  ;;  %v684_v14 = vld [vmem:[%s4487_s10 + $0x28] sm:$0xff]  ;;  %s4355_s14 = smov 1   ;;  %s4356_s26 = smov 127  }
  0x37   : > { %719 = vmatpush.msra.mxu0 %v687_v9  ;;  %739 = vmatpush.msra.mxu1 %v688_v10  ;;  %v695_v15 = vld [vmem:[%s8301_s1] sm:$0xff]  ;;  %v680_v17 = vld [vmem:[%s4487_s10 + $0x8] sm:$0xff]  ;;  %v262_v9 = vlaneseq  ;;  %s4357_s11 = smov 126   ;;  %s4031_s27 = sshll.u32 %s4483_s28, 5 }
  0x38   : > { %760 = vmatpush.msra.mxu2 %v685_v7  ;;  %780 = vmatpush.msra.mxu3 %v686_v8  ;;  %v679_v16 = vld [vmem:[%s4487_s10] sm:$0xff]  ;;  %s4125_s30 = sshll.u32 %s4409_s22, 5  ;;  %s261_s22 = scalar_lea.vmem [#allocation8], %s4031_s27 }
  0x39   : > { %720 = vmatpush.msra.mxu0 %v683_v13  ;;  %740 = vmatpush.msra.mxu1 %v684_v14  ;;  %v696_v18 = vld [vmem:[%s8302_s2] sm:$0xff]  ;;  %v4613_v10 = vand.u32 127, %v262_v9  ;;  %s4289_s10 = scalar_lea.hbm %s8305_s5, 64 }
  0x3a   : > { %761 = vmatpush.msra.mxu2 %v681_v11  ;;  %781 = vmatpush.msra.mxu3 %v682_v12  ;;  %v4202_v32 = vpop.eup %4201 }
  0x3b   : > { %4076 = vmatmul.msk.f32.vlgmr.msra.gmra.mxu2 %vm702_vm0, %v695_v15  ;;  %4077 = vmatmul.msk.f32.vlgmr.msra.gmra.mxu3 %vm702_vm0, %v695_v15  ;;  %v792_v33 = vmul.f32 512.0, %v4202_v32  ;;  %vm796_vm1 = vweird.f32 %v4202_v32  ;;  %8872 = vst [vmem:[#allocation19_spill] sm:$0xff] %v4613_v10  ;;  %v264_v12 = vadd.s32 128, %v4613_v10  ;;  %vm8306_vm6 = vcmp.lt.s32.totalorder %v4613_v10, 64 }
  0x3c   : > { %721 = vmatpush.msra.mxu0 %v679_v16  ;;  %741 = vmatpush.msra.mxu1 %v680_v17  ;;  %vm8614_vm12 = vcmp.lt.s32.totalorder %v4613_v10, 112 }
  0x3d   : > { %4074 = vmatmul.msk.f32.vlgmr.msra.gmra.mxu0 %vm702_vm0, %v695_v15  ;;  %4075 = vmatmul.msk.f32.vlgmr.msra.gmra.mxu1 %vm702_vm0, %v695_v15  ;;  %v793_v34 = vsub.f32 1.0, %v792_v33  ;;  %vm288_vm5 = vcmp.ge.s32.totalorder %v264_v12, 192 }
  0x3e   : > { %699 = vperm.xlu0 %4199, %v696_v18   ;;  %v292_v15 = vsel %vm288_vm5, 1, %v8307_v0  ;;  %vm267_vm5 = vcmp.ge.s32.totalorder %v4613_v10, 64 }
  0x3f   : > { %v794_v35 = vmul.f32 %v4202_v32, %v793_v34  ;;  %v296_v16 = vadd.s32 2, %v292_v15 }
  0x41   : > { %v795_v36 = vadd.f32 %v4202_v32, %v794_v35 }
  0x43   : > { %v4521_v37 = vsel %vm796_vm1, %v4202_v32, %v795_v36  ;;  %v8313_v36 = vmov 0.0  }
  0x44   : > { %8865 = vst [vmem:[#allocation12_spill] sm:$0xff] %v4521_v37 }
  0xb0   : > { %v700_v19 = vpop.permute.xlu0 %699 }
  0xba   : > { %v723_v20 = vpop.f32.mrf.mxu0  ;;  %v743_v21 = vpop.f32.mrf.mxu1 }
  0xbb   : > { %v724_v22 = vadd.f32 %v723_v20, %v700_v19  ;;  %v744_v23 = vadd.f32 %v743_v21, %v700_v19 }
  0xbd   : > { %v786_v24 = vadd.f32 %v744_v23, %v724_v22 }
  0xbe   : > { %v763_v25 = vpop.f32.mrf.mxu2  ;;  %v783_v26 = vpop.f32.mrf.mxu3 }
  0xbf   : > { %v764_v27 = vadd.f32 %v763_v25, %v700_v19  ;;  %v784_v29 = vadd.f32 %v783_v26, %v700_v19  ;;  %v348_v19 = vmul.u32 64, %v296_v16 }
  0xc1   : > { %v787_v28 = vadd.f32 %v786_v24, %v764_v27 }
  0xc3   : > { %v788_v30 = vadd.f32 %v787_v28, %v784_v29 }
  0xc5   : > { %789 = vadd.xlane.f32.xlu0 %v788_v30 }
 0x138   : > { %v790_v38 = vpop.xlane.xlu0 %789 }
 0x139   : > { %v798_v39 = vmul.f32 %v4521_v37, %v790_v38 }
 0x13b   : > { %v799_v40 = vsub.f32 %v724_v22, %v798_v39  ;;  %v800_v41 = vsub.f32 %v744_v23, %v798_v39  ;;  %v801_v42 = vsub.f32 %v764_v27, %v798_v39  ;;  %v802_v43 = vsub.f32 %v784_v29, %v798_v39 }
 0x13c   : > { %v4650_v22 = vsub.s32 %v264_v12, %v348_v19  ;;  %v265_v39 = vadd.s32 256, %v4613_v10 }
 0x13d   : > { %v803_v44 = vmul.f32 %v799_v40, %v799_v40  ;;  %v804_v45 = vmul.f32 %v800_v41, %v800_v41  ;;  %v805_v46 = vmul.f32 %v801_v42, %v801_v42  ;;  %v806_v48 = vmul.f32 %v802_v43, %v802_v43 }
 0x13e   : > { %8874 = vst [vmem:[#allocation21_spill] sm:$0xff] %v4650_v22  ;;  %vm364_vm7 = vcmp.ge.s32.totalorder %v4650_v22, 16  ;;  %vm356_vm8 = vcmp.ge.s32.totalorder %v4650_v22, 8  ;;  %vm580_vm9 = vcmp.lt.s32.totalorder %v4650_v22, 48  ;;  %vm548_vm10 = vcmp.ge.s32.totalorder %v4650_v22, 0 }
 0x13f   : > { %v807_v47 = vadd.f32 %v804_v45, %v803_v44  ;;  %v368_v24 = vsel %vm364_vm7, 1, %v8307_v0  ;;  %v360_v28 = vsel %vm356_vm8, 1, %v8307_v0  ;;  %vm584_vm11 = vmand %vm548_vm10, %vm580_vm9  ;;  %vm520_vm13 = vcmp.lt.s32.totalorder %v4650_v22, 64 }
 0x140   : > { %v4674_v29 = vadd.s32 %v368_v24, %v360_v28  ;;  %v4706_v38 = vsel %vm584_vm11, 1.0, %v8313_v36  ;;  %vm564_vm14 = vcmp.lt.s32.totalorder %v4650_v22, 56  ;;  %vm313_vm15 = vcmp.ge.s32.totalorder %v265_v39, 320  ;;  %vm552_vm0 = vmand %vm548_vm10, %vm520_vm13 }
 0x141   : > { %v808_v49 = vadd.f32 %v807_v47, %v805_v46  ;;  %8876 = vst [vmem:[#allocation23_spill] sm:$0xff] %v4706_v38  ;;  %vm568_vm1 = vmand %vm548_vm10, %vm564_vm14  ;;  %v317_v45 = vsel %vm313_vm15, 1, %v8307_v0  ;;  %vm8615_vm11 = vcmp.lt.s32.totalorder %v4613_v10, 8 }
 0x142   : > { %8875 = vst [vmem:[#allocation22_spill] sm:$0xff] %v4674_v29  ;;  %v4741_v47 = vsel %vm568_vm1, 1.0, %v8313_v36  ;;  %vm536_vm9 = vmand %vm356_vm8, %vm520_vm13 }
 0x143   : > { %v809_v50 = vadd.f32 %v808_v49, %v806_v48  ;;  %8879 = vst [vmem:[#allocation26_spill] sm:$0xff] %v4741_v47  ;;  %v4744_v48 = vsel %vm552_vm0, 1.0, %v8313_v36  ;;  %v4814_v15 = vsel %vm536_vm9, 1.0, %v8313_v36 }
 0x144   : > { %8880 = vst [vmem:[#allocation27_spill] sm:$0xff] %v4744_v48 }
 0x145   : > { %810 = vadd.xlane.f32.xlu1 %v809_v50  ;;  %8889 = vst [vmem:[#allocation36_spill] sm:$0xff] %v4814_v15 }
 0x1b8   : > { %v811_v51 = vpop.xlane.xlu1 %810 }
 0x1b9   : > { %v812_v52 = vmul.f32 %v811_v51, %v4521_v37 }
 0x1bb   : > { %v813_v53 = vadd.f32 1e-05, %v812_v52  ;;  %v321_v52 = vadd.s32 4, %v317_v45 }
 0x1bd   : > { %4203 = vrsqrt.f32 %v813_v53  ;;  %vm820_vm3 = vweird.f32 %v813_v53 }
 0x1c3   : > { %v4204_v54 = vpop.eup %4203 }
 0x1c4   : > { %v815_v55 = vmul.f32 %v4204_v54, %v813_v53  ;;  %vm821_vm2 = vweird.f32 %v4204_v54 }
 0x1c5   : > { %vm822_vm4 = vmor %vm820_vm3, %vm821_vm2  ;;  %vm8613_vm3 = vcmp.lt.s32.totalorder %v4613_v10, 120 }
 0x1c6   : > { %v816_v56 = vmul.f32 %v4204_v54, %v815_v55 }
 0x1c8   : > { %v817_v57 = vmul.f32 0.5, %v816_v56 }
 0x1ca   : > { %v818_v58 = vsub.f32 1.5, %v817_v57  ;;  %v271_v57 = vsel %vm267_vm5, 1, %v8307_v0 }
 0x1cc   : > { %v819_v59 = vmul.f32 %v4204_v54, %v818_v58  ;;  %v349_v58 = vmul.u32 64, %v321_v52 }
 0x1ce   : > { %v823_v60 = vsel %vm822_vm4, %v4204_v54, %v819_v59 }
 0x1cf   : > { %v824_v61 = vmul.f32 %v823_v60, %v799_v40  ;;  %v825_v62 = vmul.f32 %v823_v60, %v800_v41  ;;  %v827_v63 = vmul.f32 %v823_v60, %v802_v43  ;;  %v826_v4 = vmul.f32 %v823_v60, %v801_v42 }
 0x1d0   : > { %v266_v42 = vadd.s32 384, %v4613_v10 }
 0x1d1   : > { %v4525_v1 = vmax.f32 %v824_v61, 0.0  ;;  %v4527_v2 = vmax.f32 %v825_v62, 0.0  ;;  %v4529_v3 = vmax.f32 %v827_v63, 0.0  ;;  %v4537_v5 = vmax.f32 %v826_v4, 0.0 }
 0x1d2   : > { %vm338_vm2 = vcmp.ge.s32.totalorder %v266_v42, 448  ;;  %vm490_vm4 = vcmp.lt.s32.totalorder %v266_v42, 448  ;;  %v347_v63 = vmul.u32 64, %v271_v57 }
 0x1d3   : > { %8866 = vst [vmem:[#allocation13_spill] sm:$0xff] %v4525_v1  ;;  %1293 = vrot.lane.b32.xlu0 %v4529_v3, %s4348_s6  ;;  %930 = vrot.lane.b32.xlu2 %v4527_v2, %s4349_s8  ;;  %v4594_v6 = vmul.f32 0.0, %v4529_v3  ;;  %v4603_v7 = vmul.f32 0.0, %v4525_v1  ;;  %v342_v50 = vsel %vm338_vm2, 1, %v8307_v0  ;;  %v4760_v53 = vmul.f32 %v4744_v48, %v4537_v5 }
 0x1d4   : > { %8867 = vst [vmem:[#allocation14_spill] sm:$0xff] %v4527_v2  ;;  %928 = vrot.lane.b32.xlu1 %v4525_v1, %s4349_s8  ;;  %v346_v54 = vadd.s32 6, %v342_v50  ;;  %v4763_v55 = vsel %vm490_vm4, 1.0, %v8313_v36  ;;  %v4791_v9 = vsub.s32 %v4613_v10, %v347_v63 }
 0x1d5   : > { %8868 = vst [vmem:[#allocation15_spill] sm:$0xff] %v4529_v3 }
 0x1d6   : > { %8869 = vst [vmem:[#allocation16_spill] sm:$0xff] %v4537_v5  ;;  %v350_v4 = vmul.u32 64, %v346_v54  ;;  %vm363_vm14 = vcmp.ge.s32.totalorder %v4791_v9, 16  ;;  %vm355_vm0 = vcmp.ge.s32.totalorder %v4791_v9, 8  ;;  %vm579_vm2 = vcmp.lt.s32.totalorder %v4791_v9, 48 }
 0x1d7   : > { %8870 = vst [vmem:[#allocation17_spill] sm:$0xff] %v4594_v6  ;;  %v367_v19 = vsel %vm363_vm14, 1, %v8307_v0  ;;  %v359_v45 = vsel %vm355_vm0, 1, %v8307_v0  ;;  %vm547_vm4 = vcmp.ge.s32.totalorder %v4791_v9, 0  ;;  %v4858_v54 = vsel %vm267_vm5, 1.0, %v8313_v36 }
 0x1d8   : > { %8871 = vst [vmem:[#allocation18_spill] sm:$0xff] %v4603_v7  ;;  %v4849_v50 = vadd.s32 %v367_v19, %v359_v45  ;;  %vm583_vm9 = vmand %vm547_vm4, %vm579_vm2  ;;  %vm8612_vm5 = vcmp.lt.s32.totalorder %v4613_v10, 16 }
 0x1d9   : > { %8882 = vst [vmem:[#allocation29_spill] sm:$0xff] %v4760_v53  ;;  %v4877_v63 = vsel %vm583_vm9, 1.0, %v8313_v36 }
 0x1da   : > { %8883 = vst [vmem:[#allocation30_spill] sm:$0xff] %v4763_v55 }
 0x1db   : > { %932 = vrot.lane.b32.xlu2 %v4537_v5, %s4349_s8  ;;  %1037 = vrot.lane.b32.xlu0 %v4525_v1, %s4350_s15  ;;  %8886 = vst [vmem:[#allocation33_spill] sm:$0xff] %v4791_v9 }
 0x1dc   : > { %1107 = vrot.lane.b32.xlu1 %v4527_v2, %s4348_s6  ;;  %8893 = vst [vmem:[#allocation40_spill] sm:$0xff] %v4849_v50 }
 0x1dd   : > { %8895 = vst [vmem:[#allocation42_spill] sm:$0xff] %v4858_v54 }
 0x1de   : > { %8898 = vst [vmem:[#allocation45_spill] sm:$0xff] %v4877_v63 }
 0x1e3   : > { %934 = vrot.lane.b32.xlu2 %v4529_v3, %s4349_s8  ;;  %1243 = vrot.lane.b32.xlu0 %v4537_v5, %s4351_s16 }
 0x1e4   : > { %1087 = vrot.lane.b32.xlu1 %v4527_v2, %s4352_s17 }
 0x1eb   : > { %1109 = vrot.lane.b32.xlu2 %v4537_v5, %s4348_s6  ;;  %1091 = vrot.lane.b32.xlu0 %v4529_v3, %s4352_s17 }
 0x1ec   : > { %1291 = vrot.lane.b32.xlu1 %v4537_v5, %s4348_s6 }
 0x1f3   : > { %1089 = vrot.lane.b32.xlu2 %v4537_v5, %s4352_s17  ;;  %1085 = vrot.lane.b32.xlu0 %v4525_v1, %s4352_s17 }
 0x1f4   : > { %1273 = vrot.lane.b32.xlu1 %v4529_v3, %s4352_s17 }
 0x1fb   : > { %1271 = vrot.lane.b32.xlu2 %v4537_v5, %s4352_s17  ;;  %911 = vrot.lane.b32.xlu0 %v4527_v2, %s4348_s6 }
 0x1fc   : > { %1059 = vrot.lane.b32.xlu1 %v4527_v2, %s4351_s16 }
 0x203   : > { %888 = vrot.lane.b32.xlu0 %v4525_v1, %s4352_s17  ;;  %1057 = vrot.lane.b32.xlu2 %v4525_v1, %s4351_s16 }
 0x204   : > { %1241 = vrot.lane.b32.xlu1 %v4527_v2, %s4351_s16 }
 0x20b   : > { %1043 = vrot.lane.b32.xlu0 %v4529_v3, %s4350_s15  ;;  %1039 = vrot.lane.b32.xlu2 %v4527_v2, %s4350_s15 }
 0x20c   : > { %1223 = vrot.lane.b32.xlu1 %v4537_v5, %s4350_s15 }
 0x213   : > { %838 = vrot.lane.b32.xlu0 %v4525_v1, %s4350_s15  ;;  %1221 = vrot.lane.b32.xlu2 %v4527_v2, %s4350_s15 }
 0x214   : > { %1111 = vrot.lane.b32.xlu1 %v4529_v3, %s4348_s6 }
 0x21b   : > { %913 = vrot.lane.b32.xlu0 %v4537_v5, %s4348_s6  ;;  %1105 = vrot.lane.b32.xlu2 %v4525_v1, %s4348_s6 }
 0x21c   : > { %909 = vrot.lane.b32.xlu1 %v4525_v1, %s4348_s6 }
 0x223   : > { %857 = vrot.lane.b32.xlu0 %v4594_v6, %s4351_s16  ;;  %1289 = vrot.lane.b32.xlu2 %v4527_v2, %s4348_s6 }
 0x224   : > { %1063 = vrot.lane.b32.xlu1 %v4529_v3, %s4351_s16 }
 0x22b   : > { %1061 = vrot.lane.b32.xlu2 %v4537_v5, %s4351_s16  ;;  %1275 = vrot.lane.b32.xlu0 %v4603_v7, %s4352_s17 }
 0x22c   : > { %1245 = vrot.lane.b32.xlu1 %v4529_v3, %s4351_s16 }
 0x22d   : > { %v931_v8 = vpop.permute.xlu2 %930 }
 0x233   : > { %1269 = vrot.lane.b32.xlu2 %v4527_v2, %s4352_s17 }
 0x234   : > { %1225 = vrot.lane.b32.xlu1 %v4529_v3, %s4350_s15 }
 0x235   : > { %v933_v11 = vpop.permute.xlu2 %932 }
 0x236   : > { %v4654_v23 = vsel %vm8306_vm6, %v931_v8, %v933_v11 }
 0x23b   : > { %1041 = vrot.lane.b32.xlu2 %v4537_v5, %s4350_s15 }
 0x23c   : > { %1227 = vrot.lane.b32.xlu1 %v4603_v7, %s4350_s15 }
 0x23d   : > { %v4623_v13 = vpop.permute.xlu2 %934 }
 0x23e   : > { %v4628_v14 = vsel %vm8306_vm6, %v933_v11, %v4623_v13  ;;  %v4793_v11 = vsub.s32 %v266_v42, %v350_v4 }
 0x23f   : > { %8873 = vst [vmem:[#allocation20_spill] sm:$0xff] %v4628_v14  ;;  %1133 = vrot.lane.b32.xlu0 %v4628_v14, %s4350_s15 }
 0x240   : > { %8887 = vst [vmem:[#allocation34_spill] sm:$0xff] %v4793_v11  ;;  %vm366_vm15 = vcmp.ge.s32.totalorder %v4793_v11, 16  ;;  %vm358_vm1 = vcmp.ge.s32.totalorder %v4793_v11, 8 }
 0x241   : > { %v370_v24 = vsel %vm366_vm15, 1, %v8307_v0 }
 0x243   : > { %890 = vrot.lane.b32.xlu2 %v4527_v2, %s4352_s17 }
 0x244   : > { %836 = vrot.lane.b32.xlu1 %v4594_v6, %s4350_s15 }
 0x245   : > { %v4637_v17 = vpop.permute.xlu0 %1293  ;;  %v4639_v18 = vpop.permute.xlu2 %1109 }
 0x246   : > { %v4641_v20 = vpop.permute.xlu1 %928 }
 0x247   : > { %v4646_v21 = vsel %vm8306_vm6, %v4641_v20, %v931_v8  ;;  %v940_v56 = vsel %vm8306_vm6, %v4623_v13, %v4641_v20  ;;  %v4788_v8 = vsub.s32 %v265_v39, %v349_v58  ;;  %vm524_vm6 = vmand %vm364_vm7, %vm520_vm13  ;;  %vm563_vm7 = vcmp.lt.s32.totalorder %v4791_v9, 56 }
 0x248   : > { %995 = vrot.lane.b32.xlu0 %v4646_v21, %s4352_s17  ;;  %v4782_v61 = vmul.f32 %v4763_v55, %v940_v56  ;;  %v4873_v58 = vmul.f32 %v4858_v54, %v940_v56  ;;  %v4886_v19 = vsel %vm524_vm6, 1.0, %v8313_v36  ;;  %vm519_vm6 = vcmp.lt.s32.totalorder %v4791_v9, 64  ;;  %vm567_vm2 = vmand %vm547_vm4, %vm563_vm7 }
 0x249   : > { %8885 = vst [vmem:[#allocation32_spill] sm:$0xff] %v4788_v8  ;;  %vm357_vm10 = vcmp.ge.s32.totalorder %v4788_v8, 8  ;;  %vm365_vm8 = vcmp.ge.s32.totalorder %v4788_v8, 16  ;;  %vm551_vm13 = vmand %vm547_vm4, %vm519_vm6  ;;  %vm565_vm7 = vcmp.lt.s32.totalorder %v4788_v8, 56 }
 0x24a   : > { %8884 = vst [vmem:[#allocation31_spill] sm:$0xff] %v4782_v61  ;;  %v361_v12 = vsel %vm357_vm10, 1, %v8307_v0  ;;  %v369_v20 = vsel %vm365_vm8, 1, %v8307_v0  ;;  %vm535_vm4 = vmand %vm355_vm0, %vm519_vm6  ;;  %vm549_vm0 = vcmp.ge.s32.totalorder %v4788_v8, 0 }
 0x24b   : > { %859 = vrot.lane.b32.xlu2 %v4525_v1, %s4351_s16  ;;  %8897 = vst [vmem:[#allocation44_spill] sm:$0xff] %v4873_v58  ;;  %vm523_vm9 = vmand %vm363_vm14, %vm519_vm6  ;;  %vm581_vm14 = vcmp.lt.s32.totalorder %v4788_v8, 48  ;;  %vm521_vm6 = vcmp.lt.s32.totalorder %v4788_v8, 64 }
 0x24c   : > { %1017 = vrot.lane.b32.xlu1 %v4654_v23, %s4348_s6  ;;  %8899 = vst [vmem:[#allocation46_spill] sm:$0xff] %v4886_v19 }
 0x24d   : > { %v4664_v25 = vpop.permute.xlu2 %1089  ;;  %v4666_v26 = vpop.permute.xlu0 %1037 }
 0x24e   : > { %v4669_v27 = vpop.permute.xlu1 %1107 }
 0x250   : > { %1181 = vrot.lane.b32.xlu0 %v4628_v14, %s4352_s17 }
 0x253   : > { %1247 = vrot.lane.b32.xlu2 %v4603_v7, %s4351_s16 }
 0x254   : > { %1201 = vrot.lane.b32.xlu1 %v4628_v14, %s4348_s6 }
 0x255   : > { %v4682_v30 = vpop.permute.xlu2 %1271  ;;  %v4684_v31 = vpop.permute.xlu0 %1243 }
 0x256   : > { %v4686_v32 = vpop.permute.xlu1 %1087 }
 0x258   : > { %947 = vrot.lane.b32.xlu0 %v4646_v21, %s4350_s15 }
 0x25b   : > { %1295 = vrot.lane.b32.xlu2 %v4603_v7, %s4348_s6 }
 0x25c   : > { %1179 = vrot.lane.b32.xlu1 %v4654_v23, %s4352_s17 }
 0x25d   : > { %v4698_v33 = vpop.permute.xlu0 %1091  ;;  %v4700_v34 = vpop.permute.xlu2 %1057 }
 0x25e   : > { %v4703_v35 = vpop.permute.xlu1 %1291 }
 0x25f   : > { %v1298_v40 = vsel %vm8614_vm12, %v4703_v35, %v4637_v17 }
 0x260   : > { %v4714_v41 = vmul.f32 %v4706_v38, %v1298_v40  ;;  %1151 = vrot.lane.b32.xlu0 %v4654_v23, %s4351_s16  ;;  %v4833_v40 = vadd.s32 %v369_v20, %v361_v12 }
 0x262   : > { %8877 = vst [vmem:[#allocation24_spill] sm:$0xff] %v4714_v41  ;;  %1482 = vmatpush.msrb.mxu3 %v4714_v41 }
 0x263   : > { %1129 = vrot.lane.b32.xlu2 %v4646_v21, %s4350_s15  ;;  %8891 = vst [vmem:[#allocation38_spill] sm:$0xff] %v4833_v40 }
 0x264   : > { %967 = vrot.lane.b32.xlu1 %v4646_v21, %s4351_s16 }
 0x265   : > { %v4732_v43 = vpop.permute.xlu0 %1085  ;;  %v4734_v44 = vpop.permute.xlu2 %1039 }
 0x266   : > { %8878 = vst [vmem:[#allocation25_spill] sm:$0xff] %v4732_v43  ;;  %v4738_v46 = vpop.permute.xlu1 %1273 }
 0x267   : > { %v1278_v49 = vsel %vm8613_vm3, %v4682_v30, %v4738_v46 }
 0x268   : > { %v4752_v51 = vmul.f32 %v4741_v47, %v1278_v49  ;;  %949 = vrot.lane.b32.xlu0 %v4654_v23, %s4350_s15  ;;  %v362_v49 = vsel %vm358_vm1, 1, %v8307_v0  ;;  %v4934_v0 = vsel %vm551_vm13, 1.0, %v8313_v36  ;;  %vm585_vm13 = vmand %vm549_vm0, %vm581_vm14 }
 0x269   : > { %v4851_v52 = vadd.s32 %v370_v24, %v362_v49  ;;  %8906 = vst [vmem:[#allocation53_spill] sm:$0xff] %v4934_v0 }
 0x26a   : > { %8881 = vst [vmem:[#allocation28_spill] sm:$0xff] %v4752_v51  ;;  %1483 = vmatpush.msrb.mxu3 %v4752_v51  ;;  %v8914_v51 = vmov 0.0  }
 0x26b   : > { %1131 = vrot.lane.b32.xlu2 %v4654_v23, %s4350_s15  ;;  %8894 = vst [vmem:[#allocation41_spill] sm:$0xff] %v4851_v52  ;;  %v4950_v52 = vmul.f32 %v4934_v0, %v4527_v2  ;;  %v5000_v41 = vsel %vm535_vm4, 1.0, %v8914_v51  ;;  %vm569_vm4 = vmand %vm549_vm0, %vm565_vm7 }
 0x26c   : > { %1484 = vmatpush.msrb.mxu3 %v4760_v53  ;;  %1149 = vrot.lane.b32.xlu1 %v4646_v21, %s4351_s16  ;;  %8915 = vst [vmem:[#allocation61_spill] sm:$0xff] %v5000_v41 }
 0x26d   : > { %v4777_v59 = vpop.permute.xlu0 %911  ;;  %v4779_v60 = vpop.permute.xlu2 %1221  ;;  %8908 = vst [vmem:[#allocation55_spill] sm:$0xff] %v4950_v52 }
 0x26e   : > { %v4784_v62 = vpop.permute.xlu1 %1059 }
 0x270   : > { %1135 = vrot.lane.b32.xlu0 %v4782_v61, %s4350_s15 }
 0x273   : > { %1015 = vrot.lane.b32.xlu2 %v4646_v21, %s4348_s6 }
 0x274   : > { %1019 = vrot.lane.b32.xlu1 %v4628_v14, %s4348_s6 }
 0x275   : > { %v4808_v13 = vpop.permute.xlu2 %1105  ;;  %v4827_v28 = vpop.permute.xlu0 %888 }
 0x276   : > { %8888 = vst [vmem:[#allocation35_spill] sm:$0xff] %v4808_v13  ;;  %v4816_v16 = vpop.permute.xlu1 %1241 }
 0x277   : > { %8890 = vst [vmem:[#allocation37_spill] sm:$0xff] %v4827_v28  ;;  %v1251_v39 = vsel %vm8615_vm11, %v4816_v16, %v4684_v31 }
 0x278   : > { %v4839_v42 = vmul.f32 %v4814_v15, %v1251_v39  ;;  %861 = vrot.lane.b32.xlu0 %v4527_v2, %s4351_s16 }
 0x27a   : > { %8892 = vst [vmem:[#allocation39_spill] sm:$0xff] %v4839_v42  ;;  %1485 = vmatpush.msrb.mxu3 %v4839_v42 }
 0x27b   : > { %997 = vrot.lane.b32.xlu2 %v4654_v23, %s4352_s17 }
 0x27c   : > { %999 = vrot.lane.b32.xlu1 %v4628_v14, %s4352_s17 }
 0x27d   : > { %v4870_v57 = vpop.permute.xlu2 %1289 }
 0x27e   : > { %8896 = vst [vmem:[#allocation43_spill] sm:$0xff] %v4870_v57  ;;  %v1299_v4 = vsel %vm8614_vm12, %v4870_v57, %v4703_v35  ;;  %v4883_v12 = vpop.permute.xlu1 %1223  ;;  %v4900_v35 = vpop.permute.xlu0 %1043  ;;  %v1094_v57 = vsel %vm8613_vm3, %v4686_v32, %v4664_v25 }
 0x27f   : > { %v4889_v20 = vmul.f32 %v4877_v63, %v1299_v4  ;;  %v1231_v56 = vsel %vm8612_vm5, %v4779_v60, %v4883_v12  ;;  %8902 = vst [vmem:[#allocation49_spill] sm:$0xff] %v4900_v35 }
 0x280   : > { %v4896_v24 = vmul.f32 %v4886_v19, %v1231_v56  ;;  %1013 = vrot.lane.b32.xlu0 %v4873_v58, %s4348_s6  ;;  %v4931_v56 = vsel %vm567_vm2, 1.0, %v8313_v36  ;;  %vm5158_vm2 = vmand %vm549_vm0, %vm521_vm6 }
 0x281   : > { %8900 = vst [vmem:[#allocation47_spill] sm:$0xff] %v4889_v20  ;;  %1442 = vmatpush.msrb.mxu1 %v4889_v20 }
 0x282   : > { %8901 = vst [vmem:[#allocation48_spill] sm:$0xff] %v4896_v24  ;;  %1486 = vmatpush.msrb.mxu3 %v4896_v24 }
 0x283   : > { %1199 = vrot.lane.b32.xlu2 %v4654_v23, %s4348_s6  ;;  %8905 = vst [vmem:[#allocation52_spill] sm:$0xff] %v4931_v56 }
 0x284   : > { %1177 = vrot.lane.b32.xlu1 %v4646_v21, %s4352_s17 }
 0x285   : > { %v4908_v39 = vpop.permute.xlu2 %1061 }
 0x286   : > { %v4910_v45 = vpop.permute.xlu1 %1111  ;;  %v4922_v49 = vpop.permute.xlu0 %838 }
 0x287   : > { %8903 = vst [vmem:[#allocation50_spill] sm:$0xff] %v4922_v49 }
 0x288   : > { %1155 = vrot.lane.b32.xlu0 %v4782_v61, %s4351_s16 }
 0x28b   : > { %1197 = vrot.lane.b32.xlu2 %v4646_v21, %s4348_s6 }
 0x28c   : > { %907 = vrot.lane.b32.xlu1 %v4594_v6, %s4348_s6 }
 0x28d   : > { %v4928_v4 = vpop.permute.xlu2 %1269 }
 0x28e   : > { %8904 = vst [vmem:[#allocation51_spill] sm:$0xff] %v4928_v4  ;;  %v1279_v54 = vsel %vm8613_vm3, %v4928_v4, %v4682_v30  ;;  %v4940_v55 = vpop.permute.xlu1 %909  ;;  %v4957_v30 = vpop.permute.xlu0 %913 }
 0x28f   : > { %v4943_v37 = vmul.f32 %v4931_v56, %v1279_v54  ;;  %8909 = vst [vmem:[#allocation56_spill] sm:$0xff] %v4957_v30  ;;  %v5066_v30 = vmul.f32 %v4741_v47, %v1094_v57  ;;  %v1047_v57 = vsel %vm8612_vm5, %v4666_v26, %v4734_v44 }
 0x290   : > { %1203 = vrot.lane.b32.xlu0 %v4782_v61, %s4348_s6 }
 0x291   : > { %8907 = vst [vmem:[#allocation54_spill] sm:$0xff] %v4943_v37  ;;  %1443 = vmatpush.msrb.mxu1 %v4943_v37 }
 0x292   : > { %8925 = vst [vmem:[#allocation71_spill] sm:$0xff] %v5066_v30 }
 0x293   : > { %1444 = vmatpush.msrb.mxu1 %v4950_v52  ;;  %969 = vrot.lane.b32.xlu2 %v4654_v23, %s4351_s16 }
 0x294   : > { %945 = vrot.lane.b32.xlu1 %v4873_v58, %s4350_s15 }
 0x295   : > { %v4959_v54 = vpop.permute.xlu2 %1041 }
 0x296   : > { %v4961_v36 = vpop.permute.xlu1 %1063  ;;  %v4973_v29 = vpop.permute.xlu0 %857 }
 0x297   : > { %8910 = vst [vmem:[#allocation57_spill] sm:$0xff] %v4961_v36 }
 0x298   : > { %1153 = vrot.lane.b32.xlu0 %v4628_v14, %s4351_s16  ;;  %8911 = vst [vmem:[#allocation58_spill] sm:$0xff] %v4973_v29 }
 0x29b   : > { %971 = vrot.lane.b32.xlu2 %v4628_v14, %s4351_s16 }
 0x29c   : > { %993 = vrot.lane.b32.xlu1 %v4873_v58, %s4352_s17 }
 0x29d   : > { %v4969_v40 = vpop.permute.xlu2 %890 }
 0x29e   : > { %v4971_v50 = vpop.permute.xlu1 %1245  ;;  %v4983_v42 = vpop.permute.xlu0 %1275 }
 0x2a3   : > { %951 = vrot.lane.b32.xlu2 %v4628_v14, %s4350_s15 }
 0x2a4   : > { %1183 = vrot.lane.b32.xlu1 %v4782_v61, %s4352_s17  ;;  %v5016_v61 = vsel %vm523_vm9, 1.0, %v8914_v51  ;;  %vm537_vm9 = vmand %vm357_vm10, %vm521_vm6 }
 0x2a5   : > { %v4979_v22 = vpop.permute.xlu2 %859  ;;  %8918 = vst [vmem:[#allocation64_spill] sm:$0xff] %v5016_v61  ;;  %vm525_vm10 = vmand %vm365_vm8, %vm521_vm6  ;;  %v5260_v8 = vsel %vm537_vm9, 1.0, %v8914_v51  ;;  %vm8611_vm8 = vcmask 588800  }
 0x2a6   : > { %8912 = vst [vmem:[#allocation59_spill] sm:$0xff] %v4979_v22  ;;  %v4981_v24 = vpop.permute.xlu1 %1225 }
 0x2a7   : > { %8953 = vst [vmem:[#allocation97_spill] sm:$0xff] %v5260_v8 }
 0x2ab   : > { %965 = vrot.lane.b32.xlu2 %v4873_v58, %s4351_s16 }
 0x2ac   : > { %863 = vrot.lane.b32.xlu1 %v4537_v5, %s4351_s16 }
 0x2ad   : > { %v4997_v53 = vpop.permute.xlu2 %1247 }
 0x2ae   : > { %8913 = vst [vmem:[#allocation60_spill] sm:$0xff] %v4997_v53  ;;  %v5002_v52 = vpop.permute.xlu1 %1227  ;;  %v1252_v37 = vsel %vm8615_vm11, %v4997_v53, %v4816_v16 }
 0x2af   : > { %8916 = vst [vmem:[#allocation62_spill] sm:$0xff] %v5002_v52  ;;  %v1232_v20 = vsel %vm8612_vm5, %v5002_v52, %v4779_v60  ;;  %v5013_v9 = vmul.f32 %v5000_v41, %v1252_v37 }
 0x2b0   : > { %v5019_v14 = vmul.f32 %v5016_v61, %v1232_v20 }
 0x2b1   : > { %8917 = vst [vmem:[#allocation63_spill] sm:$0xff] %v5013_v9  ;;  %v5021_v7 = vpop.permute.xlu0 %1133  ;;  %1445 = vmatpush.msrb.mxu1 %v5013_v9 }
 0x2b2   : > { %8919 = vst [vmem:[#allocation65_spill] sm:$0xff] %v5019_v14 }
 0x2b3   : > { %892 = vrot.lane.b32.xlu2 %v4537_v5, %s4352_s17  ;;  %1446 = vmatpush.msrb.mxu1 %v5019_v14  ;;  %v1114_v14 = vsel %vm8614_vm12, %v4669_v27, %v4639_v18 }
 0x2b5   : > { %v5027_v16 = vpop.permute.xlu2 %1295 }
 0x2b6   : > { %v5029_v60 = vpop.permute.xlu1 %836 }
 0x2b7   : > { %8920 = vst [vmem:[#allocation66_spill] sm:$0xff] %v5029_v60  ;;  %v5060_v60 = vmul.f32 %v4706_v38, %v1114_v14 }
 0x2b9   : > { %8924 = vst [vmem:[#allocation70_spill] sm:$0xff] %v5060_v60 }
 0x2ba   : > { %v5031_v37 = vpop.permute.xlu0 %995 }
 0x2bb   : > { %8921 = vst [vmem:[#allocation67_spill] sm:$0xff] %v5031_v37  ;;  %886 = vrot.lane.b32.xlu2 %v4594_v6, %s4352_s17 }
 0x2bd   : > { %v1130_v20 = vpop.permute.xlu2 %1129 }
 0x2be   : > { %v5035_v52 = vpop.permute.xlu1 %1017 }
 0x2c2   : > { %v5037_v53 = vpop.permute.xlu0 %1181 }
 0x2c3   : > { %8922 = vst [vmem:[#allocation68_spill] sm:$0xff] %v5037_v53  ;;  %840 = vrot.lane.b32.xlu2 %v4527_v2, %s4350_s15 }
 0x2c5   : > { %v5041_v9 = vpop.permute.xlu2 %1131 }
 0x2c6   : > { %v5047_v4 = vpop.permute.xlu1 %1201  ;;  %v1139_v6 = vsel %vm8612_vm5, %v1130_v20, %v5041_v9 }
 0x2c7   : > { %v5053_v58 = vmul.f32 %v4886_v19, %v1139_v6  ;;  %v1067_v6 = vsel %vm8615_vm11, %v4700_v34, %v4784_v62 }
 0x2c9   : > { %8923 = vst [vmem:[#allocation69_spill] sm:$0xff] %v5053_v58  ;;  %1455 = vmatpush.msrb.mxu2 %v5053_v58  ;;  %v5080_v58 = vmul.f32 %v4744_v48, %v4527_v2  ;;  %v5097_v2 = vmul.f32 %v4886_v19, %v1047_v57 }
 0x2ca   : > { %v5063_v49 = vpop.permute.xlu0 %947 }
 0x2cb   : > { %842 = vrot.lane.b32.xlu2 %v4537_v5, %s4350_s15  ;;  %1456 = vmatpush.msrb.mxu2 %v5060_v60  ;;  %8926 = vst [vmem:[#allocation72_spill] sm:$0xff] %v5080_v58  ;;  %v5089_v60 = vmul.f32 %v4814_v15, %v1067_v6 }
 0x2cc   : > { %8928 = vst [vmem:[#allocation74_spill] sm:$0xff] %v5097_v2 }
 0x2cd   : > { %1457 = vmatpush.msrb.mxu2 %v5066_v30  ;;  %v5076_v14 = vpop.permute.xlu2 %1015  ;;  %8927 = vst [vmem:[#allocation73_spill] sm:$0xff] %v5089_v60 }
 0x2ce   : > { %v5086_v29 = vpop.permute.xlu1 %1179  ;;  %v1022_v30 = vsel %vm8614_vm12, %v5076_v14, %v5035_v52 }
 0x2cf   : > { %1458 = vmatpush.msrb.mxu2 %v5080_v58  ;;  %v5103_v11 = vmul.f32 %v4706_v38, %v1022_v30  ;;  %v5121_v30 = vmul.f32 %v4744_v48, %v4646_v21  ;;  %v1186_v28 = vsel %vm8613_vm3, %v5086_v29, %v5037_v53 }
 0x2d1   : > { %1459 = vmatpush.msrb.mxu2 %v5089_v60  ;;  %8930 = vst [vmem:[#allocation76_spill] sm:$0xff] %v5103_v11 }
 0x2d2   : > { %v5100_v22 = vpop.permute.xlu0 %1151  ;;  %8932 = vst [vmem:[#allocation78_spill] sm:$0xff] %v5121_v30 }
 0x2d3   : > { %8929 = vst [vmem:[#allocation75_spill] sm:$0xff] %v5100_v22  ;;  %1460 = vmatpush.msrb.mxu2 %v5097_v2 }
 0x2d5   : > { %1461 = vmatpush.msrb.mxu2 %v5103_v11  ;;  %v5107_v6 = vpop.permute.xlu2 %997 }
 0x2d6   : > { %v5109_v58 = vpop.permute.xlu1 %967  ;;  %v1002_v57 = vsel %vm8613_vm3, %v5031_v37, %v5107_v6 }
 0x2d7   : > { %v5116_v60 = vmul.f32 %v4741_v47, %v1002_v57 }
 0x2d9   : > { %8931 = vst [vmem:[#allocation77_spill] sm:$0xff] %v5116_v60  ;;  %1462 = vmatpush.msrb.mxu2 %v5116_v60 }
 0x2da   : > { %v5123_v2 = vpop.permute.xlu0 %949 }
 0x2db   : > { %8933 = vst [vmem:[#allocation79_spill] sm:$0xff] %v5123_v2  ;;  %1463 = vmatpush.msrb.mxu2 %v5121_v30  ;;  %v5143_v30 = vmul.f32 %v4741_v47, %v1186_v28  ;;  %v1095_v47 = vsel %vm8613_vm3, %v4732_v43, %v4686_v32  ;;  %v1068_v28 = vsel %vm8615_vm11, %v4961_v36, %v4700_v34 }
 0x2dc   : > { %v5249_v34 = vmul.f32 %v4934_v0, %v4525_v1 }
 0x2dd   : > { %v1200_v11 = vpop.permute.xlu2 %1199  ;;  %8935 = vst [vmem:[#allocation81_spill] sm:$0xff] %v5143_v30 }
 0x2de   : > { %v5130_v37 = vpop.permute.xlu1 %1149  ;;  %v1206_v57 = vsel %vm8614_vm12, %v1200_v11, %v5047_v4  ;;  %8951 = vst [vmem:[#allocation95_spill] sm:$0xff] %v5249_v34 }
 0x2df   : > { %v5137_v60 = vmul.f32 %v4706_v38, %v1206_v57  ;;  %v1159_v53 = vsel %vm8615_vm11, %v5130_v37, %v5100_v22  ;;  %v1115_v57 = vsel %vm8614_vm12, %v4808_v13, %v4669_v27  ;;  %v5172_v27 = vmul.f32 %v4744_v48, %v4654_v23 }
 0x2e1   : > { %8934 = vst [vmem:[#allocation80_spill] sm:$0xff] %v5137_v60  ;;  %1487 = vmatpush.msrb.mxu3 %v5137_v60  ;;  %v1297_v60 = vsel %vm8614_vm12, %v4637_v17, %v5027_v16  ;;  %v5182_v17 = vsel %vm585_vm13, 1.0, %v8914_v51 }
 0x2e2   : > { %v5150_v2 = vpop.permute.xlu0 %1135  ;;  %8939 = vst [vmem:[#allocation83_spill] sm:$0xff] %v5172_v27  ;;  %v5198_v32 = vmul.f32 %v5182_v17, %v1297_v60  ;;  %v5219_v60 = vmul.f32 %v4931_v56, %v1095_v47  ;;  %v1250_v47 = vsel %vm8615_vm11, %v4684_v31, %v4971_v50 }
 0x2e3   : > { %8936 = vst [vmem:[#allocation82_spill] sm:$0xff] %v5150_v2  ;;  %v1140_v22 = vsel %vm8612_vm5, %v5150_v2, %v1130_v20  ;;  %1488 = vmatpush.msrb.mxu3 %v5143_v30  ;;  %v1277_v20 = vsel %vm8613_vm3, %v4738_v46, %v4983_v42  ;;  %v5189_v30 = vmul.f32 %v4814_v15, %v1159_v53  ;;  %v5207_v53 = vsel %vm569_vm4, 1.0, %v8914_v51 }
 0x2e4   : > { %v5175_v13 = vmul.f32 %v5016_v61, %v1140_v22  ;;  %8941 = vst [vmem:[#allocation85_spill] sm:$0xff] %v5182_v17  ;;  %v5195_v2 = vmul.f32 %v4877_v63, %v1115_v57  ;;  %v9101_v10 = vld [vmem:[#allocation81_spill] sm:$0xff] }
 0x2e5   : > { %8942 = vst [vmem:[#allocation86_spill] sm:$0xff] %v5189_v30  ;;  %1489 = vmatpush.msrb.mxu3 %v5172_v27  ;;  %v5192_v22 = vpop.permute.xlu2 %1197  ;;  %v5212_v27 = vsel %vm5158_vm2, 1.0, %v8914_v51 }
 0x2e6   : > { %8940 = vst [vmem:[#allocation84_spill] sm:$0xff] %v5175_v13  ;;  %v5200_v43 = vpop.permute.xlu1 %1019  ;;  %1415 = vmatpush.msrb.mxu0 %v5175_v13  ;;  %v1207_v46 = vsel %vm8614_vm12, %v5192_v22, %v1200_v11  ;;  %v5226_v11 = vmul.f32 %v5207_v53, %v1277_v20  ;;  %v5253_v31 = vmul.f32 %v5212_v27, %v4529_v3 }
 0x2e7   : > { %8943 = vst [vmem:[#allocation87_spill] sm:$0xff] %v5195_v2  ;;  %v5215_v57 = vmul.f32 %v4877_v63, %v1207_v46  ;;  %1490 = vmatpush.msrb.mxu3 %v5189_v30  ;;  %v1048_v46 = vsel %vm8612_vm5, %v4900_v35, %v4666_v26  ;;  %v5270_v30 = vmul.f32 %v5260_v8, %v1250_v47  ;;  %v5275_v26 = vsel %vm525_vm10, 1.0, %v8914_v51 }
 0x2e8   : > { %8944 = vst [vmem:[#allocation88_spill] sm:$0xff] %v5198_v32  ;;  %1416 = vmatpush.msrb.mxu0 %v5195_v2  ;;  %v5280_v3 = vmul.f32 %v5016_v61, %v1048_v46 }
 0x2e9   : > { %8945 = vst [vmem:[#allocation89_spill] sm:$0xff] %v5207_v53  ;;  %1522 = vmatpush.msra.mxu3 %v5198_v32  ;;  %1447 = vmatpush.msrb.mxu1 %v5215_v57  ;;  %v5267_v32 = vmul.f32 %v5000_v41, %v1068_v28 }
 0x2ea   : > { %8946 = vst [vmem:[#allocation90_spill] sm:$0xff] %v5212_v27  ;;  %v5243_v20 = vpop.permute.xlu0 %861  ;;  %1417 = vmatpush.msrb.mxu0 %v5219_v60 }
 0x2eb   : > { %8947 = vst [vmem:[#allocation91_spill] sm:$0xff] %v5215_v57  ;;  %1523 = vmatpush.msra.mxu3 %v5226_v11  ;;  %v5331_v57 = vld [vmem:[#allocation6 + $0x8] sm:$0xff] }
 0x2ec   : > { %8948 = vst [vmem:[#allocation92_spill] sm:$0xff] %v5219_v60  ;;  %1418 = vmatpush.msrb.mxu0 %v5249_v34  ;;  %4079 = vmatmul.msk.f32.vlgmr.msrb.gmra.mxu3 %vm8611_vm8, %v5331_v57 }
 0x2ed   : > { %8949 = vst [vmem:[#allocation93_spill] sm:$0xff] %v5226_v11  ;;  %v1230_v11 = vsel %vm8612_vm5, %v4883_v12, %v4981_v24  ;;  %1524 = vmatpush.msra.mxu3 %v5253_v31  ;;  %v5277_v35 = vpop.permute.xlu2 %969 }
 0x2ee   : > { %8950 = vst [vmem:[#allocation94_spill] sm:$0xff] %v5243_v20  ;;  %v5283_v12 = vmul.f32 %v5275_v26, %v1230_v11  ;;  %v5285_v28 = vpop.permute.xlu1 %999  ;;  %1419 = vmatpush.msrb.mxu0 %v5267_v32 }
 0x2ef   : > { %8952 = vst [vmem:[#allocation96_spill] sm:$0xff] %v5253_v31  ;;  %1525 = vmatpush.msra.mxu3 %v5270_v30 }
 0x2f0   : > { %8954 = vst [vmem:[#allocation98_spill] sm:$0xff] %v5267_v32  ;;  %1420 = vmatpush.msrb.mxu0 %v5280_v3 }
 0x2f1   : > { %8955 = vst [vmem:[#allocation99_spill] sm:$0xff] %v5270_v30  ;;  %1526 = vmatpush.msra.mxu3 %v5283_v12 }
 0x2f2   : > { %8956 = vst [vmem:[#allocation100_spill] sm:$0xff] %v5275_v26  ;;  %v1014_v47 = vpop.permute.xlu0 %1013 }
 0x2f3   : > { %8957 = vst [vmem:[#allocation101_spill] sm:$0xff] %v5280_v3  ;;  %v1023_v31 = vsel %vm8614_vm12, %v1014_v47, %v5076_v14  ;;  %v5297_v11 = vsel %vm8614_vm12, %v5200_v43, %v1014_v47  ;;  %v1138_v47 = vsel %vm8612_vm5, %v5041_v9, %v5021_v7  ;;  %v1113_v9 = vsel %vm8614_vm12, %v4639_v18, %v4910_v45 }
 0x2f4   : > { %8958 = vst [vmem:[#allocation102_spill] sm:$0xff] %v5283_v12  ;;  %v5300_v46 = vmul.f32 %v4877_v63, %v1023_v31  ;;  %v5360_v18 = vmul.f32 %v5182_v17, %v1113_v9 }
 0x2f5   : > { %8959 = vst [vmem:[#allocation103_spill] sm:$0xff] %v5285_v28  ;;  %v5302_v36 = vpop.permute.xlu2 %971 }
 0x2f6   : > { %8960 = vst [vmem:[#allocation104_spill] sm:$0xff] %v5297_v11  ;;  %v5304_v30 = vpop.permute.xlu1 %1177  ;;  %v5310_v12 = vsel %vm8615_vm11, %v5277_v35, %v5302_v36  ;;  %1421 = vmatpush.msrb.mxu0 %v5300_v46 }
 0x2f7   : > { %8961 = vst [vmem:[#allocation105_spill] sm:$0xff] %v5300_v46  ;;  %v1187_v14 = vsel %vm8613_vm3, %v5304_v30, %v5086_v29 }
 0x2f8   : > { %8962 = vst [vmem:[#allocation106_spill] sm:$0xff] %v5310_v12  ;;  %v5318_v31 = vmul.f32 %v4931_v56, %v1187_v14  ;;  %v5329_v12 = vmul.f32 %v4934_v0, %v4646_v21  ;;  %v5348_v21 = vmul.f32 %v5275_v26, %v1138_v47 }
 0x2f9   : > { %8967 = vst [vmem:[#allocation111_spill] sm:$0xff] %v5360_v18 }
 0x2fa   : > { %8963 = vst [vmem:[#allocation107_spill] sm:$0xff] %v5318_v31  ;;  %v5324_v11 = vpop.permute.xlu0 %1155  ;;  %1448 = vmatpush.msrb.mxu1 %v5318_v31 }
 0x2fb   : > { %8964 = vst [vmem:[#allocation108_spill] sm:$0xff] %v5329_v12  ;;  %v1160_v29 = vsel %vm8615_vm11, %v5324_v11, %v5130_v37  ;;  %v1093_v37 = vsel %vm8613_vm3, %v4664_v25, %v4698_v33  ;;  %v1066_v25 = vsel %vm8615_vm11, %v4784_v62, %v4908_v39 }
 0x2fc   : > { %v5344_v14 = vmul.f32 %v5000_v41, %v1160_v29  ;;  %1449 = vmatpush.msrb.mxu1 %v5329_v12  ;;  %8966 = vst [vmem:[#allocation110_spill] sm:$0xff] %v5348_v21  ;;  %v5366_v47 = vmul.f32 %v5207_v53, %v1093_v37  ;;  %v5382_v37 = vmul.f32 %v5212_v27, %v4537_v5 }
 0x2fd   : > { %v5350_v31 = vpop.permute.xlu2 %951  ;;  %v1021_v5 = vsel %vm8614_vm12, %v5035_v52, %v5200_v43  ;;  %v917_v43 = vsel %vm8614_vm12, %v4940_v55, %v4777_v59  ;;  %v1001_v52 = vsel %vm8613_vm3, %v5107_v6, %v5285_v28  ;;  %v8982_v28 = vld [vmem:[#allocation59_spill] sm:$0xff] }
 0x2fe   : > { %8965 = vst [vmem:[#allocation109_spill] sm:$0xff] %v5344_v14  ;;  %v5356_v46 = vpop.permute.xlu1 %907  ;;  %1450 = vmatpush.msrb.mxu1 %v5344_v14  ;;  %v5434_v14 = vmul.f32 %v4706_v38, %v917_v43  ;;  %v5437_v6 = vmul.f32 %v5207_v53, %v1001_v52  ;;  %v8983_v43 = vld [vmem:[#allocation58_spill] sm:$0xff] }
 0x2ff   : > { %4078 = vmatmul.msk.f32.vlgmr.msrb.gmra.mxu1 %vm8611_vm8, %v5331_v57  ;;  %8968 = vst [vmem:[#allocation112_spill] sm:$0xff] %v5366_v47  ;;  %v868_v52 = vsel %vm8615_vm11, %v8983_v43, %v8982_v28 }
 0x300   : > { %1495 = vmatpush.msra.mxu1 %v5348_v21  ;;  %8969 = vst [vmem:[#allocation113_spill] sm:$0xff] %v5382_v37  ;;  %v5392_v21 = vmul.f32 %v5260_v8, %v1066_v25 }
 0x301   : > { %8978 = vst [vmem:[#allocation120_spill] sm:$0xff] %v5437_v6 }
 0x302   : > { %1496 = vmatpush.msra.mxu1 %v5360_v18  ;;  %v5373_v29 = vpop.permute.xlu0 %1203  ;;  %v1046_v18 = vsel %vm8612_vm5, %v4734_v44, %v4959_v54  ;;  %8971 = vst [vmem:[#allocation115_spill] sm:$0xff] %v5392_v21 }
 0x303   : > { %v1205_v9 = vsel %vm8614_vm12, %v5047_v4, %v5373_v29 }
 0x304   : > { %1497 = vmatpush.msra.mxu1 %v5366_v47  ;;  %v5389_v62 = vmul.f32 %v5182_v17, %v1205_v9  ;;  %v5404_v9 = vmul.f32 %v5275_v26, %v1046_v18  ;;  %v5422_v18 = vmul.f32 %v5182_v17, %v1021_v5  ;;  %v974_v5 = vsel %vm8615_vm11, %v5109_v58, %v5277_v35 }
 0x305   : > { %v966_v4 = vpop.permute.xlu2 %965 }
 0x306   : > { %8970 = vst [vmem:[#allocation114_spill] sm:$0xff] %v5389_v62  ;;  %1498 = vmatpush.msra.mxu1 %v5382_v37  ;;  %v946_v47 = vpop.permute.xlu1 %945  ;;  %1527 = vmatpush.msra.mxu3 %v5389_v62  ;;  %v975_v44 = vsel %vm8615_vm11, %v966_v4, %v5109_v58  ;;  %v8985_v58 = vld [vmem:[#allocation79_spill] sm:$0xff] }
 0x307   : > { %8972 = vst [vmem:[#allocation116_spill] sm:$0xff] %v5404_v9  ;;  %v955_v25 = vsel %vm8612_vm5, %v946_v47, %v5063_v49  ;;  %v5410_v37 = vmul.f32 %v4814_v15, %v975_v44  ;;  %v8976_v44 = vld [vmem:[#allocation37_spill] sm:$0xff]  ;;  %v954_v35 = vsel %vm8612_vm5, %v5063_v49, %v8985_v58 }
 0x308   : > { %1499 = vmatpush.msra.mxu1 %v5392_v21  ;;  %8974 = vst [vmem:[#allocation118_spill] sm:$0xff] %v5422_v18  ;;  %v5425_v62 = vmul.f32 %v4886_v19, %v955_v25  ;;  %v896_v21 = vsel %vm8613_vm3, %v8976_v44, %v4969_v40  ;;  %v8979_v25 = vld [vmem:[#allocation34_spill] sm:$0xff] }
 0x309   : > { %8973 = vst [vmem:[#allocation117_spill] sm:$0xff] %v5410_v37  ;;  %1464 = vmatpush.msrb.mxu2 %v5410_v37  ;;  %vm582_vm14 = vcmp.lt.s32.totalorder %v8979_v25, 48  ;;  %vm550_vm0 = vcmp.ge.s32.totalorder %v8979_v25, 0  ;;  %vm566_vm6 = vcmp.lt.s32.totalorder %v8979_v25, 56  ;;  %vm522_vm2 = vcmp.lt.s32.totalorder %v8979_v25, 64 }
 0x30a   : > { %8975 = vst [vmem:[#allocation119_spill] sm:$0xff] %v5425_v62  ;;  %1500 = vmatpush.msra.mxu1 %v5404_v9  ;;  %v8980_v9 = vld [vmem:[#allocation26_spill] sm:$0xff]  ;;  %vm586_vm7 = vmand %vm550_vm0, %vm582_vm14 }
 0x30b   : > { %8977 = vst [vmem:[#allocation37_spill] sm:$0xff] %v5434_v14  ;;  %1465 = vmatpush.msrb.mxu2 %v5425_v62  ;;  %v5447_v37 = vmul.f32 %v8980_v9, %v896_v21  ;;  %v5470_v9 = vmul.f32 %v4744_v48, %v4525_v1  ;;  %v8989_v62 = vld [vmem:[#allocation67_spill] sm:$0xff]  ;;  %v5491_v1 = vmul.f32 %v4814_v15, %v868_v52  ;;  %vm570_vm13 = vmand %vm550_vm0, %vm566_vm6 }
 0x30c   : > { %1501 = vmatpush.msra.mxu1 %v5422_v18  ;;  %v5459_v18 = vmul.f32 %v5212_v27, %v4654_v23  ;;  %v976_v52 = vsel %vm8615_vm11, %v5302_v36, %v966_v4  ;;  %v8997_v36 = vld [vmem:[#allocation44_spill] sm:$0xff]  ;;  %vm5558_vm4 = vmand %vm550_vm0, %vm522_vm2 }
 0x30d   : > { %8981 = vst [vmem:[#allocation121_spill] sm:$0xff] %v5447_v37  ;;  %1466 = vmatpush.msrb.mxu2 %v5434_v14  ;;  %v5455_v38 = vpop.permute.xlu2 %892  ;;  %v5478_v14 = vmul.f32 %v5260_v8, %v974_v5  ;;  %v8992_v5 = vld [vmem:[#allocation66_spill] sm:$0xff]  ;;  %v5527_v4 = vmul.f32 %v4934_v0, %v8997_v36  ;;  %v5548_v15 = vmul.f32 %v5000_v41, %v976_v52  ;;  %vm5591_vm9 = vmand %vm358_vm1, %vm522_vm2 }
 0x30e   : > { %1502 = vmatpush.msra.mxu1 %v5437_v6  ;;  %8984 = vst [vmem:[#allocation59_spill] sm:$0xff] %v5459_v18  ;;  %v5466_v21 = vpop.permute.xlu1 %993  ;;  %v8987_v6 = vld [vmem:[#allocation56_spill] sm:$0xff]  ;;  %vm526_vm1 = vmand %vm366_vm15, %vm522_vm2 }
 0x30f   : > { %8986 = vst [vmem:[#allocation58_spill] sm:$0xff] %v5470_v9  ;;  %v916_v23 = vsel %vm8614_vm12, %v4777_v59, %v8987_v6  ;;  %v1003_v49 = vsel %vm8613_vm3, %v5466_v21, %v8989_v62  ;;  %1467 = vmatpush.msrb.mxu2 %v5447_v37  ;;  %v8991_v59 = vld [vmem:[#allocation50_spill] sm:$0xff]  ;;  %v8994_v62 = vld [vmem:[#allocation43_spill] sm:$0xff]  ;;  %v5505_v37 = vmul.f32 %v5275_v26, %v954_v35  ;;  %v5530_v35 = vsel %vm586_vm7, 1.0, %v8914_v51 }
 0x310   : > { %8988 = vst [vmem:[#allocation79_spill] sm:$0xff] %v5478_v14  ;;  %1503 = vmatpush.msra.mxu1 %v5459_v18  ;;  %v847_v48 = vsel %vm8612_vm5, %v8992_v5, %v8991_v59  ;;  %v5498_v6 = vmul.f32 %v4931_v56, %v1003_v49  ;;  %v1300_v18 = vsel %vm8614_vm12, %v5027_v16, %v8994_v62  ;;  %v9000_v62 = vld [vmem:[#allocation51_spill] sm:$0xff] }
 0x311   : > { %8990 = vst [vmem:[#allocation67_spill] sm:$0xff] %v5491_v1  ;;  %1468 = vmatpush.msrb.mxu2 %v5470_v9  ;;  %v5517_v49 = vmul.f32 %v5182_v17, %v916_v23  ;;  %v895_v16 = vsel %vm8613_vm3, %v4969_v40, %v5455_v38  ;;  %v1280_v23 = vsel %vm8613_vm3, %v4983_v42, %v9000_v62  ;;  %v5552_v42 = vsel %vm570_vm13, 1.0, %v8914_v51 }
 0x312   : > { %8993 = vst [vmem:[#allocation50_spill] sm:$0xff] %v5498_v6  ;;  %1504 = vmatpush.msra.mxu1 %v5478_v14  ;;  %1422 = vmatpush.msrb.mxu0 %v5498_v6  ;;  %v5537_v17 = vmul.f32 %v4886_v19, %v847_v48  ;;  %v956_v40 = vsel %vm8612_vm5, %v5350_v31, %v946_v47 }
 0x313   : > { %8995 = vst [vmem:[#allocation66_spill] sm:$0xff] %v5505_v37  ;;  %1469 = vmatpush.msrb.mxu2 %v5491_v1  ;;  %v5545_v36 = vmul.f32 %v5530_v35, %v1300_v18  ;;  %v918_v47 = vsel %vm8614_vm12, %v5356_v46, %v4940_v55  ;;  %v5567_v18 = vmul.f32 %v5207_v53, %v895_v16  ;;  %v1154_v55 = vpop.permute.xlu0 %1153  ;;  %v5610_v1 = vsel %vm5558_vm4, 1.0, %v8914_v51 }
 0x314   : > { %8996 = vst [vmem:[#allocation43_spill] sm:$0xff] %v5517_v49  ;;  %1505 = vmatpush.msra.mxu1 %v5505_v37  ;;  %1423 = vmatpush.msrb.mxu0 %v5527_v4  ;;  %v5574_v62 = vmul.f32 %v5552_v42, %v1280_v23  ;;  %v867_v19 = vsel %vm8615_vm11, %v8982_v28, %v5243_v20  ;;  %v9011_v28 = vld [vmem:[#allocation68_spill] sm:$0xff] }
 0x315   : > { %8998 = vst [vmem:[#allocation44_spill] sm:$0xff] %v5527_v4  ;;  %v5570_v52 = vpop.permute.xlu2 %886  ;;  %1470 = vmatpush.msrb.mxu2 %v5537_v17  ;;  %v5581_v37 = vmul.f32 %v5016_v61, %v956_v40  ;;  %v9015_v20 = vld [vmem:[#allocation60_spill] sm:$0xff]  ;;  %v5617_v9 = vmul.f32 %v4877_v63, %v918_v47  ;;  %v5629_v48 = vmul.f32 %v5260_v8, %v867_v19 }
 0x316   : > { %8999 = vst [vmem:[#allocation122_spill] sm:$0xff] %v5530_v35  ;;  %1506 = vmatpush.msra.mxu1 %v5517_v49  ;;  %v1184_v16 = vpop.permute.xlu1 %1183  ;;  %1424 = vmatpush.msrb.mxu0 %v5548_v15  ;;  %v5585_v49 = vld [vmem:[#allocation6] sm:$0xff]  ;;  %v897_v14 = vsel %vm8613_vm3, %v5570_v52, %v8976_v44 }
 0x317   : > { %9001 = vst [vmem:[#allocation51_spill] sm:$0xff] %v5537_v17  ;;  %1562 = vmatpush.msra.mxu2 %v5545_v36  ;;  %v1185_v40 = vsel %vm8613_vm3, %v9011_v28, %v1184_v16  ;;  %v1249_v28 = vsel %vm8615_vm11, %v4971_v50, %v9015_v20  ;;  %v9020_v20 = vld [vmem:[#allocation18_spill] sm:$0xff] }
 0x318   : > { %9002 = vst [vmem:[#allocation123_spill] sm:$0xff] %v5545_v36  ;;  %1507 = vmatpush.msra.mxu1 %v5567_v18  ;;  %v9012_v36 = vld [vmem:[#allocation14_spill] sm:$0xff]  ;;  %v5620_v44 = vmul.f32 %v5207_v53, %v1185_v40  ;;  %1425 = vmatpush.msrb.mxu0 %v5581_v37  ;;  %v5637_v47 = vmul.f32 %v5610_v1, %v9020_v20  ;;  %v5643_v40 = vsel %vm5591_vm9, 1.0, %v8914_v51  ;;  %v9025_v20 = vld [vmem:[#allocation20_spill] sm:$0xff] }
 0x319   : > { %9003 = vst [vmem:[#allocation124_spill] sm:$0xff] %v5548_v15  ;;  %v5605_v17 = vmul.f32 %v5212_v27, %v9012_v36  ;;  %1563 = vmatpush.msra.mxu2 %v5574_v62  ;;  %v9019_v36 = vld [vmem:[#allocation75_spill] sm:$0xff]  ;;  %v9023_v53 = vld [vmem:[#allocation62_spill] sm:$0xff]  ;;  %v5656_v63 = vmul.f32 %v5212_v27, %v9025_v20  ;;  %v5659_v23 = vmul.f32 %v5643_v40, %v1249_v28  ;;  %v9030_v28 = vld [vmem:[#allocation17_spill] sm:$0xff] }
 0x31a   : > { %9004 = vst [vmem:[#allocation125_spill] sm:$0xff] %v5552_v42  ;;  %v1158_v50 = vsel %vm8615_vm11, %v9019_v36, %v1154_v55  ;;  %1471 = vmatmul.f32.vlgmr.msrb.gmra.mxu2 %v5585_v49  ;;  %v1229_v19 = vsel %vm8612_vm5, %v4981_v24, %v9023_v53  ;;  %v5650_v36 = vmul.f32 %v4931_v56, %v897_v14  ;;  %v5664_v24 = vsel %vm526_vm1, 1.0, %v8914_v51 }
 0x31b   : > { %9007 = vst [vmem:[#allocation126_spill] sm:$0xff] %v5574_v62  ;;  %1508 = vmatpush.msra.mxu1 %v5605_v17  ;;  %1426 = vmatpush.msrb.mxu0 %v5617_v9  ;;  %v1208_v53 = vsel %vm8614_vm12, %v5373_v29, %v5192_v22  ;;  %v5671_v14 = vmul.f32 %v5260_v8, %v1158_v50 }
 0x31c   : > { %9008 = vst [vmem:[#allocation127_spill] sm:$0xff] %v5581_v37  ;;  %1528 = vmatpush.msra.mxu3 %v5620_v44  ;;  %1564 = vmatpush.msra.mxu2 %v5637_v47  ;;  %v5677_v27 = vmul.f32 %v4934_v0, %v9030_v28  ;;  %v5680_v56 = vmul.f32 %v5664_v24, %v1229_v19 }
 0x31d   : > { %9013 = vst [vmem:[#allocation68_spill] sm:$0xff] %v5605_v17  ;;  %1509 = vmatpush.msra.mxu1 %v5629_v48  ;;  %1427 = vmatpush.msrb.mxu0 %v5650_v36  ;;  %v5683_v51 = vpop.permute.xlu2 %840  ;;  %v1188_v22 = vsel %vm8613_vm3, %v1184_v16, %v5304_v30  ;;  %v5697_v19 = vmul.f32 %v5530_v35, %v1208_v53  ;;  %v9034_v53 = vld [vmem:[#allocation31_spill] sm:$0xff] }
 0x31e   : > { %9014 = vst [vmem:[#allocation128_spill] sm:$0xff] %v5610_v1  ;;  %1529 = vmatpush.msra.mxu3 %v5656_v63  ;;  %1565 = vmatpush.msra.mxu2 %v5659_v23  ;;  %v5688_v29 = vpop.permute.xlu1 %863  ;;  %v846_v50 = vsel %vm8612_vm5, %v8991_v59, %v5683_v51  ;;  %v5714_v59 = vmul.f32 %v5552_v42, %v1188_v22 }
 0x31f   : > { %9016 = vst [vmem:[#allocation60_spill] sm:$0xff] %v5617_v9  ;;  %1428 = vmatpush.msrb.mxu0 %v5677_v27  ;;  %v869_v28 = vsel %vm8615_vm11, %v5688_v29, %v8983_v43  ;;  %v5704_v30 = vmul.f32 %v5275_v26, %v846_v50  ;;  %v1157_v43 = vsel %vm8615_vm11, %v1154_v55, %v5324_v11  ;;  %v9036_v50 = vld [vmem:[#allocation47_spill] sm:$0xff]  ;;  %v9037_v55 = vld [vmem:[#allocation82_spill] sm:$0xff] }
 0x320   : > { %9017 = vst [vmem:[#allocation129_spill] sm:$0xff] %v5620_v44  ;;  %1530 = vmatpush.msra.mxu3 %v5671_v14  ;;  %1566 = vmatpush.msra.mxu2 %v5680_v56  ;;  %v5709_v16 = vmul.f32 %v5000_v41, %v869_v28  ;;  %v5727_v22 = vmul.f32 %v5610_v1, %v9034_v53  ;;  %v9038_v26 = vld [vmem:[#allocation54_spill] sm:$0xff]  ;;  %v9040_v41 = vld [vmem:[#allocation35_spill] sm:$0xff] }
 0x321   : > { %9018 = vst [vmem:[#allocation130_spill] sm:$0xff] %v5629_v48  ;;  %4080 = vmatmul.msk.f32.vlgmr.msra.gmra.mxu3 %vm8611_vm8, %v5331_v57  ;;  %1510 = vmatpush.msra.mxu1 %v5704_v30  ;;  %v5731_v28 = vmul.f32 %v5643_v40, %v1157_v43  ;;  %v1137_v8 = vsel %vm8612_vm5, %v5021_v7, %v9037_v55  ;;  %v9041_v7 = vld [vmem:[#allocation55_spill] sm:$0xff]  ;;  %v9042_v55 = vld [vmem:[#allocation69_spill] sm:$0xff] }
 0x322   : > { %9021 = vst [vmem:[#allocation75_spill] sm:$0xff] %v5637_v47  ;;  %1598 = vmatpush.msrb.mxu3 %v5175_v13  ;;  %1567 = vmatpush.msra.mxu2 %v5697_v19  ;;  %v1116_v0 = vsel %vm8614_vm12, %v4910_v45, %v9040_v41  ;;  %v5758_v25 = vmul.f32 %v5664_v24, %v1137_v8  ;;  %v9047_v45 = vld [vmem:[#allocation70_spill] sm:$0xff]  ;;  %v9048_v8 = vld [vmem:[#allocation105_spill] sm:$0xff] }
 0x323   : > { %9022 = vst [vmem:[#allocation18_spill] sm:$0xff] %v5643_v40  ;;  %1429 = vmatpush.msrb.mxu0 %v5709_v16  ;;  %1625 = vmatpush.msrb.mxu1 %v9036_v50  ;;  %v5769_v41 = vmul.f32 %v5530_v35, %v1116_v0  ;;  %v9052_v0 = vld [vmem:[#allocation57_spill] sm:$0xff] }
 0x324   : > { %9024 = vst [vmem:[#allocation62_spill] sm:$0xff] %v5650_v36  ;;  %1599 = vmatpush.msrb.mxu3 %v5195_v2  ;;  %1568 = vmatpush.msra.mxu2 %v5714_v59 }
 0x325   : > { %9026 = vst [vmem:[#allocation20_spill] sm:$0xff] %v5656_v63  ;;  %v5735_v11 = vpop.permute.xlu2 %842  ;;  %1626 = vmatpush.msrb.mxu1 %v9038_v26 }
 0x326   : > { %9027 = vst [vmem:[#allocation131_spill] sm:$0xff] %v5659_v23  ;;  %1600 = vmatpush.msrb.mxu3 %v5219_v60  ;;  %1569 = vmatpush.msra.mxu2 %v5727_v22  ;;  %v848_v53 = vsel %vm8612_vm5, %v5735_v11, %v8992_v5  ;;  %v9044_v5 = vld [vmem:[#allocation25_spill] sm:$0xff]  ;;  %v9053_v60 = vld [vmem:[#allocation72_spill] sm:$0xff] }
 0x327   : > { %9028 = vst [vmem:[#allocation132_spill] sm:$0xff] %v5664_v24  ;;  %v5747_v43 = vmul.f32 %v5016_v61, %v848_v53  ;;  %1627 = vmatpush.msrb.mxu1 %v9041_v7  ;;  %v1096_v53 = vsel %vm8613_vm3, %v4698_v33, %v9044_v5  ;;  %v9045_v61 = vld [vmem:[#allocation63_spill] sm:$0xff]  ;;  %v1065_v5 = vsel %vm8615_vm11, %v4908_v39, %v9052_v0  ;;  %v9058_v0 = vld [vmem:[#allocation74_spill] sm:$0xff] }
 0x328   : > { %9029 = vst [vmem:[#allocation133_spill] sm:$0xff] %v5671_v14  ;;  %1601 = vmatpush.msrb.mxu3 %v5249_v34  ;;  %1570 = vmatpush.msra.mxu2 %v5731_v28  ;;  %v9050_v34 = vld [vmem:[#allocation71_spill] sm:$0xff]  ;;  %v9057_v14 = vld [vmem:[#allocation73_spill] sm:$0xff]  ;;  %v5801_v39 = vmul.f32 %v5643_v40, %v1065_v5 }
 0x329   : > { %9031 = vst [vmem:[#allocation17_spill] sm:$0xff] %v5677_v27  ;;  %1511 = vmatmul.f32.vlgmr.msra.gmra.mxu1 %v5585_v49  ;;  %1430 = vmatpush.msrb.mxu0 %v5747_v43  ;;  %v9051_v33 = vld [vmem:[#allocation91_spill] sm:$0xff]  ;;  %v9060_v5 = vld [vmem:[#allocation109_spill] sm:$0xff] }
 0x32a   : > { %9032 = vst [vmem:[#allocation134_spill] sm:$0xff] %v5697_v19  ;;  %1602 = vmatpush.msrb.mxu3 %v5267_v32  ;;  %1638 = vmatpush.msrb.mxu2 %v9042_v55  ;;  %v9049_v32 = vld [vmem:[#allocation65_spill] sm:$0xff] }
 0x32b   : > { %9033 = vst [vmem:[#allocation135_spill] sm:$0xff] %v5709_v16  ;;  %1628 = vmatpush.msrb.mxu1 %v9045_v61  ;;  %1535 = vmatpush.msra.mxu0 %v5758_v25 }
 0x32c   : > { %9035 = vst [vmem:[#allocation31_spill] sm:$0xff] %v5727_v22  ;;  %1603 = vmatpush.msrb.mxu3 %v5280_v3  ;;  %1639 = vmatpush.msrb.mxu2 %v9047_v45  ;;  %v5776_v3 = vmul.f32 %v5552_v42, %v1096_v53  ;;  %v9054_v53 = vld [vmem:[#allocation107_spill] sm:$0xff] }
 0x32d   : > { %9039 = vst [vmem:[#allocation47_spill] sm:$0xff] %v5747_v43  ;;  %1629 = vmatpush.msrb.mxu1 %v9049_v32  ;;  %1536 = vmatpush.msra.mxu0 %v5769_v41 }
 0x32e   : > { %9043 = vst [vmem:[#allocation82_spill] sm:$0xff] %v5758_v25  ;;  %1604 = vmatpush.msrb.mxu3 %v9048_v8  ;;  %1640 = vmatpush.msrb.mxu2 %v9050_v34  ;;  %v9055_v8 = vld [vmem:[#allocation15_spill] sm:$0xff] }
 0x32f   : > { %9046 = vst [vmem:[#allocation54_spill] sm:$0xff] %v5769_v41  ;;  %1630 = vmatpush.msrb.mxu1 %v9051_v33  ;;  %1537 = vmatpush.msra.mxu0 %v5776_v3  ;;  %v5792_v2 = vmul.f32 %v5610_v1, %v9055_v8 }
 0x330   : > { %1605 = vmatpush.msrb.mxu3 %v5498_v6  ;;  %1641 = vmatpush.msrb.mxu2 %v9053_v60  ;;  %v9056_v6 = vld [vmem:[#allocation49_spill] sm:$0xff] }
 0x331   : > { %1631 = vmatpush.msrb.mxu1 %v9054_v53  ;;  %v1045_v13 = vsel %vm8612_vm5, %v4959_v54, %v9056_v6  ;;  %1431 = vmatmul.f32.vlgmr.msrb.gmra.mxu0 %v5585_v49  ;;  %v9059_v54 = vld [vmem:[#allocation103_spill] sm:$0xff] }
 0x332   : > { %1606 = vmatpush.msrb.mxu3 %v5527_v4  ;;  %1642 = vmatpush.msrb.mxu2 %v9057_v14  ;;  %v5808_v8 = vmul.f32 %v5664_v24, %v1045_v13  ;;  %v1004_v6 = vsel %vm8613_vm3, %v9059_v54, %v5466_v21  ;;  %v9061_v4 = vld [vmem:[#allocation76_spill] sm:$0xff]  ;;  %v9064_v13 = vld [vmem:[#allocation77_spill] sm:$0xff]  ;;  %v9066_v21 = vld [vmem:[#allocation111_spill] sm:$0xff] }
 0x333   : > { %1538 = vmatpush.msra.mxu0 %v5792_v2  ;;  %1632 = vmatpush.msrb.mxu1 %v5329_v12  ;;  %v9067_v54 = vld [vmem:[#allocation78_spill] sm:$0xff] }
 0x334   : > { %1607 = vmatpush.msrb.mxu3 %v5548_v15  ;;  %1643 = vmatpush.msrb.mxu2 %v9058_v0  ;;  %v9062_v15 = vld [vmem:[#allocation104_spill] sm:$0xff]  ;;  %v9063_v0 = vld [vmem:[#allocation110_spill] sm:$0xff] }
 0x335   : > { %1539 = vmatpush.msra.mxu0 %v5801_v39  ;;  %1633 = vmatpush.msrb.mxu1 %v9060_v5  ;;  %v5820_v12 = vmul.f32 %v5530_v35, %v9062_v15  ;;  %v9068_v15 = vld [vmem:[#allocation112_spill] sm:$0xff] }
 0x336   : > { %1608 = vmatpush.msrb.mxu3 %v5581_v37  ;;  %1644 = vmatpush.msrb.mxu2 %v9061_v4  ;;  %v5827_v37 = vmul.f32 %v5552_v42, %v1004_v6  ;;  %v9069_v6 = vld [vmem:[#allocation117_spill] sm:$0xff] }
 0x337   : > { %1678 = vmatpush.msra.mxu1 %v9063_v0  ;;  %1540 = vmatpush.msra.mxu0 %v5808_v8 }
 0x338   : > { %1609 = vmatpush.msrb.mxu3 %v5617_v9  ;;  %1645 = vmatpush.msrb.mxu2 %v9064_v13  ;;  %9065 = vst [vmem:[#allocation35_spill] sm:$0xff] %v5827_v37  ;;  %v5837_v9 = vmul.f32 %v5610_v1, %v9025_v20  ;;  %v9070_v13 = vld [vmem:[#allocation106_spill] sm:$0xff]  ;;  %v9072_v20 = vld [vmem:[#allocation119_spill] sm:$0xff] }
 0x339   : > { %1679 = vmatpush.msra.mxu1 %v9066_v21  ;;  %1541 = vmatpush.msra.mxu0 %v5820_v12  ;;  %v5843_v21 = vmul.f32 %v5643_v40, %v9070_v13  ;;  %v9074_v13 = vld [vmem:[#allocation115_spill] sm:$0xff] }
 0x33a   : > { %1610 = vmatpush.msrb.mxu3 %v5650_v36  ;;  %1646 = vmatpush.msrb.mxu2 %v9067_v54  ;;  %v953_v36 = vsel %vm8612_vm5, %v8985_v58, %v5350_v31  ;;  %v9076_v31 = vld [vmem:[#allocation37_spill] sm:$0xff]  ;;  %v898_v58 = vsel %vm8613_vm3, %v5455_v38, %v5570_v52  ;;  %v9084_v38 = vld [vmem:[#allocation58_spill] sm:$0xff] }
 0x33b   : > { %1680 = vmatpush.msra.mxu1 %v9068_v15  ;;  %1542 = vmatpush.msra.mxu0 %v5827_v37  ;;  %v9071_v15 = vld [vmem:[#allocation113_spill] sm:$0xff]  ;;  %v5860_v54 = vmul.f32 %v5664_v24, %v953_v36  ;;  %v9081_v36 = vld [vmem:[#allocation28_spill] sm:$0xff]  ;;  %v9085_v52 = vld [vmem:[#allocation94_spill] sm:$0xff] }
 0x33c   : > { %1611 = vmatpush.msrb.mxu3 %v5677_v27  ;;  %1647 = vmatpush.msrb.mxu2 %v9069_v6  ;;  %v9073_v27 = vld [vmem:[#allocation56_spill] sm:$0xff] }
 0x33d   : > { %1681 = vmatpush.msra.mxu1 %v9071_v15  ;;  %1543 = vmatpush.msra.mxu0 %v5837_v9  ;;  %v919_v6 = vsel %vm8614_vm12, %v9073_v27, %v5356_v46  ;;  %9075 = vst [vmem:[#allocation25_spill] sm:$0xff] %v5860_v54  ;;  %v9080_v46 = vld [vmem:[#allocation121_spill] sm:$0xff] }
 0x33e   : > { %1612 = vmatpush.msrb.mxu3 %v5709_v16  ;;  %1648 = vmatpush.msrb.mxu2 %v9072_v20  ;;  %v9077_v16 = vld [vmem:[#allocation24_spill] sm:$0xff]  ;;  %v5871_v27 = vmul.f32 %v5530_v35, %v919_v6  ;;  %v866_v6 = vsel %vm8615_vm11, %v9085_v52, %v5688_v29  ;;  %v9086_v35 = vld [vmem:[#allocation29_spill] sm:$0xff]  ;;  %v9092_v29 = vld [vmem:[#allocation59_spill] sm:$0xff] }
 0x33f   : > { %1682 = vmatpush.msra.mxu1 %v9074_v13  ;;  %1544 = vmatpush.msra.mxu0 %v5843_v21  ;;  %v9078_v20 = vld [vmem:[#allocation116_spill] sm:$0xff]  ;;  %v5901_v52 = vmul.f32 %v5643_v40, %v866_v6  ;;  %v9100_v6 = vld [vmem:[#allocation66_spill] sm:$0xff] }
 0x340   : > { %1613 = vmatpush.msrb.mxu3 %v5747_v43  ;;  %1649 = vmatpush.msrb.mxu2 %v9076_v31  ;;  %9079 = vst [vmem:[#allocation63_spill] sm:$0xff] %v5871_v27  ;;  %v9082_v43 = vld [vmem:[#allocation118_spill] sm:$0xff]  ;;  %v5878_v31 = vmul.f32 %v5552_v42, %v898_v58  ;;  %v845_v42 = vsel %vm8612_vm5, %v5683_v51, %v5735_v11  ;;  %v9098_v51 = vld [vmem:[#allocation123_spill] sm:$0xff]  ;;  %v9099_v11 = vld [vmem:[#allocation80_spill] sm:$0xff] }
 0x341   : > { %1683 = vmatpush.msra.mxu1 %v9078_v20  ;;  %1545 = vmatpush.msra.mxu0 %v5860_v54  ;;  %v9087_v20 = vld [vmem:[#allocation120_spill] sm:$0xff]  ;;  %9093 = vst [vmem:[#allocation107_spill] sm:$0xff] %v5901_v52  ;;  %v5917_v40 = vld [vmem:[#allocation6 + $0x10] sm:$0xff] }
 0x342   : > { %1665 = vmatpush.msra.mxu3 %v9077_v16  ;;  %1650 = vmatpush.msrb.mxu2 %v9080_v46  ;;  %9083 = vst [vmem:[#allocation70_spill] sm:$0xff] %v5878_v31  ;;  %v9088_v46 = vld [vmem:[#allocation67_spill] sm:$0xff] }
 0x343   : > { %1684 = vmatpush.msra.mxu1 %v9082_v43  ;;  %1546 = vmatpush.msra.mxu0 %v5871_v27  ;;  %v9089_v43 = vld [vmem:[#allocation16_spill] sm:$0xff] }
 0x344   : > { %1666 = vmatpush.msra.mxu3 %v9081_v36  ;;  %1651 = vmatpush.msrb.mxu2 %v9084_v38  ;;  %v5892_v58 = vmul.f32 %v5610_v1, %v9089_v43  ;;  %v9091_v38 = vld [vmem:[#allocation39_spill] sm:$0xff]  ;;  %v5908_v1 = vmul.f32 %v5664_v24, %v845_v42  ;;  %v9104_v24 = vld [vmem:[#allocation86_spill] sm:$0xff] }
 0x345   : > { %1685 = vmatpush.msra.mxu1 %v9087_v20  ;;  %1547 = vmatpush.msra.mxu0 %v5878_v31  ;;  %v9094_v20 = vld [vmem:[#allocation51_spill] sm:$0xff] }
 0x346   : > { %1667 = vmatpush.msra.mxu3 %v9086_v35  ;;  %1652 = vmatpush.msrb.mxu2 %v9088_v46  ;;  %9090 = vst [vmem:[#allocation57_spill] sm:$0xff] %v5892_v58  ;;  %v9095_v46 = vld [vmem:[#allocation48_spill] sm:$0xff]  ;;  %v9096_v43 = vld [vmem:[#allocation79_spill] sm:$0xff] }
 0x347   : > { %1686 = vmatpush.msra.mxu1 %v9092_v29  ;;  %1548 = vmatpush.msra.mxu0 %v5892_v58  ;;  %9097 = vst [vmem:[#allocation49_spill] sm:$0xff] %v5908_v1  ;;  %v9102_v42 = vld [vmem:[#allocation43_spill] sm:$0xff] }
 0x348   : > { %1668 = vmatpush.msra.mxu3 %v9091_v38  ;;  %1653 = vmatpush.msrb.mxu2 %v9094_v20 }
 0x349   : > { %1687 = vmatpush.msra.mxu1 %v9096_v43  ;;  %1549 = vmatpush.msra.mxu0 %v5901_v52 }
 0x34a   : > { %1669 = vmatpush.msra.mxu3 %v9095_v46  ;;  %4081 = vmatmul.msk.f32.vlgmr.msra.gmra.mxu2 %vm8611_vm8, %v5331_v57  ;;  %v9103_v57 = vld [vmem:[#allocation83_spill] sm:$0xff] }
 0x34b   : > { %1745 = vmatpush.msra.mxu2 %v9098_v51  ;;  %1688 = vmatpush.msra.mxu1 %v9100_v6 }
 0x34c   : > { %1670 = vmatpush.msra.mxu3 %v9099_v11  ;;  %1550 = vmatpush.msra.mxu0 %v5908_v1 }
 0x34d   : > { %1746 = vmatpush.msra.mxu2 %v5574_v62  ;;  %1689 = vmatpush.msra.mxu1 %v9102_v42  ;;  %v1594_v62 = vld [vmem:[#allocation6 + $0x18] sm:$0xff] }
 0x34e   : > { %1671 = vmatpush.msra.mxu3 %v9101_v10  ;;  %1718 = vmatpush.msrb.mxu0 %v5758_v25  ;;  %v9105_v25 = vld [vmem:[#allocation88_spill] sm:$0xff] }
 0x34f   : > { %1614 = vmatmul.f32.vlgmr.msrb.gmra.mxu3 %v5917_v40  ;;  %1747 = vmatpush.msra.mxu2 %v5637_v47 }
 0x350   : > { %1672 = vmatpush.msra.mxu3 %v9103_v57  ;;  %1690 = vmatpush.msra.mxu1 %v5567_v18 }
 0x351   : > { %1719 = vmatpush.msrb.mxu0 %v5769_v41  ;;  %1748 = vmatpush.msra.mxu2 %v5659_v23  ;;  %v9106_v41 = vld [vmem:[#allocation93_spill] sm:$0xff] }
 0x352   : > { %1673 = vmatpush.msra.mxu3 %v9104_v24  ;;  %1691 = vmatpush.msra.mxu1 %v5605_v17  ;;  %v9107_v17 = vld [vmem:[#allocation96_spill] sm:$0xff] }
 0x353   : > { %1720 = vmatpush.msrb.mxu0 %v5776_v3  ;;  %1749 = vmatpush.msra.mxu2 %v5680_v56 }
 0x354   : > { %1705 = vmatpush.msrb.mxu3 %v9105_v25  ;;  %1692 = vmatpush.msra.mxu1 %v5629_v48  ;;  %v9108_v48 = vld [vmem:[#allocation99_spill] sm:$0xff] }
 0x355   : > { %1721 = vmatpush.msrb.mxu0 %v5792_v2  ;;  %4082 = vmatmul.msk.f32.vlgmr.msrb.gmra.mxu1 %vm8611_vm8, %v1594_v62 }
 0x356   : > { %1706 = vmatpush.msrb.mxu3 %v9106_v41  ;;  %1750 = vmatpush.msra.mxu2 %v5697_v19  ;;  %v9109_v19 = vld [vmem:[#allocation102_spill] sm:$0xff] }
 0x357   : > { %1693 = vmatpush.msra.mxu1 %v5704_v30  ;;  %1722 = vmatpush.msrb.mxu0 %v5801_v39 }
 0x358   : > { %1707 = vmatpush.msrb.mxu3 %v9107_v17  ;;  %1751 = vmatpush.msra.mxu2 %v5714_v59 }
 0x359   : > { %1812 = vmatpush.msrb.mxu1 %v9036_v50  ;;  %1723 = vmatpush.msrb.mxu0 %v5808_v8 }
 0x35a   : > { %1708 = vmatpush.msrb.mxu3 %v9108_v48  ;;  %1752 = vmatpush.msra.mxu2 %v5727_v22  ;;  %v9110_v22 = vld [vmem:[#allocation114_spill] sm:$0xff] }
 0x35b   : > { %1813 = vmatpush.msrb.mxu1 %v9038_v26  ;;  %1724 = vmatpush.msrb.mxu0 %v5820_v12 }
 0x35c   : > { %1709 = vmatpush.msrb.mxu3 %v9109_v19  ;;  %1753 = vmatpush.msra.mxu2 %v5731_v28 }
 0x35d   : > { %1814 = vmatpush.msrb.mxu1 %v9041_v7  ;;  %1551 = vmatmul.f32.vlgmr.msra.gmra.mxu0 %v5585_v49  ;;  %v9111_v49 = vld [vmem:[#allocation133_spill] sm:$0xff] }
 0x35e   : > { %1654 = vmatmul.f32.vlgmr.msrb.gmra.mxu2 %v5917_v40  ;;  %4083 = vmatmul.msk.f32.vlgmr.msra.gmra.mxu3 %vm8611_vm8, %v1594_v62 }
 0x35f   : > { %1725 = vmatpush.msrb.mxu0 %v5827_v37  ;;  %1825 = vmatpush.msrb.mxu2 %v9042_v55 }
 0x360   : > { %1710 = vmatpush.msrb.mxu3 %v9110_v22  ;;  %1815 = vmatpush.msrb.mxu1 %v9045_v61 }
 0x361   : > { %1726 = vmatpush.msrb.mxu0 %v5837_v9  ;;  %1826 = vmatpush.msrb.mxu2 %v9047_v45 }
 0x362   : > { %1711 = vmatpush.msrb.mxu3 %v5620_v44  ;;  %1816 = vmatpush.msrb.mxu1 %v9049_v32  ;;  %v9112_v32 = vld [vmem:[#allocation84_spill] sm:$0xff] }
 0x363   : > { %1727 = vmatpush.msrb.mxu0 %v5843_v21  ;;  %1827 = vmatpush.msrb.mxu2 %v9050_v34  ;;  %v9113_v34 = vld [vmem:[#allocation108_spill] sm:$0xff] }
 0x364   : > { %1712 = vmatpush.msrb.mxu3 %v5656_v63  ;;  %1817 = vmatpush.msrb.mxu1 %v9051_v33  ;;  %v9114_v33 = vld [vmem:[#allocation87_spill] sm:$0xff] }
 0x365   : > { %1728 = vmatpush.msrb.mxu0 %v5860_v54  ;;  %1828 = vmatpush.msrb.mxu2 %v9053_v60  ;;  %v9115_v54 = vld [vmem:[#allocation74_spill] sm:$0xff] }
 0x366   : > { %1713 = vmatpush.msrb.mxu3 %v9111_v49  ;;  %1818 = vmatpush.msrb.mxu1 %v9054_v53 }
 0x367   : > { %4084 = vmatmul.msk.f32.vlgmr.msrb.gmra.mxu3 %vm8611_vm8, %v1594_v62  ;;  %1729 = vmatpush.msrb.mxu0 %v5871_v27  ;;  %v9116_v27 = vld [vmem:[#allocation92_spill] sm:$0xff] }
 0x368   : > { %1785 = vmatpush.msra.mxu3 %v9112_v32  ;;  %1829 = vmatpush.msrb.mxu2 %v9057_v14 }
 0x369   : > { %1819 = vmatpush.msrb.mxu1 %v9113_v34  ;;  %1730 = vmatpush.msrb.mxu0 %v5878_v31  ;;  %v9117_v31 = vld [vmem:[#allocation95_spill] sm:$0xff] }
 0x36a   : > { %1786 = vmatpush.msra.mxu3 %v9114_v33  ;;  %1830 = vmatpush.msrb.mxu2 %v9115_v54  ;;  %v9118_v33 = vld [vmem:[#allocation77_spill] sm:$0xff]  ;;  %v9119_v54 = vld [vmem:[#allocation111_spill] sm:$0xff] }
 0x36b   : > { %4085 = vmatmul.msk.f32.vlgmr.msra.gmra.mxu2 %vm8611_vm8, %v1594_v62  ;;  %1820 = vmatpush.msrb.mxu1 %v9060_v5  ;;  %v9120_v62 = vld [vmem:[#allocation98_spill] sm:$0xff] }
 0x36c   : > { %1694 = vmatmul.f32.vlgmr.msra.gmra.mxu1 %v5917_v40  ;;  %1731 = vmatpush.msrb.mxu0 %v5892_v58  ;;  %v9121_v5 = vld [vmem:[#allocation78_spill] sm:$0xff]  ;;  %v9122_v58 = vld [vmem:[#allocation112_spill] sm:$0xff] }
 0x36d   : > { %1787 = vmatpush.msra.mxu3 %v9116_v27  ;;  %1831 = vmatpush.msrb.mxu2 %v9061_v4 }
 0x36e   : > { %1865 = vmatpush.msra.mxu1 %v9063_v0  ;;  %1732 = vmatpush.msrb.mxu0 %v5901_v52  ;;  %v9123_v0 = vld [vmem:[#allocation101_spill] sm:$0xff] }
 0x36f   : > { %1788 = vmatpush.msra.mxu3 %v9117_v31  ;;  %1832 = vmatpush.msrb.mxu2 %v9118_v33  ;;  %v9124_v52 = vld [vmem:[#allocation117_spill] sm:$0xff] }
 0x370   : > { %1866 = vmatpush.msra.mxu1 %v9119_v54  ;;  %1733 = vmatpush.msrb.mxu0 %v5908_v1  ;;  %v9125_v54 = vld [vmem:[#allocation105_spill] sm:$0xff]  ;;  %v9126_v1 = vld [vmem:[#allocation119_spill] sm:$0xff] }
 0x371   : > { %1789 = vmatpush.msra.mxu3 %v9120_v62  ;;  %1833 = vmatpush.msrb.mxu2 %v9121_v5 }
 0x372   : > { %1867 = vmatpush.msra.mxu1 %v9122_v58  ;;  %1734 = vmatmul.f32.vlgmr.msrb.gmra.mxu0 %v5917_v40  ;;  %v9127_v58 = vld [vmem:[#allocation50_spill] sm:$0xff]  ;;  %v9128_v40 = vld [vmem:[#allocation37_spill] sm:$0xff] }
 0x373   : > { %1852 = vmatpush.msra.mxu0 %v9077_v16  ;;  %1790 = vmatpush.msra.mxu3 %v9123_v0  ;;  %v9129_v16 = vld [vmem:[#allocation116_spill] sm:$0xff] }
 0x374   : > { %1834 = vmatpush.msrb.mxu2 %v9124_v52  ;;  %1868 = vmatpush.msra.mxu1 %v9071_v15  ;;  %v9130_v52 = vld [vmem:[#allocation44_spill] sm:$0xff]  ;;  %v9131_v15 = vld [vmem:[#allocation121_spill] sm:$0xff] }
 0x375   : > { %1853 = vmatpush.msra.mxu0 %v9081_v36  ;;  %1791 = vmatpush.msra.mxu3 %v9125_v54  ;;  %v9132_v36 = vld [vmem:[#allocation118_spill] sm:$0xff] }
 0x376   : > { %1835 = vmatpush.msrb.mxu2 %v9126_v1  ;;  %1869 = vmatpush.msra.mxu1 %v9074_v13  ;;  %v9133_v1 = vld [vmem:[#allocation124_spill] sm:$0xff]  ;;  %v9134_v13 = vld [vmem:[#allocation58_spill] sm:$0xff] }
 0x377   : > { %1854 = vmatpush.msra.mxu0 %v9086_v35  ;;  %1792 = vmatpush.msra.mxu3 %v9127_v58  ;;  %v9135_v35 = vld [vmem:[#allocation120_spill] sm:$0xff] }
 0x378   : > { %1836 = vmatpush.msrb.mxu2 %v9128_v40  ;;  %1870 = vmatpush.msra.mxu1 %v9129_v16  ;;  %v9136_v40 = vld [vmem:[#allocation127_spill] sm:$0xff] }
 0x379   : > { %1855 = vmatpush.msra.mxu0 %v9091_v38  ;;  %1793 = vmatpush.msra.mxu3 %v9130_v52  ;;  %v9137_v16 = vld [vmem:[#allocation67_spill] sm:$0xff] }
 0x37a   : > { %1837 = vmatpush.msrb.mxu2 %v9131_v15  ;;  %1871 = vmatpush.msra.mxu1 %v9132_v36  ;;  %v9138_v15 = vld [vmem:[#allocation60_spill] sm:$0xff] }
 0x37b   : > { %1856 = vmatpush.msra.mxu0 %v9095_v46  ;;  %1794 = vmatpush.msra.mxu3 %v9133_v1 }
 0x37c   : > { %1838 = vmatpush.msrb.mxu2 %v9134_v13  ;;  %1872 = vmatpush.msra.mxu1 %v9135_v35  ;;  %v9139_v35 = vld [vmem:[#allocation62_spill] sm:$0xff] }
 0x37d   : > { %1857 = vmatpush.msra.mxu0 %v9099_v11  ;;  %1795 = vmatpush.msra.mxu3 %v9136_v40 }
 0x37e   : > { %1839 = vmatpush.msrb.mxu2 %v9137_v16  ;;  %1873 = vmatpush.msra.mxu1 %v9092_v29  ;;  %v9140_v16 = vld [vmem:[#allocation126_spill] sm:$0xff]  ;;  %v9141_v29 = vld [vmem:[#allocation17_spill] sm:$0xff] }
 0x37f   : > { %1858 = vmatpush.msra.mxu0 %v9101_v10  ;;  %1796 = vmatpush.msra.mxu3 %v9138_v15  ;;  %v9142_v10 = vld [vmem:[#allocation82_spill] sm:$0xff] }
 0x380   : > { %1840 = vmatpush.msrb.mxu2 %v9094_v20  ;;  %1874 = vmatpush.msra.mxu1 %v9096_v43  ;;  %v9143_v43 = vld [vmem:[#allocation135_spill] sm:$0xff] }
 0x381   : > { %1859 = vmatpush.msra.mxu0 %v9103_v57  ;;  %1797 = vmatpush.msra.mxu3 %v9139_v35 }
 0x382   : > { %1932 = vmatpush.msra.mxu2 %v9098_v51  ;;  %1875 = vmatpush.msra.mxu1 %v9100_v6  ;;  %v9144_v51 = vld [vmem:[#allocation54_spill] sm:$0xff]  ;;  %v9145_v6 = vld [vmem:[#allocation47_spill] sm:$0xff] }
 0x383   : > { %1860 = vmatpush.msra.mxu0 %v9104_v24  ;;  %1798 = vmatpush.msra.mxu3 %v9141_v29  ;;  %v9146_v24 = vld [vmem:[#allocation68_spill] sm:$0xff] }
 0x384   : > { %1933 = vmatpush.msra.mxu2 %v9140_v16  ;;  %1876 = vmatpush.msra.mxu1 %v9102_v42 }
 0x385   : > { %1905 = vmatpush.msrb.mxu0 %v9142_v10  ;;  %1799 = vmatpush.msra.mxu3 %v9143_v43  ;;  %v9147_v10 = vld [vmem:[#allocation130_spill] sm:$0xff] }
 0x386   : > { %1934 = vmatpush.msra.mxu2 %v5637_v47  ;;  %1877 = vmatpush.msra.mxu1 %v5567_v18  ;;  %v6043_v47 = vld [vmem:[#allocation6 + $0x28] sm:$0xff] }
 0x387   : > { %1906 = vmatpush.msrb.mxu0 %v9144_v51  ;;  %1800 = vmatpush.msra.mxu3 %v9145_v6  ;;  %v9148_v51 = vld [vmem:[#allocation134_spill] sm:$0xff] }
 0x388   : > { %1935 = vmatpush.msra.mxu2 %v5659_v23  ;;  %1878 = vmatpush.msra.mxu1 %v9146_v24 }
 0x389   : > { %1907 = vmatpush.msrb.mxu0 %v5776_v3  ;;  %1892 = vmatpush.msrb.mxu3 %v9105_v25 }
 0x38a   : > { %1936 = vmatpush.msra.mxu2 %v5680_v56  ;;  %1879 = vmatpush.msra.mxu1 %v9147_v10 }
 0x38b   : > { %1908 = vmatpush.msrb.mxu0 %v5792_v2  ;;  %1893 = vmatpush.msrb.mxu3 %v9106_v41  ;;  %v9149_v41 = vld [vmem:[#allocation31_spill] sm:$0xff] }
 0x38c   : > { %1937 = vmatpush.msra.mxu2 %v9148_v51  ;;  %1880 = vmatpush.msra.mxu1 %v5704_v30  ;;  %v6058_v51 = vld [vmem:[#allocation6 + $0x20] sm:$0xff] }
 0x38d   : > { %1909 = vmatpush.msrb.mxu0 %v5801_v39  ;;  %4086 = vmatmul.msk.f32.vlgmr.msrb.gmra.mxu1 %vm8611_vm8, %v6043_v47 }
 0x38e   : > { %1894 = vmatpush.msrb.mxu3 %v9107_v17  ;;  %1938 = vmatpush.msra.mxu2 %v5714_v59 }
 0x38f   : > { %1986 = vmatpush.msrb.mxu1 %v9036_v50  ;;  %1910 = vmatpush.msrb.mxu0 %v5808_v8 }
 0x390   : > { %1895 = vmatpush.msrb.mxu3 %v9108_v48  ;;  %1939 = vmatpush.msra.mxu2 %v9149_v41 }
 0x391   : > { %1987 = vmatpush.msrb.mxu1 %v9038_v26  ;;  %1911 = vmatpush.msrb.mxu0 %v5820_v12 }
 0x392   : > { %1896 = vmatpush.msrb.mxu3 %v9109_v19  ;;  %1940 = vmatpush.msra.mxu2 %v5731_v28  ;;  %v9150_v19 = vld [vmem:[#allocation65_spill] sm:$0xff] }
 0x393   : > { %1988 = vmatpush.msrb.mxu1 %v9041_v7  ;;  %1841 = vmatmul.f32.vlgmr.msrb.gmra.mxu2 %v6058_v51  ;;  %v9151_v7 = vld [vmem:[#allocation71_spill] sm:$0xff] }
 0x394   : > { %1912 = vmatpush.msrb.mxu0 %v5827_v37  ;;  %1999 = vmatpush.msrb.mxu2 %v9042_v55  ;;  %v9152_v37 = vld [vmem:[#allocation91_spill] sm:$0xff]  ;;  %v9153_v55 = vld [vmem:[#allocation25_spill] sm:$0xff] }
 0x395   : > { %1897 = vmatpush.msrb.mxu3 %v9110_v22  ;;  %1989 = vmatpush.msrb.mxu1 %v9045_v61 }
 0x396   : > { %1913 = vmatpush.msrb.mxu0 %v5837_v9  ;;  %2000 = vmatpush.msrb.mxu2 %v9047_v45 }
 0x397   : > { %1898 = vmatpush.msrb.mxu3 %v5620_v44  ;;  %1990 = vmatpush.msrb.mxu1 %v9150_v19  ;;  %v9154_v44 = vld [vmem:[#allocation63_spill] sm:$0xff] }
 0x398   : > { %1914 = vmatpush.msrb.mxu0 %v5843_v21  ;;  %2001 = vmatpush.msrb.mxu2 %v9151_v7 }
 0x399   : > { %1899 = vmatpush.msrb.mxu3 %v5656_v63  ;;  %1991 = vmatpush.msrb.mxu1 %v9152_v37  ;;  %v9155_v63 = vld [vmem:[#allocation70_spill] sm:$0xff]  ;;  %v9156_v37 = vld [vmem:[#allocation87_spill] sm:$0xff] }
 0x39a   : > { %1915 = vmatpush.msrb.mxu0 %v9153_v55  ;;  %2002 = vmatpush.msrb.mxu2 %v9053_v60  ;;  %v9157_v55 = vld [vmem:[#allocation74_spill] sm:$0xff]  ;;  %v9158_v60 = vld [vmem:[#allocation109_spill] sm:$0xff] }
 0x39b   : > { %1900 = vmatpush.msrb.mxu3 %v9111_v49  ;;  %1992 = vmatpush.msrb.mxu1 %v9054_v53  ;;  %v9159_v49 = vld [vmem:[#allocation57_spill] sm:$0xff] }
 0x39c   : > { %1801 = vmatmul.f32.vlgmr.msra.gmra.mxu3 %v6058_v51  ;;  %1916 = vmatpush.msrb.mxu0 %v9154_v44 }
 0x39d   : > { %1959 = vmatpush.msra.mxu3 %v9112_v32  ;;  %2003 = vmatpush.msrb.mxu2 %v9057_v14  ;;  %v9160_v32 = vld [vmem:[#allocation110_spill] sm:$0xff]  ;;  %v9161_v14 = vld [vmem:[#allocation107_spill] sm:$0xff] }
 0x39e   : > { %1993 = vmatpush.msrb.mxu1 %v9113_v34  ;;  %1917 = vmatpush.msrb.mxu0 %v9155_v63 }
 0x39f   : > { %1960 = vmatpush.msra.mxu3 %v9156_v37  ;;  %2004 = vmatpush.msrb.mxu2 %v9157_v55  ;;  %v9162_v37 = vld [vmem:[#allocation111_spill] sm:$0xff]  ;;  %v9163_v55 = vld [vmem:[#allocation49_spill] sm:$0xff] }
 0x3a0   : > { %1994 = vmatpush.msrb.mxu1 %v9158_v60  ;;  %1918 = vmatpush.msrb.mxu0 %v9159_v49  ;;  %v9164_v49 = vld [vmem:[#allocation112_spill] sm:$0xff] }
 0x3a1   : > { %1881 = vmatmul.f32.vlgmr.msra.gmra.mxu1 %v6058_v51  ;;  %1961 = vmatpush.msra.mxu3 %v9116_v27 }
 0x3a2   : > { %2005 = vmatpush.msrb.mxu2 %v9061_v4  ;;  %2039 = vmatpush.msra.mxu1 %v9160_v32  ;;  %v1492_v32 = vpop.f32.mrf.mxu3 }
 0x3a3   : > { %1919 = vmatpush.msrb.mxu0 %v9161_v14  ;;  %1962 = vmatpush.msra.mxu3 %v9117_v31  ;;  %v9165_v14 = vld [vmem:[#allocation24_spill] sm:$0xff]  ;;  %v9166_v31 = vld [vmem:[#allocation117_spill] sm:$0xff] }
 0x3a4   : > { %2006 = vmatpush.msrb.mxu2 %v9118_v33  ;;  %2040 = vmatpush.msra.mxu1 %v9162_v37  ;;  %v1452_v33 = vpop.f32.mrf.mxu1  ;;  %v9167_v37 = vld [vmem:[#allocation113_spill] sm:$0xff] }
 0x3a5   : > { %1920 = vmatpush.msrb.mxu0 %v9163_v55  ;;  %1963 = vmatpush.msra.mxu3 %v9120_v62  ;;  %v9168_v62 = vld [vmem:[#allocation28_spill] sm:$0xff]  ;;  %v9171_v55 = vld [vmem:[#allocation29_spill] sm:$0xff] }
 0x3a6   : > { %2007 = vmatpush.msrb.mxu2 %v9121_v5  ;;  %2041 = vmatpush.msra.mxu1 %v9164_v49  ;;  %v9169_v5 = vld [vmem:[#allocation119_spill] sm:$0xff] }
 0x3a7   : > { %4087 = vmatmul.msk.f32.vlgmr.msra.gmra.mxu0 %vm8611_vm8, %v6043_v47  ;;  %1964 = vmatpush.msra.mxu3 %v9123_v0  ;;  %v9170_v49 = vld [vmem:[#allocation115_spill] sm:$0xff]  ;;  %v9172_v0 = vld [vmem:[#allocation37_spill] sm:$0xff] }
 0x3a8   : > { %2026 = vmatpush.msra.mxu0 %v9165_v14  ;;  %2008 = vmatpush.msrb.mxu2 %v9166_v31  ;;  %v9173_v14 = vld [vmem:[#allocation116_spill] sm:$0xff] }
 0x3a9   : > { %2042 = vmatpush.msra.mxu1 %v9167_v37  ;;  %1965 = vmatpush.msra.mxu3 %v9125_v54 }
 0x3aa   : > { %2027 = vmatpush.msra.mxu0 %v9168_v62  ;;  %2009 = vmatpush.msrb.mxu2 %v9169_v5  ;;  %v9174_v62 = vld [vmem:[#allocation121_spill] sm:$0xff] }
 0x3ab   : > { %2043 = vmatpush.msra.mxu1 %v9170_v49  ;;  %1966 = vmatpush.msra.mxu3 %v9127_v58 }
 0x3ac   : > { %2028 = vmatpush.msra.mxu0 %v9171_v55  ;;  %2010 = vmatpush.msrb.mxu2 %v9172_v0  ;;  %v9175_v0 = vld [vmem:[#allocation120_spill] sm:$0xff]  ;;  %v9176_v55 = vld [vmem:[#allocation67_spill] sm:$0xff] }
 0x3ad   : > { %2044 = vmatpush.msra.mxu1 %v9173_v14  ;;  %4089 = vmatmul.msk.f32.vlgmr.msra.gmra.mxu2 %vm8611_vm8, %v6043_v47  ;;  %v1512_v14 = vpop.f32.mrf.mxu1 }
 0x3ae   : > { %2029 = vmatpush.msra.mxu0 %v9091_v38  ;;  %1967 = vmatpush.msra.mxu3 %v9130_v52  ;;  %v1532_v38 = vpop.f32.mrf.mxu3  ;;  %v9177_v52 = vld [vmem:[#allocation59_spill] sm:$0xff] }
 0x3af   : > { %2011 = vmatpush.msrb.mxu2 %v9174_v62  ;;  %2045 = vmatpush.msra.mxu1 %v9132_v36  ;;  %v6132_v62 = vld [vmem:[#allocation6 + $0x30] sm:$0xff] }
 0x3b0   : > { %2030 = vmatpush.msra.mxu0 %v9095_v46  ;;  %1968 = vmatpush.msra.mxu3 %v9133_v1  ;;  %v9178_v1 = vld [vmem:[#allocation81_spill] sm:$0xff] }
 0x3b1   : > { %2012 = vmatpush.msrb.mxu2 %v9134_v13  ;;  %2046 = vmatpush.msra.mxu1 %v9175_v0  ;;  %v1533_v13 = vadd.f32 %v1532_v38, %v1512_v14  ;;  %v9183_v14 = vld [vmem:[#allocation82_spill] sm:$0xff]  ;;  %v6150_v38 = vld [vmem:[#allocation6 + $0x38] sm:$0xff] }
 0x3b2   : > { %2031 = vmatpush.msra.mxu0 %v9099_v11  ;;  %1969 = vmatpush.msra.mxu3 %v9136_v40  ;;  %v9179_v11 = vld [vmem:[#allocation79_spill] sm:$0xff] }
 0x3b3   : > { %2013 = vmatpush.msrb.mxu2 %v9176_v55  ;;  %2047 = vmatpush.msra.mxu1 %v9177_v52  ;;  %v9180_v55 = vld [vmem:[#allocation123_spill] sm:$0xff]  ;;  %v9181_v52 = vld [vmem:[#allocation66_spill] sm:$0xff] }
 0x3b4   : > { %1921 = vmatmul.f32.vlgmr.msrb.gmra.mxu0 %v6058_v51  ;;  %1970 = vmatpush.msra.mxu3 %v9138_v15  ;;  %v9182_v51 = vld [vmem:[#allocation86_spill] sm:$0xff] }
 0x3b5   : > { %2032 = vmatpush.msra.mxu0 %v9178_v1  ;;  %2014 = vmatpush.msrb.mxu2 %v9094_v20 }
 0x3b6   : > { %2048 = vmatpush.msra.mxu1 %v9179_v11  ;;  %2015 = vmatmul.f32.vlgmr.msrb.gmra.mxu2 %v6132_v62 }
 0x3b7   : > { %2033 = vmatpush.msra.mxu0 %v9103_v57  ;;  %2106 = vmatpush.msra.mxu2 %v9180_v55  ;;  %v9184_v55 = vld [vmem:[#allocation75_spill] sm:$0xff] }
 0x3b8   : > { %1971 = vmatpush.msra.mxu3 %v9139_v35  ;;  %2049 = vmatpush.msra.mxu1 %v9181_v52  ;;  %v1432_v52 = vpop.f32.mrf.mxu0 }
 0x3b9   : > { %1579 = vrot.lane.b32.xlu1 %v1533_v13, %s4354_s23  ;;  %2034 = vmatpush.msra.mxu0 %v9182_v51  ;;  %v9185_v13 = vld [vmem:[#allocation54_spill] sm:$0xff]  ;;  %v1472_v51 = vpop.f32.mrf.mxu2 }
 0x3ba   : > { %2107 = vmatpush.msra.mxu2 %v9140_v16  ;;  %1972 = vmatpush.msra.mxu3 %v9141_v29 }
 0x3bb   : > { %2050 = vmatpush.msra.mxu1 %v9102_v42  ;;  %2079 = vmatpush.msrb.mxu0 %v9183_v14  ;;  %v1453_v42 = vadd.f32 %v1452_v33, %v1432_v52  ;;  %v1493_v14 = vadd.f32 %v1492_v32, %v1472_v51  ;;  %v9187_v33 = vld [vmem:[#allocation134_spill] sm:$0xff]  ;;  %v9190_v52 = vld [vmem:[#allocation35_spill] sm:$0xff] }
 0x3bc   : > { %2108 = vmatpush.msra.mxu2 %v9184_v55  ;;  %1973 = vmatpush.msra.mxu3 %v9143_v43  ;;  %v9188_v32 = vld [vmem:[#allocation102_spill] sm:$0xff]  ;;  %v9194_v51 = vld [vmem:[#allocation91_spill] sm:$0xff] }
 0x3bd   : > { %2051 = vmatpush.msra.mxu1 %v5567_v18  ;;  %2080 = vmatpush.msrb.mxu0 %v9185_v13 }
 0x3be   : > { %4091 = vmatmul.msk.f32.vlgmr.msra.gmra.mxu0 %vm8611_vm8, %v6150_v38  ;;  %2109 = vmatpush.msra.mxu2 %v5659_v23  ;;  %v9186_v23 = vld [vmem:[#allocation93_spill] sm:$0xff] }
 0x3bf   : > { %1974 = vmatpush.msra.mxu3 %v9145_v6  ;;  %2052 = vmatpush.msra.mxu1 %v9146_v24 }
 0x3c0   : > { %2081 = vmatpush.msrb.mxu0 %v5776_v3  ;;  %4088 = vmatmul.msk.f32.vlgmr.msrb.gmra.mxu3 %vm8611_vm8, %v6043_v47  ;;  %v9189_v47 = vld [vmem:[#allocation55_spill] sm:$0xff] }
 0x3c1   : > { %2066 = vmatpush.msrb.mxu3 %v9105_v25  ;;  %2110 = vmatpush.msra.mxu2 %v5680_v56 }
 0x3c2   : > { %2053 = vmatpush.msra.mxu1 %v9147_v10  ;;  %2082 = vmatpush.msrb.mxu0 %v5792_v2 }
 0x3c3   : > { %2067 = vmatpush.msrb.mxu3 %v9186_v23  ;;  %1575 = vrot.lane.b32.xlu1 %v1453_v42, %s4354_s23  ;;  %v9193_v42 = vld [vmem:[#allocation20_spill] sm:$0xff] }
 0x3c4   : > { %2111 = vmatpush.msra.mxu2 %v9187_v33  ;;  %1577 = vrot.lane.b32.xlu0 %v1493_v14, %s4354_s23  ;;  %v9195_v14 = vld [vmem:[#allocation25_spill] sm:$0xff] }
 0x3c5   : > { %2054 = vmatpush.msra.mxu1 %v5704_v30  ;;  %2083 = vmatpush.msrb.mxu0 %v5801_v39 }
 0x3c6   : > { %4090 = vmatmul.msk.f32.vlgmr.msrb.gmra.mxu1 %vm8611_vm8, %v6150_v38  ;;  %2068 = vmatpush.msrb.mxu3 %v9107_v17 }
 0x3c7   : > { %2112 = vmatpush.msra.mxu2 %v5714_v59  ;;  %2173 = vmatpush.msrb.mxu1 %v9036_v50  ;;  %v9191_v50 = vld [vmem:[#allocation69_spill] sm:$0xff] }
 0x3c8   : > { %2084 = vmatpush.msrb.mxu0 %v5808_v8  ;;  %2069 = vmatpush.msrb.mxu3 %v9108_v48 }
 0x3c9   : > { %2113 = vmatpush.msra.mxu2 %v9149_v41  ;;  %2174 = vmatpush.msrb.mxu1 %v9038_v26  ;;  %v9192_v26 = vld [vmem:[#allocation129_spill] sm:$0xff] }
 0x3ca   : > { %2085 = vmatpush.msrb.mxu0 %v5820_v12  ;;  %2070 = vmatpush.msrb.mxu3 %v9188_v32 }
 0x3cb   : > { %2114 = vmatpush.msra.mxu2 %v5731_v28  ;;  %2175 = vmatpush.msrb.mxu1 %v9189_v47  ;;  %v9196_v47 = vld [vmem:[#allocation72_spill] sm:$0xff] }
 0x3cc   : > { %1975 = vmatmul.f32.vlgmr.msra.gmra.mxu3 %v6132_v62  ;;  %2086 = vmatpush.msrb.mxu0 %v9190_v52 }
 0x3cd   : > { %2186 = vmatpush.msrb.mxu2 %v9191_v50  ;;  %2071 = vmatpush.msrb.mxu3 %v9110_v22  ;;  %v9201_v50 = vld [vmem:[#allocation74_spill] sm:$0xff] }
 0x3ce   : > { %2176 = vmatpush.msrb.mxu1 %v9045_v61  ;;  %2087 = vmatpush.msrb.mxu0 %v5837_v9  ;;  %v9197_v61 = vld [vmem:[#allocation133_spill] sm:$0xff] }
 0x3cf   : > { %2187 = vmatpush.msrb.mxu2 %v9047_v45  ;;  %2072 = vmatpush.msrb.mxu3 %v9192_v26  ;;  %v9200_v45 = vld [vmem:[#allocation87_spill] sm:$0xff] }
 0x3d0   : > { %2177 = vmatpush.msrb.mxu1 %v9150_v19  ;;  %2088 = vmatpush.msrb.mxu0 %v5843_v21  ;;  %v9198_v19 = vld [vmem:[#allocation84_spill] sm:$0xff] }
 0x3d1   : > { %2188 = vmatpush.msrb.mxu2 %v9151_v7  ;;  %2073 = vmatpush.msrb.mxu3 %v9193_v42  ;;  %v9199_v7 = vld [vmem:[#allocation73_spill] sm:$0xff] }
 0x3d2   : > { %2178 = vmatpush.msrb.mxu1 %v9194_v51  ;;  %2089 = vmatpush.msrb.mxu0 %v9195_v14  ;;  %v9204_v51 = vld [vmem:[#allocation107_spill] sm:$0xff] }
 0x3d3   : > { %2189 = vmatpush.msrb.mxu2 %v9196_v47  ;;  %2074 = vmatpush.msrb.mxu3 %v9197_v61  ;;  %v9205_v47 = vld [vmem:[#allocation95_spill] sm:$0xff] }
 0x3d4   : > { %2179 = vmatpush.msrb.mxu1 %v9054_v53  ;;  %4092 = vmatmul.msk.f32.vlgmr.msrb.gmra.mxu3 %vm8611_vm8, %v6150_v38  ;;  %v9202_v53 = vld [vmem:[#allocation57_spill] sm:$0xff] }
 0x3d5   : > { %2090 = vmatpush.msrb.mxu0 %v9154_v44  ;;  %2146 = vmatpush.msra.mxu3 %v9198_v19  ;;  %v9206_v19 = vld [vmem:[#allocation77_spill] sm:$0xff] }
 0x3d6   : > { %2190 = vmatpush.msrb.mxu2 %v9199_v7  ;;  %2180 = vmatpush.msrb.mxu1 %v9113_v34  ;;  %v9203_v34 = vld [vmem:[#allocation110_spill] sm:$0xff]  ;;  %v9208_v7 = vld [vmem:[#allocation49_spill] sm:$0xff] }
 0x3d7   : > { %2091 = vmatpush.msrb.mxu0 %v9155_v63  ;;  %2147 = vmatpush.msra.mxu3 %v9200_v45  ;;  %v9210_v45 = vld [vmem:[#allocation78_spill] sm:$0xff] }
 0x3d8   : > { %2191 = vmatpush.msrb.mxu2 %v9201_v50  ;;  %2181 = vmatpush.msrb.mxu1 %v9158_v60  ;;  %v9207_v60 = vld [vmem:[#allocation111_spill] sm:$0xff]  ;;  %v9211_v50 = vld [vmem:[#allocation112_spill] sm:$0xff] }
 0x3d9   : > { %4093 = vmatmul.msk.f32.vlgmr.msra.gmra.mxu2 %vm8611_vm8, %v6150_v38  ;;  %2055 = vmatmul.f32.vlgmr.msra.gmra.mxu1 %v6132_v62  ;;  %v9209_v38 = vld [vmem:[#allocation98_spill] sm:$0xff] }
 0x3da   : > { %2092 = vmatpush.msrb.mxu0 %v9202_v53  ;;  %2148 = vmatpush.msra.mxu3 %v9116_v27  ;;  %v9213_v27 = vld [vmem:[#allocation24_spill] sm:$0xff] }
 0x3db   : > { %2192 = vmatpush.msrb.mxu2 %v9061_v4  ;;  %2226 = vmatpush.msra.mxu1 %v9203_v34  ;;  %v9212_v4 = vld [vmem:[#allocation101_spill] sm:$0xff]  ;;  %v1615_v34 = vpop.f32.mrf.mxu3 }
 0x3dc   : > { %2093 = vmatpush.msrb.mxu0 %v9204_v51  ;;  %2149 = vmatpush.msra.mxu3 %v9205_v47  ;;  %v1635_v47 = vpop.f32.mrf.mxu1 }
 0x3dd   : > { %2193 = vmatpush.msrb.mxu2 %v9206_v19  ;;  %2227 = vmatpush.msra.mxu1 %v9207_v60  ;;  %v9214_v19 = vld [vmem:[#allocation28_spill] sm:$0xff]  ;;  %v1636_v60 = vadd.f32 %v1635_v47, %v1615_v34  ;;  %v9225_v34 = vld [vmem:[#allocation59_spill] sm:$0xff] }
 0x3de   : > { %2094 = vmatpush.msrb.mxu0 %v9208_v7  ;;  %2150 = vmatpush.msra.mxu3 %v9209_v38  ;;  %v9216_v38 = vld [vmem:[#allocation37_spill] sm:$0xff] }
 0x3df   : > { %2194 = vmatpush.msrb.mxu2 %v9210_v45  ;;  %2228 = vmatpush.msra.mxu1 %v9211_v50  ;;  %v9218_v45 = vld [vmem:[#allocation44_spill] sm:$0xff]  ;;  %v1572_v50 = vpop.f32.mrf.mxu2 }
 0x3e0   : > { %2095 = vmatmul.f32.vlgmr.msrb.gmra.mxu0 %v6132_v62  ;;  %2151 = vmatpush.msra.mxu3 %v9212_v4  ;;  %v9215_v62 = vld [vmem:[#allocation29_spill] sm:$0xff]  ;;  %v9223_v4 = vld [vmem:[#allocation80_spill] sm:$0xff] }
 0x3e1   : > { %2213 = vmatpush.msra.mxu0 %v9213_v27  ;;  %2195 = vmatpush.msrb.mxu2 %v9166_v31  ;;  %v9217_v31 = vld [vmem:[#allocation116_spill] sm:$0xff]  ;;  %v9224_v27 = vld [vmem:[#allocation67_spill] sm:$0xff] }
 0x3e2   : > { %2229 = vmatpush.msra.mxu1 %v9167_v37  ;;  %2152 = vmatpush.msra.mxu3 %v9125_v54  ;;  %v9219_v37 = vld [vmem:[#allocation39_spill] sm:$0xff]  ;;  %v9220_v54 = vld [vmem:[#allocation121_spill] sm:$0xff] }
 0x3e3   : > { %2214 = vmatpush.msra.mxu0 %v9214_v19  ;;  %2196 = vmatpush.msrb.mxu2 %v9169_v5  ;;  %v9221_v5 = vld [vmem:[#allocation124_spill] sm:$0xff]  ;;  %v9228_v19 = vld [vmem:[#allocation86_spill] sm:$0xff] }
 0x3e4   : > { %2230 = vmatpush.msra.mxu1 %v9170_v49  ;;  %2153 = vmatpush.msra.mxu3 %v9127_v58  ;;  %v9222_v58 = vld [vmem:[#allocation58_spill] sm:$0xff]  ;;  %v1552_v49 = vpop.f32.mrf.mxu0 }
 0x3e5   : > { %2215 = vmatpush.msra.mxu0 %v9215_v62  ;;  %2197 = vmatpush.msrb.mxu2 %v9216_v38  ;;  %v1573_v47 = vadd.f32 %v1572_v50, %v1552_v49  ;;  %v9234_v50 = vmov 0   ;;  %v9235_v49 = vld [vmem:[#allocation32_spill] sm:$0xff] }
 0x3e6   : > { %2231 = vmatpush.msra.mxu1 %v9217_v31  ;;  %2154 = vmatpush.msra.mxu3 %v9218_v45  ;;  %vm377_vm0 = vcmp.ge.s32.totalorder %v9235_v49, 24  ;;  %vm389_vm2 = vcmp.ge.s32.totalorder %v9235_v49, 32 }
 0x3e7   : > { %2216 = vmatpush.msra.mxu0 %v9219_v37  ;;  %2198 = vmatpush.msrb.mxu2 %v9220_v54  ;;  %v9232_v37 = vld [vmem:[#allocation21_spill] sm:$0xff] }
 0x3e8   : > { %2232 = vmatpush.msra.mxu1 %v9132_v36  ;;  %1758 = vrot.lane.b32.xlu1 %v1636_v60, %s4355_s14  ;;  %v6255_v36 = vld [vmem:[#allocation6 + $0x40] sm:$0xff]  ;;  %vm376_vm15 = vcmp.ge.s32.totalorder %v9232_v37, 24  ;;  %v9233_v54 = vld [vmem:[#allocation33_spill] sm:$0xff]  ;;  %vm388_vm14 = vcmp.ge.s32.totalorder %v9232_v37, 32  ;;  %vm400_vm13 = vcmp.ge.s32.totalorder %v9232_v37, 40  ;;  %vm412_vm1 = vcmp.ge.s32.totalorder %v9232_v37, 48 }
 0x3e9   : > { %2217 = vmatpush.msra.mxu0 %v9095_v46  ;;  %2155 = vmatpush.msra.mxu3 %v9221_v5  ;;  %v9226_v46 = vld [vmem:[#allocation123_spill] sm:$0xff]  ;;  %vm375_vm10 = vcmp.ge.s32.totalorder %v9233_v54, 24  ;;  %v380_v5 = vsel %vm376_vm15, 1, %v9234_v50  ;;  %vm387_vm6 = vcmp.ge.s32.totalorder %v9233_v54, 32  ;;  %vm399_vm4 = vcmp.ge.s32.totalorder %v9233_v54, 40 }
 0x3ea   : > { %2199 = vmatpush.msrb.mxu2 %v9222_v58  ;;  %2233 = vmatpush.msra.mxu1 %v9175_v0  ;;  %v1675_v0 = vpop.f32.mrf.mxu3  ;;  %v379_v58 = vsel %vm375_vm10, 1, %v9234_v50  ;;  %vm401_vm15 = vcmp.ge.s32.totalorder %v9235_v49, 40  ;;  %vm411_vm10 = vcmp.ge.s32.totalorder %v9233_v54, 48 }
 0x3eb   : > { %2218 = vmatpush.msra.mxu0 %v9223_v4  ;;  %2156 = vmatpush.msra.mxu3 %v9136_v40  ;;  %v9227_v40 = vld [vmem:[#allocation66_spill] sm:$0xff] }
 0x3ec   : > { %2200 = vmatpush.msrb.mxu2 %v9224_v27  ;;  %2234 = vmatpush.msra.mxu1 %v9225_v34  ;;  %v9236_v4 = vld [vmem:[#allocation22_spill] sm:$0xff] }
 0x3ed   : > { %2219 = vmatpush.msra.mxu0 %v9178_v1  ;;  %2157 = vmatpush.msra.mxu3 %v9138_v15  ;;  %v1655_v1 = vpop.f32.mrf.mxu2  ;;  %v9229_v15 = vld [vmem:[#allocation43_spill] sm:$0xff]  ;;  %v384_v27 = vadd.s32 %v380_v5, %v9236_v4  ;;  %v9237_v34 = vld [vmem:[#allocation34_spill] sm:$0xff] }
 0x3ee   : > { %2201 = vmatpush.msrb.mxu2 %v9094_v20  ;;  %2235 = vmatpush.msra.mxu1 %v9179_v11  ;;  %v9230_v20 = vld [vmem:[#allocation82_spill] sm:$0xff]  ;;  %v2142_v11 = vld [vmem:[#allocation6 + $0x48] sm:$0xff]  ;;  %vm378_vm7 = vcmp.ge.s32.totalorder %v9237_v34, 24  ;;  %vm390_vm9 = vcmp.ge.s32.totalorder %v9237_v34, 32 }
 0x3ef   : > { %2202 = vmatmul.f32.vlgmr.msrb.gmra.mxu2 %v6255_v36  ;;  %2220 = vmatpush.msra.mxu0 %v9103_v57 }
 0x3f0   : > { %2293 = vmatpush.msra.mxu2 %v9226_v46  ;;  %2158 = vmatpush.msra.mxu3 %v9139_v35  ;;  %v9231_v35 = vld [vmem:[#allocation131_spill] sm:$0xff]  ;;  %v381_v46 = vsel %vm377_vm0, 1, %v9234_v50  ;;  %vm424_vm0 = vcmp.ge.s32.totalorder %v9232_v37, 56 }
 0x3f1   : > { %2236 = vmatpush.msra.mxu1 %v9227_v40  ;;  %1581 = vrot.lane.b32.xlu2 %v1573_v47, %s4354_s23  ;;  %v9238_v47 = vld [vmem:[#allocation40_spill] sm:$0xff]  ;;  %v391_v40 = vsel %vm387_vm6, 1, %v9234_v50  ;;  %vm413_vm6 = vcmp.ge.s32.totalorder %v9235_v49, 48 }
 0x3f2   : > { %2221 = vmatpush.msra.mxu0 %v9228_v19  ;;  %2294 = vmatpush.msra.mxu2 %v9140_v16  ;;  %v1695_v16 = vpop.f32.mrf.mxu1 }
 0x3f3   : > { %2159 = vmatpush.msra.mxu3 %v9141_v29  ;;  %2237 = vmatpush.msra.mxu1 %v9229_v15  ;;  %v404_v15 = vsel %vm400_vm13, 1, %v9234_v50  ;;  %vm414_vm13 = vcmp.ge.s32.totalorder %v9237_v34, 48 }
 0x3f4   : > { %2266 = vmatpush.msrb.mxu0 %v9230_v20  ;;  %2295 = vmatpush.msra.mxu2 %v9184_v55  ;;  %v9239_v20 = vld [vmem:[#allocation38_spill] sm:$0xff] }
 0x3f5   : > { %2160 = vmatpush.msra.mxu3 %v9143_v43  ;;  %2238 = vmatpush.msra.mxu1 %v5567_v18  ;;  %v1715_v43 = vpop.f32.mrf.mxu3  ;;  %v1735_v18 = vpop.f32.mrf.mxu0 }
 0x3f6   : > { %2267 = vmatpush.msrb.mxu0 %v9185_v13  ;;  %2296 = vmatpush.msra.mxu2 %v9231_v35  ;;  %v1755_v55 = vpop.f32.mrf.mxu2 }
 0x3f7   : > { %4095 = vmatmul.msk.f32.vlgmr.msra.gmra.mxu0 %vm8611_vm8, %v2142_v11  ;;  %2161 = vmatpush.msra.mxu3 %v9145_v6 }
 0x3f8   : > { %2239 = vmatpush.msra.mxu1 %v9146_v24  ;;  %2268 = vmatpush.msrb.mxu0 %v5776_v3  ;;  %v1716_v3 = vadd.f32 %v1715_v43, %v1695_v16  ;;  %v9240_v16 = vld [vmem:[#allocation41_spill] sm:$0xff] }
 0x3f9   : > { %2162 = vmatmul.f32.vlgmr.msra.gmra.mxu3 %v6255_v36  ;;  %2297 = vmatpush.msra.mxu2 %v5680_v56 }
 0x3fa   : > { %2253 = vmatpush.msrb.mxu3 %v9105_v25  ;;  %2240 = vmatpush.msra.mxu1 %v9147_v10  ;;  %v1756_v10 = vadd.f32 %v1755_v55, %v1735_v18  ;;  %v393_v18 = vsel %vm389_vm2, 1, %v9234_v50  ;;  %v403_v55 = vsel %vm399_vm4, 1, %v9234_v50  ;;  %vm425_vm2 = vcmp.ge.s32.totalorder %v9235_v49, 56 }
 0x3fb   : > { %2269 = vmatpush.msrb.mxu0 %v5792_v2  ;;  %2298 = vmatpush.msra.mxu2 %v9187_v33  ;;  %v1676_v2 = vadd.f32 %v1675_v0, %v1655_v1  ;;  %v383_v0 = vadd.s32 %v379_v58, %v9238_v47  ;;  %v382_v1 = vsel %vm378_vm7, 1, %v9234_v50  ;;  %vm423_vm7 = vcmp.ge.s32.totalorder %v9233_v54, 56 }
 0x3fc   : > { %2254 = vmatpush.msrb.mxu3 %v9186_v23  ;;  %2241 = vmatpush.msra.mxu1 %v5704_v30  ;;  %v386_v43 = vadd.s32 %v382_v1, %v9240_v16  ;;  %vm426_vm4 = vcmp.ge.s32.totalorder %v9237_v34, 56  ;;  %v9248_v47 = vmov 0.0  }
 0x3fd   : > { %2270 = vmatpush.msrb.mxu0 %v5801_v39  ;;  %2299 = vmatpush.msra.mxu2 %v5714_v59  ;;  %v395_v35 = vadd.s32 %v391_v40, %v383_v0 }
 0x3fe   : > { %2255 = vmatpush.msrb.mxu3 %v9107_v17  ;;  %4094 = vmatmul.msk.f32.vlgmr.msrb.gmra.mxu1 %vm8611_vm8, %v2142_v11 }
 0x3ff   : > { %2271 = vmatpush.msrb.mxu0 %v5808_v8  ;;  %2300 = vmatpush.msra.mxu2 %v9149_v41 }
 0x400   : > { %2256 = vmatpush.msrb.mxu3 %v9108_v48  ;;  %1762 = vrot.lane.b32.xlu0 %v1716_v3, %s4355_s14  ;;  %v394_v3 = vsel %vm390_vm9, 1, %v9234_v50 }
 0x401   : > { %2272 = vmatpush.msrb.mxu0 %v5820_v12  ;;  %2301 = vmatpush.msra.mxu2 %v5731_v28 }
 0x402   : > { %2257 = vmatpush.msrb.mxu3 %v9188_v32  ;;  %1764 = vrot.lane.b32.xlu2 %v1756_v10, %s4355_s14 }
 0x403   : > { %2273 = vmatpush.msrb.mxu0 %v9190_v52  ;;  %4097 = vmatmul.msk.f32.vlgmr.msra.gmra.mxu2 %vm8611_vm8, %v2142_v11 }
 0x404   : > { %2258 = vmatpush.msrb.mxu3 %v9110_v22 }
 0x405   : > { %2274 = vmatpush.msrb.mxu0 %v5837_v9 }
 0x406   : > { %2259 = vmatpush.msrb.mxu3 %v9192_v26  ;;  %2242 = vmatmul.f32.vlgmr.msra.gmra.mxu1 %v6255_v36 }
 0x407   : > { %2275 = vmatpush.msrb.mxu0 %v5843_v21 }
 0x408   : > { %2260 = vmatpush.msrb.mxu3 %v9193_v42  ;;  %1760 = vrot.lane.b32.xlu0 %v1676_v2, %s4355_s14  ;;  %v416_v2 = vsel %vm412_vm1, 1, %v9234_v50 }
 0x409   : > { %2276 = vmatpush.msrb.mxu0 %v9195_v14 }
 0x40a   : > { %2261 = vmatpush.msrb.mxu3 %v9197_v61  ;;  %v1822_v56 = vpop.f32.mrf.mxu1 }
 0x40b   : > { %4096 = vmatmul.msk.f32.vlgmr.msrb.gmra.mxu3 %vm8611_vm8, %v2142_v11  ;;  %2277 = vmatpush.msrb.mxu0 %v9154_v44  ;;  %v385_v11 = vadd.s32 %v381_v46, %v9239_v20 }
 0x40d   : > { %2278 = vmatpush.msrb.mxu0 %v9155_v63 }
 0x40f   : > { %2279 = vmatpush.msrb.mxu0 %v9202_v53  ;;  %v2327_v53 = vld [vmem:[%s8304_s4] sm:$0xff] }
 0x411   : > { %2280 = vmatpush.msrb.mxu0 %v9204_v51 }
 0x413   : > { %2281 = vmatpush.msrb.mxu0 %v9208_v7 }
 0x414   : > { %2282 = vmatmul.f32.vlgmr.msrb.gmra.mxu0 %v6255_v36  ;;  %v392_v36 = vsel %vm388_vm14, 1, %v9234_v50  ;;  %vm402_vm14 = vcmp.ge.s32.totalorder %v9237_v34, 40 }
 0x415   : > { %v396_v19 = vadd.s32 %v392_v36, %v384_v27 }
 0x416   : > { %v1842_v9 = vpop.f32.mrf.mxu2 }
 0x417   : > { %v408_v10 = vadd.s32 %v404_v15, %v396_v19 }
 0x41e   : > { %v1882_v22 = vpop.f32.mrf.mxu1 }
 0x41f   : > { %v1802_v17 = vpop.f32.mrf.mxu3 }
 0x420   : > { %v6319_v12 = vadd.f32 %v1822_v56, %v1802_v17  ;;  %v397_v56 = vadd.s32 %v393_v18, %v385_v11  ;;  %v407_v17 = vadd.s32 %v403_v55, %v395_v35 }
 0x424   : > { %v1862_v25 = vpop.f32.mrf.mxu0 }
 0x425   : > { %v6321_v48 = vadd.f32 %v1862_v25, %v1842_v9  ;;  %v398_v9 = vadd.s32 %v394_v3, %v386_v43  ;;  %v405_v25 = vsel %vm401_vm15, 1, %v9234_v50 }
 0x430   : > { %v1942_v23 = vpop.f32.mrf.mxu2 }
 0x431   : > { %v1922_v44 = vpop.f32.mrf.mxu0 }
 0x432   : > { %v6323_v24 = vadd.f32 %v1942_v23, %v1922_v44  ;;  %v6369_v23 = vpop.permute.xlu1 %1579  ;;  %v415_v44 = vsel %vm411_vm10, 1, %v9234_v50 }
 0x439   : > { %v2016_v63 = vpop.f32.mrf.mxu2 }
 0x43b   : > { %v2036_v30 = vpop.f32.mrf.mxu0 }
 0x43c   : > { %v2037_v59 = vadd.f32 %v2036_v30, %v2016_v63  ;;  %v406_v63 = vsel %vm402_vm14, 1, %v9234_v50  ;;  %v420_v30 = vadd.s32 %v416_v2, %v408_v10 }
 0x43e   : > { %2121 = vrot.lane.b32.xlu1 %v2037_v59, %s4356_s26  ;;  %v428_v59 = vsel %vm424_vm0, 1, %v9234_v50 }
 0x443   : > { %v1902_v28 = vpop.f32.mrf.mxu3  ;;  %v1996_v8 = vpop.f32.mrf.mxu1 }
 0x444   : > { %v6326_v41 = vadd.f32 %v1902_v28, %v1882_v22  ;;  %v409_v22 = vadd.s32 %v405_v25, %v397_v56  ;;  %v6377_v28 = vpop.permute.xlu0 %1577 }
 0x44f   : > { %v1976_v39 = vpop.f32.mrf.mxu3 }
 0x450   : > { %v1997_v21 = vadd.f32 %v1996_v8, %v1976_v39  ;;  %v419_v8 = vadd.s32 %v415_v44, %v407_v17  ;;  %v410_v39 = vadd.s32 %v406_v63, %v398_v9 }
 0x452   : > { %2119 = vrot.lane.b32.xlu2 %v1997_v21, %s4356_s26  ;;  %v417_v21 = vsel %vm413_vm6, 1, %v9234_v50 }
 0x456   : > { %v2056_v29 = vpop.f32.mrf.mxu1 }
 0x457   : > { %v2076_v6 = vpop.f32.mrf.mxu3 }
 0x458   : > { %v2077_v57 = vadd.f32 %v2076_v6, %v2056_v29  ;;  %v427_v29 = vsel %vm423_vm7, 1, %v9234_v50  ;;  %v418_v6 = vsel %vm414_vm13, 1, %v9234_v50 }
 0x45a   : > { %2123 = vrot.lane.b32.xlu0 %v2077_v57, %s4356_s26  ;;  %v6383_v57 = vpop.permute.xlu2 %1581 }
 0x45c   : > { %v2116_v13 = vpop.f32.mrf.mxu2 }
 0x45d   : > { %v2096_v33 = vpop.f32.mrf.mxu0 }
 0x45e   : > { %v2117_v32 = vadd.f32 %v2116_v13, %v2096_v33  ;;  %v432_v13 = vadd.s32 %v428_v59, %v420_v30  ;;  %v421_v33 = vadd.s32 %v417_v21, %v409_v22 }
 0x460   : > { %2125 = vrot.lane.b32.xlu2 %v2117_v32, %s4356_s26  ;;  %v431_v32 = vadd.s32 %v427_v29, %v419_v8 }
 0x472   : > { %v2203_v52 = vpop.f32.mrf.mxu2 }
 0x474   : > { %v2223_v26 = vpop.f32.mrf.mxu0 }
 0x475   : > { %v2224_v42 = vadd.f32 %v2223_v26, %v2203_v52  ;;  %v422_v52 = vadd.s32 %v418_v6, %v410_v39  ;;  %v429_v26 = vsel %vm425_vm2, 1, %v9234_v50 }
 0x477   : > { %2308 = vrot.lane.b32.xlu0 %v2224_v42, %s4357_s11  ;;  %v430_v42 = vsel %vm426_vm4, 1, %v9234_v50 }
 0x47b   : > { %v2183_v14 = vpop.f32.mrf.mxu1 }
 0x47c   : > { %v2163_v61 = vpop.f32.mrf.mxu3 }
 0x47d   : > { %v2184_v51 = vadd.f32 %v2183_v14, %v2163_v61  ;;  %v436_v14 = vmul.u32 8, %v432_v13  ;;  %v6388_v61 = vpop.permute.xlu1 %1575 }
 0x47f   : > { %2306 = vrot.lane.b32.xlu1 %v2184_v51, %s4357_s11  ;;  %2330 = vperm.xlu0 %4199, %v2327_v53   ;;  %v433_v53 = vadd.s32 %v429_v26, %v421_v33  ;;  %v6390_v51 = vpop.permute.xlu0 %1762 }
 0x483   : > { %v2243_v7 = vpop.f32.mrf.mxu1 }
 0x485   : > { %v1759_v58 = vpop.permute.xlu1 %1758 }
 0x486   : > { %v2303_v38 = vpop.f32.mrf.mxu2 }
 0x48e   : > { %v2263_v60 = vpop.f32.mrf.mxu3 }
 0x48f   : > { %v2264_v62 = vadd.f32 %v2263_v60, %v2243_v7  ;;  %v435_v7 = vmul.u32 8, %v431_v32  ;;  %v434_v60 = vadd.s32 %v430_v42, %v422_v52 }
 0x491   : > { %v2283_v31 = vpop.f32.mrf.mxu0  ;;  %2310 = vrot.lane.b32.xlu2 %v2264_v62, %s4357_s11  ;;  %v6392_v62 = vpop.permute.xlu2 %1764  ;;  %v438_v5 = vmul.u32 8, %v434_v60 }
 0x492   : > { %v2304_v45 = vadd.f32 %v2303_v38, %v2283_v31  ;;  %v6395_v38 = vsub.s32 %v9232_v37, %v436_v14  ;;  %v437_v31 = vmul.u32 8, %v433_v53 }
 0x493   : > { %v6409_v37 = vsub.s32 %v9237_v34, %v438_v5  ;;  %v9245_v34 = vld [vmem:[#allocation19_spill] sm:$0xff] }
 0x494   : > { %2312 = vrot.lane.b32.xlu1 %v2304_v45, %s4357_s11  ;;  %v6398_v45 = vsub.s32 %v9233_v54, %v435_v7  ;;  %vm8618_vm9 = vcmp.lt.s32.totalorder %v6395_v38, 8  ;;  %vm8616_vm1 = vcmp.ge.s32.totalorder %v6395_v38, 0  ;;  %v6403_v50 = vsub.s32 %v9235_v49, %v437_v31  ;;  %v1761_v49 = vpop.permute.xlu0 %1760 }
 0x495   : > { %vm596_vm15 = vcmp.ge.s32.totalorder %v6395_v38, 2  ;;  %vm6415_vm0 = vmand %vm8616_vm1, %vm8618_vm9  ;;  %vm602_vm5 = vcmp.lt.s32.totalorder %v6409_v37, 8  ;;  %vm8619_vm3 = vcmp.ge.s32.totalorder %v6409_v37, 0  ;;  %vm1766_vm12 = vcmp.lt.s32.totalorder %v9245_v34, 1 }
 0x496   : > { %vm599_vm10 = vcmp.lt.s32.totalorder %v6398_v45, 8  ;;  %vm8617_vm14 = vcmp.ge.s32.totalorder %v6398_v45, 0  ;;  %vm615_vm6 = vcmp.ge.s32.totalorder %v6398_v45, 1  ;;  %vm6424_vm7 = vmand %vm596_vm15, %vm8618_vm9  ;;  %vm595_vm13 = vcmp.ge.s32.totalorder %v6398_v45, 2 }
 0x497   : > { %vm635_vm2 = vmand %vm8617_vm14, %vm599_vm10  ;;  %vm597_vm4 = vcmp.ge.s32.totalorder %v6403_v50, 2  ;;  %vm601_vm8 = vcmp.lt.s32.totalorder %v6403_v50, 8  ;;  %vm598_vm11 = vcmp.ge.s32.totalorder %v6409_v37, 2  ;;  %vm616_vm9 = vcmp.ge.s32.totalorder %v6395_v38, 1 }
 0x498   : > { %vm619_vm15 = vmand %vm615_vm6, %vm599_vm10  ;;  %v6451_v0 = vsel %vm635_vm2, 1.0, %v9248_v47  ;;  %v1770_v1 = vsel %vm1766_vm12, %v6392_v62, %v1759_v58  ;;  %v6481_v20 = vsel %vm6415_vm0, 1.0, %v9248_v47  ;;  %v6502_v55 = vsel %vm6424_vm7, 1.0, %v9248_v47 }
 0x499   : > { %vm603_vm1 = vmand %vm595_vm13, %vm599_vm10  ;;  %9249 = vst [vmem:[#allocation103_spill] sm:$0xff] %v6451_v0  ;;  %v6462_v40 = vsel %vm619_vm15, 1.0, %v9248_v47  ;;  %vm618_vm10 = vcmp.ge.s32.totalorder %v6409_v37, 1  ;;  %vm1583_vm13 = vcmp.lt.s32.totalorder %v9245_v34, 2  ;;  %vm9257_vm15 = vcmp.lt.s32.totalorder %v6395_v38, 8 }
 0x49a   : > { %vm6445_vm14 = vmand %vm597_vm4, %vm601_vm8  ;;  %9252 = vst [vmem:[#allocation76_spill] sm:$0xff] %v6462_v40  ;;  %vm617_vm4 = vcmp.ge.s32.totalorder %v6403_v50, 1  ;;  %v6484_v11 = vsel %vm603_vm1, 1.0, %v9248_v47  ;;  %v1587_v35 = vsel %vm1583_vm13, %v6383_v57, %v6388_v61  ;;  %v1945_v18 = vmul.f32 %v6451_v0, %v6319_v12 }
 0x49b   : > { %vm6457_vm6 = vmand %vm8619_vm3, %vm602_vm5  ;;  %9255 = vst [vmem:[#allocation104_spill] sm:$0xff] %v6481_v20  ;;  %v1771_v3 = vmul.f32 %v6462_v40, %v1770_v1  ;;  %vm647_vm0 = vcmp.lt.s32.totalorder %v6398_v45, 7  ;;  %v6516_v12 = vsel %vm6445_vm14, 1.0, %v9248_v47  ;;  %v1585_v2 = vsel %vm1583_vm13, %v6377_v28, %v6369_v23 }
 0x49c   : > { %vm6473_vm2 = vmand %vm598_vm11, %vm602_vm5  ;;  %9256 = vst [vmem:[#allocation106_spill] sm:$0xff] %v6484_v11  ;;  %vm633_vm11 = vcmp.ge.s32.totalorder %v6403_v50, 0  ;;  %v6511_v10 = vsel %vm6457_vm6, 1.0, %v9248_v47  ;;  %v1588_v9 = vmul.f32 %v6484_v11, %v1587_v35  ;;  %v1769_v63 = vsel %vm1766_vm12, %v1759_v58, %v1761_v49 }
 0x49d   : > { %vm6493_vm3 = vmand %vm616_vm9, %vm9257_vm15  ;;  %9260 = vst [vmem:[#allocation56_spill] sm:$0xff] %v6502_v55  ;;  %v6525_v56 = vsel %vm6473_vm2, 1.0, %v9248_v47  ;;  %vm663_vm14 = vcmp.lt.s32.totalorder %v6398_v45, 6  ;;  %v1586_v30 = vsel %vm1583_vm13, %v6388_v61, %v6377_v28  ;;  %vm2127_vm6 = vcmp.lt.s32.totalorder %v9245_v34, 127 }
 0x49e   : > { %vm622_vm1 = vmand %vm618_vm10, %vm602_vm5  ;;  %9261 = vst [vmem:[#allocation94_spill] sm:$0xff] %v6511_v10  ;;  %v6543_v44 = vsel %vm6493_vm3, 1.0, %v9248_v47  ;;  %vm650_vm3 = vcmp.lt.s32.totalorder %v6409_v37, 7  ;;  %v1584_v22 = vsel %vm1583_vm13, %v6369_v23, %v6383_v57  ;;  %v1775_v8 = vadd.f32 %v1771_v3, %v1588_v9 }
 0x49f   : > { %9262 = vst [vmem:[#allocation51_spill] sm:$0xff] %v6516_v12  ;;  %vm621_vm5 = vmand %vm617_vm4, %vm601_vm8  ;;  %v6553_v59 = vsel %vm622_vm1, 1.0, %v9248_v47  ;;  %vm648_vm10 = vcmp.lt.s32.totalorder %v6395_v38, 7  ;;  %v1767_v28 = vsel %vm1766_vm12, %v6390_v51, %v6392_v62  ;;  %v1768_v21 = vsel %vm1766_vm12, %v1761_v49, %v6390_v51 }
 0x4a0   : > { %9263 = vst [vmem:[#allocation48_spill] sm:$0xff] %v6525_v56  ;;  %vm6536_vm9 = vmand %vm633_vm11, %vm601_vm8  ;;  %vm9268_vm8 = vcmp.ge.s32.totalorder %v6398_v45, 0  ;;  %v6564_v39 = vsel %vm621_vm5, 1.0, %v9248_v47  ;;  %v1772_v29 = vmul.f32 %v6543_v44, %v1769_v63  ;;  %vm649_vm2 = vcmp.lt.s32.totalorder %v6403_v50, 7 }
 0x4a1   : > { %9266 = vst [vmem:[#allocation83_spill] sm:$0xff] %v6543_v44  ;;  %vm651_vm7 = vmand %vm9268_vm8, %vm647_vm0  ;;  %v6585_v57 = vsel %vm6536_vm9, 1.0, %v9248_v47  ;;  %vm9275_vm1 = vcmp.ge.s32.totalorder %v6409_v37, 0  ;;  %vm664_vm5 = vcmp.lt.s32.totalorder %v6395_v38, 6  ;;  %v1589_v52 = vmul.f32 %v6502_v55, %v1586_v30 }
 0x4a2   : > { %9267 = vst [vmem:[#allocation88_spill] sm:$0xff] %v6553_v59  ;;  %vm9270_vm4 = vmmov %vm9268_vm8  ;;  %v6588_v13 = vsel %vm651_vm7, 1.0, %v9248_v47  ;;  %v1590_v26 = vmul.f32 %v6516_v12, %v1585_v2  ;;  %v1591_v42 = vmul.f32 %v6525_v56, %v1584_v22  ;;  %vm9278_vm9 = vcmp.ge.s32.totalorder %v6395_v38, 0 }
 0x4a3   : > { %9269 = vst [vmem:[#allocation96_spill] sm:$0xff] %v6564_v39  ;;  %vm6578_vm15 = vmand %vm9270_vm4, %vm663_vm14  ;;  %vm2314_vm8 = vcmp.lt.s32.totalorder %v9245_v34, 126  ;;  %v1774_v61 = vmul.f32 %v6553_v59, %v1767_v28  ;;  %v1773_v53 = vmul.f32 %v6564_v39, %v1768_v21  ;;  %v1776_v60 = vadd.f32 %v1772_v29, %v1589_v52  ;;  %v9338_v39 = vld [vmem:[#allocation46_spill] sm:$0xff] }
 0x4a4   : > { %9273 = vst [vmem:[#allocation99_spill] sm:$0xff] %v6585_v57  ;;  %vm6596_vm0 = vmand %vm9275_vm1, %vm650_vm3  ;;  %v6618_v51 = vsel %vm6578_vm15, 1.0, %v9248_v47  ;;  %v1949_v62 = vadd.f32 %v1945_v18, %v1775_v8  ;;  %vm666_vm4 = vcmp.lt.s32.totalorder %v6409_v37, 6  ;;  %v1947_v18 = vmul.f32 %v6585_v57, %v6326_v41 }
 0x4a5   : > { %9274 = vst [vmem:[#allocation114_spill] sm:$0xff] %v6588_v13  ;;  %vm652_vm14 = vmand %vm9278_vm9, %vm648_vm10  ;;  %v6631_v5 = vsel %vm6596_vm0, 1.0, %v9248_v47  ;;  %v1778_v46 = vadd.f32 %v1774_v61, %v1591_v42  ;;  %v1777_v1 = vadd.f32 %v1773_v53, %v1590_v26 }
 0x4a6   : > { %vm653_vm7 = vmand %vm633_vm11, %vm649_vm2  ;;  %9279 = vst [vmem:[#allocation108_spill] sm:$0xff] %v6618_v51  ;;  %vm665_vm2 = vcmp.lt.s32.totalorder %v6403_v50, 6  ;;  %v6634_v58 = vsel %vm652_vm14, 1.0, %v9248_v47  ;;  %vm9290_vm14 = vcmp.lt.s32.totalorder %v9245_v34, 8 }
 0x4a7   : > { %vm9280_vm3 = vmmov %vm9278_vm9  ;;  %9281 = vst [vmem:[#allocation92_spill] sm:$0xff] %v6631_v5  ;;  %v6644_v49 = vsel %vm653_vm7, 1.0, %v9248_v47  ;;  %v1951_v25 = vadd.f32 %v1947_v18, %v1777_v1  ;;  %vm9291_vm7 = vcmp.lt.s32.totalorder %v9245_v34, 64 }
 0x4a8   : > { %vm668_vm10 = vmand %vm9280_vm3, %vm664_vm5  ;;  %9282 = vst [vmem:[#allocation105_spill] sm:$0xff] %v6634_v58 }
 0x4a9   : > { %9283 = vst [vmem:[#allocation50_spill] sm:$0xff] %v6644_v49  ;;  %v6650_v15 = vsel %vm668_vm10, 1.0, %v9248_v47  ;;  %vm669_vm15 = vmand %vm633_vm11, %vm665_vm2  ;;  %vm9295_vm2 = vcmp.lt.s32.totalorder %v9245_v34, 112 }
 0x4aa   : > { %9284 = vst [vmem:[#allocation118_spill] sm:$0xff] %v6650_v15  ;;  %vm670_vm0 = vmand %vm9275_vm1, %vm666_vm4  ;;  %v6669_v63 = vsel %vm669_vm15, 1.0, %v9248_v47 }
 0x4ab   : > { %9285 = vst [vmem:[#allocation127_spill] sm:$0xff] %v6669_v63  ;;  %v6672_v37 = vsel %vm670_vm0, 1.0, %v9248_v47  ;;  %vm9292_vm3 = vmmov %vm9290_vm14 }
 0x4ac   : > { %v6420_v4 = vpop.permute.xlu2 %2119  ;;  %9286 = vst [vmem:[#allocation60_spill] sm:$0xff] %v6672_v37  ;;  %vm9293_vm10 = vmmov %vm9291_vm7 }
 0x4ad   : > { %vm9296_vm4 = vmmov %vm9295_vm2 }
 0x4ae   : > { %vm9297_vm15 = vmmov %vm9291_vm7 }
 0x4af   : > { %vm9298_vm1 = vmmov %vm9295_vm2 }
 0x4b0   : > { %v6468_v19 = vpop.permute.xlu1 %2121  ;;  %vm9300_vm0 = vmmov %vm9298_vm1 }
 0x4b1   : > { %v2130_v33 = vsel %vm2127_vm6, %v6420_v4, %v6468_v19 }
 0x4b2   : > { %v2132_v31 = vmul.f32 %v6588_v13, %v2130_v33 }
 0x4b4   : > { %v2136_v35 = vadd.f32 %v2132_v31, %v1949_v62  ;;  %v9287_v62 = vld [vmem:[#allocation12_spill] sm:$0xff] }
 0x4ba   : > { %v2126_v17 = vpop.permute.xlu2 %2125 }
 0x4bb   : > { %v2131_v38 = vsel %vm2127_vm6, %v2126_v17, %v6420_v4  ;;  %v1946_v4 = vmul.f32 %v6481_v20, %v6321_v48  ;;  %v9331_v20 = vld [vmem:[#allocation36_spill] sm:$0xff] }
 0x4bc   : > { %v2135_v3 = vmul.f32 %v6631_v5, %v2131_v38 }
 0x4bd   : > { %v1950_v2 = vadd.f32 %v1946_v4, %v1776_v60 }
 0x4cc   : > { %v2124_v43 = vpop.permute.xlu0 %2123 }
 0x4cd   : > { %v2129_v54 = vsel %vm2127_vm6, %v6468_v19, %v2124_v43  ;;  %v2128_v27 = vsel %vm2127_vm6, %v2124_v43, %v2126_v17  ;;  %v1948_v43 = vmul.f32 %v6511_v10, %v6323_v24 }
 0x4ce   : > { %v2133_v16 = vmul.f32 %v6634_v58, %v2129_v54  ;;  %v2134_v50 = vmul.f32 %v6644_v49, %v2128_v27  ;;  %v9325_v58 = vld [vmem:[#allocation52_spill] sm:$0xff] }
 0x4cf   : > { %v1952_v9 = vadd.f32 %v1948_v43, %v1778_v46 }
 0x4d0   : > { %v2137_v24 = vadd.f32 %v2133_v16, %v1950_v2  ;;  %v2138_v41 = vadd.f32 %v2134_v50, %v1951_v25 }
 0x4d1   : > { %v2139_v22 = vadd.f32 %v2135_v3, %v1952_v9 }
 0x4e9   : > { %v2309_v14 = vpop.permute.xlu0 %2308 }
 0x4eb   : > { %v2311_v45 = vpop.permute.xlu2 %2310 }
 0x4ec   : > { %v2316_v19 = vsel %vm2314_vm8, %v2309_v14, %v2311_v45 }
 0x4ed   : > { %v2320_v17 = vmul.f32 %v6650_v15, %v2316_v19  ;;  %v9320_v15 = vld [vmem:[#allocation30_spill] sm:$0xff] }
 0x4ef   : > { %v2324_v29 = vadd.f32 %v2320_v17, %v2137_v24 }
 0x4f1   : > { %v2307_v6 = vpop.permute.xlu1 %2306  ;;  %v2331_v8 = vpop.permute.xlu0 %2330 }
 0x4f2   : > { %v2317_v7 = vsel %vm2314_vm8, %v2307_v6, %v2309_v14  ;;  %v2334_v52 = vadd.f32 %v2331_v8, %v2324_v29 }
 0x4f3   : > { %v2319_v36 = vmul.f32 %v6618_v51, %v2317_v7 }
 0x4f5   : > { %v2323_v48 = vadd.f32 %v2319_v36, %v2136_v35 }
 0x4f7   : > { %v2333_v23 = vadd.f32 %v2331_v8, %v2323_v48 }
 0x4f9   : > { %v2337_v14 = vadd.f32 %v2334_v52, %v2333_v23 }
 0x506   : > { %v2313_v30 = vpop.permute.xlu1 %2312 }
 0x507   : > { %v2315_v28 = vsel %vm2314_vm8, %v2311_v45, %v2313_v30  ;;  %v2318_v21 = vsel %vm2314_vm8, %v2313_v30, %v2307_v6 }
 0x508   : > { %v2321_v33 = vmul.f32 %v6669_v63, %v2315_v28  ;;  %v2322_v32 = vmul.f32 %v6672_v37, %v2318_v21 }
 0x50a   : > { %v2325_v47 = vadd.f32 %v2321_v33, %v2138_v41  ;;  %v2326_v26 = vadd.f32 %v2322_v32, %v2139_v22 }
 0x50c   : > { %v2335_v42 = vadd.f32 %v2331_v8, %v2325_v47  ;;  %v2336_v61 = vadd.f32 %v2331_v8, %v2326_v26 }
 0x50e   : > { %v2338_v53 = vadd.f32 %v2337_v14, %v2335_v42 }
 0x510   : > { %v2339_v7 = vadd.f32 %v2338_v53, %v2336_v61 }
 0x512   : > { %2340 = vadd.xlane.f32.xlu2 %v2339_v7 }
 0x585   : > { %v2341_v60 = vpop.xlane.xlu2 %2340 }
 0x586   : > { %v2342_v31 = vmul.f32 %v2341_v60, %v9287_v62 }
 0x588   : > { %v2343_v45 = vsub.f32 %v2333_v23, %v2342_v31  ;;  %v2344_v6 = vsub.f32 %v2334_v52, %v2342_v31  ;;  %v2345_v54 = vsub.f32 %v2335_v42, %v2342_v31  ;;  %v2346_v38 = vsub.f32 %v2336_v61, %v2342_v31 }
 0x58a   : > { %v2347_v27 = vmul.f32 %v2343_v45, %v2343_v45  ;;  %v2348_v36 = vmul.f32 %v2344_v6, %v2344_v6  ;;  %v2349_v46 = vmul.f32 %v2345_v54, %v2345_v54  ;;  %v2350_v19 = vmul.f32 %v2346_v38, %v2346_v38 }
 0x58c   : > { %v2351_v1 = vadd.f32 %v2348_v36, %v2347_v27 }
 0x58e   : > { %v2352_v4 = vadd.f32 %v2351_v1, %v2349_v46 }
 0x590   : > { %v2353_v35 = vadd.f32 %v2352_v4, %v2350_v19 }
 0x592   : > { %2354 = vadd.xlane.f32.xlu1 %v2353_v35 }
 0x605   : > { %v2355_v16 = vpop.xlane.xlu1 %2354 }
 0x606   : > { %v2356_v43 = vmul.f32 %v2355_v16, %v9287_v62 }
 0x608   : > { %v2357_v18 = vadd.f32 1e-05, %v2356_v43 }
 0x60a   : > { %4205 = vrsqrt.f32 %v2357_v18  ;;  %vm2364_vm5 = vweird.f32 %v2357_v18 }
 0x610   : > { %v4206_v3 = vpop.eup %4205 }
 0x611   : > { %v2359_v50 = vmul.f32 %v4206_v3, %v2357_v18  ;;  %vm2365_vm11 = vweird.f32 %v4206_v3 }
 0x612   : > { %vm2366_vm9 = vmor %vm2364_vm5, %vm2365_vm11  ;;  %vm9301_vm11 = vcmp.lt.s32.totalorder %v9245_v34, 120 }
 0x613   : > { %v2360_v2 = vmul.f32 %v4206_v3, %v2359_v50  ;;  %vm9302_vm5 = vmmov %vm9301_vm11 }
 0x615   : > { %v2361_v17 = vmul.f32 0.5, %v2360_v2 }
 0x617   : > { %v2362_v48 = vsub.f32 1.5, %v2361_v17 }
 0x619   : > { %v2363_v9 = vmul.f32 %v4206_v3, %v2362_v48 }
 0x61b   : > { %v2367_v25 = vsel %vm2366_vm9, %v4206_v3, %v2363_v9  ;;  %vm9304_vm9 = vmmov %vm9292_vm3 }
 0x61c   : > { %v2368_v24 = vmul.f32 %v2367_v25, %v2343_v45  ;;  %v2369_v30 = vmul.f32 %v2367_v25, %v2344_v6  ;;  %v2370_v8 = vmul.f32 %v2367_v25, %v2345_v54  ;;  %v2371_v28 = vmul.f32 %v2367_v25, %v2346_v38 }
 0x61e   : > { %v6682_v22 = vmax.f32 %v2368_v24, 0.0  ;;  %v6684_v41 = vmax.f32 %v2369_v30, 0.0  ;;  %v6692_v21 = vmax.f32 %v2370_v8, 0.0  ;;  %v6694_v29 = vmax.f32 %v2371_v28, 0.0 }
 0x620   : > { %9288 = vst [vmem:[#allocation62_spill] sm:$0xff] %v6684_v41  ;;  %2626 = vrot.lane.b32.xlu2 %v6684_v41, %s4352_s17  ;;  %2644 = vrot.lane.b32.xlu1 %v6682_v22, %s4348_s6  ;;  %v6751_v23 = vmul.f32 0.0, %v6682_v22  ;;  %v6772_v33 = vmul.f32 0.0, %v6694_v29 }
 0x621   : > { %2468 = vrot.lane.b32.xlu0 %v6682_v22, %s4349_s8 }
 0x622   : > { %9289 = vst [vmem:[#allocation126_spill] sm:$0xff] %v6751_v23 }
 0x628   : > { %2596 = vrot.lane.b32.xlu2 %v6682_v22, %s4351_s16  ;;  %2648 = vrot.lane.b32.xlu1 %v6692_v21, %s4348_s6 }
 0x629   : > { %2474 = vrot.lane.b32.xlu0 %v6694_v29, %s4349_s8 }
 0x630   : > { %2582 = vrot.lane.b32.xlu2 %v6694_v29, %s4350_s15  ;;  %2602 = vrot.lane.b32.xlu1 %v6694_v29, %s4351_s16 }
 0x631   : > { %2470 = vrot.lane.b32.xlu0 %v6684_v41, %s4349_s8 }
 0x638   : > { %2830 = vrot.lane.b32.xlu2 %v6692_v21, %s4348_s6  ;;  %2598 = vrot.lane.b32.xlu1 %v6684_v41, %s4351_s16 }
 0x639   : > { %2472 = vrot.lane.b32.xlu0 %v6692_v21, %s4349_s8 }
 0x640   : > { %2810 = vrot.lane.b32.xlu2 %v6692_v21, %s4352_s17  ;;  %2578 = vrot.lane.b32.xlu1 %v6684_v41, %s4350_s15 }
 0x641   : > { %2646 = vrot.lane.b32.xlu0 %v6684_v41, %s4348_s6 }
 0x648   : > { %2430 = vrot.lane.b32.xlu2 %v6682_v22, %s4352_s17  ;;  %2650 = vrot.lane.b32.xlu1 %v6694_v29, %s4348_s6 }
 0x649   : > { %2624 = vrot.lane.b32.xlu0 %v6682_v22, %s4352_s17 }
 0x650   : > { %2812 = vrot.lane.b32.xlu2 %v6694_v29, %s4352_s17  ;;  %2630 = vrot.lane.b32.xlu1 %v6694_v29, %s4352_s17 }
 0x651   : > { %2628 = vrot.lane.b32.xlu0 %v6692_v21, %s4352_s17 }
 0x658   : > { %2780 = vrot.lane.b32.xlu2 %v6684_v41, %s4351_s16  ;;  %2600 = vrot.lane.b32.xlu1 %v6692_v21, %s4351_s16 }
 0x659   : > { %2576 = vrot.lane.b32.xlu0 %v6682_v22, %s4350_s15 }
 0x660   : > { %2406 = vrot.lane.b32.xlu2 %v6692_v21, %s4351_s16  ;;  %2832 = vrot.lane.b32.xlu1 %v6694_v29, %s4348_s6 }
 0x661   : > { %2828 = vrot.lane.b32.xlu0 %v6684_v41, %s4348_s6 }
 0x668   : > { %2386 = vrot.lane.b32.xlu2 %v6692_v21, %s4350_s15  ;;  %2452 = vrot.lane.b32.xlu1 %v6684_v41, %s4348_s6 }
 0x669   : > { %2450 = vrot.lane.b32.xlu0 %v6682_v22, %s4348_s6 }
 0x670   : > { %2432 = vrot.lane.b32.xlu1 %v6684_v41, %s4352_s17  ;;  %2766 = vrot.lane.b32.xlu2 %v6751_v23, %s4350_s15 }
 0x671   : > { %2808 = vrot.lane.b32.xlu0 %v6684_v41, %s4352_s17 }
 0x678   : > { %2782 = vrot.lane.b32.xlu1 %v6692_v21, %s4351_s16 }
 0x679   : > { %2580 = vrot.lane.b32.xlu0 %v6692_v21, %s4350_s15 }
 0x67a   : > { %v6778_v52 = vpop.permute.xlu2 %2626 }
 0x680   : > { %2402 = vrot.lane.b32.xlu1 %v6682_v22, %s4351_s16 }
 0x681   : > { %2760 = vrot.lane.b32.xlu0 %v6684_v41, %s4350_s15 }
 0x682   : > { %v2597_v14 = vpop.permute.xlu2 %2596 }
 0x688   : > { %2762 = vrot.lane.b32.xlu1 %v6692_v21, %s4350_s15 }
 0x689   : > { %2382 = vrot.lane.b32.xlu0 %v6682_v22, %s4350_s15 }
 0x68a   : > { %v6801_v31 = vpop.permute.xlu2 %2582 }
 0x690   : > { %2448 = vrot.lane.b32.xlu1 %v6772_v33, %s4348_s6 }
 0x691   : > { %2428 = vrot.lane.b32.xlu0 %v6772_v33, %s4352_s17 }
 0x692   : > { %v2645_v32 = vpop.permute.xlu1 %2644  ;;  %v2831_v27 = vpop.permute.xlu2 %2830 }
 0x693   : > { %v6780_v47 = vpop.permute.xlu0 %2468 }
 0x698   : > { %2786 = vrot.lane.b32.xlu1 %v6751_v23, %s4351_s16 }
 0x699   : > { %2400 = vrot.lane.b32.xlu0 %v6772_v33, %s4351_s16 }
 0x69a   : > { %v2649_v26 = vpop.permute.xlu1 %2648  ;;  %v2811_v16 = vpop.permute.xlu2 %2810 }
 0x69b   : > { %v6786_v42 = vpop.permute.xlu0 %2474 }
 0x6a1   : > { %2380 = vrot.lane.b32.xlu0 %v6772_v33, %s4350_s15 }
 0x6a2   : > { %v2603_v61 = vpop.permute.xlu1 %2602  ;;  %v6868_v9 = vpop.permute.xlu2 %2430 }
 0x6a3   : > { %v6792_v53 = vsel %vm9290_vm14, %v2603_v61, %v2597_v14  ;;  %v2471_v7 = vpop.permute.xlu0 %2470  ;;  %vm9305_vm14 = vmmov %vm9292_vm3 }
 0x6a4   : > { %v6797_v60 = vsel %vm9291_vm7, %v6780_v47, %v2471_v7  ;;  %vm9307_vm7 = vcmp.lt.s32.totalorder %v9245_v34, 16 }
 0x6a5   : > { %2554 = vrot.lane.b32.xlu2 %v6797_v60, %s4348_s6 }
 0x6a9   : > { %2668 = vrot.lane.b32.xlu0 %v6797_v60, %s4350_s15 }
 0x6aa   : > { %v2599_v45 = vpop.permute.xlu1 %2598 }
 0x6ab   : > { %v6807_v6 = vsel %vm9292_vm3, %v2597_v14, %v2599_v45  ;;  %v2473_v54 = vpop.permute.xlu0 %2472  ;;  %vm9308_vm3 = vmmov %vm9302_vm5 }
 0x6ac   : > { %v6811_v38 = vsel %vm9293_vm10, %v2471_v7, %v2473_v54  ;;  %v6836_v4 = vsel %vm9297_vm15, %v2473_v54, %v6786_v42  ;;  %vm9309_vm10 = vmmov %vm9300_vm0 }
 0x6ad   : > { %9294 = vst [vmem:[#allocation17_spill] sm:$0xff] %v6811_v38  ;;  %2534 = vrot.lane.b32.xlu2 %v6797_v60, %s4352_s17  ;;  %2556 = vrot.lane.b32.xlu1 %v6811_v38, %s4348_s6 }
 0x6b1   : > { %2670 = vrot.lane.b32.xlu0 %v6811_v38, %s4350_s15 }
 0x6b2   : > { %v6819_v36 = vpop.permute.xlu1 %2578 }
 0x6b3   : > { %v2647_v46 = vpop.permute.xlu0 %2646 }
 0x6b4   : > { %v6823_v1 = vsel %vm9295_vm2, %v2647_v46, %v2649_v26  ;;  %v6827_v19 = vsel %vm9296_vm4, %v2645_v32, %v2647_v46  ;;  %vm9312_vm2 = vmmov %vm9300_vm0 }
 0x6b5   : > { %2536 = vrot.lane.b32.xlu2 %v6811_v38, %s4352_s17  ;;  %2506 = vrot.lane.b32.xlu1 %v6797_v60, %s4351_s16  ;;  %vm9317_vm4 = vmmov %vm9297_vm15 }
 0x6b6   : > { %vm9324_vm15 = vmmov %vm9308_vm3 }
 0x6b9   : > { %2672 = vrot.lane.b32.xlu0 %v6836_v4, %s4350_s15 }
 0x6ba   : > { %v2651_v35 = vpop.permute.xlu1 %2650 }
 0x6bb   : > { %v6842_v43 = vsel %vm9298_vm1, %v2649_v26, %v2651_v35  ;;  %v6846_v18 = vsel %vm9300_vm0, %v2651_v35, %v2645_v32  ;;  %v6848_v3 = vpop.permute.xlu0 %2624  ;;  %v6896_v32 = vpop.permute.xlu2 %2812  ;;  %v9313_v35 = vld [vmem:[#allocation45_spill] sm:$0xff]  ;;  %vm9330_vm1 = vmmov %vm9304_vm9 }
 0x6bc   : > { %9299 = vst [vmem:[#allocation135_spill] sm:$0xff] %v6842_v43  ;;  %v2817_v14 = vsel %vm9308_vm3, %v2811_v16, %v6896_v32  ;;  %vm9333_vm0 = vmmov %vm9307_vm7 }
 0x6bd   : > { %2510 = vrot.lane.b32.xlu2 %v6836_v4, %s4351_s16  ;;  %2538 = vrot.lane.b32.xlu1 %v6836_v4, %s4352_s17 }
 0x6c1   : > { %2558 = vrot.lane.b32.xlu0 %v6836_v4, %s4348_s6 }
 0x6c2   : > { %v2631_v50 = vpop.permute.xlu1 %2630 }
 0x6c3   : > { %v6859_v2 = vsel %vm9301_vm11, %v2631_v50, %v6848_v3  ;;  %v6861_v17 = vpop.permute.xlu0 %2628  ;;  %v2781_v63 = vpop.permute.xlu2 %2780  ;;  %vm9337_vm11 = vmmov %vm9333_vm0 }
 0x6c4   : > { %v6866_v48 = vsel %vm9302_vm5, %v6861_v17, %v2631_v50  ;;  %vm9341_vm5 = vmmov %vm9333_vm0 }
 0x6c5   : > { %9303 = vst [vmem:[#allocation47_spill] sm:$0xff] %v6866_v48  ;;  %2490 = vrot.lane.b32.xlu2 %v6836_v4, %s4350_s15  ;;  %2716 = vrot.lane.b32.xlu1 %v6797_v60, %s4352_s17 }
 0x6c9   : > { %2736 = vrot.lane.b32.xlu0 %v6797_v60, %s4348_s6 }
 0x6ca   : > { %v2601_v25 = vpop.permute.xlu1 %2600 }
 0x6cb   : > { %v6878_v24 = vsel %vm9304_vm9, %v2601_v25, %v2603_v61  ;;  %v6882_v30 = vsel %vm9305_vm14, %v2599_v45, %v2601_v25  ;;  %v6884_v8 = vpop.permute.xlu0 %2576  ;;  %v9310_v45 = vld [vmem:[#allocation23_spill] sm:$0xff]  ;;  %v9315_v25 = vld [vmem:[#allocation26_spill] sm:$0xff]  ;;  %v6958_v10 = vpop.permute.xlu2 %2406  ;;  %vm9342_vm9 = vmmov %vm9330_vm1 }
 0x6cc   : > { %9306 = vst [vmem:[#allocation68_spill] sm:$0xff] %v6882_v30  ;;  %v6890_v28 = vsel %vm9307_vm7, %v6884_v8, %v6819_v36  ;;  %v6924_v62 = vmul.f32 %v9315_v25, %v2817_v14  ;;  %v9345_v30 = vld [vmem:[#allocation64_spill] sm:$0xff]  ;;  %vm9347_vm14 = vmmov %vm9333_vm0 }
 0x6cd   : > { %2486 = vrot.lane.b32.xlu2 %v6797_v60, %s4350_s15  ;;  %2488 = vrot.lane.b32.xlu1 %v6811_v38, %s4350_s15  ;;  %vm9349_vm7 = vmmov %vm9308_vm3 }
 0x6ce   : > { %9316 = vst [vmem:[#allocation65_spill] sm:$0xff] %v6924_v62  ;;  %vm9353_vm3 = vmmov %vm9333_vm0 }
 0x6d1   : > { %2718 = vrot.lane.b32.xlu0 %v6811_v38, %s4352_s17 }
 0x6d2   : > { %v6900_v26 = vpop.permute.xlu1 %2832 }
 0x6d3   : > { %v2837_v61 = vsel %vm9309_vm10, %v2831_v27, %v6900_v26  ;;  %v6908_v7 = vpop.permute.xlu0 %2828  ;;  %v6996_v12 = vpop.permute.xlu2 %2386  ;;  %vm9356_vm10 = vmmov %vm9312_vm2 }
 0x6d4   : > { %v6911_v54 = vmul.f32 %v9310_v45, %v2837_v61  ;;  %v2838_v46 = vsel %vm9312_vm2, %v6908_v7, %v2831_v27  ;;  %v2479_v27 = vsel %vm9317_vm4, %v6786_v42, %v6780_v47  ;;  %v9318_v61 = vld [vmem:[#allocation27_spill] sm:$0xff]  ;;  %v9322_v47 = vld [vmem:[#allocation42_spill] sm:$0xff]  ;;  %vm9358_vm2 = vmmov %vm9349_vm7 }
 0x6d5   : > { %v6917_v50 = vmul.f32 %v9313_v35, %v2838_v46  ;;  %2738 = vrot.lane.b32.xlu2 %v6811_v38, %s4348_s6  ;;  %2688 = vrot.lane.b32.xlu1 %v6797_v60, %s4351_s16  ;;  %v6935_v46 = vmul.f32 %v9318_v61, %v6692_v21  ;;  %v6943_v37 = vmul.f32 %v9320_v15, %v2479_v27  ;;  %vm9359_vm4 = vmmov %vm9358_vm2 }
 0x6d6   : > { %9311 = vst [vmem:[#allocation130_spill] sm:$0xff] %v6911_v54  ;;  %3021 = vmatpush.msra.mxu0 %v6911_v54  ;;  %v6952_v42 = vmul.f32 %v9322_v47, %v2479_v27  ;;  %v9327_v27 = vld [vmem:[#allocation53_spill] sm:$0xff] }
 0x6d7   : > { %9314 = vst [vmem:[#allocation31_spill] sm:$0xff] %v6917_v50  ;;  %2981 = vmatpush.msrb.mxu1 %v6917_v50  ;;  %v6975_v47 = vmul.f32 %v9327_v27, %v6684_v41  ;;  %v9343_v54 = vld [vmem:[#allocation61_spill] sm:$0xff] }
 0x6d8   : > { %3022 = vmatpush.msra.mxu0 %v6924_v62  ;;  %9319 = vst [vmem:[#allocation71_spill] sm:$0xff] %v6935_v46 }
 0x6d9   : > { %2720 = vrot.lane.b32.xlu0 %v6836_v4, %s4352_s17  ;;  %9321 = vst [vmem:[#allocation63_spill] sm:$0xff] %v6943_v37 }
 0x6da   : > { %3023 = vmatpush.msra.mxu0 %v6935_v46  ;;  %v6940_v14 = vpop.permute.xlu1 %2452  ;;  %9328 = vst [vmem:[#allocation117_spill] sm:$0xff] %v6975_v47 }
 0x6db   : > { %v6945_v5 = vpop.permute.xlu0 %2450 }
 0x6dd   : > { %2674 = vrot.lane.b32.xlu2 %v6943_v37, %s4350_s15  ;;  %2690 = vrot.lane.b32.xlu1 %v6811_v38, %s4351_s16 }
 0x6e1   : > { %2552 = vrot.lane.b32.xlu0 %v6952_v42, %s4348_s6 }
 0x6e2   : > { %v6956_v51 = vpop.permute.xlu1 %2432 }
 0x6e3   : > { %v6960_v15 = vpop.permute.xlu0 %2808 }
 0x6e4   : > { %9323 = vst [vmem:[#allocation70_spill] sm:$0xff] %v6960_v15  ;;  %v2818_v49 = vsel %vm9324_vm15, %v6960_v15, %v2811_v16  ;;  %vm9363_vm15 = vmmov %vm9356_vm10 }
 0x6e5   : > { %v6966_v57 = vmul.f32 %v9325_v58, %v2818_v49  ;;  %2508 = vrot.lane.b32.xlu2 %v6811_v38, %s4351_s16  ;;  %2404 = vrot.lane.b32.xlu1 %v6684_v41, %s4351_s16 }
 0x6e7   : > { %9326 = vst [vmem:[#allocation109_spill] sm:$0xff] %v6966_v57  ;;  %2982 = vmatpush.msrb.mxu1 %v6966_v57 }
 0x6e9   : > { %2532 = vrot.lane.b32.xlu0 %v6952_v42, %s4352_s17  ;;  %2983 = vmatpush.msrb.mxu1 %v6975_v47 }
 0x6ea   : > { %v6980_v16 = vpop.permute.xlu1 %2782 }
 0x6eb   : > { %9329 = vst [vmem:[#allocation113_spill] sm:$0xff] %v6980_v16  ;;  %v2790_v49 = vsel %vm9330_vm1, %v2781_v63, %v6980_v16  ;;  %v6985_v13 = vpop.permute.xlu0 %2580  ;;  %vm9365_vm1 = vmmov %vm9333_vm0 }
 0x6ec   : > { %v6988_v0 = vmul.f32 %v9331_v20, %v2790_v49  ;;  %v6994_v56 = vsel %vm9333_vm0, %v6819_v36, %v6985_v13  ;;  %v7011_v36 = vpop.permute.xlu2 %2766  ;;  %vm9367_vm0 = vmmov %vm9358_vm2 }
 0x6ed   : > { %9334 = vst [vmem:[#allocation115_spill] sm:$0xff] %v6994_v56  ;;  %2740 = vrot.lane.b32.xlu2 %v6836_v4, %s4348_s6  ;;  %2764 = vrot.lane.b32.xlu1 %v6694_v29, %s4350_s15 }
 0x6ee   : > { %9332 = vst [vmem:[#allocation119_spill] sm:$0xff] %v6988_v0  ;;  %3024 = vmatpush.msra.mxu0 %v6988_v0 }
 0x6ef   : > { %9335 = vst [vmem:[#allocation120_spill] sm:$0xff] %v7011_v36 }
 0x6f1   : > { %2504 = vrot.lane.b32.xlu0 %v6952_v42, %s4351_s16 }
 0x6f2   : > { %v7005_v49 = vpop.permute.xlu1 %2402 }
 0x6f3   : > { %v2761_v55 = vpop.permute.xlu0 %2760 }
 0x6f5   : > { %2454 = vrot.lane.b32.xlu2 %v6692_v21, %s4348_s6  ;;  %2692 = vrot.lane.b32.xlu1 %v6836_v4, %s4351_s16 }
 0x6f9   : > { %2484 = vrot.lane.b32.xlu0 %v6952_v42, %s4350_s15 }
 0x6fa   : > { %v7015_v59 = vpop.permute.xlu1 %2762 }
 0x6fb   : > { %9336 = vst [vmem:[#allocation81_spill] sm:$0xff] %v7015_v59  ;;  %v2770_v11 = vsel %vm9337_vm11, %v2761_v55, %v7015_v59  ;;  %v7020_v44 = vpop.permute.xlu0 %2382  ;;  %vm9369_vm11 = vmmov %vm9356_vm10 }
 0x6fc   : > { %v7023_v40 = vmul.f32 %v9338_v39, %v2770_v11 }
 0x6fd   : > { %2434 = vrot.lane.b32.xlu2 %v6692_v21, %s4352_s17 }
 0x6fe   : > { %9339 = vst [vmem:[#allocation79_spill] sm:$0xff] %v7023_v40  ;;  %3025 = vmatpush.msra.mxu0 %v7023_v40  ;;  %v2771_v40 = vsel %vm9341_vm5, %v7011_v36, %v2761_v55  ;;  %vm9373_vm5 = vmmov %vm9365_vm1 }
 0x6ff   : > { %v7028_v47 = vpop.permute.xlu2 %2554  ;;  %v7058_v48 = vmul.f32 %v9345_v30, %v2771_v40 }
 0x701   : > { %2834 = vrot.lane.b32.xlu0 %v6751_v23, %s4348_s6  ;;  %9346 = vst [vmem:[#allocation93_spill] sm:$0xff] %v7058_v48 }
 0x702   : > { %v7032_v57 = vpop.permute.xlu1 %2448 }
 0x703   : > { %v7034_v50 = vpop.permute.xlu0 %2428 }
 0x705   : > { %2814 = vrot.lane.b32.xlu2 %v6751_v23, %s4352_s17  ;;  %v2633_v23 = vsel %vm9349_vm7, %v6778_v52, %v6861_v17  ;;  %v7099_v17 = vmul.f32 %v9318_v61, %v6684_v41  ;;  %vm9379_vm7 = vmmov %vm9367_vm0 }
 0x706   : > { %v7093_v15 = vmul.f32 %v9315_v25, %v2633_v23 }
 0x707   : > { %v7038_v0 = vpop.permute.xlu2 %2534  ;;  %9352 = vst [vmem:[#allocation35_spill] sm:$0xff] %v7099_v17 }
 0x708   : > { %9351 = vst [vmem:[#allocation55_spill] sm:$0xff] %v7093_v15 }
 0x709   : > { %2694 = vrot.lane.b32.xlu0 %v6943_v37, %s4351_s16 }
 0x70a   : > { %v7042_v11 = vpop.permute.xlu1 %2786 }
 0x70b   : > { %9340 = vst [vmem:[#allocation75_spill] sm:$0xff] %v7042_v11  ;;  %v7047_v46 = vpop.permute.xlu0 %2400  ;;  %v2791_v62 = vsel %vm9342_vm9, %v7042_v11, %v2781_v63  ;;  %v7085_v11 = vmul.f32 %v9310_v45, %v6823_v1 }
 0x70c   : > { %v7053_v56 = vmul.f32 %v9343_v54, %v2791_v62 }
 0x70d   : > { %2784 = vrot.lane.b32.xlu2 %v6694_v29, %s4351_s16  ;;  %9350 = vst [vmem:[#allocation102_spill] sm:$0xff] %v7085_v11  ;;  %s3938_s16 = sshll.u32 %s261_s22, 4  ;;  %s3939_s16 = int_to_ptr.vmem [resolvable:$true] %s3938_s16 }
 0x70e   : > { %9344 = vst [vmem:[#allocation54_spill] sm:$0xff] %v7053_v56  ;;  %2984 = vmatpush.msrb.mxu1 %v7053_v56 }
 0x70f   : > { %v2537_v43 = vpop.permute.xlu2 %2536 }
 0x710   : > { %2985 = vmatpush.msrb.mxu1 %v7058_v48 }
 0x711   : > { %2384 = vrot.lane.b32.xlu0 %v6684_v41, %s4350_s15  ;;  %s3936_s15 = scalar_lea.hbm %s8305_s5, %s4125_s30 }
 0x713   : > { %v7064_v55 = vpop.permute.xlu0 %2380 }
 0x715   : > { %2722 = vrot.lane.b32.xlu2 %v6943_v37, %s4352_s17  ;;  %s3940_s17 = sshll.u32 %s3936_s15, 4  ;;  %s3941_s17 = int_to_ptr.hbm [resolvable:$true] %s3940_s17 }
 0x717   : > { %v7068_v63 = vpop.permute.xlu2 %2510 }
 0x719   : > { %2742 = vrot.lane.b32.xlu0 %v6943_v37, %s4348_s6 }
 0x71b   : > { %v2669_v40 = vpop.permute.xlu0 %2668 }
 0x71f   : > { %v7072_v62 = vpop.permute.xlu2 %2490  ;;  %v2557_v56 = vpop.permute.xlu1 %2556 }
 0x720   : > { %v2561_v23 = vsel %vm9356_vm10, %v7028_v47, %v2557_v56 }
 0x723   : > { %v2671_v36 = vpop.permute.xlu0 %2670 }
 0x724   : > { %v2678_v48 = vsel %vm9347_vm14, %v2669_v40, %v2671_v36  ;;  %vm9375_vm14 = vmmov %vm9365_vm1 }
 0x725   : > { %v7077_v59 = vmul.f32 %v9338_v39, %v2678_v48 }
 0x727   : > { %9348 = vst [vmem:[#allocation134_spill] sm:$0xff] %v7077_v59  ;;  %2994 = vmatpush.msrb.mxu2 %v7077_v59  ;;  %v7088_v37 = vpop.permute.xlu2 %2486  ;;  %v7090_v16 = vpop.permute.xlu1 %2506  ;;  %v7107_v59 = vmul.f32 %v9331_v20, %v6807_v6  ;;  %v2541_v6 = vsel %vm9358_vm2, %v7038_v0, %v2537_v43  ;;  %vm9386_vm2 = vmmov %vm9365_vm1 }
 0x729   : > { %2995 = vmatpush.msrb.mxu2 %v7085_v11  ;;  %9355 = vst [vmem:[#allocation129_spill] sm:$0xff] %v7107_v59 }
 0x72b   : > { %2996 = vmatpush.msrb.mxu2 %v7093_v15  ;;  %v2673_v48 = vpop.permute.xlu0 %2672  ;;  %v7115_v15 = vmul.f32 %v9338_v39, %v6890_v28  ;;  %v7133_v28 = vmul.f32 %v9315_v25, %v2541_v6 }
 0x72c   : > { %v7103_v1 = vsel %vm9353_vm3, %v2671_v36, %v2673_v48  ;;  %vm9382_vm3 = vmmov %vm9356_vm10 }
 0x72d   : > { %9354 = vst [vmem:[#allocation69_spill] sm:$0xff] %v7103_v1  ;;  %2997 = vmatpush.msrb.mxu2 %v7099_v17  ;;  %v7129_v17 = vmul.f32 %v9310_v45, %v2561_v23  ;;  %vm9384_vm10 = vmmov %vm9367_vm0 }
 0x72e   : > { %9357 = vst [vmem:[#allocation20_spill] sm:$0xff] %v7115_v15 }
 0x72f   : > { %2998 = vmatpush.msrb.mxu2 %v7107_v59  ;;  %v2739_v41 = vpop.permute.xlu2 %2738  ;;  %v7118_v11 = vpop.permute.xlu1 %2538  ;;  %9361 = vst [vmem:[#allocation25_spill] sm:$0xff] %v7129_v17 }
 0x730   : > { %v7126_v36 = vsel %vm9359_vm4, %v2537_v43, %v7118_v11  ;;  %9362 = vst [vmem:[#allocation72_spill] sm:$0xff] %v7133_v28  ;;  %v7146_v43 = vmul.f32 %v9318_v61, %v6797_v60  ;;  %vm9388_vm4 = vmmov %vm9342_vm9 }
 0x731   : > { %9360 = vst [vmem:[#allocation91_spill] sm:$0xff] %v7126_v36  ;;  %2999 = vmatpush.msrb.mxu2 %v7115_v15 }
 0x732   : > { %9364 = vst [vmem:[#allocation133_spill] sm:$0xff] %v7146_v43 }
 0x733   : > { %v7135_v59 = vpop.permute.xlu0 %2558  ;;  %3000 = vmatpush.msrb.mxu2 %v7129_v17 }
 0x734   : > { %v7141_v1 = vsel %vm9363_vm15, %v2557_v56, %v7135_v59  ;;  %v2634_v56 = vsel %vm9367_vm0, %v6848_v3, %v6778_v52  ;;  %v7185_v3 = vmul.f32 %v9327_v27, %v6682_v22  ;;  %vm9394_vm15 = vmmov %vm9382_vm3 }
 0x735   : > { %3001 = vmatpush.msrb.mxu2 %v7133_v28  ;;  %v7162_v28 = vmul.f32 %v9313_v35, %v6827_v19  ;;  %vm9402_vm0 = vmmov %vm9382_vm3 }
 0x736   : > { %9372 = vst [vmem:[#allocation57_spill] sm:$0xff] %v7185_v3 }
 0x737   : > { %v2675_v23 = vpop.permute.xlu2 %2674  ;;  %3002 = vmatpush.msrb.mxu2 %v7146_v43  ;;  %v7149_v6 = vpop.permute.xlu1 %2716  ;;  %9368 = vst [vmem:[#allocation73_spill] sm:$0xff] %v7162_v28 }
 0x738   : > { %v2679_v15 = vsel %vm9365_vm1, %v2675_v23, %v2669_v40 }
 0x739   : > { %v7154_v17 = vmul.f32 %v9345_v30, %v2679_v15  ;;  %v7171_v15 = vmul.f32 %v9325_v58, %v2634_v56  ;;  %v2587_v56 = vsel %vm9373_vm5, %v6801_v31, %v6884_v8  ;;  %vm9405_vm5 = vmmov %vm9379_vm7 }
 0x73a   : > { %v7209_v8 = vmul.f32 %v9345_v30, %v2587_v56  ;;  %v7226_v56 = vmul.f32 %v9327_v27, %v6797_v60 }
 0x73b   : > { %9366 = vst [vmem:[#allocation84_spill] sm:$0xff] %v7154_v17  ;;  %v7164_v36 = vpop.permute.xlu0 %2736  ;;  %2954 = vmatpush.msra.mxu3 %v7154_v17 }
 0x73c   : > { %v2746_v40 = vsel %vm9369_vm11, %v7164_v36, %v2739_v41  ;;  %9370 = vst [vmem:[#allocation87_spill] sm:$0xff] %v7171_v15  ;;  %vm9404_vm11 = vmmov %vm9379_vm7 }
 0x73d   : > { %v7174_v43 = vmul.f32 %v9313_v35, %v2746_v40  ;;  %2955 = vmatpush.msra.mxu3 %v7162_v28  ;;  %9378 = vst [vmem:[#allocation77_spill] sm:$0xff] %v7209_v8 }
 0x73e   : > { %9381 = vst [vmem:[#allocation49_spill] sm:$0xff] %v7226_v56 }
 0x73f   : > { %9371 = vst [vmem:[#allocation74_spill] sm:$0xff] %v7174_v43  ;;  %2956 = vmatpush.msra.mxu3 %v7171_v15  ;;  %v7178_v52 = vpop.permute.xlu2 %2508  ;;  %2986 = vmatpush.msrb.mxu1 %v7174_v43  ;;  %v7181_v19 = vpop.permute.xlu1 %2488  ;;  %v7205_v15 = vmul.f32 %v9343_v54, %v6792_v53 }
 0x740   : > { %v7195_v40 = vsel %vm9342_vm9, %v7090_v16, %v7178_v52  ;;  %v7201_v43 = vsel %vm9375_vm14, %v7088_v37, %v7181_v19  ;;  %vm9409_vm9 = vmmov %vm9388_vm4 }
 0x741   : > { %9374 = vst [vmem:[#allocation110_spill] sm:$0xff] %v7195_v40  ;;  %2957 = vmatpush.msra.mxu3 %v7185_v3  ;;  %vm9411_vm14 = vmmov %vm9365_vm1 }
 0x742   : > { %9376 = vst [vmem:[#allocation107_spill] sm:$0xff] %v7201_v43 }
 0x743   : > { %9377 = vst [vmem:[#allocation95_spill] sm:$0xff] %v7205_v15  ;;  %v2719_v28 = vpop.permute.xlu0 %2718  ;;  %2958 = vmatpush.msra.mxu3 %v7205_v15 }
 0x744   : > { %v2726_v17 = vsel %vm9379_vm7, %v7149_v6, %v2719_v28  ;;  %vm9413_vm7 = vmmov %vm9388_vm4 }
 0x745   : > { %v7216_v40 = vmul.f32 %v9325_v58, %v2726_v17  ;;  %2959 = vmatpush.msra.mxu3 %v7209_v8  ;;  %v2676_v8 = vsel %vm9386_vm2, %v2673_v48, %v2675_v23  ;;  %vm9419_vm2 = vmmov %vm9405_vm5 }
 0x747   : > { %9380 = vst [vmem:[#allocation111_spill] sm:$0xff] %v7216_v40  ;;  %v7219_v43 = vpop.permute.xlu2 %2740  ;;  %2987 = vmatpush.msrb.mxu1 %v7216_v40  ;;  %v7222_v53 = vpop.permute.xlu1 %2688 }
 0x748   : > { %v2745_v15 = vsel %vm9382_vm3, %v2739_v41, %v7219_v43  ;;  %vm9414_vm3 = vmmov %vm9388_vm4 }
 0x749   : > { %v7232_v3 = vmul.f32 %v9310_v45, %v2745_v15  ;;  %2988 = vmatpush.msrb.mxu1 %v7226_v56  ;;  %v7251_v15 = vmul.f32 %v9318_v61, %v6811_v38 }
 0x74b   : > { %9383 = vst [vmem:[#allocation98_spill] sm:$0xff] %v7232_v3  ;;  %v7235_v17 = vpop.permute.xlu0 %2720  ;;  %3026 = vmatpush.msra.mxu0 %v7232_v3 }
 0x74c   : > { %v2725_v40 = vsel %vm9384_vm10, %v2719_v28, %v7235_v17  ;;  %9387 = vst [vmem:[#allocation112_spill] sm:$0xff] %v7251_v15  ;;  %vm9415_vm10 = vmmov %vm9402_vm0 }
 0x74d   : > { %v7242_v60 = vmul.f32 %v9315_v25, %v2725_v40  ;;  %v9390_v40 = vld [vmem:[#allocation132_spill] sm:$0xff] }
 0x74e   : > { %v7262_v48 = vmul.f32 %v9390_v40, %v2676_v8 }
 0x74f   : > { %9385 = vst [vmem:[#allocation78_spill] sm:$0xff] %v7242_v60  ;;  %3027 = vmatpush.msra.mxu0 %v7242_v60  ;;  %v7247_v41 = vpop.permute.xlu1 %2690  ;;  %v9392_v60 = vld [vmem:[#allocation122_spill] sm:$0xff] }
 0x750   : > { %v2698_v56 = vsel %vm9388_vm4, %v7222_v53, %v7247_v41  ;;  %9391 = vst [vmem:[#allocation24_spill] sm:$0xff] %v7262_v48  ;;  %v7267_v3 = vmul.f32 %v9392_v60, %v6846_v18  ;;  %v9398_v18 = vld [vmem:[#allocation128_spill] sm:$0xff]  ;;  %vm9421_vm4 = vcmask 588800  }
 0x751   : > { %v7258_v28 = vmul.f32 %v9331_v20, %v2698_v56  ;;  %3028 = vmatpush.msra.mxu0 %v7251_v15  ;;  %v9396_v15 = vld [vmem:[#allocation125_spill] sm:$0xff] }
 0x752   : > { %9393 = vst [vmem:[#allocation28_spill] sm:$0xff] %v7267_v3  ;;  %v7278_v8 = vmul.f32 %v9396_v15, %v6859_v2  ;;  %v7295_v2 = vpop.permute.xlu2 %2454 }
 0x753   : > { %9389 = vst [vmem:[#allocation101_spill] sm:$0xff] %v7258_v28  ;;  %v2553_v23 = vpop.permute.xlu0 %2552  ;;  %3029 = vmatpush.msra.mxu0 %v7258_v28  ;;  %v7285_v28 = vmul.f32 %v9398_v18, %v6694_v29 }
 0x754   : > { %v2562_v38 = vsel %vm9394_vm15, %v2553_v23, %v7028_v47  ;;  %9397 = vst [vmem:[#allocation37_spill] sm:$0xff] %v7278_v8  ;;  %v9400_v47 = vld [vmem:[#allocation18_spill] sm:$0xff]  ;;  %vm9423_vm15 = vmmov %vm9414_vm3 }
 0x755   : > { %3074 = vmatpush.msrb.mxu0 %v7262_v48  ;;  %v7274_v56 = vmul.f32 %v9313_v35, %v2562_v38  ;;  %9399 = vst [vmem:[#allocation116_spill] sm:$0xff] %v7285_v28  ;;  %v2584_v38 = vsel %vm9365_vm1, %v6985_v13, %v6801_v31  ;;  %v7293_v48 = vmul.f32 %v9400_v47, %v6878_v24  ;;  %vm9425_vm1 = vmmov %vm9402_vm0 }
 0x757   : > { %9395 = vst [vmem:[#allocation29_spill] sm:$0xff] %v7274_v56  ;;  %3075 = vmatpush.msrb.mxu0 %v7267_v3  ;;  %2960 = vmatpush.msra.mxu3 %v7274_v56  ;;  %v2563_v56 = vsel %vm9402_vm0, %v7135_v59, %v2553_v23  ;;  %v7302_v3 = vmul.f32 %v9390_v40, %v2584_v38 }
 0x758   : > { %9401 = vst [vmem:[#allocation44_spill] sm:$0xff] %v7293_v48  ;;  %v7321_v59 = vmul.f32 %v9327_v27, %v6952_v42  ;;  %v7335_v23 = vmul.f32 %v9398_v18, %v6836_v4  ;;  %v2492_v42 = vsel %vm9411_vm14, %v7181_v19, %v7072_v62  ;;  %v2459_v19 = vsel %vm9415_vm10, %v7295_v2, %v7032_v57 }
 0x759   : > { %3076 = vmatpush.msrb.mxu0 %v7278_v8  ;;  %9403 = vst [vmem:[#allocation39_spill] sm:$0xff] %v7302_v3 }
 0x75a   : > { %9407 = vst [vmem:[#allocation124_spill] sm:$0xff] %v7321_v59  ;;  %v7344_v38 = vpop.permute.xlu2 %2434 }
 0x75b   : > { %3077 = vmatpush.msrb.mxu0 %v7285_v28  ;;  %v2533_v8 = vpop.permute.xlu0 %2532  ;;  %v7315_v28 = vmul.f32 %v9392_v60, %v2563_v56  ;;  %9410 = vst [vmem:[#allocation80_spill] sm:$0xff] %v7335_v23 }
 0x75c   : > { %v2542_v13 = vsel %vm9404_vm11, %v2533_v8, %v7038_v0  ;;  %v2543_v31 = vsel %vm9405_vm5, %v7118_v11, %v2533_v8  ;;  %v2512_v11 = vsel %vm9409_vm9, %v7178_v52, %v7068_v63  ;;  %vm9426_vm11 = vmmov %vm9411_vm14 }
 0x75d   : > { %3078 = vmatpush.msrb.mxu0 %v7293_v48  ;;  %v7312_v24 = vmul.f32 %v9325_v58, %v2542_v13  ;;  %v7324_v0 = vmul.f32 %v9396_v15, %v2543_v31  ;;  %v7342_v8 = vmul.f32 %v9400_v47, %v2512_v11  ;;  %vm9427_vm5 = vmmov %vm9426_vm11 }
 0x75e   : > { %vm9429_vm9 = vmmov %vm9419_vm2 }
 0x75f   : > { %9406 = vst [vmem:[#allocation121_spill] sm:$0xff] %v7312_v24  ;;  %3079 = vmatpush.msrb.mxu0 %v7302_v3  ;;  %2961 = vmatpush.msra.mxu3 %v7312_v24  ;;  %vm9430_vm14 = vmmov %vm9419_vm2 }
 0x760   : > { %9408 = vst [vmem:[#allocation58_spill] sm:$0xff] %v7324_v0  ;;  %vm9437_vm10 = vmmov %vm9427_vm5 }
 0x761   : > { %3080 = vmatpush.msrb.mxu0 %v7315_v28  ;;  %2962 = vmatpush.msra.mxu3 %v7321_v59  ;;  %9412 = vst [vmem:[#allocation67_spill] sm:$0xff] %v7342_v8 }
 0x763   : > { %3081 = vmatpush.msrb.mxu0 %v7324_v0  ;;  %v2505_v56 = vpop.permute.xlu0 %2504  ;;  %v7364_v0 = vmul.f32 %v9390_v40, %v2492_v42 }
 0x764   : > { %v2514_v52 = vsel %vm9413_vm7, %v2505_v56, %v7090_v16  ;;  %v2515_v13 = vsel %vm9414_vm3, %v7068_v63, %v2505_v56  ;;  %v2439_v16 = vsel %vm9419_vm2, %v7344_v38, %v7034_v50  ;;  %v7373_v63 = vld [vmem:[#allocation6 + $0x58] sm:$0xff]  ;;  %v7376_v56 = vmul.f32 %v9392_v60, %v2459_v19  ;;  %vm9436_vm7 = vmmov %vm9414_vm3 }
 0x765   : > { %3082 = vmatpush.msrb.mxu0 %v7335_v23  ;;  %v7358_v31 = vmul.f32 %v9343_v54, %v2515_v13  ;;  %v7361_v11 = vmul.f32 %v9331_v20, %v2514_v52  ;;  %9418 = vst [vmem:[#allocation66_spill] sm:$0xff] %v7364_v0  ;;  %v7378_v52 = vpop.permute.xlu1 %2404  ;;  %v7384_v42 = vmul.f32 %v9396_v15, %v2439_v16  ;;  %vm9441_vm2 = vmmov %vm9427_vm5 }
 0x766   : > { %9420 = vst [vmem:[#allocation86_spill] sm:$0xff] %v7376_v56  ;;  %4099 = vmatmul.msk.f32.vlgmr.msra.gmra.mxu0 %vm9421_vm4, %v7373_v63  ;;  %v2408_v13 = vsel %vm9423_vm15, %v7378_v52, %v6958_v10  ;;  %v7393_v19 = vmul.f32 %v9398_v18, %v6692_v21  ;;  %v2458_v16 = vsel %vm9402_vm0, %v7032_v57, %v6945_v5  ;;  %vm9443_vm4 = vmmov %vm9402_vm0 }
 0x767   : > { %9416 = vst [vmem:[#allocation59_spill] sm:$0xff] %v7358_v31  ;;  %3083 = vmatpush.msrb.mxu0 %v7342_v8  ;;  %3003 = vmatpush.msrb.mxu2 %v7361_v11  ;;  %v2437_v57 = vsel %vm9429_vm9, %v6868_v9, %v6956_v51  ;;  %vm9444_vm15 = vmmov %vm9402_vm0 }
 0x768   : > { %9417 = vst [vmem:[#allocation123_spill] sm:$0xff] %v7361_v11  ;;  %2963 = vmatpush.msra.mxu3 %v7358_v31 }
 0x769   : > { %3084 = vmatpush.msrb.mxu0 %v7364_v0  ;;  %9422 = vst [vmem:[#allocation43_spill] sm:$0xff] %v7384_v42  ;;  %v2457_v0 = vsel %vm9425_vm1, %v6945_v5, %v6940_v14  ;;  %v2438_v5 = vsel %vm9430_vm14, %v7034_v50, %v6868_v9  ;;  %v7438_v9 = vmul.f32 %v9315_v25, %v2437_v57  ;;  %vm9447_vm1 = vmmov %vm9429_vm9 }
 0x76a   : > { %9424 = vst [vmem:[#allocation82_spill] sm:$0xff] %v7393_v19  ;;  %v7441_v50 = vmul.f32 %v9325_v58, %v2438_v5  ;;  %v2391_v58 = vsel %vm9437_vm10, %v6996_v12, %v7064_v55  ;;  %vm9449_vm0 = vmmov %vm9447_vm1 }
 0x76b   : > { %3085 = vmatpush.msrb.mxu0 %v7376_v56  ;;  %v2485_v8 = vpop.permute.xlu0 %2484  ;;  %9434 = vst [vmem:[#allocation22_spill] sm:$0xff] %v7438_v9  ;;  %vm9462_vm9 = vmmov %vm9414_vm3 }
 0x76c   : > { %v2494_v56 = vsel %vm9426_vm11, %v2485_v8, %v7088_v37  ;;  %v2495_v23 = vsel %vm9427_vm5, %v7072_v62, %v2485_v8  ;;  %v7425_v37 = vmul.f32 %v9400_v47, %v2408_v13  ;;  %v2815_v62 = vpop.permute.xlu2 %2814  ;;  %v7432_v8 = vmul.f32 %v9313_v35, %v2458_v16  ;;  %9435 = vst [vmem:[#allocation34_spill] sm:$0xff] %v7441_v50  ;;  %v9450_v16 = vld [vmem:[#allocation85_spill] sm:$0xff]  ;;  %vm9457_vm11 = vmmov %vm9414_vm3 }
 0x76d   : > { %3086 = vmatpush.msrb.mxu0 %v7384_v42  ;;  %v7411_v11 = vmul.f32 %v9345_v30, %v2495_v23  ;;  %v7414_v31 = vmul.f32 %v9338_v39, %v2494_v56  ;;  %v7429_v23 = vmul.f32 %v9310_v45, %v2457_v0  ;;  %v2411_v45 = vsel %vm9436_vm7, %v6958_v10, %v7047_v46  ;;  %vm9461_vm5 = vmmov %vm9414_vm3 }
 0x76e   : > { %9431 = vst [vmem:[#allocation21_spill] sm:$0xff] %v7425_v37  ;;  %v2410_v35 = vsel %vm9414_vm3, %v7047_v46, %v7005_v49  ;;  %v7461_v10 = vmul.f32 %v9327_v27, %v6772_v33  ;;  %v7465_v0 = vmul.f32 %v9318_v61, %v6682_v22  ;;  %v7468_v46 = vmul.f32 %v9343_v54, %v2411_v45  ;;  %v2765_v45 = vpop.permute.xlu1 %2764  ;;  %vm9466_vm14 = vmmov %vm9441_vm2 }
 0x76f   : > { %9428 = vst [vmem:[#allocation131_spill] sm:$0xff] %v7411_v11  ;;  %3087 = vmatpush.msrb.mxu0 %v7393_v19  ;;  %2964 = vmatpush.msra.mxu3 %v7411_v11  ;;  %v2390_v56 = vsel %vm9441_vm2, %v7064_v55, %v7020_v44  ;;  %v7475_v13 = vmul.f32 %v9331_v20, %v2410_v35  ;;  %v9448_v55 = vld [vmem:[#allocation70_spill] sm:$0xff]  ;;  %v9456_v35 = vld [vmem:[#allocation113_spill] sm:$0xff]  ;;  %vm9472_vm7 = vmmov %vm9441_vm2  ;;  %vm9480_vm3 = vcmask 588800  }
 0x770   : > { %9432 = vst [vmem:[#allocation33_spill] sm:$0xff] %v7429_v23  ;;  %3004 = vmatpush.msrb.mxu2 %v7414_v31  ;;  %v7486_v61 = vmul.f32 %v9345_v30, %v2391_v58  ;;  %v7489_v27 = vmul.f32 %v9338_v39, %v2390_v56  ;;  %v2816_v20 = vsel %vm9447_vm1, %v6896_v32, %v2815_v62  ;;  %v7505_v39 = vld [vmem:[#allocation6 + $0x50] sm:$0xff]  ;;  %v9453_v32 = vld [vmem:[#allocation89_spill] sm:$0xff]  ;;  %vm9483_vm10 = vmmov %vm9441_vm2 }
 0x771   : > { %9433 = vst [vmem:[#allocation32_spill] sm:$0xff] %v7432_v8  ;;  %3088 = vmatpush.msrb.mxu0 %v7425_v37  ;;  %2965 = vmatpush.msra.mxu3 %v7432_v8  ;;  %v7510_v5 = vmul.f32 %v9453_v32, %v2816_v20  ;;  %v9458_v56 = vld [vmem:[#allocation90_spill] sm:$0xff]  ;;  %vm9493_vm2 = vmmov %vm9449_vm0 }
 0x772   : > { %3005 = vmatpush.msrb.mxu2 %v7429_v23  ;;  %9438 = vst [vmem:[#allocation40_spill] sm:$0xff] %v7461_v10  ;;  %vm9495_vm1 = vmmov %vm9444_vm15 }
 0x773   : > { %v2835_v25 = vpop.permute.xlu0 %2834  ;;  %2966 = vmatpush.msra.mxu3 %v7441_v50  ;;  %9439 = vst [vmem:[#allocation38_spill] sm:$0xff] %v7465_v0 }
 0x774   : > { %3006 = vmatpush.msrb.mxu2 %v7438_v9  ;;  %9440 = vst [vmem:[#allocation41_spill] sm:$0xff] %v7468_v46  ;;  %v2836_v33 = vsel %vm9443_vm4, %v6900_v26, %v2835_v25  ;;  %v2839_v22 = vsel %vm9444_vm15, %v2835_v25, %v6908_v7  ;;  %v2819_v26 = vsel %vm9449_vm0, %v2815_v62, %v9448_v55  ;;  %v2785_v7 = vpop.permute.xlu2 %2784  ;;  %vm9494_vm4 = vmmov %vm9449_vm0 }
 0x775   : > { %9442 = vst [vmem:[#allocation23_spill] sm:$0xff] %v7475_v13  ;;  %2967 = vmatpush.msra.mxu3 %v7461_v10  ;;  %v7500_v57 = vmul.f32 %v9450_v16, %v2836_v33  ;;  %v7503_v30 = vmul.f32 %v9392_v60, %v2839_v22  ;;  %v7513_v62 = vmul.f32 %v9396_v15, %v2819_v26  ;;  %v9460_v22 = vld [vmem:[#allocation75_spill] sm:$0xff]  ;;  %v9463_v26 = vld [vmem:[#allocation126_spill] sm:$0xff]  ;;  %vm9500_vm0 = vmmov %vm9461_vm5 }
 0x776   : > { %3007 = vmatpush.msrb.mxu2 %v7465_v0  ;;  %9445 = vst [vmem:[#allocation45_spill] sm:$0xff] %v7486_v61  ;;  %v2789_v58 = vsel %vm9457_vm11, %v9456_v35, %v2785_v7  ;;  %v7524_v33 = vmul.f32 %v9458_v56, %v6694_v29  ;;  %v2788_v20 = vsel %vm9461_vm5, %v2785_v7, %v9460_v22  ;;  %v9465_v35 = vld [vmem:[#allocation81_spill] sm:$0xff]  ;;  %v9469_v22 = vld [vmem:[#allocation100_spill] sm:$0xff]  ;;  %vm9501_vm11 = vmmov %vm9500_vm0 }
 0x777   : > { %9446 = vst [vmem:[#allocation26_spill] sm:$0xff] %v7489_v27  ;;  %2968 = vmatpush.msra.mxu3 %v7468_v46  ;;  %v7539_v29 = vmul.f32 %v9398_v18, %v9463_v26  ;;  %v9468_v7 = vld [vmem:[#allocation69_spill] sm:$0xff]  ;;  %v7560_v26 = vmul.f32 %v9400_v47, %v2788_v20  ;;  %vm9503_vm5 = vmmov %vm9495_vm1 }
 0x778   : > { %3008 = vmatpush.msrb.mxu2 %v7475_v13  ;;  %9451 = vst [vmem:[#allocation27_spill] sm:$0xff] %v7500_v57  ;;  %v7549_v37 = vmul.f32 %v9469_v22, %v9468_v7  ;;  %v7594_v7 = vmul.f32 %v9458_v56, %v6692_v21  ;;  %v9490_v21 = vld [vmem:[#allocation130_spill] sm:$0xff] }
 0x779   : > { %9452 = vst [vmem:[#allocation30_spill] sm:$0xff] %v7503_v30  ;;  %2969 = vmatpush.msra.mxu3 %v7486_v61 }
 0x77a   : > { %3009 = vmatpush.msrb.mxu2 %v7489_v27  ;;  %9454 = vst [vmem:[#allocation42_spill] sm:$0xff] %v7510_v5  ;;  %2970 = vmatmul.f32.vlgmr.msra.gmra.mxu3 %v7505_v39 }
 0x77b   : > { %9455 = vst [vmem:[#allocation52_spill] sm:$0xff] %v7513_v62  ;;  %3061 = vmatpush.msrb.mxu3 %v7500_v57  ;;  %v7520_v25 = vpop.permute.xlu0 %2694  ;;  %3010 = vmatmul.f32.vlgmr.msrb.gmra.mxu2 %v7505_v39 }
 0x77c   : > { %3101 = vmatpush.msra.mxu2 %v7503_v30  ;;  %9459 = vst [vmem:[#allocation53_spill] sm:$0xff] %v7524_v33  ;;  %v2699_v55 = vsel %vm9462_vm9, %v7520_v25, %v7222_v53  ;;  %v2769_v30 = vsel %vm9466_vm14, %v9465_v35, %v2765_v45  ;;  %v9471_v53 = vld [vmem:[#allocation120_spill] sm:$0xff]  ;;  %vm9509_vm9 = vmmov %vm9493_vm2 }
 0x77d   : > { %3062 = vmatpush.msrb.mxu3 %v7510_v5  ;;  %9464 = vst [vmem:[#allocation36_spill] sm:$0xff] %v7539_v29  ;;  %v7545_v57 = vmul.f32 %v9343_v54, %v2699_v55  ;;  %v2768_v5 = vsel %vm9472_vm7, %v2765_v45, %v9471_v53  ;;  %v9476_v54 = vld [vmem:[#allocation135_spill] sm:$0xff]  ;;  %v7568_v35 = vmul.f32 %v9469_v22, %v2769_v30  ;;  %vm9517_vm14 = vmmov %vm9500_vm0 }
 0x77e   : > { %3102 = vmatpush.msra.mxu2 %v7513_v62  ;;  %9470 = vst [vmem:[#allocation61_spill] sm:$0xff] %v7549_v37  ;;  %v9473_v62 = vld [vmem:[#allocation97_spill] sm:$0xff]  ;;  %v7565_v55 = vmul.f32 %v9450_v16, %v9476_v54  ;;  %v7573_v45 = vmul.f32 %v9390_v40, %v2768_v5  ;;  %v9486_v54 = vld [vmem:[#allocation68_spill] sm:$0xff] }
 0x77f   : > { %9467 = vst [vmem:[#allocation46_spill] sm:$0xff] %v7545_v57  ;;  %v7555_v27 = vmul.f32 %v9473_v62, %v2789_v58  ;;  %3063 = vmatpush.msrb.mxu3 %v7524_v33  ;;  %2989 = vmatpush.msrb.mxu1 %v7545_v57  ;;  %v9481_v58 = vld [vmem:[#allocation47_spill] sm:$0xff] }
 0x780   : > { %3103 = vmatpush.msra.mxu2 %v7539_v29  ;;  %9475 = vst [vmem:[#allocation132_spill] sm:$0xff] %v7560_v26  ;;  %4098 = vmatmul.msk.f32.vlgmr.msrb.gmra.mxu1 %vm9480_vm3, %v7373_v63  ;;  %v7580_v20 = vmul.f32 %v9453_v32, %v9481_v58  ;;  %v7601_v58 = vmul.f32 %v9473_v62, %v9486_v54  ;;  %v9492_v54 = vld [vmem:[#allocation91_spill] sm:$0xff] }
 0x781   : > { %9474 = vst [vmem:[#allocation64_spill] sm:$0xff] %v7555_v27  ;;  %3034 = vmatpush.msra.mxu1 %v7549_v37  ;;  %3064 = vmatpush.msrb.mxu3 %v7555_v27 }
 0x782   : > { %9477 = vst [vmem:[#allocation122_spill] sm:$0xff] %v7565_v55  ;;  %3104 = vmatpush.msra.mxu2 %v7560_v26  ;;  %v7620_v26 = vmul.f32 %v9453_v32, %v9492_v54  ;;  %v9496_v54 = vld [vmem:[#allocation71_spill] sm:$0xff] }
 0x783   : > { %9478 = vst [vmem:[#allocation125_spill] sm:$0xff] %v7568_v35  ;;  %3035 = vmatpush.msra.mxu1 %v7565_v55  ;;  %3065 = vmatpush.msrb.mxu3 %v7568_v35  ;;  %v7585_v30 = vpop.permute.xlu0 %2384  ;;  %v2723_v35 = vpop.permute.xlu2 %2722 }
 0x784   : > { %9479 = vst [vmem:[#allocation128_spill] sm:$0xff] %v7573_v45  ;;  %3105 = vmatpush.msra.mxu2 %v7573_v45  ;;  %v2388_v5 = vsel %vm9483_vm10, %v7585_v30, %v6996_v12  ;;  %v9488_v45 = vld [vmem:[#allocation115_spill] sm:$0xff]  ;;  %v2727_v29 = vsel %vm9494_vm4, %v2723_v35, %v7149_v6  ;;  %vm9523_vm10 = vmmov %vm9480_vm3 }
 0x785   : > { %9482 = vst [vmem:[#allocation18_spill] sm:$0xff] %v7580_v20  ;;  %3036 = vmatpush.msra.mxu1 %v7580_v20  ;;  %v7597_v53 = vmul.f32 %v9390_v40, %v2388_v5  ;;  %v7607_v12 = vmul.f32 %v9469_v22, %v9488_v45  ;;  %v7614_v40 = vmul.f32 %v9450_v16, %v7141_v1  ;;  %v9491_v5 = vld [vmem:[#allocation65_spill] sm:$0xff]  ;;  %v9497_v6 = vld [vmem:[#allocation119_spill] sm:$0xff] }
 0x786   : > { %9484 = vst [vmem:[#allocation70_spill] sm:$0xff] %v7594_v7  ;;  %v2724_v45 = vsel %vm9493_vm2, %v7235_v17, %v2723_v35  ;;  %vm9563_vm2 = vmmov %vm9480_vm3 }
 0x787   : > { %9485 = vst [vmem:[#allocation85_spill] sm:$0xff] %v7597_v53  ;;  %3037 = vmatpush.msra.mxu1 %v7594_v7  ;;  %3089 = vmatpush.msrb.mxu0 %v7597_v53  ;;  %vm9568_vm4 = vmmov %vm9563_vm2 }
 0x788   : > { %9487 = vst [vmem:[#allocation89_spill] sm:$0xff] %v7601_v58  ;;  %3090 = vmatmul.f32.vlgmr.msrb.gmra.mxu0 %v7505_v39 }
 0x789   : > { %9489 = vst [vmem:[#allocation113_spill] sm:$0xff] %v7607_v12  ;;  %3038 = vmatpush.msra.mxu1 %v7601_v58  ;;  %3203 = vmatpush.msra.mxu0 %v9490_v21 }
 0x78b   : > { %3039 = vmatpush.msra.mxu1 %v7607_v12  ;;  %3204 = vmatpush.msra.mxu0 %v9491_v5  ;;  %v2743_v27 = vpop.permute.xlu0 %2742  ;;  %v2693_v12 = vpop.permute.xlu1 %2692 }
 0x78c   : > { %v2744_v1 = vsel %vm9444_vm15, %v7219_v43, %v2743_v27  ;;  %v2747_v5 = vsel %vm9495_vm1, %v2743_v27, %v7164_v36  ;;  %v9498_v43 = vld [vmem:[#allocation17_spill] sm:$0xff]  ;;  %v7649_v36 = vmul.f32 %v9453_v32, %v2724_v45  ;;  %v7652_v27 = vmul.f32 %v9396_v15, %v2727_v29  ;;  %v9502_v15 = vld [vmem:[#allocation79_spill] sm:$0xff]  ;;  %vm9574_vm15 = vmmov %vm9563_vm2 }
 0x78d   : > { %3040 = vmatpush.msra.mxu1 %v7614_v40  ;;  %3205 = vmatpush.msra.mxu0 %v9496_v54  ;;  %v7637_v17 = vmul.f32 %v9450_v16, %v2744_v1  ;;  %v7640_v33 = vmul.f32 %v9392_v60, %v2747_v5  ;;  %v7646_v35 = vmul.f32 %v9458_v56, %v9498_v43  ;;  %v9499_v60 = vld [vmem:[#allocation110_spill] sm:$0xff]  ;;  %v9505_v43 = vld [vmem:[#allocation63_spill] sm:$0xff]  ;;  %vm9576_vm1 = vmmov %vm9563_vm2 }
 0x78e   : > { %v7658_v5 = vmul.f32 %v9473_v62, %v9499_v60  ;;  %v2697_v1 = vsel %vm9500_vm0, %v7247_v41, %v2693_v12  ;;  %v2696_v45 = vsel %vm9501_vm11, %v2693_v12, %v7520_v25  ;;  %v2456_v29 = vsel %vm9503_vm5, %v6940_v14, %v7295_v2  ;;  %v9507_v12 = vld [vmem:[#allocation107_spill] sm:$0xff]  ;;  %vm9611_vm0 = vmmov %vm9576_vm1 }
 0x78f   : > { %3041 = vmatpush.msra.mxu1 %v7620_v26  ;;  %3206 = vmatpush.msra.mxu0 %v9497_v6  ;;  %v7676_v41 = vmul.f32 %v9458_v56, %v6836_v4  ;;  %v7680_v25 = vmul.f32 %v9398_v18, %v9505_v43  ;;  %v7684_v60 = vmul.f32 %v9469_v22, %v9507_v12  ;;  %v9512_v43 = vld [vmem:[#allocation78_spill] sm:$0xff]  ;;  %vm9629_vm11 = vmmov %vm9611_vm0 }
 0x790   : > { %3066 = vmatpush.msrb.mxu3 %v7637_v17  ;;  %3106 = vmatpush.msra.mxu2 %v7640_v33  ;;  %v2436_v14 = vsel %vm9509_vm9, %v6956_v51, %v7344_v38  ;;  %v7693_v4 = vmul.f32 %v9473_v62, %v2697_v1  ;;  %v7696_v2 = vmul.f32 %v9400_v47, %v2696_v45  ;;  %v9514_v47 = vld [vmem:[#allocation84_spill] sm:$0xff]  ;;  %v9515_v38 = vld [vmem:[#allocation134_spill] sm:$0xff]  ;;  %v9518_v45 = vld [vmem:[#allocation73_spill] sm:$0xff] }
 0x791   : > { %3042 = vmatpush.msra.mxu1 %v7646_v35  ;;  %3207 = vmatpush.msra.mxu0 %v9502_v15  ;;  %9504 = vst [vmem:[#allocation90_spill] sm:$0xff] %v7676_v41  ;;  %v9508_v15 = vld [vmem:[#allocation98_spill] sm:$0xff]  ;;  %v7701_v18 = vmul.f32 %v9450_v16, %v2456_v29  ;;  %v7708_v51 = vmul.f32 %v9453_v32, %v2436_v14  ;;  %v9516_v1 = vld [vmem:[#allocation112_spill] sm:$0xff]  ;;  %v9520_v32 = vld [vmem:[#allocation101_spill] sm:$0xff] }
 0x792   : > { %3067 = vmatpush.msrb.mxu3 %v7649_v36  ;;  %3107 = vmatpush.msra.mxu2 %v7652_v27  ;;  %9506 = vst [vmem:[#allocation75_spill] sm:$0xff] %v7680_v25  ;;  %v2409_v16 = vsel %vm9517_vm14, %v7005_v49, %v7378_v52  ;;  %v9519_v29 = vld [vmem:[#allocation102_spill] sm:$0xff]  ;;  %v9525_v52 = vld [vmem:[#allocation24_spill] sm:$0xff]  ;;  %vm9636_vm5 = vmmov %vm9611_vm0 }
 0x793   : > { %3043 = vmatpush.msra.mxu1 %v7658_v5  ;;  %3208 = vmatpush.msra.mxu0 %v9508_v15  ;;  %9510 = vst [vmem:[#allocation126_spill] sm:$0xff] %v7693_v4  ;;  %v9521_v12 = vld [vmem:[#allocation62_spill] sm:$0xff]  ;;  %v7735_v49 = vmul.f32 %v9473_v62, %v2409_v16  ;;  %v9532_v62 = vld [vmem:[#allocation37_spill] sm:$0xff]  ;;  %v9533_v16 = vld [vmem:[#allocation95_spill] sm:$0xff] }
 0x794   : > { %9511 = vst [vmem:[#allocation81_spill] sm:$0xff] %v7696_v2  ;;  %3068 = vmatpush.msrb.mxu3 %v7676_v41  ;;  %3108 = vmatpush.msra.mxu2 %v7680_v25  ;;  %v7724_v14 = vmul.f32 %v9458_v56, %v9521_v12  ;;  %v9526_v56 = vld [vmem:[#allocation87_spill] sm:$0xff]  ;;  %vm9639_vm9 = vmmov %vm9611_vm0 }
 0x795   : > { %3044 = vmatpush.msra.mxu1 %v7684_v60  ;;  %3209 = vmatpush.msra.mxu0 %v9512_v43  ;;  %9513 = vst [vmem:[#allocation69_spill] sm:$0xff] %v7708_v51  ;;  %v9527_v12 = vld [vmem:[#allocation55_spill] sm:$0xff]  ;;  %vm9655_vm14 = vmmov %vm9611_vm0 }
 0x796   : > { %3069 = vmatpush.msrb.mxu3 %v7693_v4  ;;  %3109 = vmatpush.msra.mxu2 %v7696_v2  ;;  %9522 = vst [vmem:[#allocation100_spill] sm:$0xff] %v7724_v14 }
 0x797   : > { %3045 = vmatpush.msra.mxu1 %v7701_v18  ;;  %3210 = vmatpush.msra.mxu0 %v9516_v1  ;;  %v2389_v1 = vsel %vm9472_vm7, %v7020_v44, %v7585_v30  ;;  %9524 = vst [vmem:[#allocation120_spill] sm:$0xff] %v7735_v49  ;;  %v9529_v44 = vld [vmem:[#allocation28_spill] sm:$0xff]  ;;  %v9530_v30 = vld [vmem:[#allocation57_spill] sm:$0xff]  ;;  %vm9656_vm7 = vmmov %vm9611_vm0 }
 0x798   : > { %3136 = vmatpush.msra.mxu3 %v9514_v47  ;;  %3176 = vmatpush.msrb.mxu2 %v9515_v38  ;;  %v7742_v34 = vmul.f32 %v9469_v22, %v2389_v1  ;;  %v9535_v22 = vld [vmem:[#allocation116_spill] sm:$0xff]  ;;  %v9536_v1 = vld [vmem:[#allocation31_spill] sm:$0xff] }
 0x799   : > { %3046 = vmatpush.msra.mxu1 %v7708_v51  ;;  %3211 = vmatpush.msra.mxu0 %v9520_v32 }
 0x79a   : > { %3137 = vmatpush.msra.mxu3 %v9518_v45  ;;  %3177 = vmatpush.msrb.mxu2 %v9519_v29  ;;  %9528 = vst [vmem:[#allocation97_spill] sm:$0xff] %v7742_v34 }
 0x79b   : > { %4100 = vmatmul.msk.f32.vlgmr.msrb.gmra.mxu3 %vm9480_vm3, %v7373_v63  ;;  %4101 = vmatmul.msk.f32.vlgmr.msra.gmra.mxu2 %vm9523_vm10, %v7373_v63  ;;  %v9531_v63 = vld [vmem:[#allocation35_spill] sm:$0xff]  ;;  %vm9665_vm3 = vmmov %vm9611_vm0 }
 0x79c   : > { %3256 = vmatpush.msrb.mxu0 %v9525_v52  ;;  %3047 = vmatpush.msra.mxu1 %v7724_v14  ;;  %vm9675_vm10 = vmmov %vm9611_vm0 }
 0x79d   : > { %3138 = vmatpush.msra.mxu3 %v9526_v56  ;;  %3178 = vmatpush.msrb.mxu2 %v9527_v12  ;;  %v9534_v56 = vld [vmem:[#allocation129_spill] sm:$0xff] }
 0x79e   : > { %3257 = vmatpush.msrb.mxu0 %v9529_v44  ;;  %3048 = vmatpush.msra.mxu1 %v7735_v49  ;;  %v9537_v44 = vld [vmem:[#allocation77_spill] sm:$0xff]  ;;  %v9538_v49 = vld [vmem:[#allocation20_spill] sm:$0xff] }
 0x79f   : > { %3139 = vmatpush.msra.mxu3 %v9530_v30  ;;  %3179 = vmatpush.msrb.mxu2 %v9531_v63  ;;  %v9539_v63 = vld [vmem:[#allocation109_spill] sm:$0xff] }
 0x7a0   : > { %3258 = vmatpush.msrb.mxu0 %v9532_v62  ;;  %3049 = vmatpush.msra.mxu1 %v7742_v34  ;;  %v9540_v62 = vld [vmem:[#allocation29_spill] sm:$0xff] }
 0x7a1   : > { %3140 = vmatpush.msra.mxu3 %v9533_v16  ;;  %3180 = vmatpush.msrb.mxu2 %v9534_v56  ;;  %v9541_v34 = vld [vmem:[#allocation25_spill] sm:$0xff] }
 0x7a2   : > { %3050 = vmatmul.f32.vlgmr.msra.gmra.mxu1 %v7505_v39  ;;  %3259 = vmatpush.msrb.mxu0 %v9535_v22  ;;  %v9542_v56 = vld [vmem:[#allocation117_spill] sm:$0xff]  ;;  %v9543_v39 = vld [vmem:[#allocation72_spill] sm:$0xff] }
 0x7a3   : > { %3163 = vmatpush.msrb.mxu1 %v9536_v1  ;;  %3141 = vmatpush.msra.mxu3 %v9537_v44  ;;  %v9544_v44 = vld [vmem:[#allocation54_spill] sm:$0xff] }
 0x7a4   : > { %3181 = vmatpush.msrb.mxu2 %v9538_v49  ;;  %3260 = vmatpush.msrb.mxu0 %v7293_v48  ;;  %v9545_v48 = vld [vmem:[#allocation133_spill] sm:$0xff] }
 0x7a5   : > { %3164 = vmatpush.msrb.mxu1 %v9539_v63  ;;  %3142 = vmatpush.msra.mxu3 %v9540_v62  ;;  %v9546_v63 = vld [vmem:[#allocation58_spill] sm:$0xff]  ;;  %v9547_v62 = vld [vmem:[#allocation93_spill] sm:$0xff] }
 0x7a6   : > { %3182 = vmatpush.msrb.mxu2 %v9541_v34  ;;  %3261 = vmatpush.msrb.mxu0 %v7302_v3  ;;  %v9548_v34 = vld [vmem:[#allocation59_spill] sm:$0xff] }
 0x7a7   : > { %3165 = vmatpush.msrb.mxu1 %v9542_v56  ;;  %3143 = vmatpush.msra.mxu3 %v7312_v24  ;;  %v9549_v3 = vld [vmem:[#allocation123_spill] sm:$0xff]  ;;  %v9550_v56 = vld [vmem:[#allocation80_spill] sm:$0xff]  ;;  %v9551_v24 = vld [vmem:[#allocation74_spill] sm:$0xff] }
 0x7a8   : > { %3183 = vmatpush.msrb.mxu2 %v9543_v39  ;;  %3262 = vmatpush.msrb.mxu0 %v7315_v28 }
 0x7a9   : > { %3166 = vmatpush.msrb.mxu1 %v9544_v44  ;;  %3144 = vmatpush.msra.mxu3 %v7321_v59  ;;  %v9552_v44 = vld [vmem:[#allocation67_spill] sm:$0xff] }
 0x7aa   : > { %3184 = vmatpush.msrb.mxu2 %v9545_v48  ;;  %3263 = vmatpush.msrb.mxu0 %v9546_v63  ;;  %v9553_v59 = vld [vmem:[#allocation111_spill] sm:$0xff] }
 0x7ab   : > { %3167 = vmatpush.msrb.mxu1 %v9547_v62  ;;  %3145 = vmatpush.msra.mxu3 %v9548_v34  ;;  %v9554_v62 = vld [vmem:[#allocation66_spill] sm:$0xff]  ;;  %v9555_v34 = vld [vmem:[#allocation49_spill] sm:$0xff] }
 0x7ac   : > { %3185 = vmatpush.msrb.mxu2 %v9549_v3  ;;  %3264 = vmatpush.msrb.mxu0 %v9550_v56 }
 0x7ad   : > { %3168 = vmatpush.msrb.mxu1 %v9551_v24  ;;  %3146 = vmatpush.msra.mxu3 %v7411_v11  ;;  %v9556_v24 = vld [vmem:[#allocation86_spill] sm:$0xff] }
 0x7ae   : > { %3186 = vmatpush.msrb.mxu2 %v7414_v31  ;;  %3265 = vmatpush.msrb.mxu0 %v9552_v44 }
 0x7af   : > { %3169 = vmatpush.msrb.mxu1 %v9553_v59  ;;  %3147 = vmatpush.msra.mxu3 %v7432_v8 }
 0x7b0   : > { %3187 = vmatpush.msrb.mxu2 %v7429_v23  ;;  %3266 = vmatpush.msrb.mxu0 %v9554_v62 }
 0x7b1   : > { %3170 = vmatpush.msrb.mxu1 %v9555_v34  ;;  %3148 = vmatpush.msra.mxu3 %v7441_v50  ;;  %v7794_v50 = vld [vmem:[#allocation6 + $0x60] sm:$0xff] }
 0x7b2   : > { %3188 = vmatpush.msrb.mxu2 %v7438_v9  ;;  %3267 = vmatpush.msrb.mxu0 %v9556_v24 }
 0x7b3   : > { %3171 = vmatpush.msrb.mxu1 %v7545_v57  ;;  %3149 = vmatpush.msra.mxu3 %v7461_v10  ;;  %v9557_v57 = vld [vmem:[#allocation26_spill] sm:$0xff] }
 0x7b4   : > { %3189 = vmatpush.msrb.mxu2 %v7465_v0  ;;  %3268 = vmatpush.msrb.mxu0 %v7384_v42  ;;  %v9559_v42 = vld [vmem:[#allocation27_spill] sm:$0xff] }
 0x7b5   : > { %3216 = vmatpush.msra.mxu1 %v7549_v37  ;;  %3150 = vmatpush.msra.mxu3 %v7468_v46  ;;  %v9558_v37 = vld [vmem:[#allocation21_spill] sm:$0xff]  ;;  %v9560_v46 = vld [vmem:[#allocation30_spill] sm:$0xff] }
 0x7b6   : > { %3190 = vmatpush.msrb.mxu2 %v7475_v13  ;;  %3269 = vmatpush.msrb.mxu0 %v7393_v19  ;;  %v3132_v13 = vld [vmem:[#allocation6 + $0x68] sm:$0xff]  ;;  %v9561_v19 = vld [vmem:[#allocation42_spill] sm:$0xff] }
 0x7b7   : > { %3217 = vmatpush.msra.mxu1 %v7565_v55  ;;  %3151 = vmatpush.msra.mxu3 %v7486_v61  ;;  %v9562_v61 = vld [vmem:[#allocation52_spill] sm:$0xff] }
 0x7b8   : > { %3191 = vmatpush.msrb.mxu2 %v9557_v57  ;;  %3152 = vmatmul.f32.vlgmr.msra.gmra.mxu3 %v7794_v50 }
 0x7b9   : > { %3218 = vmatpush.msra.mxu1 %v7580_v20  ;;  %3270 = vmatpush.msrb.mxu0 %v9558_v37  ;;  %v9564_v37 = vld [vmem:[#allocation53_spill] sm:$0xff] }
 0x7ba   : > { %3243 = vmatpush.msrb.mxu3 %v9559_v42  ;;  %3283 = vmatpush.msra.mxu2 %v9560_v46  ;;  %v9565_v42 = vld [vmem:[#allocation36_spill] sm:$0xff]  ;;  %v9566_v46 = vld [vmem:[#allocation113_spill] sm:$0xff] }
 0x7bb   : > { %3219 = vmatpush.msra.mxu1 %v7594_v7  ;;  %3271 = vmatpush.msrb.mxu0 %v7597_v53  ;;  %v9567_v20 = vld [vmem:[#allocation65_spill] sm:$0xff]  ;;  %v9569_v53 = vld [vmem:[#allocation64_spill] sm:$0xff] }
 0x7bc   : > { %3244 = vmatpush.msrb.mxu3 %v9561_v19  ;;  %3284 = vmatpush.msra.mxu2 %v9562_v61  ;;  %v9570_v19 = vld [vmem:[#allocation132_spill] sm:$0xff] }
 0x7bd   : > { %4103 = vmatmul.msk.f32.vlgmr.msra.gmra.mxu0 %vm9563_vm2, %v3132_v13  ;;  %3220 = vmatpush.msra.mxu1 %v7601_v58  ;;  %v9571_v58 = vld [vmem:[#allocation125_spill] sm:$0xff]  ;;  %vm9705_vm2 = vmmov %vm9611_vm0 }
 0x7be   : > { %3389 = vmatpush.msra.mxu0 %v9490_v21  ;;  %3245 = vmatpush.msrb.mxu3 %v9564_v37  ;;  %v9572_v21 = vld [vmem:[#allocation128_spill] sm:$0xff] }
 0x7bf   : > { %3285 = vmatpush.msra.mxu2 %v9565_v42  ;;  %3221 = vmatpush.msra.mxu1 %v9566_v46 }
 0x7c0   : > { %3390 = vmatpush.msra.mxu0 %v9567_v20  ;;  %4102 = vmatmul.msk.f32.vlgmr.msrb.gmra.mxu1 %vm9568_vm4, %v3132_v13  ;;  %vm9707_vm4 = vmmov %vm9611_vm0 }
 0x7c1   : > { %3246 = vmatpush.msrb.mxu3 %v9569_v53  ;;  %3286 = vmatpush.msra.mxu2 %v9570_v19  ;;  %v9573_v19 = vld [vmem:[#allocation79_spill] sm:$0xff] }
 0x7c2   : > { %3222 = vmatpush.msra.mxu1 %v7614_v40  ;;  %3391 = vmatpush.msra.mxu0 %v9496_v54 }
 0x7c3   : > { %3247 = vmatpush.msrb.mxu3 %v9571_v58  ;;  %3287 = vmatpush.msra.mxu2 %v9572_v21 }
 0x7c4   : > { %3192 = vmatmul.f32.vlgmr.msrb.gmra.mxu2 %v7794_v50  ;;  %3223 = vmatpush.msra.mxu1 %v7620_v26 }
 0x7c5   : > { %3392 = vmatpush.msra.mxu0 %v9497_v6  ;;  %3248 = vmatpush.msrb.mxu3 %v7637_v17 }
 0x7c6   : > { %3288 = vmatpush.msra.mxu2 %v7640_v33  ;;  %3224 = vmatpush.msra.mxu1 %v7646_v35 }
 0x7c7   : > { %3393 = vmatpush.msra.mxu0 %v9573_v19  ;;  %3249 = vmatpush.msrb.mxu3 %v7649_v36 }
 0x7c8   : > { %3289 = vmatpush.msra.mxu2 %v7652_v27  ;;  %3225 = vmatpush.msra.mxu1 %v7658_v5 }
 0x7c9   : > { %3394 = vmatpush.msra.mxu0 %v9508_v15  ;;  %3250 = vmatpush.msrb.mxu3 %v7676_v41  ;;  %v9575_v15 = vld [vmem:[#allocation112_spill] sm:$0xff] }
 0x7ca   : > { %3290 = vmatpush.msra.mxu2 %v7680_v25  ;;  %3226 = vmatpush.msra.mxu1 %v7684_v60 }
 0x7cb   : > { %3395 = vmatpush.msra.mxu0 %v9512_v43  ;;  %3251 = vmatpush.msrb.mxu3 %v7693_v4 }
 0x7cc   : > { %3291 = vmatpush.msra.mxu2 %v7696_v2  ;;  %3227 = vmatpush.msra.mxu1 %v7701_v18 }
 0x7cd   : > { %4105 = vmatmul.msk.f32.vlgmr.msra.gmra.mxu2 %vm9574_vm15, %v3132_v13  ;;  %3322 = vmatpush.msra.mxu3 %v9514_v47  ;;  %v9577_v47 = vld [vmem:[#allocation87_spill] sm:$0xff]  ;;  %vm9708_vm15 = vmmov %vm9611_vm0 }
 0x7ce   : > { %3362 = vmatpush.msrb.mxu2 %v9515_v38  ;;  %3396 = vmatpush.msra.mxu0 %v9575_v15  ;;  %v9578_v15 = vld [vmem:[#allocation28_spill] sm:$0xff] }
 0x7cf   : > { %3228 = vmatpush.msra.mxu1 %v7708_v51  ;;  %3323 = vmatpush.msra.mxu3 %v9518_v45  ;;  %v9579_v51 = vld [vmem:[#allocation120_spill] sm:$0xff] }
 0x7d0   : > { %3363 = vmatpush.msrb.mxu2 %v9519_v29  ;;  %3397 = vmatpush.msra.mxu0 %v9520_v32  ;;  %v9580_v29 = vld [vmem:[#allocation35_spill] sm:$0xff]  ;;  %v9581_v32 = vld [vmem:[#allocation37_spill] sm:$0xff] }
 0x7d1   : > { %4104 = vmatmul.msk.f32.vlgmr.msrb.gmra.mxu3 %vm9576_vm1, %v3132_v13  ;;  %3272 = vmatmul.f32.vlgmr.msrb.gmra.mxu0 %v7794_v50  ;;  %v9582_v13 = vld [vmem:[#allocation97_spill] sm:$0xff]  ;;  %vm9709_vm1 = vmmov %vm9611_vm0 }
 0x7d2   : > { %3442 = vmatpush.msrb.mxu0 %v9525_v52  ;;  %3229 = vmatpush.msra.mxu1 %v7724_v14  ;;  %v9583_v52 = vld [vmem:[#allocation129_spill] sm:$0xff] }
 0x7d3   : > { %3324 = vmatpush.msra.mxu3 %v9577_v47  ;;  %3364 = vmatpush.msrb.mxu2 %v9527_v12 }
 0x7d4   : > { %3443 = vmatpush.msrb.mxu0 %v9578_v15  ;;  %3230 = vmatpush.msra.mxu1 %v9579_v51  ;;  %v9584_v15 = vld [vmem:[#allocation77_spill] sm:$0xff] }
 0x7d5   : > { %3325 = vmatpush.msra.mxu3 %v9530_v30  ;;  %3365 = vmatpush.msrb.mxu2 %v9580_v29  ;;  %v9585_v30 = vld [vmem:[#allocation44_spill] sm:$0xff]  ;;  %v9586_v29 = vld [vmem:[#allocation109_spill] sm:$0xff] }
 0x7d6   : > { %3444 = vmatpush.msrb.mxu0 %v9581_v32  ;;  %3231 = vmatpush.msra.mxu1 %v9582_v13  ;;  %v9587_v32 = vld [vmem:[#allocation29_spill] sm:$0xff] }
 0x7d7   : > { %3326 = vmatpush.msra.mxu3 %v9533_v16  ;;  %3366 = vmatpush.msrb.mxu2 %v9583_v52  ;;  %v9588_v13 = vld [vmem:[#allocation25_spill] sm:$0xff]  ;;  %v9589_v16 = vld [vmem:[#allocation39_spill] sm:$0xff] }
 0x7d8   : > { %3232 = vmatmul.f32.vlgmr.msra.gmra.mxu1 %v7794_v50  ;;  %3445 = vmatpush.msrb.mxu0 %v9535_v22  ;;  %v9590_v52 = vld [vmem:[#allocation117_spill] sm:$0xff] }
 0x7d9   : > { %3349 = vmatpush.msrb.mxu1 %v9536_v1  ;;  %3327 = vmatpush.msra.mxu3 %v9584_v15  ;;  %v9591_v50 = vld [vmem:[#allocation121_spill] sm:$0xff]  ;;  %v9592_v15 = vld [vmem:[#allocation54_spill] sm:$0xff] }
 0x7da   : > { %3367 = vmatpush.msrb.mxu2 %v9538_v49  ;;  %3446 = vmatpush.msrb.mxu0 %v9585_v30  ;;  %v9593_v49 = vld [vmem:[#allocation124_spill] sm:$0xff] }
 0x7db   : > { %3350 = vmatpush.msrb.mxu1 %v9586_v29  ;;  %3328 = vmatpush.msra.mxu3 %v9587_v32  ;;  %v9594_v32 = vld [vmem:[#allocation93_spill] sm:$0xff] }
 0x7dc   : > { %3368 = vmatpush.msrb.mxu2 %v9588_v13  ;;  %3447 = vmatpush.msrb.mxu0 %v9589_v16  ;;  %v9595_v13 = vld [vmem:[#allocation59_spill] sm:$0xff] }
 0x7dd   : > { %3351 = vmatpush.msrb.mxu1 %v9590_v52  ;;  %3329 = vmatpush.msra.mxu3 %v9591_v50  ;;  %v9596_v50 = vld [vmem:[#allocation74_spill] sm:$0xff] }
 0x7de   : > { %3369 = vmatpush.msrb.mxu2 %v9543_v39  ;;  %3448 = vmatpush.msrb.mxu0 %v7315_v28 }
 0x7df   : > { %3352 = vmatpush.msrb.mxu1 %v9592_v15  ;;  %3330 = vmatpush.msra.mxu3 %v9593_v49 }
 0x7e0   : > { %3370 = vmatpush.msrb.mxu2 %v9545_v48  ;;  %3449 = vmatpush.msrb.mxu0 %v9546_v63 }
 0x7e1   : > { %3353 = vmatpush.msrb.mxu1 %v9594_v32  ;;  %3331 = vmatpush.msra.mxu3 %v9595_v13 }
 0x7e2   : > { %3371 = vmatpush.msrb.mxu2 %v9549_v3  ;;  %3450 = vmatpush.msrb.mxu0 %v9550_v56  ;;  %v9597_v3 = vld [vmem:[#allocation34_spill] sm:$0xff] }
 0x7e3   : > { %3354 = vmatpush.msrb.mxu1 %v9596_v50  ;;  %3332 = vmatpush.msra.mxu3 %v7411_v11  ;;  %v9598_v11 = vld [vmem:[#allocation46_spill] sm:$0xff] }
 0x7e4   : > { %3372 = vmatpush.msrb.mxu2 %v7414_v31  ;;  %3451 = vmatpush.msrb.mxu0 %v9552_v44  ;;  %v9599_v44 = vld [vmem:[#allocation61_spill] sm:$0xff] }
 0x7e5   : > { %3355 = vmatpush.msrb.mxu1 %v9553_v59  ;;  %3333 = vmatpush.msra.mxu3 %v7432_v8  ;;  %v9600_v8 = vld [vmem:[#allocation43_spill] sm:$0xff] }
 0x7e6   : > { %3373 = vmatpush.msrb.mxu2 %v7429_v23  ;;  %3452 = vmatpush.msrb.mxu0 %v9554_v62  ;;  %v9601_v23 = vld [vmem:[#allocation41_spill] sm:$0xff]  ;;  %v9602_v62 = vld [vmem:[#allocation23_spill] sm:$0xff] }
 0x7e7   : > { %3356 = vmatpush.msrb.mxu1 %v9555_v34  ;;  %3334 = vmatpush.msra.mxu3 %v9597_v3  ;;  %v9603_v3 = vld [vmem:[#allocation82_spill] sm:$0xff] }
 0x7e8   : > { %3374 = vmatpush.msrb.mxu2 %v7438_v9  ;;  %3453 = vmatpush.msrb.mxu0 %v9556_v24  ;;  %v9604_v9 = vld [vmem:[#allocation45_spill] sm:$0xff]  ;;  %v9605_v24 = vld [vmem:[#allocation18_spill] sm:$0xff] }
 0x7e9   : > { %3357 = vmatpush.msrb.mxu1 %v9598_v11  ;;  %3335 = vmatpush.msra.mxu3 %v7461_v10  ;;  %v9606_v10 = vld [vmem:[#allocation27_spill] sm:$0xff] }
 0x7ea   : > { %3375 = vmatpush.msrb.mxu2 %v7465_v0  ;;  %3454 = vmatpush.msrb.mxu0 %v9600_v8  ;;  %v9607_v0 = vld [vmem:[#allocation21_spill] sm:$0xff]  ;;  %v9608_v8 = vld [vmem:[#allocation30_spill] sm:$0xff] }
 0x7eb   : > { %3402 = vmatpush.msra.mxu1 %v9599_v44  ;;  %3336 = vmatpush.msra.mxu3 %v9601_v23  ;;  %v7910_v44 = vld [vmem:[#allocation6 + $0x78] sm:$0xff] }
 0x7ec   : > { %3376 = vmatpush.msrb.mxu2 %v9602_v62  ;;  %3455 = vmatpush.msrb.mxu0 %v9603_v3  ;;  %v9609_v62 = vld [vmem:[#allocation42_spill] sm:$0xff] }
 0x7ed   : > { %3403 = vmatpush.msra.mxu1 %v7565_v55  ;;  %3337 = vmatpush.msra.mxu3 %v9604_v9  ;;  %v9610_v55 = vld [vmem:[#allocation85_spill] sm:$0xff] }
 0x7ee   : > { %3377 = vmatpush.msrb.mxu2 %v9557_v57  ;;  %3456 = vmatpush.msrb.mxu0 %v9607_v0 }
 0x7ef   : > { %3404 = vmatpush.msra.mxu1 %v9605_v24  ;;  %3429 = vmatpush.msrb.mxu3 %v9606_v10  ;;  %v9612_v24 = vld [vmem:[#allocation89_spill] sm:$0xff]  ;;  %v9613_v10 = vld [vmem:[#allocation130_spill] sm:$0xff] }
 0x7f0   : > { %3469 = vmatpush.msra.mxu2 %v9608_v8  ;;  %3457 = vmatpush.msrb.mxu0 %v9610_v55  ;;  %v9614_v55 = vld [vmem:[#allocation132_spill] sm:$0xff] }
 0x7f1   : > { %3405 = vmatpush.msra.mxu1 %v7594_v7  ;;  %3430 = vmatpush.msrb.mxu3 %v9609_v62 }
 0x7f2   : > { %3470 = vmatpush.msra.mxu2 %v9562_v61  ;;  %4107 = vmatmul.msk.f32.vlgmr.msra.gmra.mxu0 %vm9611_vm0, %v7910_v44 }
 0x7f3   : > { %3406 = vmatpush.msra.mxu1 %v9612_v24  ;;  %3563 = vmatpush.msra.mxu0 %v9613_v10 }
 0x7f4   : > { %3431 = vmatpush.msrb.mxu3 %v9564_v37  ;;  %3471 = vmatpush.msra.mxu2 %v9565_v42 }
 0x7f5   : > { %3407 = vmatpush.msra.mxu1 %v9566_v46  ;;  %3564 = vmatpush.msra.mxu0 %v9567_v20 }
 0x7f6   : > { %3432 = vmatpush.msrb.mxu3 %v9569_v53  ;;  %3472 = vmatpush.msra.mxu2 %v9614_v55 }
 0x7f7   : > { %3408 = vmatpush.msra.mxu1 %v7614_v40  ;;  %3565 = vmatpush.msra.mxu0 %v9496_v54 }
 0x7f8   : > { %3433 = vmatpush.msrb.mxu3 %v9571_v58  ;;  %3473 = vmatpush.msra.mxu2 %v9572_v21  ;;  %v9615_v58 = vld [vmem:[#allocation98_spill] sm:$0xff] }
 0x7f9   : > { %3409 = vmatpush.msra.mxu1 %v7620_v26  ;;  %3566 = vmatpush.msra.mxu0 %v9497_v6  ;;  %v7943_v6 = vld [vmem:[#allocation6 + $0x70] sm:$0xff] }
 0x7fa   : > { %3434 = vmatpush.msrb.mxu3 %v7637_v17  ;;  %3474 = vmatpush.msra.mxu2 %v7640_v33 }
 0x7fb   : > { %3410 = vmatpush.msra.mxu1 %v7646_v35  ;;  %3567 = vmatpush.msra.mxu0 %v9573_v19 }
 0x7fc   : > { %3435 = vmatpush.msrb.mxu3 %v7649_v36  ;;  %3475 = vmatpush.msra.mxu2 %v7652_v27 }
 0x7fd   : > { %3411 = vmatpush.msra.mxu1 %v7658_v5  ;;  %3568 = vmatpush.msra.mxu0 %v9615_v58  ;;  %v9616_v58 = vld [vmem:[#allocation84_spill] sm:$0xff] }
 0x7fe   : > { %3436 = vmatpush.msrb.mxu3 %v7676_v41  ;;  %3476 = vmatpush.msra.mxu2 %v7680_v25  ;;  %v9617_v25 = vld [vmem:[#allocation112_spill] sm:$0xff]  ;;  %v9618_v41 = vld [vmem:[#allocation69_spill] sm:$0xff] }
 0x7ff   : > { %3412 = vmatpush.msra.mxu1 %v7684_v60  ;;  %3569 = vmatpush.msra.mxu0 %v9512_v43  ;;  %v9619_v43 = vld [vmem:[#allocation102_spill] sm:$0xff] }
 0x800   : > { %3437 = vmatpush.msrb.mxu3 %v7693_v4  ;;  %3477 = vmatpush.msra.mxu2 %v7696_v2  ;;  %v9620_v4 = vld [vmem:[#allocation101_spill] sm:$0xff]  ;;  %v9621_v2 = vld [vmem:[#allocation24_spill] sm:$0xff] }
 0x801   : > { %3338 = vmatmul.f32.vlgmr.msra.gmra.mxu3 %v7943_v6  ;;  %3378 = vmatmul.f32.vlgmr.msrb.gmra.mxu2 %v7943_v6 }
 0x802   : > { %3413 = vmatpush.msra.mxu1 %v7701_v18  ;;  %3496 = vmatpush.msra.mxu3 %v9616_v58 }
 0x803   : > { %3536 = vmatpush.msrb.mxu2 %v9515_v38  ;;  %3570 = vmatpush.msra.mxu0 %v9617_v25  ;;  %v9622_v25 = vld [vmem:[#allocation28_spill] sm:$0xff]  ;;  %v9627_v38 = vld [vmem:[#allocation95_spill] sm:$0xff] }
 0x804   : > { %3414 = vmatpush.msra.mxu1 %v9618_v41  ;;  %3497 = vmatpush.msra.mxu3 %v9518_v45  ;;  %v9623_v41 = vld [vmem:[#allocation57_spill] sm:$0xff]  ;;  %v9624_v45 = vld [vmem:[#allocation35_spill] sm:$0xff] }
 0x805   : > { %3537 = vmatpush.msrb.mxu2 %v9619_v43  ;;  %3571 = vmatpush.msra.mxu0 %v9620_v4  ;;  %v9625_v43 = vld [vmem:[#allocation97_spill] sm:$0xff] }
 0x806   : > { %3458 = vmatmul.f32.vlgmr.msrb.gmra.mxu0 %v7943_v6  ;;  %3415 = vmatpush.msra.mxu1 %v7724_v14  ;;  %v9626_v4 = vld [vmem:[#allocation37_spill] sm:$0xff] }
 0x807   : > { %3616 = vmatpush.msrb.mxu0 %v9621_v2  ;;  %3498 = vmatpush.msra.mxu3 %v9577_v47  ;;  %v9628_v14 = vld [vmem:[#allocation129_spill] sm:$0xff] }
 0x808   : > { %3538 = vmatpush.msrb.mxu2 %v9527_v12  ;;  %3416 = vmatpush.msra.mxu1 %v9579_v51 }
 0x809   : > { %3617 = vmatpush.msrb.mxu0 %v9622_v25  ;;  %3499 = vmatpush.msra.mxu3 %v9623_v41  ;;  %v9630_v25 = vld [vmem:[#allocation77_spill] sm:$0xff]  ;;  %v9631_v41 = vld [vmem:[#allocation20_spill] sm:$0xff] }
 0x80a   : > { %3539 = vmatpush.msrb.mxu2 %v9624_v45  ;;  %3417 = vmatpush.msra.mxu1 %v9625_v43  ;;  %v9632_v43 = vld [vmem:[#allocation29_spill] sm:$0xff] }
 0x80b   : > { %3618 = vmatpush.msrb.mxu0 %v9626_v4  ;;  %3500 = vmatpush.msra.mxu3 %v9627_v38  ;;  %v9633_v38 = vld [vmem:[#allocation25_spill] sm:$0xff] }
 0x80c   : > { %3540 = vmatpush.msrb.mxu2 %v9628_v14  ;;  %4106 = vmatmul.msk.f32.vlgmr.msrb.gmra.mxu1 %vm9629_vm11, %v7910_v44  ;;  %v2971_v14 = vpop.f32.mrf.mxu3  ;;  %v9634_v4 = vld [vmem:[#allocation121_spill] sm:$0xff] }
 0x80d   : > { %3523 = vmatpush.msrb.mxu1 %v9536_v1  ;;  %3619 = vmatpush.msrb.mxu0 %v9535_v22  ;;  %v2991_v1 = vpop.f32.mrf.mxu1 }
 0x80e   : > { %3501 = vmatpush.msra.mxu3 %v9630_v25  ;;  %3541 = vmatpush.msrb.mxu2 %v9631_v41 }
 0x80f   : > { %3524 = vmatpush.msrb.mxu1 %v9586_v29  ;;  %3620 = vmatpush.msrb.mxu0 %v9585_v30  ;;  %v2992_v29 = vadd.f32 %v2991_v1, %v2971_v14  ;;  %v9637_v14 = vld [vmem:[#allocation131_spill] sm:$0xff] }
 0x810   : > { %3502 = vmatpush.msra.mxu3 %v9632_v43  ;;  %3542 = vmatpush.msrb.mxu2 %v9633_v38  ;;  %v9638_v1 = vld [vmem:[#allocation67_spill] sm:$0xff] }
 0x811   : > { %3525 = vmatpush.msrb.mxu1 %v9590_v52  ;;  %3621 = vmatpush.msrb.mxu0 %v9589_v16  ;;  %v9635_v52 = vld [vmem:[#allocation123_spill] sm:$0xff] }
 0x812   : > { %3503 = vmatpush.msra.mxu3 %v9634_v4  ;;  %3543 = vmatpush.msrb.mxu2 %v9543_v39 }
 0x813   : > { %3526 = vmatpush.msrb.mxu1 %v9592_v15  ;;  %3622 = vmatpush.msrb.mxu0 %v7315_v28 }
 0x814   : > { %3504 = vmatpush.msra.mxu3 %v9593_v49  ;;  %3544 = vmatpush.msrb.mxu2 %v9545_v48 }
 0x815   : > { %3527 = vmatpush.msrb.mxu1 %v9594_v32  ;;  %3623 = vmatpush.msrb.mxu0 %v9546_v63 }
 0x816   : > { %3505 = vmatpush.msra.mxu3 %v9595_v13  ;;  %3545 = vmatpush.msrb.mxu2 %v9635_v52  ;;  %v9640_v52 = vld [vmem:[#allocation32_spill] sm:$0xff] }
 0x817   : > { %3528 = vmatpush.msrb.mxu1 %v9596_v50  ;;  %3624 = vmatpush.msrb.mxu0 %v9550_v56  ;;  %v9641_v50 = vld [vmem:[#allocation33_spill] sm:$0xff]  ;;  %v9643_v56 = vld [vmem:[#allocation34_spill] sm:$0xff] }
 0x818   : > { %3114 = vrot.lane.b32.xlu0 %v2992_v29, %s4354_s23  ;;  %4108 = vmatmul.msk.f32.vlgmr.msrb.gmra.mxu3 %vm9636_vm5, %v7910_v44  ;;  %v9642_v29 = vld [vmem:[#allocation66_spill] sm:$0xff] }
 0x819   : > { %3506 = vmatpush.msra.mxu3 %v9637_v14  ;;  %3546 = vmatpush.msrb.mxu2 %v7414_v31  ;;  %v9644_v14 = vld [vmem:[#allocation22_spill] sm:$0xff] }
 0x81a   : > { %3529 = vmatpush.msrb.mxu1 %v9553_v59  ;;  %3625 = vmatpush.msrb.mxu0 %v9638_v1  ;;  %v9645_v59 = vld [vmem:[#allocation86_spill] sm:$0xff]  ;;  %v9646_v1 = vld [vmem:[#allocation40_spill] sm:$0xff] }
 0x81b   : > { %4109 = vmatmul.msk.f32.vlgmr.msra.gmra.mxu2 %vm9639_vm9, %v7910_v44  ;;  %3507 = vmatpush.msra.mxu3 %v9640_v52  ;;  %v9647_v44 = vld [vmem:[#allocation38_spill] sm:$0xff]  ;;  %v9648_v52 = vld [vmem:[#allocation61_spill] sm:$0xff] }
 0x81c   : > { %3547 = vmatpush.msrb.mxu2 %v9641_v50  ;;  %3530 = vmatpush.msrb.mxu1 %v9555_v34  ;;  %v9649_v50 = vld [vmem:[#allocation43_spill] sm:$0xff]  ;;  %v8020_v34 = vld [vmem:[#allocation6 + $0x80] sm:$0xff] }
 0x81d   : > { %3626 = vmatpush.msrb.mxu0 %v9642_v29  ;;  %3508 = vmatpush.msra.mxu3 %v9643_v56  ;;  %v9650_v29 = vld [vmem:[#allocation23_spill] sm:$0xff]  ;;  %v3011_v56 = vpop.f32.mrf.mxu2 }
 0x81e   : > { %3548 = vmatpush.msrb.mxu2 %v9644_v14  ;;  %3531 = vmatpush.msrb.mxu1 %v9598_v11  ;;  %v3031_v14 = vpop.f32.mrf.mxu0  ;;  %v9651_v11 = vld [vmem:[#allocation122_spill] sm:$0xff] }
 0x81f   : > { %3627 = vmatpush.msrb.mxu0 %v9645_v59  ;;  %3418 = vmatmul.f32.vlgmr.msra.gmra.mxu1 %v7943_v6  ;;  %v9652_v6 = vld [vmem:[#allocation18_spill] sm:$0xff] }
 0x820   : > { %3509 = vmatpush.msra.mxu3 %v9646_v1  ;;  %3549 = vmatpush.msrb.mxu2 %v9647_v44 }
 0x821   : > { %3576 = vmatpush.msra.mxu1 %v9648_v52  ;;  %3628 = vmatpush.msrb.mxu0 %v9649_v50 }
 0x822   : > { %3510 = vmatpush.msra.mxu3 %v9601_v23  ;;  %3550 = vmatpush.msrb.mxu2 %v9650_v29  ;;  %v9653_v23 = vld [vmem:[#allocation27_spill] sm:$0xff]  ;;  %v8032_v29 = vld [vmem:[#allocation6 + $0x88] sm:$0xff] }
 0x823   : > { %3577 = vmatpush.msra.mxu1 %v9651_v11  ;;  %3629 = vmatpush.msrb.mxu0 %v9603_v3 }
 0x824   : > { %3511 = vmatpush.msra.mxu3 %v9604_v9  ;;  %3551 = vmatpush.msrb.mxu2 %v9557_v57  ;;  %v9654_v9 = vld [vmem:[#allocation85_spill] sm:$0xff] }
 0x825   : > { %3578 = vmatpush.msra.mxu1 %v9652_v6  ;;  %3512 = vmatmul.f32.vlgmr.msra.gmra.mxu3 %v8020_v34 }
 0x826   : > { %3552 = vmatmul.f32.vlgmr.msrb.gmra.mxu2 %v8020_v34  ;;  %3603 = vmatpush.msrb.mxu3 %v9653_v23 }
 0x827   : > { %3630 = vmatpush.msrb.mxu0 %v9607_v0  ;;  %3643 = vmatpush.msra.mxu2 %v9608_v8  ;;  %v3051_v8 = vpop.f32.mrf.mxu1  ;;  %v3071_v0 = vpop.f32.mrf.mxu3 }
 0x828   : > { %3579 = vmatpush.msra.mxu1 %v7594_v7  ;;  %3604 = vmatpush.msrb.mxu3 %v9609_v62  ;;  %v3091_v62 = vpop.f32.mrf.mxu0  ;;  %v3111_v7 = vpop.f32.mrf.mxu2 }
 0x829   : > { %3631 = vmatpush.msrb.mxu0 %v9654_v9  ;;  %3644 = vmatpush.msra.mxu2 %v9562_v61 }
 0x82a   : > { %4111 = vmatmul.msk.f32.vlgmr.msra.gmra.mxu0 %vm9655_vm14, %v8032_v29  ;;  %3580 = vmatpush.msra.mxu1 %v9612_v24  ;;  %v3112_v24 = vadd.f32 %v3111_v7, %v3091_v62  ;;  %v9661_v7 = vld [vmem:[#allocation75_spill] sm:$0xff]  ;;  %v9668_v62 = vld [vmem:[#allocation69_spill] sm:$0xff] }
 0x82b   : > { %3749 = vmatpush.msra.mxu0 %v9613_v10  ;;  %3605 = vmatpush.msrb.mxu3 %v9564_v37  ;;  %v3072_v10 = vadd.f32 %v3071_v0, %v3051_v8  ;;  %v9659_v8 = vld [vmem:[#allocation98_spill] sm:$0xff] }
 0x82c   : > { %3645 = vmatpush.msra.mxu2 %v9565_v42  ;;  %3581 = vmatpush.msra.mxu1 %v9566_v46  ;;  %v9657_v42 = vld [vmem:[#allocation125_spill] sm:$0xff]  ;;  %v3032_v46 = vadd.f32 %v3031_v14, %v3011_v56  ;;  %v9660_v0 = vld [vmem:[#allocation90_spill] sm:$0xff]  ;;  %v9667_v56 = vld [vmem:[#allocation112_spill] sm:$0xff] }
 0x82d   : > { %3750 = vmatpush.msra.mxu0 %v9567_v20  ;;  %4110 = vmatmul.msk.f32.vlgmr.msrb.gmra.mxu1 %vm9656_vm7, %v8032_v29  ;;  %v9658_v20 = vld [vmem:[#allocation119_spill] sm:$0xff]  ;;  %v9669_v14 = vld [vmem:[#allocation73_spill] sm:$0xff] }
 0x82e   : > { %3606 = vmatpush.msrb.mxu3 %v9569_v53  ;;  %3646 = vmatpush.msra.mxu2 %v9614_v55 }
 0x82f   : > { %3582 = vmatpush.msra.mxu1 %v7614_v40  ;;  %3751 = vmatpush.msra.mxu0 %v9496_v54  ;;  %v9663_v54 = vld [vmem:[#allocation126_spill] sm:$0xff] }
 0x830   : > { %3607 = vmatpush.msrb.mxu3 %v9657_v42  ;;  %3647 = vmatpush.msra.mxu2 %v9572_v21 }
 0x831   : > { %3583 = vmatpush.msra.mxu1 %v7620_v26  ;;  %3752 = vmatpush.msra.mxu0 %v9658_v20  ;;  %v9671_v20 = vld [vmem:[#allocation101_spill] sm:$0xff] }
 0x832   : > { %3608 = vmatpush.msrb.mxu3 %v7637_v17  ;;  %3118 = vrot.lane.b32.xlu0 %v3072_v10, %s4354_s23  ;;  %v9670_v10 = vld [vmem:[#allocation102_spill] sm:$0xff] }
 0x833   : > { %3648 = vmatpush.msra.mxu2 %v7640_v33  ;;  %3120 = vrot.lane.b32.xlu1 %v3112_v24, %s4354_s23  ;;  %v9662_v24 = vld [vmem:[#allocation78_spill] sm:$0xff] }
 0x834   : > { %3584 = vmatpush.msra.mxu1 %v7646_v35  ;;  %3753 = vmatpush.msra.mxu0 %v9573_v19  ;;  %v9664_v19 = vld [vmem:[#allocation81_spill] sm:$0xff] }
 0x835   : > { %3609 = vmatpush.msrb.mxu3 %v7649_v36  ;;  %3649 = vmatpush.msra.mxu2 %v7652_v27 }
 0x836   : > { %3116 = vrot.lane.b32.xlu2 %v3032_v46, %s4354_s23  ;;  %3585 = vmatpush.msra.mxu1 %v7658_v5  ;;  %v9666_v46 = vld [vmem:[#allocation134_spill] sm:$0xff]  ;;  %s3925_s23 = scalar_lea.sflag [#allocation5], %s4483_s28 }
 0x837   : > { %3754 = vmatpush.msra.mxu0 %v9659_v8  ;;  %3610 = vmatpush.msrb.mxu3 %v9660_v0  ;;  %v9672_v8 = vld [vmem:[#allocation100_spill] sm:$0xff] }
 0x838   : > { %3650 = vmatpush.msra.mxu2 %v9661_v7  ;;  %3586 = vmatpush.msra.mxu1 %v7684_v60 }
 0x839   : > { %3755 = vmatpush.msra.mxu0 %v9662_v24  ;;  %3611 = vmatpush.msrb.mxu3 %v9663_v54  ;;  %v9674_v24 = vld [vmem:[#allocation57_spill] sm:$0xff] }
 0x83a   : > { %3651 = vmatpush.msra.mxu2 %v9664_v19  ;;  %3587 = vmatpush.msra.mxu1 %v7701_v18 }
 0x83b   : > { %4113 = vmatmul.msk.f32.vlgmr.msra.gmra.mxu2 %vm9665_vm3, %v8032_v29  ;;  %3682 = vmatpush.msra.mxu3 %v9616_v58  ;;  %v9673_v58 = vld [vmem:[#allocation28_spill] sm:$0xff] }
 0x83c   : > { %3722 = vmatpush.msrb.mxu2 %v9666_v46  ;;  %3756 = vmatpush.msra.mxu0 %v9667_v56  ;;  %v9676_v46 = vld [vmem:[#allocation37_spill] sm:$0xff] }
 0x83d   : > { %3588 = vmatpush.msra.mxu1 %v9668_v62  ;;  %3683 = vmatpush.msra.mxu3 %v9669_v14  ;;  %v9677_v56 = vld [vmem:[#allocation97_spill] sm:$0xff] }
 0x83e   : > { %3723 = vmatpush.msrb.mxu2 %v9670_v10  ;;  %3757 = vmatpush.msra.mxu0 %v9671_v20  ;;  %v9696_v14 = vld [vmem:[#allocation41_spill] sm:$0xff]  ;;  %v9697_v10 = vld [vmem:[#allocation23_spill] sm:$0xff]  ;;  %v3677_v20 = vld [vmem:[#allocation6 + $0x90] sm:$0xff] }
 0x83f   : > { %3632 = vmatmul.f32.vlgmr.msrb.gmra.mxu0 %v8020_v34  ;;  %3589 = vmatpush.msra.mxu1 %v9672_v8 }
 0x840   : > { %3802 = vmatpush.msrb.mxu0 %v9621_v2  ;;  %3684 = vmatpush.msra.mxu3 %v9577_v47  ;;  %v9678_v2 = vld [vmem:[#allocation95_spill] sm:$0xff]  ;;  %v9679_v47 = vld [vmem:[#allocation129_spill] sm:$0xff] }
 0x841   : > { %3724 = vmatpush.msrb.mxu2 %v9527_v12  ;;  %3590 = vmatpush.msra.mxu1 %v9579_v51  ;;  %v9680_v12 = vld [vmem:[#allocation31_spill] sm:$0xff] }
 0x842   : > { %3803 = vmatpush.msrb.mxu0 %v9673_v58  ;;  %3685 = vmatpush.msra.mxu3 %v9674_v24  ;;  %v9698_v58 = vld [vmem:[#allocation45_spill] sm:$0xff]  ;;  %v9701_v24 = vld [vmem:[#allocation70_spill] sm:$0xff] }
 0x843   : > { %3725 = vmatpush.msrb.mxu2 %v9624_v45  ;;  %4112 = vmatmul.msk.f32.vlgmr.msrb.gmra.mxu3 %vm9675_vm10, %v8032_v29  ;;  %v9681_v45 = vld [vmem:[#allocation109_spill] sm:$0xff] }
 0x844   : > { %3804 = vmatpush.msrb.mxu0 %v9676_v46  ;;  %3591 = vmatpush.msra.mxu1 %v9677_v56  ;;  %v9682_v29 = vld [vmem:[#allocation117_spill] sm:$0xff] }
 0x845   : > { %3686 = vmatpush.msra.mxu3 %v9678_v2  ;;  %3726 = vmatpush.msrb.mxu2 %v9679_v47  ;;  %v9706_v47 = vld [vmem:[#allocation113_spill] sm:$0xff] }
 0x846   : > { %3709 = vmatpush.msrb.mxu1 %v9680_v12  ;;  %3805 = vmatpush.msrb.mxu0 %v9535_v22  ;;  %v9692_v22 = vld [vmem:[#allocation66_spill] sm:$0xff] }
 0x847   : > { %3687 = vmatpush.msra.mxu3 %v9630_v25  ;;  %3727 = vmatpush.msrb.mxu2 %v9631_v41  ;;  %v3153_v41 = vpop.f32.mrf.mxu3  ;;  %v3173_v25 = vpop.f32.mrf.mxu1 }
 0x848   : > { %3710 = vmatpush.msrb.mxu1 %v9681_v45  ;;  %3806 = vmatpush.msrb.mxu0 %v9585_v30  ;;  %v3193_v30 = vpop.f32.mrf.mxu2 }
 0x849   : > { %3688 = vmatpush.msra.mxu3 %v9632_v43  ;;  %3728 = vmatpush.msrb.mxu2 %v9633_v38  ;;  %v9684_v43 = vld [vmem:[#allocation80_spill] sm:$0xff]  ;;  %v9686_v38 = vld [vmem:[#allocation131_spill] sm:$0xff] }
 0x84a   : > { %3592 = vmatmul.f32.vlgmr.msra.gmra.mxu1 %v8020_v34  ;;  %3807 = vmatpush.msrb.mxu0 %v9589_v16  ;;  %v3174_v34 = vadd.f32 %v3173_v25, %v3153_v41  ;;  %v9691_v16 = vld [vmem:[#allocation49_spill] sm:$0xff] }
 0x84b   : > { %3711 = vmatpush.msrb.mxu1 %v9682_v29  ;;  %3689 = vmatpush.msra.mxu3 %v9634_v4  ;;  %v9683_v4 = vld [vmem:[#allocation123_spill] sm:$0xff] }
 0x84c   : > { %3729 = vmatpush.msrb.mxu2 %v9543_v39  ;;  %3808 = vmatpush.msrb.mxu0 %v7315_v28  ;;  %v9685_v28 = vld [vmem:[#allocation74_spill] sm:$0xff] }
 0x84d   : > { %3712 = vmatpush.msrb.mxu1 %v9592_v15  ;;  %3690 = vmatpush.msra.mxu3 %v9593_v49  ;;  %v9687_v15 = vld [vmem:[#allocation67_spill] sm:$0xff]  ;;  %v9690_v49 = vld [vmem:[#allocation33_spill] sm:$0xff]  ;;  %v9693_v39 = vld [vmem:[#allocation34_spill] sm:$0xff] }
 0x84e   : > { %3730 = vmatpush.msrb.mxu2 %v9545_v48  ;;  %3809 = vmatpush.msrb.mxu0 %v9546_v63  ;;  %v9688_v48 = vld [vmem:[#allocation111_spill] sm:$0xff]  ;;  %v3213_v63 = vpop.f32.mrf.mxu0 }
 0x84f   : > { %3713 = vmatpush.msrb.mxu1 %v9594_v32  ;;  %3691 = vmatpush.msra.mxu3 %v9595_v13  ;;  %v9689_v32 = vld [vmem:[#allocation32_spill] sm:$0xff]  ;;  %v9694_v13 = vld [vmem:[#allocation22_spill] sm:$0xff] }
 0x850   : > { %3731 = vmatpush.msrb.mxu2 %v9683_v4  ;;  %3810 = vmatpush.msrb.mxu0 %v9684_v43 }
 0x851   : > { %3714 = vmatpush.msrb.mxu1 %v9685_v28  ;;  %3692 = vmatpush.msra.mxu3 %v9686_v38  ;;  %v4118_v28 = vld [vmem:[%s8304_s4 + $0x8] sm:$0xff] }
 0x852   : > { %3732 = vmatpush.msrb.mxu2 %v7414_v31  ;;  %3811 = vmatpush.msrb.mxu0 %v9687_v15  ;;  %v9695_v31 = vld [vmem:[#allocation46_spill] sm:$0xff] }
 0x853   : > { %3715 = vmatpush.msrb.mxu1 %v9688_v48  ;;  %3296 = vrot.lane.b32.xlu0 %v3174_v34, %s4355_s14 }
 0x854   : > { %3693 = vmatpush.msra.mxu3 %v9689_v32  ;;  %3733 = vmatpush.msrb.mxu2 %v9690_v49  ;;  %v3253_v2 = vpop.f32.mrf.mxu3 }
 0x855   : > { %3716 = vmatpush.msrb.mxu1 %v9691_v16  ;;  %3812 = vmatpush.msrb.mxu0 %v9692_v22  ;;  %v3233_v46 = vpop.f32.mrf.mxu1 }
 0x856   : > { %3694 = vmatpush.msra.mxu3 %v9693_v39  ;;  %3734 = vmatpush.msrb.mxu2 %v9694_v13 }
 0x857   : > { %3717 = vmatpush.msrb.mxu1 %v9695_v31  ;;  %3813 = vmatpush.msrb.mxu0 %v9645_v59  ;;  %v3214_v59 = vadd.f32 %v3213_v63, %v3193_v30 }
 0x858   : > { %3695 = vmatpush.msra.mxu3 %v9646_v1  ;;  %3735 = vmatpush.msrb.mxu2 %v9647_v44  ;;  %v3293_v1 = vpop.f32.mrf.mxu2  ;;  %v9700_v44 = vld [vmem:[#allocation30_spill] sm:$0xff] }
 0x859   : > { %3762 = vmatpush.msra.mxu1 %v9648_v52  ;;  %3814 = vmatpush.msrb.mxu0 %v9649_v50  ;;  %v9699_v52 = vld [vmem:[#allocation21_spill] sm:$0xff]  ;;  %v3273_v50 = vpop.f32.mrf.mxu0 }
 0x85a   : > { %3696 = vmatpush.msra.mxu3 %v9696_v14  ;;  %3736 = vmatpush.msrb.mxu2 %v9697_v10 }
 0x85b   : > { %3763 = vmatpush.msra.mxu1 %v9651_v11  ;;  %3815 = vmatpush.msrb.mxu0 %v9603_v3  ;;  %v9702_v11 = vld [vmem:[#allocation42_spill] sm:$0xff]  ;;  %v3678_v3 = vld [vmem:[#allocation6 + $0x98] sm:$0xff] }
 0x85c   : > { %3697 = vmatpush.msra.mxu3 %v9698_v58  ;;  %3737 = vmatpush.msrb.mxu2 %v9557_v57  ;;  %v3294_v57 = vadd.f32 %v3293_v1, %v3273_v50 }
 0x85d   : > { %3764 = vmatpush.msra.mxu1 %v9652_v6  ;;  %3698 = vmatmul.f32.vlgmr.msra.gmra.mxu3 %v3677_v20  ;;  %v9703_v6 = vld [vmem:[#allocation89_spill] sm:$0xff] }
 0x85e   : > { %3789 = vmatpush.msrb.mxu3 %v9653_v23  ;;  %3816 = vmatpush.msrb.mxu0 %v9699_v52  ;;  %v9704_v23 = vld [vmem:[#allocation36_spill] sm:$0xff] }
 0x85f   : > { %3829 = vmatpush.msra.mxu2 %v9700_v44  ;;  %3765 = vmatpush.msra.mxu1 %v9701_v24 }
 0x860   : > { %3790 = vmatpush.msrb.mxu3 %v9702_v11  ;;  %3817 = vmatpush.msrb.mxu0 %v9654_v9  ;;  %v3254_v9 = vadd.f32 %v3253_v2, %v3233_v46  ;;  %v9712_v46 = vld [vmem:[#allocation96_spill] sm:$0xff] }
 0x861   : > { %3830 = vmatpush.msra.mxu2 %v9562_v61  ;;  %3298 = vrot.lane.b32.xlu2 %v3214_v59, %s4355_s14 }
 0x862   : > { %3766 = vmatpush.msra.mxu1 %v9703_v6  ;;  %3791 = vmatpush.msrb.mxu3 %v9564_v37 }
 0x863   : > { %3831 = vmatpush.msra.mxu2 %v9704_v23  ;;  %4114 = vmatmul.msk.f32.vlgmr.msrb.gmra.mxu1 %vm9705_vm2, %v3678_v3 }
 0x864   : > { %3767 = vmatpush.msra.mxu1 %v9706_v47  ;;  %3792 = vmatpush.msrb.mxu3 %v9569_v53  ;;  %v9713_v47 = vld [vmem:[#allocation83_spill] sm:$0xff] }
 0x865   : > { %3832 = vmatpush.msra.mxu2 %v9614_v55  ;;  %3302 = vrot.lane.b32.xlu1 %v3294_v57, %s4355_s14  ;;  %v9711_v57 = vld [vmem:[#allocation76_spill] sm:$0xff] }
 0x866   : > { %3768 = vmatpush.msra.mxu1 %v7614_v40  ;;  %3793 = vmatpush.msrb.mxu3 %v9657_v42 }
 0x867   : > { %3833 = vmatpush.msra.mxu2 %v9572_v21  ;;  %4115 = vmatmul.msk.f32.vlgmr.msra.gmra.mxu0 %vm9707_vm4, %v3678_v3 }
 0x868   : > { %3738 = vmatmul.f32.vlgmr.msrb.gmra.mxu2 %v3677_v20  ;;  %3769 = vmatpush.msra.mxu1 %v7620_v26 }
 0x869   : > { %3794 = vmatpush.msrb.mxu3 %v7637_v17  ;;  %3834 = vmatpush.msra.mxu2 %v7640_v33 }
 0x86a   : > { %3300 = vrot.lane.b32.xlu2 %v3254_v9, %s4355_s14  ;;  %3770 = vmatpush.msra.mxu1 %v7646_v35  ;;  %s4283_s14 = sshra.s32 %s3941_s17, 4  ;;  %s4284_s14 = int_to_ptr.hbm [resolvable:$true] %s4283_s14 }
 0x86b   : > { %3795 = vmatpush.msrb.mxu3 %v7649_v36  ;;  %3835 = vmatpush.msra.mxu2 %v7652_v27  ;;  %p4290_p11 = scmp.lt.s32.totalorder %s4284_s14, %s8305_s5 }
 0x86c   : > { %3771 = vmatpush.msra.mxu1 %v7658_v5 }
 0x86d   : > { %3796 = vmatpush.msrb.mxu3 %v9660_v0  ;;  %3836 = vmatpush.msra.mxu2 %v9661_v7 }
 0x86e   : > { %3772 = vmatpush.msra.mxu1 %v7684_v60 }
 0x86f   : > { %3797 = vmatpush.msrb.mxu3 %v9663_v54  ;;  %3837 = vmatpush.msra.mxu2 %v9664_v19  ;;  %v3399_v42 = vpop.f32.mrf.mxu0 }
 0x870   : > { %3773 = vmatpush.msra.mxu1 %v7701_v18  ;;  %4117 = vmatmul.msk.f32.vlgmr.msra.gmra.mxu2 %vm9708_vm15, %v3678_v3 }
 0x871   : > { %4116 = vmatmul.msk.f32.vlgmr.msrb.gmra.mxu3 %vm9709_vm1, %v3678_v3  ;;  %3818 = vmatmul.f32.vlgmr.msrb.gmra.mxu0 %v3677_v20 }
 0x872   : > { %3774 = vmatpush.msra.mxu1 %v9668_v62 }
 0x874   : > { %3775 = vmatpush.msra.mxu1 %v9672_v8 }
 0x876   : > { %3776 = vmatpush.msra.mxu1 %v9579_v51 }
 0x878   : > { %3777 = vmatpush.msra.mxu1 %v9677_v56 }
 0x879   : > { %3778 = vmatmul.f32.vlgmr.msra.gmra.mxu1 %v3677_v20 }
 0x883   : > { %v3459_v40 = vpop.f32.mrf.mxu0 }
 0x884   : > { %v3379_v37 = vpop.f32.mrf.mxu2  ;;  %v3339_v33 = vpop.f32.mrf.mxu3 }
 0x885   : > { %v8185_v61 = vadd.f32 %v3399_v42, %v3379_v37  ;;  %v9714_v37 = vld [vmem:[#allocation106_spill] sm:$0xff] }
 0x889   : > { %v3359_v26 = vpop.f32.mrf.mxu1 }
 0x88a   : > { %v8187_v55 = vadd.f32 %v3359_v26, %v3339_v33  ;;  %v3115_v49 = vpop.permute.xlu0 %3114  ;;  %v9715_v26 = vld [vmem:[#allocation88_spill] sm:$0xff] }
 0x890   : > { %v3117_v30 = vpop.permute.xlu2 %3116 }
 0x891   : > { %v3124_v11 = vsel %vm1583_vm13, %v3115_v49, %v3117_v30 }
 0x89b   : > { %v3439_v53 = vpop.f32.mrf.mxu3 }
 0x89c   : > { %v3419_v21 = vpop.f32.mrf.mxu1 }
 0x89d   : > { %v8189_v17 = vadd.f32 %v3439_v53, %v3419_v21  ;;  %v9716_v21 = vld [vmem:[#allocation56_spill] sm:$0xff] }
 0x89e   : > { %v3479_v35 = vpop.f32.mrf.mxu2 }
 0x89f   : > { %v8191_v36 = vadd.f32 %v3479_v35, %v3459_v40  ;;  %v3127_v40 = vmul.f32 %v9716_v21, %v3124_v11  ;;  %v9717_v35 = vld [vmem:[#allocation51_spill] sm:$0xff] }
 0x8a4   : > { %v3119_v63 = vpop.permute.xlu0 %3118 }
 0x8a5   : > { %v3121_v16 = vpop.permute.xlu1 %3120  ;;  %v3123_v3 = vsel %vm1583_vm13, %v3117_v30, %v3119_v63  ;;  %v9725_v30 = vld [vmem:[#allocation94_spill] sm:$0xff] }
 0x8a6   : > { %v3125_v1 = vsel %vm1583_vm13, %v3121_v16, %v3115_v49  ;;  %v3122_v23 = vsel %vm1583_vm13, %v3119_v63, %v3121_v16  ;;  %v9726_v16 = vld [vmem:[#allocation108_spill] sm:$0xff] }
 0x8a7   : > { %v3573_v27 = vpop.f32.mrf.mxu0  ;;  %v3126_v33 = vmul.f32 %v9714_v37, %v3125_v1 }
 0x8a8   : > { %v3513_v5 = vpop.f32.mrf.mxu3 }
 0x8a9   : > { %v3553_v60 = vpop.f32.mrf.mxu2 }
 0x8aa   : > { %v3533_v18 = vpop.f32.mrf.mxu1  ;;  %v3574_v51 = vadd.f32 %v3573_v27, %v3553_v60  ;;  %v3128_v27 = vmul.f32 %v9717_v35, %v3123_v3  ;;  %v9718_v60 = vld [vmem:[#allocation48_spill] sm:$0xff]  ;;  %v9729_v3 = vld [vmem:[#allocation118_spill] sm:$0xff] }
 0x8ab   : > { %v3534_v0 = vadd.f32 %v3533_v18, %v3513_v5  ;;  %v3129_v18 = vmul.f32 %v9718_v60, %v3122_v23  ;;  %v9731_v35 = vld [vmem:[#allocation12_spill] sm:$0xff] }
 0x8ac   : > { %3658 = vrot.lane.b32.xlu0 %v3574_v51, %s4356_s26 }
 0x8ad   : > { %3656 = vrot.lane.b32.xlu1 %v3534_v0, %s4356_s26 }
 0x8bb   : > { %v3299_v22 = vpop.permute.xlu2 %3298 }
 0x8bc   : > { %v3633_v7 = vpop.f32.mrf.mxu0 }
 0x8be   : > { %v3653_v54 = vpop.f32.mrf.mxu2 }
 0x8bf   : > { %v3654_v19 = vadd.f32 %v3653_v54, %v3633_v7 }
 0x8c1   : > { %3662 = vrot.lane.b32.xlu1 %v3654_v19, %s4356_s26 }
 0x8c4   : > { %v3301_v31 = vpop.permute.xlu2 %3300 }
 0x8c5   : > { %v3297_v39 = vpop.permute.xlu0 %3296  ;;  %v3305_v52 = vsel %vm1766_vm12, %v3299_v22, %v3301_v31 }
 0x8c6   : > { %v3613_v62 = vpop.f32.mrf.mxu3  ;;  %v3306_v50 = vsel %vm1766_vm12, %v3297_v39, %v3299_v22  ;;  %v3310_v2 = vmul.f32 %v9712_v46, %v3305_v52 }
 0x8c7   : > { %v3593_v8 = vpop.f32.mrf.mxu1  ;;  %v3309_v9 = vmul.f32 %v9713_v47, %v3306_v50 }
 0x8c8   : > { %v3614_v56 = vadd.f32 %v3613_v62, %v3593_v8  ;;  %v3314_v19 = vadd.f32 %v3310_v2, %v3128_v27 }
 0x8c9   : > { %v3313_v62 = vadd.f32 %v3309_v9, %v3127_v40 }
 0x8ca   : > { %3660 = vrot.lane.b32.xlu2 %v3614_v56, %s4356_s26  ;;  %v9719_v56 = vld [vmem:[#allocation103_spill] sm:$0xff]  ;;  %s4285_s26 = scalar_lea.hbm %s4284_s14, 32 }
 0x8cb   : > { %p4286_p1 = scmp.ne.s32.totalorder %s4284_s14, %s4285_s26  ;;  %p4291_p9 = scmp.lt.s32.totalorder %s4289_s10, %s4285_s26 }
 0x8cd   : > { %p4287_p4 = pnand %p4286_p1, %p4455_p7  ;;  %p4292_p2 = por %p4291_p9, %p4290_p11 }
 0x8cf   : > { %p4288_p8 = pneg %p4287_p4 }
 0x8d1   : > { %p4293_p10 = pnand %p4292_p2, %p4288_p8 }
 0x8d7   : > { %v3303_v13 = vpop.permute.xlu1 %3302 }
 0x8d8   : > { %v3307_v59 = vsel %vm1766_vm12, %v3303_v13, %v3297_v39  ;;  %v3304_v44 = vsel %vm1766_vm12, %v3301_v31, %v3303_v13 }
 0x8d9   : > { %v3308_v6 = vmul.f32 %v9711_v57, %v3307_v59  ;;  %v3311_v53 = vmul.f32 %v9715_v26, %v3304_v44  ;;  %v9728_v44 = vld [vmem:[#allocation60_spill] sm:$0xff] }
 0x8db   : > { %v3312_v51 = vadd.f32 %v3308_v6, %v3126_v33  ;;  %v9730_v6 = vld [vmem:[#allocation127_spill] sm:$0xff] }
 0x8e0   : > { %v3699_v12 = vpop.f32.mrf.mxu3  ;;  %v3719_v45 = vpop.f32.mrf.mxu1 }
 0x8e1   : > { %v3720_v29 = vadd.f32 %v3719_v45, %v3699_v12  ;;  %v3482_v12 = vmul.f32 %v9719_v56, %v8187_v55  ;;  %v9720_v45 = vld [vmem:[#allocation104_spill] sm:$0xff]  ;;  %v3485_v55 = vmul.f32 %v9725_v30, %v8191_v36 }
 0x8e3   : > { %3842 = vrot.lane.b32.xlu0 %v3720_v29, %s4357_s11  ;;  %v3483_v29 = vmul.f32 %v9720_v45, %v8185_v61  ;;  %v3486_v63 = vadd.f32 %v3482_v12, %v3312_v51 }
 0x8e4   : > { %v3759_v41 = vpop.f32.mrf.mxu0 }
 0x8e5   : > { %v3487_v22 = vadd.f32 %v3483_v29, %v3313_v62 }
 0x8eb   : > { %v3739_v25 = vpop.f32.mrf.mxu2 }
 0x8ec   : > { %v3760_v34 = vadd.f32 %v3759_v41, %v3739_v25  ;;  %v3315_v41 = vadd.f32 %v3311_v53, %v3129_v18  ;;  %v9721_v25 = vld [vmem:[#allocation114_spill] sm:$0xff] }
 0x8ee   : > { %3844 = vrot.lane.b32.xlu2 %v3760_v34, %s4357_s11  ;;  %v3819_v4 = vpop.f32.mrf.mxu0  ;;  %v3489_v31 = vadd.f32 %v3485_v55, %v3315_v41 }
 0x8f3   : > { %v3839_v43 = vpop.f32.mrf.mxu2 }
 0x8f4   : > { %v3840_v38 = vadd.f32 %v3839_v43, %v3819_v4  ;;  %v3799_v15 = vpop.f32.mrf.mxu3  ;;  %v9722_v4 = vld [vmem:[#allocation99_spill] sm:$0xff] }
 0x8f5   : > { %v3484_v43 = vmul.f32 %v9722_v4, %v8189_v17 }
 0x8f6   : > { %v3779_v48 = vpop.f32.mrf.mxu1  ;;  %3848 = vrot.lane.b32.xlu0 %v3840_v38, %s4357_s11  ;;  %3866 = vperm.xlu2 %4200, %v4118_v28   ;;  %v9723_v28 = vld [vmem:[#allocation105_spill] sm:$0xff] }
 0x8f7   : > { %v3800_v32 = vadd.f32 %v3799_v15, %v3779_v48  ;;  %v9724_v48 = vld [vmem:[#allocation50_spill] sm:$0xff]  ;;  %v3488_v39 = vadd.f32 %v3484_v43, %v3314_v19 }
 0x8f9   : > { %3846 = vrot.lane.b32.xlu1 %v3800_v32, %s4357_s11 }
 0x91e   : > { %v3659_v14 = vpop.permute.xlu0 %3658 }
 0x91f   : > { %v3657_v10 = vpop.permute.xlu1 %3656 }
 0x920   : > { %v3666_v5 = vsel %vm2127_vm6, %v3657_v10, %v3659_v14 }
 0x921   : > { %v3668_v34 = vmul.f32 %v9721_v25, %v3666_v5 }
 0x923   : > { %v3672_v17 = vadd.f32 %v3668_v34, %v3486_v63 }
 0x924   : > { %v3661_v20 = vpop.permute.xlu2 %3660 }
 0x925   : > { %v3665_v0 = vsel %vm2127_vm6, %v3659_v14, %v3661_v20  ;;  %v9727_v14 = vld [vmem:[#allocation92_spill] sm:$0xff] }
 0x926   : > { %v3669_v38 = vmul.f32 %v9723_v28, %v3665_v0 }
 0x933   : > { %v3663_v42 = vpop.permute.xlu1 %3662 }
 0x934   : > { %v3664_v7 = vsel %vm2127_vm6, %v3661_v20, %v3663_v42  ;;  %v3667_v15 = vsel %vm2127_vm6, %v3663_v42, %v3657_v10  ;;  %v3673_v10 = vadd.f32 %v3669_v38, %v3487_v22 }
 0x935   : > { %v3670_v32 = vmul.f32 %v9724_v48, %v3664_v7  ;;  %v3671_v20 = vmul.f32 %v9727_v14, %v3667_v15  ;;  %v9735_v14 = vld [vmem:[#allocation15_spill] sm:$0xff] }
 0x937   : > { %v3674_v52 = vadd.f32 %v3670_v32, %v3488_v39  ;;  %v3675_v46 = vadd.f32 %v3671_v20, %v3489_v31  ;;  %v9733_v39 = vld [vmem:[#allocation14_spill] sm:$0xff] }
 0x948   : > { %v3845_v54 = vpop.permute.xlu2 %3844 }
 0x950   : > { %v3867_v23 = vpop.permute.xlu2 %3866 }
 0x955   : > { %v3843_v24 = vpop.permute.xlu0 %3842 }
 0x956   : > { %v3852_v8 = vsel %vm2314_vm8, %v3843_v24, %v3845_v54 }
 0x957   : > { %v3854_v61 = vmul.f32 %v9726_v16, %v3852_v8 }
 0x959   : > { %v3858_v1 = vadd.f32 %v3854_v61, %v3672_v17  ;;  %v9732_v61 = vld [vmem:[#allocation13_spill] sm:$0xff]  ;;  %v9734_v17 = vld [vmem:[#allocation16_spill] sm:$0xff] }
 0x95b   : > { %v3869_v9 = vadd.f32 %v3867_v23, %v3858_v1 }
 0x968   : > { %v3849_v49 = vpop.permute.xlu0 %3848 }
 0x969   : > { %v3853_v13 = vsel %vm2314_vm8, %v3849_v49, %v3843_v24 }
 0x96a   : > { %v3857_v11 = vmul.f32 %v9728_v44, %v3853_v13 }
 0x96b   : > { %v3847_v59 = vpop.permute.xlu1 %3846 }
 0x96c   : > { %v3850_v50 = vsel %vm2314_vm8, %v3847_v59, %v3849_v49  ;;  %v3851_v36 = vsel %vm2314_vm8, %v3845_v54, %v3847_v59  ;;  %v3861_v42 = vadd.f32 %v3857_v11, %v3675_v46 }
 0x96d   : > { %v3855_v57 = vmul.f32 %v9729_v3, %v3851_v36  ;;  %v3856_v24 = vmul.f32 %v9730_v6, %v3850_v50 }
 0x96e   : > { %v3872_v53 = vadd.f32 %v3867_v23, %v3861_v42 }
 0x96f   : > { %v3859_v2 = vadd.f32 %v3855_v57, %v3673_v10  ;;  %v3860_v47 = vadd.f32 %v3856_v24, %v3674_v52 }
 0x971   : > { %v3870_v37 = vadd.f32 %v3867_v23, %v3859_v2  ;;  %v3871_v33 = vadd.f32 %v3867_v23, %v3860_v47 }
 0x973   : > { %v3873_v26 = vadd.f32 %v3870_v37, %v3869_v9 }
 0x975   : > { %v3874_v21 = vadd.f32 %v3873_v26, %v3871_v33 }
 0x977   : > { %v3875_v58 = vadd.f32 %v3874_v21, %v3872_v53 }
 0x979   : > { %3876 = vadd.xlane.f32.xlu1 %v3875_v58 }
 0x9ec   : > { %v3877_v40 = vpop.xlane.xlu1 %3876 }
 0x9ed   : > { %v3878_v27 = vmul.f32 %v3877_v40, %v9731_v35 }
 0x9ef   : > { %v3879_v5 = vsub.f32 %v3869_v9, %v3878_v27  ;;  %v3880_v60 = vsub.f32 %v3870_v37, %v3878_v27  ;;  %v3881_v18 = vsub.f32 %v3871_v33, %v3878_v27  ;;  %v3882_v51 = vsub.f32 %v3872_v53, %v3878_v27 }
 0x9f1   : > { %v3883_v0 = vmul.f32 %v3879_v5, %v3879_v5  ;;  %v3884_v7 = vmul.f32 %v3880_v60, %v3880_v60  ;;  %v3885_v54 = vmul.f32 %v3881_v18, %v3881_v18  ;;  %v3886_v62 = vmul.f32 %v3882_v51, %v3882_v51 }
 0x9f3   : > { %v3887_v19 = vadd.f32 %v3884_v7, %v3883_v0 }
 0x9f5   : > { %v3888_v8 = vadd.f32 %v3887_v19, %v3885_v54 }
 0x9f7   : > { %v3889_v56 = vadd.f32 %v3888_v8, %v3886_v62 }
 0x9f9   : > { %3890 = vadd.xlane.f32.xlu0 %v3889_v56 }
 0xa6c   : > { %v3891_v12 = vpop.xlane.xlu0 %3890 }
 0xa6d   : > { %v3892_v45 = vmul.f32 %v3891_v12, %v9731_v35 }
 0xa6f   : > { %v3893_v29 = vadd.f32 1e-05, %v3892_v45 }
 0xa71   : > { %4207 = vrsqrt.f32 %v3893_v29  ;;  %vm3900_vm13 = vweird.f32 %v3893_v29 }
 0xa77   : > { %v4208_v41 = vpop.eup %4207 }
 0xa78   : > { %v3895_v25 = vmul.f32 %v4208_v41, %v3893_v29  ;;  %vm3901_vm12 = vweird.f32 %v4208_v41 }
 0xa79   : > { %vm3902_vm6 = vmor %vm3900_vm13, %vm3901_vm12 }
 0xa7a   : > { %v3896_v34 = vmul.f32 %v4208_v41, %v3895_v25 }
 0xa7c   : > { %v3897_v4 = vmul.f32 0.5, %v3896_v34 }
 0xa7e   : > { %v3898_v43 = vsub.f32 1.5, %v3897_v4 }
 0xa80   : > { %v3899_v28 = vmul.f32 %v4208_v41, %v3898_v43 }
 0xa82   : > { %v3903_v38 = vsel %vm3902_vm6, %v4208_v41, %v3899_v28 }
 0xa83   : > { %v3904_v15 = vmul.f32 %v3903_v38, %v3879_v5  ;;  %v3905_v48 = vmul.f32 %v3903_v38, %v3880_v60  ;;  %v3906_v32 = vmul.f32 %v3903_v38, %v3881_v18  ;;  %v3907_v49 = vmul.f32 %v3903_v38, %v3882_v51 }
 0xa85   : > { %v3908_v30 = vmax.f32 %v3904_v15, 0.0  ;;  %v3909_v55 = vmax.f32 %v3905_v48, 0.0  ;;  %v3910_v63 = vmax.f32 %v3906_v32, 0.0  ;;  %v3911_v16 = vmax.f32 %v3907_v49, 0.0 }
 0xa87   : > { %v3912_v22 = vadd.f32 %v3908_v30, %v9732_v61  ;;  %v3913_v13 = vadd.f32 %v3909_v55, %v9733_v39  ;;  %v3914_v31 = vadd.f32 %v3910_v63, %v9734_v17  ;;  %v3915_v20 = vadd.f32 %v3911_v16, %v9735_v14 }
 0xa89   : > { %v3916_v59 = vmax.f32 %v3912_v22, 0.0  ;;  %v3917_v10 = vmax.f32 %v3913_v13, 0.0  ;;  %v3918_v52 = vmax.f32 %v3914_v31, 0.0  ;;  %v3919_v50 = vmax.f32 %v3915_v20, 0.0 }
 0xa8b   : > { %3920 = vst [vmem:[%s261_s22] sm:$0xff] %v3916_v59 }
 0xa8c   : > { %3921 = vst [vmem:[%s261_s22 + $0x8] sm:$0xff] %v3917_v10 }
 0xa8d   : > { %3922 = vst [vmem:[%s261_s22 + $0x10] sm:$0xff] %v3918_v52 }
 0xa8e   : > { %3923 = vst [vmem:[%s261_s22 + $0x18] sm:$0xff] %v3919_v50 }
 0xa8f   : > { %4296 = shalt.err (!%p4293_p10)
}
 0xa90   : > { %4132 = dma.vmem_to_hbm [thread:$0]  (%p4455_p7), %s3939_s16, 512, %s3941_s17, %s3925_s23  }
 0xa91 PF: > { %s3952_s28 = sand.u32 1, %s4327_s18   ;;  %p9736_p12 = scmp.ge.s32.totalorder %s4339_s21, 2 }
 0xa92   : > { %s3953_s27 = scalar_lea.sflag [#allocation5], %s3952_s28 }
 0xa93   : > { %p4143_p13 = pnand %p9736_p12, %p4423_p6 }
 0xa95   : > { %p4144_p0 = pneg %p4143_p13 }
 0xa97   : > { %4322 = dma.done.wait (%p4144_p0), %s3953_s27, 512  }
 0xa98   : > { %4324 = vsyncadd (%p4144_p0), %s3953_s27, 4294966784  ;;  %p19_p3 = scmp.ge.s32.totalorder %s4441_s7, 4   ;;  %s9737_s18 = smov %s4331_s19 }
 0xa99   : > { %s9738_s19 = smov %s4335_s20  ;;  %s9739_s20 = smov %s4451_s12 }
 0xa9a   : > { %s9740_s21 = smov %s4441_s7  ;;  %21 = sbr.rel (!%p19_p3) target bundleno = 6 (0x6), region = 99 }
 0xa9f   :  { %3959 = vsyncpa [#allocation4], 1 }
 0xaa0   :  { %3961 = vsyncpa [#allocation4 + $0x1], 1 }
 0xaa1   :  { %3962 = vsyncpa [#allocation7], 1 }
 0xaa2   :  { %3963 = vsyncpa [#allocation5], 1 }
 0xaa3   :  { %3965 = vsyncpa [#allocation5 + $0x1], 1 }

</bundles_post_ra>
